<compile_context>
chip_gen: v7x
topology: tpu7x:2x2x1
jax: 0.10.0
libtpu: 0.0.40
codegen_flags: <defaults>
</compile_context>

<pallas_src>
import jax
import jax.numpy as jnp
from jax.experimental import pallas as pl
from jax.experimental.pallas import tpu as pltpu

IN_C, IN_H, IN_W = 3, 256, 256
K_DIM = IN_C * IN_H * IN_W          # 196608
HIDDEN = 64
OUT = 1

TK = 32768                          # K tile: 6 steps single-core, 3 per core when split
K_STEPS = K_DIM // TK               # 6
VMEM_LIMIT = 28 << 20               # covers ~18 MiB padded double-buffered working set

NSPLIT = 2                          # split-K across the two v7x TensorCores
K_SPLIT = K_DIM // NSPLIT           # 98304
K_STEPS_SPLIT = K_SPLIT // TK       # 3

assert K_DIM % TK == 0 and K_SPLIT % TK == 0 and TK % 128 == 0


def _sigmoid(x):
    return 1.0 / (1.0 + jnp.exp(-x))


# --------------------------------------------------------------------------
# Portable path (v5e / v6e, any single-TensorCore chip): one fused kernel.
# --------------------------------------------------------------------------
def _fused_kernel(x_ref, w1_ref, b1_ref, w2_ref, b2_ref, o_ref, acc_ref):
    """grid = (K_STEPS,): K reduction with resident accumulator + fused head.

    x_ref  : (B, TK)   f32  flattened-input slice (cast to bf16 in-kernel)
    w1_ref : (TK, 64)  bf16 fc1 weight slice (stored transposed)
    b1_ref : (1, 64)   f32  fc1 bias
    w2_ref : (1, 64)   f32  fc2 weight row (PyTorch (out=1, in=64) layout)
    b2_ref : (1, 1)    f32  fc2 bias
    o_ref  : (B, 1)    f32  final output (written on the last step only)
    acc_ref: (B, 64)   f32  VMEM accumulator for the fc1 pre-activation
    """
    k = pl.program_id(0)

    @pl.when(k == 0)
    def _init():
        acc_ref[...] = jnp.zeros_like(acc_ref)

    acc_ref[...] += jnp.dot(
        x_ref[...].astype(jnp.bfloat16), w1_ref[...],
        preferred_element_type=jnp.float32,
    )

    @pl.when(k == pl.num_programs(0) - 1)
    def _finalize():
        h = _sigmoid(acc_ref[...] + b1_ref[...])                      # (B, 64)
        # fc2 as a VPU multiply + lane reduction (a 1-wide MXU matmul is wasteful).
        logits = jnp.sum(h * w2_ref[...], axis=-1, keepdims=True) + b2_ref[...]
        o_ref[...] = _sigmoid(logits).astype(o_ref.dtype)             # (B, 1)


def _forward_fused(x, w1_bf16, b1, w2_row, b2):
    B = x.shape[0]
    return pl.pallas_call(
        _fused_kernel,
        out_shape=jax.ShapeDtypeStruct((B, OUT), jnp.float32),
        grid_spec=pltpu.PrefetchScalarGridSpec(
            num_scalar_prefetch=0,
            grid=(K_STEPS,),
            in_specs=[
                pl.BlockSpec((B, TK), lambda k: (0, k)),
                pl.BlockSpec((TK, HIDDEN), lambda k: (k, 0)),
                pl.BlockSpec((1, HIDDEN), lambda k: (0, 0)),
                pl.BlockSpec((1, HIDDEN), lambda k: (0, 0)),
                pl.BlockSpec((1, OUT), lambda k: (0, 0)),
            ],
            out_specs=pl.BlockSpec((B, OUT), lambda k: (0, 0)),
            scratch_shapes=[pltpu.VMEM((B, HIDDEN), jnp.float32)],
        ),
        compiler_params=pltpu.CompilerParams(
            dimension_semantics=("arbitrary",),
            vmem_limit_bytes=VMEM_LIMIT,
        ),
    )(x, w1_bf16, b1, w2_row, b2)


# --------------------------------------------------------------------------
# Dual-TensorCore path (v7x): CORE_PARALLEL split-K + tiny combine kernel.
# --------------------------------------------------------------------------
def _fc1_split_kernel(x_ref, w1_ref, part_ref):
    """grid = (NSPLIT, K_STEPS_SPLIT): axis 0 CORE_PARALLEL, axis 1 reduction."""
    @pl.when(pl.program_id(1) == 0)
    def _init():
        part_ref[...] = jnp.zeros_like(part_ref)

    part_ref[...] += jnp.dot(
        x_ref[...].astype(jnp.bfloat16), w1_ref[...],
        preferred_element_type=jnp.float32,
    )


def _head_kernel(part_ref, b1_ref, w2_ref, b2_ref, o_ref):
    pre = jnp.sum(part_ref[...], axis=0) + b1_ref[...]                # (B, 64)
    h = _sigmoid(pre)
    logits = jnp.sum(h * w2_ref[...], axis=-1, keepdims=True) + b2_ref[...]
    o_ref[...] = _sigmoid(logits).astype(o_ref.dtype)                 # (B, 1)


def _forward_dual_core(x, w1_bf16, b1, w2_row, b2):
    B = x.shape[0]
    partials = pl.pallas_call(
        _fc1_split_kernel,
        out_shape=jax.ShapeDtypeStruct((NSPLIT, B, HIDDEN), jnp.float32),
        grid_spec=pltpu.PrefetchScalarGridSpec(
            num_scalar_prefetch=0,
            grid=(NSPLIT, K_STEPS_SPLIT),
            in_specs=[
                pl.BlockSpec((B, TK), lambda c, k: (0, c * K_STEPS_SPLIT + k)),
                pl.BlockSpec((TK, HIDDEN), lambda c, k: (c * K_STEPS_SPLIT + k, 0)),
            ],
            out_specs=pl.BlockSpec((None, B, HIDDEN), lambda c, k: (c, 0, 0)),
        ),
        compiler_params=pltpu.CompilerParams(
            dimension_semantics=(pltpu.CORE_PARALLEL, pltpu.ARBITRARY),
            vmem_limit_bytes=VMEM_LIMIT,
        ),
    )(x, w1_bf16)
    return pl.pallas_call(
        _head_kernel,
        out_shape=jax.ShapeDtypeStruct((B, OUT), jnp.float32),
    )(partials, b1, w2_row, b2)


# --------------------------------------------------------------------------
# Dispatcher
# --------------------------------------------------------------------------
def _tensorcores_per_chip() -> int:
    """Best-effort TensorCore count: v7x has 2 per chip, v5e/v6e have 1."""
    try:
        kind = jax.devices()[0].device_kind.lower()
    except Exception:
        return 1
    return 2 if "v7" in kind else 1


def discriminator_forward(x_nchw, w1_bf16, b1, w2_row, b2):
    """x_nchw: (B, 3, 256, 256) f32 -> (B, 1) f32 = sigmoid(fc2(sigmoid(fc1(x))))."""
    B = x_nchw.shape[0]
    x = x_nchw.reshape(B, -1)                   # same as torch .view(B, -1)
    assert x.shape[1] == K_DIM

    if _tensorcores_per_chip() >= 2 and hasattr(pltpu, "CORE_PARALLEL"):
        try:
            return _forward_dual_core(x, w1_bf16, b1, w2_row, b2)
        except Exception:
            pass  # defensive: never let the specialized path break the forward
    return _forward_fused(x, w1_bf16, b1, w2_row, b2)


# --------------------------------------------------------------------------
# Parameter construction (bf16 conversion happens here, ONCE, not per call)
# --------------------------------------------------------------------------
def _init_params(key):
    """Synthetic nn.Linear-style params.

    fc1.weight is stored transposed as (K_DIM, 64) and converted to bf16 once
    at parameter-build time so the forward streams 24 MiB instead of paying a
    per-call f32->bf16 pass over 48 MiB.
    """
    k1, k2, k3, k4 = jax.random.split(key, 4)
    bound1 = 1.0 / jnp.sqrt(jnp.float32(K_DIM))
    bound2 = 1.0 / jnp.sqrt(jnp.float32(HIDDEN))
    w1_t = jax.random.uniform(k1, (K_DIM, HIDDEN), jnp.float32, -bound1, bound1)
    b1 = jax.random.uniform(k2, (1, HIDDEN), jnp.float32, -bound1, bound1)
    w2_row = jax.random.uniform(k3, (1, HIDDEN), jnp.float32, -bound2, bound2)
    b2 = jax.random.uniform(k4, (1, OUT), jnp.float32, -bound2, bound2)
    w1_bf16 = w1_t.astype(jnp.bfloat16)         # one-time conversion
    return w1_bf16, b1, w2_row, b2


if __name__ == "__main__":
    key = jax.random.PRNGKey(0)
    kx, kp = jax.random.split(key)

    B = 2
    x = jax.random.normal(kx, (B, IN_C, IN_H, IN_W), jnp.float32)
    w1_bf16, b1, w2_row, b2 = _init_params(kp)

    out = discriminator_forward(x, w1_bf16, b1, w2_row, b2)
    out = jax.block_until_ready(out)

    # Pure-JAX reference using the same bf16 operands (upcast to f32).
    xf = x.reshape(B, -1).astype(jnp.bfloat16).astype(jnp.float32)
    w1f = w1_bf16.astype(jnp.float32)
    h_ref = jax.nn.sigmoid(xf @ w1f + b1)
    ref = jax.nn.sigmoid(jnp.sum(h_ref * w2_row, axis=-1, keepdims=True) + b2)

    assert out.shape == (B, OUT)
    assert jnp.allclose(out, ref, atol=5e-3, rtol=5e-3), (
        f"max abs err {jnp.max(jnp.abs(out - ref))}"
    )

    print("KERNEL_OK")
</pallas_src>

<mosaic_0001>
module attributes {stable_mosaic.version = 11 : i64} {
  func.func @_fused_kernel(%arg0: i32, %arg1: memref<2x32768xf32, #tpu.memory_space<vmem>>, %arg2: memref<32768x64xbf16, #tpu.memory_space<vmem>>, %arg3: memref<1x64xf32, #tpu.memory_space<vmem>>, %arg4: memref<1x64xf32, #tpu.memory_space<vmem>>, %arg5: memref<1x1xf32, #tpu.memory_space<vmem>>, %arg6: memref<2x1xf32, #tpu.memory_space<vmem>>, %arg7: memref<2x64xf32, #tpu.memory_space<vmem>>) attributes {dimension_semantics = [#tpu.dimension_semantics<arbitrary>], iteration_bounds = array<i64: 6>, scalar_prefetch = 0 : i64, scratch_operands = 1 : i64, tpu.core_type = #tpu.core_type<tc>, window_params = [{transform_indices = @transform_0, window_bounds = array<i64: 2, 32768>}, {transform_indices = @transform_1, window_bounds = array<i64: 32768, 64>}, {pipeline_mode = #tpu.pipeline_mode<synchronous>, transform_indices = @transform_2, window_bounds = array<i64: 1, 64>}, {pipeline_mode = #tpu.pipeline_mode<synchronous>, transform_indices = @transform_3, window_bounds = array<i64: 1, 64>}, {pipeline_mode = #tpu.pipeline_mode<synchronous>, transform_indices = @transform_4, window_bounds = array<i64: 1, 1>}, {pipeline_mode = #tpu.pipeline_mode<synchronous>, transform_indices = @transform_5, window_bounds = array<i64: 2, 1>}]} {
    %c0_i32 = arith.constant 0 : i32
    %0 = arith.cmpi eq, %arg0, %c0_i32 : i32
    %1 = arith.extui %0 : i1 to i32
    %c0_i32_0 = arith.constant 0 : i32
    %2 = arith.cmpi ne, %1, %c0_i32_0 : i32
    scf.if %2 {
      %cst_9 = arith.constant 0.000000e+00 : f32
      %13 = vector.broadcast %cst_9 : f32 to vector<2x64xf32>
      %c0_10 = arith.constant 0 : index
      %c0_11 = arith.constant 0 : index
      %14 = vector.load %arg7[%c0_10, %c0_11] : memref<2x64xf32, #tpu.memory_space<vmem>>, vector<2x64xf32>
      tpu.vector_store %arg7[%c0_10, %c0_11], %13 {strides = array<i32>} : memref<2x64xf32, #tpu.memory_space<vmem>>, vector<2x64xf32>,
    } else {
    }
    %c0 = arith.constant 0 : index
    %c0_1 = arith.constant 0 : index
    %3 = vector.load %arg7[%c0, %c0_1] : memref<2x64xf32, #tpu.memory_space<vmem>>, vector<2x64xf32>
    %c0_2 = arith.constant 0 : index
    %c0_3 = arith.constant 0 : index
    %4 = vector.load %arg1[%c0_2, %c0_3] : memref<2x32768xf32, #tpu.memory_space<vmem>>, vector<2x32768xf32>
    %5 = arith.truncf %4 : vector<2x32768xf32> to vector<2x32768xbf16>
    %c0_4 = arith.constant 0 : index
    %c0_5 = arith.constant 0 : index
    %6 = vector.load %arg2[%c0_4, %c0_5] : memref<32768x64xbf16, #tpu.memory_space<vmem>>, vector<32768x64xbf16>
    %cst = arith.constant dense<0.000000e+00> : vector<2x64xf32>
    %7 = tpu.matmul %5, %6, %cst {dimension_numbers = #tpu.dot_dimension_numbers<[1], [0], [0], [1], [0, 0, 1, 1], [], []>} : vector<2x32768xbf16>, vector<32768x64xbf16>, vector<2x64xf32> -> vector<2x64xf32>
    %8 = arith.addf %3, %7 : vector<2x64xf32>
    %c0_6 = arith.constant 0 : index
    %c0_7 = arith.constant 0 : index
    %9 = vector.load %arg7[%c0_6, %c0_7] : memref<2x64xf32, #tpu.memory_space<vmem>>, vector<2x64xf32>
    tpu.vector_store %arg7[%c0_6, %c0_7], %8 {strides = array<i32>} : memref<2x64xf32, #tpu.memory_space<vmem>>, vector<2x64xf32>,
    %c5_i32 = arith.constant 5 : i32
    %10 = arith.cmpi eq, %arg0, %c5_i32 : i32
    %11 = arith.extui %10 : i1 to i32
    %c0_i32_8 = arith.constant 0 : i32
    %12 = arith.cmpi ne, %11, %c0_i32_8 : i32
    scf.if %12 {
      %c0_9 = arith.constant 0 : index
      %c0_10 = arith.constant 0 : index
      %13 = vector.load %arg7[%c0_9, %c0_10] : memref<2x64xf32, #tpu.memory_space<vmem>>, vector<2x64xf32>
      %c0_11 = arith.constant 0 : index
      %c0_12 = arith.constant 0 : index
      %14 = vector.load %arg3[%c0_11, %c0_12] : memref<1x64xf32, #tpu.memory_space<vmem>>, vector<1x64xf32>
      %15 = vector.broadcast %14 : vector<1x64xf32> to vector<2x64xf32>
      %16 = arith.addf %13, %15 : vector<2x64xf32>
      %cst_13 = arith.constant 0.000000e+00 : f32
      %17 = vector.broadcast %cst_13 : f32 to vector<2x64xf32>
      %18 = arith.subf %17, %16 : vector<2x64xf32>
      %19 = math.exp %18 : vector<2x64xf32>
      %cst_14 = arith.constant 1.000000e+00 : f32
      %20 = vector.broadcast %cst_14 : f32 to vector<2x64xf32>
      %21 = arith.addf %20, %19 : vector<2x64xf32>
      %cst_15 = arith.constant 1.000000e+00 : f32
      %22 = vector.broadcast %cst_15 : f32 to vector<2x64xf32>
      %23 = arith.divf %22, %21 : vector<2x64xf32>
      %c0_16 = arith.constant 0 : index
      %c0_17 = arith.constant 0 : index
      %24 = vector.load %arg4[%c0_16, %c0_17] : memref<1x64xf32, #tpu.memory_space<vmem>>, vector<1x64xf32>
      %25 = vector.broadcast %24 : vector<1x64xf32> to vector<2x64xf32>
      %26 = arith.mulf %23, %25 : vector<2x64xf32>
      %cst_18 = arith.constant dense<0.000000e+00> : vector<2xf32>
      %27 = vector.multi_reduction <add>, %26, %cst_18 [1] : vector<2x64xf32> to vector<2xf32>
      %28 = vector.shape_cast %27 : vector<2xf32> to vector<2x1xf32>
      %c0_19 = arith.constant 0 : index
      %c0_20 = arith.constant 0 : index
      %29 = vector.load %arg5[%c0_19, %c0_20] : memref<1x1xf32, #tpu.memory_space<vmem>>, vector<1x1xf32>
      %30 = vector.broadcast %29 : vector<1x1xf32> to vector<2x1xf32>
      %31 = arith.addf %28, %30 : vector<2x1xf32>
      %cst_21 = arith.constant 0.000000e+00 : f32
      %32 = vector.broadcast %cst_21 : f32 to vector<2x1xf32>
      %33 = arith.subf %32, %31 : vector<2x1xf32>
      %34 = math.exp %33 : vector<2x1xf32>
      %cst_22 = arith.constant 1.000000e+00 : f32
      %35 = vector.broadcast %cst_22 : f32 to vector<2x1xf32>
      %36 = arith.addf %35, %34 : vector<2x1xf32>
      %cst_23 = arith.constant 1.000000e+00 : f32
      %37 = vector.broadcast %cst_23 : f32 to vector<2x1xf32>
      %38 = arith.divf %37, %36 : vector<2x1xf32>
      %c0_24 = arith.constant 0 : index
      %c0_25 = arith.constant 0 : index
      %39 = vector.load %arg6[%c0_24, %c0_25] : memref<2x1xf32, #tpu.memory_space<vmem>>, vector<2x1xf32>
      tpu.vector_store %arg6[%c0_24, %c0_25], %38 {strides = array<i32>} : memref<2x1xf32, #tpu.memory_space<vmem>>, vector<2x1xf32>,
    } else {
    }
    return
  }
  func.func @transform_0(%arg0: i32) -> (i32, i32) {
    %c0_i32 = arith.constant 0 : i32
    %c0_i32_0 = arith.constant 0 : i32
    return %c0_i32, %arg0 : i32, i32
  }
  func.func @transform_1(%arg0: i32) -> (i32, i32) {
    %c0_i32 = arith.constant 0 : i32
    %c0_i32_0 = arith.constant 0 : i32
    return %arg0, %c0_i32 : i32, i32
  }
  func.func @transform_2(%arg0: i32) -> (i32, i32) {
    %c0_i32 = arith.constant 0 : i32
    %c0_i32_0 = arith.constant 0 : i32
    %c0_i32_1 = arith.constant 0 : i32
    return %c0_i32, %c0_i32_0 : i32, i32
  }
  func.func @transform_3(%arg0: i32) -> (i32, i32) {
    %c0_i32 = arith.constant 0 : i32
    %c0_i32_0 = arith.constant 0 : i32
    %c0_i32_1 = arith.constant 0 : i32
    return %c0_i32, %c0_i32_0 : i32, i32
  }
  func.func @transform_4(%arg0: i32) -> (i32, i32) {
    %c0_i32 = arith.constant 0 : i32
    %c0_i32_0 = arith.constant 0 : i32
    %c0_i32_1 = arith.constant 0 : i32
    return %c0_i32, %c0_i32_0 : i32, i32
  }
  func.func @transform_5(%arg0: i32) -> (i32, i32) {
    %c0_i32 = arith.constant 0 : i32
    %c0_i32_0 = arith.constant 0 : i32
    %c0_i32_1 = arith.constant 0 : i32
    return %c0_i32, %c0_i32_0 : i32, i32
  }
}

</mosaic_0001>

<bundles_post_ra>
// kernel: tpu_custom_call.1
= control target key start
LH: loop header
LB: loop body
LE: loop exit
PB: predicated region body
PF: predicated region fallthrough
CT: control target
= control target key end

     0   :  { %s33278_s0 = inlined_call_operand.vmem [shape: f32[2,196608], index: 0, kind: input, shape index: {}]   ;;  %s33279_s1 = inlined_call_operand.hbm [shape: bf16[196608,64], index: 1, kind: input, shape index: {}]   ;;  %s33280_s2 = inlined_call_operand.vmem [shape: f32[1,64], index: 2, kind: input, shape index: {}]   ;;  %s33281_s3 = inlined_call_operand.vmem [shape: f32[1,64], index: 3, kind: input, shape index: {}]   ;;  %s33282_s4 = inlined_call_operand.<no memory space> [shape: f32[1,1], index: 4, kind: input, shape index: {}]   ;;  %s33283_s5 = inlined_call_operand.vmem [shape: f32[2,1], index: 5, kind: output, shape index: {}]  }
   0x1   :  { %v10_v0 = vstv %s33282_s4 }
   0x2   :  { %11 = vst [vmem:[#allocation3] sm:$0x1] %v10_v0 }
   0x3   :  { %12 = vsyncpa [#allocation5], 0 }
   0x4   :  { %14 = vsyncpa [#allocation5 + $0x1], 0  ;;  %s30744_s20 = smov 0   ;;  %s30746_s21 = smov 0  }
   0x5   :  { %s30748_s22 = smov 0   ;;  %s30750_s23 = smov 0  }
   0x6 LB: > { %s30763_s4 = sadd.s32 4294967295, %s30704_s23   ;;  %s30766_s24 = sadd.s32 1, %s30704_s23   ;;  %s30704_s23 = sphi %s30750_s23, %s33290_s23   ;;  %s30700_s22 = sphi %s30748_s22, %s33289_s22   ;;  %s30696_s21 = sphi %s30746_s21, %s33288_s21   ;;  %s30692_s20 = sphi %s30744_s20, %s33287_s20  }
   0x7   : > { %s50_s25 = ssub.s32 %s30704_s23, %s30766_s24  ;;  %s53_s26 = sadd.s32 1, %s30700_s22 }
   0x8   : > { %p51_p0 = scmp.eq.s32.totalorder %s50_s25, 0  ;;  %p60_p1 = scmp.ne.s32.totalorder %s30700_s22, %s30696_s21 }
   0x9   : > { %p61_p2 = scmp.eq.s32.totalorder %s30704_s23, 0  ;;  %p66_p3 = scmp.ne.s32.totalorder %s30696_s21, %s30692_s20 }
   0xa   : > { %s30776_s27 = scalar_select %p51_p0, %s30700_s22, %s53_s26  }
   0xb   : > { %p62_p4 = por %p61_p2, %p60_p1  ;;  %p67_p5 = scmp.eq.s32.totalorder %s30763_s4, 0 }
   0xc   : > { %p28483_p6 = scmp.lt.s32.totalorder %s30704_s23, 6  ;;  %s192_s29 = sand.u32 1, %s30700_s22  }
   0xd   : > { %p30780_p7 = por %p67_p5, %p66_p3  ;;  %s23598_s30 = sshll.u32 %s192_s29, 14 }
   0xe   : > { %s25660_s6 = sshll.u32 %s30704_s23, 18  ;;  %s196_s10 = scalar_lea.vmem [#allocation4], %s23598_s30 }
   0xf   : > { %s30789_s9 = scalar_lea.hbm %s33279_s1, %s25660_s6  ;;  %s203_s11 = sshll.u32 %s196_s10, 4  ;;  %s30791_s11 = int_to_ptr.vmem [resolvable:$true] %s203_s11 }
  0x10   : > { %p30793_p8 = pnand %p28483_p6, %p62_p4  ;;  %s30798_s13 = scalar_lea.sflag [#allocation5], %s192_s29 }
  0x11   : > { %s30640_s14 = scalar_lea.hbm %s30789_s9, 262144  ;;  %s30645_s17 = scalar_lea.hbm %s33279_s1, 1572864 }
  0x12   : > { %p30641_p10 = scmp.ne.s32.totalorder %s30789_s9, %s30640_s14  ;;  %p30642_p11 = pneg %p30793_p8 }
  0x13   : > { %p30646_p0 = scmp.lt.u32.totalorder %s30789_s9, %s33279_s1  ;;  %p30647_p1 = scmp.lt.u32.totalorder %s30645_s17, %s30640_s14 }
  0x14   : > { %p30643_p12 = pnand %p30642_p11, %p30641_p10  ;;  %p30649_p3 = scmp.lt.u32.totalorder %s30640_s14, %s30789_s9 }
  0x15   : > { %p30648_p2 = por %p30647_p1, %p30646_p0 }
  0x16   : > { %p30644_p13 = pneg %p30643_p12 }
  0x17   : > { %p30650_p4 = por %p30649_p3, %p30648_p2 }
  0x19   : > { %p30651_p5 = pnand %p30650_p4, %p30644_p13 }
  0x1b   : > { %30654 = shalt.err (!%p30651_p5)
}
  0x1c   : > { %s30655_s20 = scalar_lea.vmem %s30791_s11, 262144  ;;  %s30706_s25 = smov [#allocation4]  }
  0x1d   : > { %p30656_p6 = scmp.ne.s32.totalorder %s30791_s11, %s30655_s20  ;;  %s30660_s26 = sshll.u32 %s30706_s25, 4  ;;  %s30661_s26 = int_to_ptr.vmem [resolvable:$false] %s30660_s26 }
  0x1e   : > { %s30662_s29 = scalar_lea.vmem %s30661_s26, 524288  ;;  %p30663_p9 = scmp.lt.s32.totalorder %s30791_s11, %s30661_s26 }
  0x1f   : > { %p30658_p10 = pnand %p30656_p6, %p30642_p11  ;;  %p30664_p0 = scmp.lt.s32.totalorder %s30662_s29, %s30655_s20 }
  0x21   : > { %p30659_p12 = pneg %p30658_p10  ;;  %p30665_p1 = por %p30664_p0, %p30663_p9 }
  0x23   : > { %p30666_p2 = pnand %p30665_p1, %p30659_p12 }
  0x25   : > { %30669 = shalt.err (!%p30666_p2)
}
  0x26   : > { %s30707_s30 = smov 64   ;;  %s30708_s6 = smov 4  }
  0x27   : > { %28482 = dma.hbm_to_vmem [thread:$0]  (!%p30793_p8), %s30789_s9, 262144, %s30791_s11, %s30798_s13, %s30707_s30, %s30707_s30, %s30708_s6  }
  0x28   : > { %p211_p11 = scmp.lt.s32.totalorder %s30704_s23, 7  ;;  %p33286_p13 = scmp.ge.s32.totalorder %s30704_s23, 1 }
  0x2a   : > { %p212_p3 = pnand %p33286_p13, %p211_p11 }
  0x2b   : > { %s217_s7 = sand.u32 (!%p212_p3), 1, %s30696_s21  }
  0x2c   : > { %215 = sbr.rel (%p212_p3) target bundleno = 2546 (0x9f2), region = 40  ;;  %s23602_s8 = sshll.u32 (!%p212_p3), %s217_s7, 14 }
  0x2d   : > { %s218_s10 = scalar_lea.sflag (!%p212_p3), [#allocation5], %s217_s7  ;;  %s30830_s14 = scalar_lea.vmem (!%p212_p3), [#allocation4], %s23602_s8 }
  0x33   : > { %30687 = dma.done.wait (%p30780_p7), %s218_s10, 262144  }
  0x34   : > { %30689 = vsyncadd (%p30780_p7), %s218_s10, 4294705152  ;;  %s23603_s15 = sshll.u32 %s30763_s4, 8  ;;  %p23605_p8 = scmp.ne.s32.totalorder %s30763_s4, 0 }
  0x35   : > { %p249_p9 = scmp.lt.s32.totalorder %s23603_s15, 1535  ;;  %vm260_vm0 = vcmask (!%p23605_p8), 517120   ;;  %v30709_v1 = vmov (!%p23605_p8), 0.0  }
  0x36   : > { %259 = sbr.rel (%p23605_p8) target bundleno = 61 (0x3d), region = 48  ;;  %261 = vst.msk [vmem:[#allocation2] sm:$0x3] (!%p23605_p8), %vm260_vm0, %v30709_v1 }
  0x37   : > { %s33292_s15 = smov (!%p249_p9, %s23603_s15), 1535 }
  0x38   : > { %s23604_s9 = sshll.u32 %s33292_s15, 1 }
  0x39   : > { %s30840_s12 = scalar_lea.vmem %s33278_s0, %s23604_s9 }
  0x3d PF: > { %v28520_v2 = vld [vmem:[%s30830_s14 + $0x40] sm:$0xff]   ;;  %v28524_v6 = vld [vmem:[%s30830_s14 + $0x48] sm:$0xff]   ;;  %v28528_v10 = vld [vmem:[%s30830_s14 + $0x50] sm:$0xff]   ;;  %v395_v30 = vlaneseq  ;;  %v30710_v38 = vmov 1983009808   ;;  %vm23496_vm1 = vcmask 517120  }
  0x3e   : > { %v28521_v3 = vld [vmem:[%s30830_s14 + $0xc0] sm:$0xff]   ;;  %25661 = vmatprep.subr.bf16.mxu0 %v28520_v2  ;;  %v28525_v7 = vld [vmem:[%s30830_s14 + $0xc8] sm:$0xff]   ;;  %v28529_v11 = vld [vmem:[%s30830_s14 + $0xd0] sm:$0xff]   ;;  %v393_v39 = vunpack.c.l.s4 %v30710_v38  ;;  %p25654_p7 = scmp.ne.s32.totalorder %s30763_s4, 5 }
  0x3f   : > { %v28522_v4 = vld [vmem:[%s30830_s14] sm:$0xff]   ;;  %25683 = vmatprep.subr.bf16.mxu1 %v28521_v3  ;;  %v28526_v8 = vld [vmem:[%s30830_s14 + $0x8] sm:$0xff]   ;;  %v28530_v12 = vld [vmem:[%s30830_s14 + $0x10] sm:$0xff]   ;;  %v396_v35 = vshrl.u32 %v395_v30, 7  ;;  %vm23542_vm2 = vcmask (!%p25654_p7), 1024  }
  0x40   : > { %v28523_v5 = vld [vmem:[%s30830_s14 + $0x80] sm:$0xff]   ;;  %25662 = vmatpush3.bf16.msra.mxu0 %v28522_v4  ;;  %v28527_v9 = vld [vmem:[%s30830_s14 + $0x88] sm:$0xff]   ;;  %v28531_v13 = vld [vmem:[%s30830_s14 + $0x90] sm:$0xff]   ;;  %v394_v41 = vunpack.c.0.s8 %v393_v39 }
  0x41   : > { %25684 = vmatpush3.bf16.msra.mxu1 %v28523_v5  ;;  %25663 = vmatprep.subr.bf16.mxu0 %v28524_v6  ;;  %v28532_v14 = vld [vmem:[%s30830_s14 + $0x58] sm:$0xff]   ;;  %v28536_v18 = vld [vmem:[%s30830_s14 + $0x60] sm:$0xff]   ;;  %v28540_v22 = vld [vmem:[%s30830_s14 + $0x68] sm:$0xff]  }
  0x42   : > { %25685 = vmatprep.subr.bf16.mxu1 %v28525_v7  ;;  %v28533_v15 = vld [vmem:[%s30830_s14 + $0xd8] sm:$0xff]   ;;  %v28537_v19 = vld [vmem:[%s30830_s14 + $0xe0] sm:$0xff]   ;;  %v28541_v23 = vld [vmem:[%s30830_s14 + $0xe8] sm:$0xff]   ;;  %v30878_v43 = vsub.s32 %v394_v41, %v396_v35 }
  0x43   : > { %v28534_v16 = vld [vmem:[%s30830_s14 + $0x18] sm:$0xff]   ;;  %v28538_v20 = vld [vmem:[%s30830_s14 + $0x20] sm:$0xff]   ;;  %v28542_v24 = vld [vmem:[%s30830_s14 + $0x28] sm:$0xff]  }
  0x44   : > { %25664 = vmatpush3.bf16.msra.mxu0 %v28526_v8  ;;  %v28535_v17 = vld [vmem:[%s30830_s14 + $0x98] sm:$0xff]   ;;  %v28539_v21 = vld [vmem:[%s30830_s14 + $0xa0] sm:$0xff]   ;;  %v28543_v25 = vld [vmem:[%s30830_s14 + $0xa8] sm:$0xff]  }
  0x45   : > { %25686 = vmatpush3.bf16.msra.mxu1 %v28527_v9  ;;  %25665 = vmatprep.subr.bf16.mxu0 %v28528_v10  ;;  %v28544_v26 = vld [vmem:[%s30830_s14 + $0x70] sm:$0xff]   ;;  %v28548_v31 = vld [vmem:[%s30830_s14 + $0x78] sm:$0xff]   ;;  %v28553_v37 = vld [vmem:[%s30830_s14 + $0x140] sm:$0xff]  }
  0x46   : > { %25687 = vmatprep.subr.bf16.mxu1 %v28529_v11  ;;  %v28545_v27 = vld [vmem:[%s30830_s14 + $0xf0] sm:$0xff]   ;;  %v28549_v32 = vld [vmem:[%s30830_s14 + $0xf8] sm:$0xff]   ;;  %v28554_v40 = vld [vmem:[%s30830_s14 + $0x1c0] sm:$0xff]  }
  0x47   : > { %v28546_v28 = vld [vmem:[%s30830_s14 + $0x30] sm:$0xff]   ;;  %v28550_v33 = vld [vmem:[%s30830_s14 + $0x38] sm:$0xff]   ;;  %v28555_v48 = vld [vmem:[%s30830_s14 + $0x100] sm:$0xff]  }
  0x48   : > { %25666 = vmatpush3.bf16.msra.mxu0 %v28530_v12  ;;  %v28547_v29 = vld [vmem:[%s30830_s14 + $0xb0] sm:$0xff]   ;;  %v28551_v34 = vld [vmem:[%s30830_s14 + $0xb8] sm:$0xff]   ;;  %v28556_v51 = vld [vmem:[%s30830_s14 + $0x180] sm:$0xff]  }
  0x49   : > { %25688 = vmatpush3.bf16.msra.mxu1 %v28531_v13  ;;  %25667 = vmatprep.subr.bf16.mxu0 %v28532_v14  ;;  %v263_v36 = vld [vmem:[%s30840_s12] sm:$0xff]  ;;  %v28557_v54 = vld [vmem:[%s30830_s14 + $0x148] sm:$0xff]   ;;  %v28561_v58 = vld [vmem:[%s30830_s14 + $0x150] sm:$0xff]  }
  0x4a   : > { %25689 = vmatprep.subr.bf16.mxu1 %v28533_v15  ;;  %v391_v42 = vcombine.high %v263_v36, %v263_v36  ;;  %v398_v44 = vrot.slane %v263_v36, %v30878_v43  ;;  %v28558_v55 = vld [vmem:[%s30830_s14 + $0x1c8] sm:$0xff]   ;;  %v28562_v59 = vld [vmem:[%s30830_s14 + $0x1d0] sm:$0xff]   ;;  %v28565_v62 = vld [vmem:[%s30830_s14 + $0x158] sm:$0xff]  }
  0x4b   : > { %v28559_v56 = vld [vmem:[%s30830_s14 + $0x108] sm:$0xff]   ;;  %v28563_v60 = vld [vmem:[%s30830_s14 + $0x110] sm:$0xff]   ;;  %v28566_v63 = vld [vmem:[%s30830_s14 + $0x1d8] sm:$0xff]  }
  0x4c   : > { %25668 = vmatpush3.bf16.msra.mxu0 %v28534_v16  ;;  %v405_v45 = vrot.slane %v391_v42, %v30878_v43  ;;  %v406_v46 = vcombine.high %v398_v44, %v398_v44  ;;  %v1735_v49 = vpack.c.bf16 %v398_v44, %v398_v44  ;;  %v28560_v57 = vld [vmem:[%s30830_s14 + $0x188] sm:$0xff]   ;;  %v28564_v61 = vld [vmem:[%s30830_s14 + $0x190] sm:$0xff]   ;;  %v28567_v0 = vld [vmem:[%s30830_s14 + $0x118] sm:$0xff]  }
  0x4d   : > { %25690 = vmatpush3.bf16.msra.mxu1 %v28535_v17  ;;  %25669 = vmatprep.subr.bf16.mxu0 %v28536_v18  ;;  %v28568_v1 = vld [vmem:[%s30830_s14 + $0x198] sm:$0xff]   ;;  %v28569_v2 = vld [vmem:[%s30830_s14 + $0x160] sm:$0xff]   ;;  %v28573_v6 = vld [vmem:[%s30830_s14 + $0x168] sm:$0xff]  }
  0x4e   : > { %25691 = vmatprep.subr.bf16.mxu1 %v28537_v19  ;;  %v407_v47 = vcombine.high %v405_v45, %v405_v45  ;;  %v1737_v50 = vpack.c.bf16 %v405_v45, %v405_v45  ;;  %v1736_v52 = vpack.c.bf16 %v406_v46, %v406_v46  ;;  %v28570_v3 = vld [vmem:[%s30830_s14 + $0x1e0] sm:$0xff]   ;;  %v28574_v7 = vld [vmem:[%s30830_s14 + $0x1e8] sm:$0xff]   ;;  %v28577_v10 = vld [vmem:[%s30830_s14 + $0x170] sm:$0xff]  }
  0x4f   : > { %v28571_v4 = vld [vmem:[%s30830_s14 + $0x120] sm:$0xff]   ;;  %v28575_v8 = vld [vmem:[%s30830_s14 + $0x128] sm:$0xff]   ;;  %v28578_v11 = vld [vmem:[%s30830_s14 + $0x1f0] sm:$0xff]  }
  0x50   : > { %25670 = vmatpush3.bf16.msra.mxu0 %v28538_v20  ;;  %v1738_v53 = vpack.c.bf16 %v407_v47, %v407_v47  ;;  %18407 = vmatprep.mubr.bf16.mxu0 %v1736_v52  ;;  %v28572_v5 = vld [vmem:[%s30830_s14 + $0x1a0] sm:$0xff]   ;;  %v28576_v9 = vld [vmem:[%s30830_s14 + $0x1a8] sm:$0xff]   ;;  %v28579_v13 = vld [vmem:[%s30830_s14 + $0x130] sm:$0xff]  }
  0x51   : > { %25692 = vmatpush3.bf16.msra.mxu1 %v28539_v21  ;;  %25671 = vmatprep.subr.bf16.mxu0 %v28540_v22  ;;  %v264_v12 = vld [vmem:[%s30840_s12 + $0x8] sm:$0xff]  ;;  %v28580_v16 = vld [vmem:[%s30830_s14 + $0x1b0] sm:$0xff]   ;;  %v28581_v17 = vld [vmem:[%s30830_s14 + $0x178] sm:$0xff]  }
  0x52   : > { %25693 = vmatprep.subr.bf16.mxu1 %v28541_v23  ;;  %18447 = vmatprep.mubr.bf16.mxu1 %v1738_v53  ;;  %v415_v14 = vrot.slane %v264_v12, %v30878_v43  ;;  %v408_v15 = vcombine.high %v264_v12, %v264_v12  ;;  %v28582_v20 = vld [vmem:[%s30830_s14 + $0x1f8] sm:$0xff]   ;;  %v28593_v35 = vld [vmem:[%s30830_s14 + $0x288] sm:$0xff]   ;;  %v28594_v36 = vld [vmem:[%s30830_s14 + $0x250] sm:$0xff]  }
  0x53   : > { %v28583_v21 = vld [vmem:[%s30830_s14 + $0x138] sm:$0xff]   ;;  %v28596_v38 = vld [vmem:[%s30830_s14 + $0x210] sm:$0xff]   ;;  %v28602_v45 = vld [vmem:[%s30830_s14 + $0x260] sm:$0xff]  }
  0x54   : > { %25672 = vmatpush3.bf16.msra.mxu0 %v28542_v24  ;;  %v423_v18 = vcombine.high %v415_v14, %v415_v14  ;;  %v422_v19 = vrot.slane %v408_v15, %v30878_v43  ;;  %v28584_v24 = vld [vmem:[%s30830_s14 + $0x1b8] sm:$0xff]   ;;  %v28597_v39 = vld [vmem:[%s30830_s14 + $0x290] sm:$0xff]   ;;  %v28603_v46 = vld [vmem:[%s30830_s14 + $0x2e0] sm:$0xff]  }
  0x55   : > { %25694 = vmatpush3.bf16.msra.mxu1 %v28543_v25  ;;  %25673 = vmatprep.subr.bf16.mxu0 %v28544_v26  ;;  %v28586_v26 = vld [vmem:[%s30830_s14 + $0x240] sm:$0xff]   ;;  %v28599_v41 = vld [vmem:[%s30830_s14 + $0x2d8] sm:$0xff]   ;;  %v28609_v52 = vld [vmem:[%s30830_s14 + $0x2a8] sm:$0xff]  }
  0x56   : > { %25695 = vmatprep.subr.bf16.mxu1 %v28545_v27  ;;  %v1740_v22 = vpack.c.bf16 %v423_v18, %v423_v18  ;;  %v424_v23 = vcombine.high %v422_v19, %v422_v19  ;;  %v28587_v27 = vld [vmem:[%s30830_s14 + $0x2c0] sm:$0xff]   ;;  %v1741_v30 = vpack.c.bf16 %v422_v19, %v422_v19  ;;  %v28600_v42 = vld [vmem:[%s30830_s14 + $0x218] sm:$0xff]   ;;  %v28610_v53 = vld [vmem:[%s30830_s14 + $0x270] sm:$0xff]  }
  0x57   : > { %v28601_v44 = vld [vmem:[%s30830_s14 + $0x298] sm:$0xff]   ;;  %v28604_v47 = vld [vmem:[%s30830_s14 + $0x220] sm:$0xff]   ;;  %v28624_v12 = vld [vmem:[%s30830_s14 + $0x3c8] sm:$0xff]  }
  0x58   : > { %25674 = vmatpush3.bf16.msra.mxu0 %v28546_v28  ;;  %v1742_v25 = vpack.c.bf16 %v424_v23, %v424_v23  ;;  %v28588_v28 = vld [vmem:[%s30830_s14 + $0x200] sm:$0xff]   ;;  %v28627_v15 = vld [vmem:[%s30830_s14 + $0x350] sm:$0xff]   ;;  %v28631_v19 = vld [vmem:[%s30830_s14 + $0x358] sm:$0xff]  }
  0x59   : > { %25696 = vmatpush3.bf16.msra.mxu1 %v28547_v29  ;;  %25675 = vmatprep.subr.bf16.mxu0 %v28548_v31  ;;  %v1739_v29 = vpack.c.bf16 %v415_v14, %v415_v14  ;;  %v28589_v31 = vld [vmem:[%s30830_s14 + $0x280] sm:$0xff]   ;;  %v28626_v14 = vld [vmem:[%s30830_s14 + $0x388] sm:$0xff]   ;;  %v28630_v18 = vld [vmem:[%s30830_s14 + $0x390] sm:$0xff]  }
  0x5a   : > { %25697 = vmatprep.subr.bf16.mxu1 %v28549_v32  ;;  %v28590_v32 = vld [vmem:[%s30830_s14 + $0x248] sm:$0xff]   ;;  %v28635_v23 = vld [vmem:[%s30830_s14 + $0x360] sm:$0xff]  }
  0x5c   : > { %25676 = vmatpush3.bf16.msra.mxu0 %v28550_v33  ;;  %v28591_v33 = vld [vmem:[%s30830_s14 + $0x2c8] sm:$0xff]  }
  0x5d   : > { %25698 = vmatpush3.bf16.msra.mxu1 %v28551_v34  ;;  %25705 = vmatprep.subr.bf16.mxu0 %v28553_v37  ;;  %v28592_v34 = vld [vmem:[%s30830_s14 + $0x208] sm:$0xff]   ;;  %v28595_v37 = vld [vmem:[%s30830_s14 + $0x2d0] sm:$0xff]  }
  0x5e   : > { %25727 = vmatprep.subr.bf16.mxu1 %v28554_v40  ;;  %v28598_v40 = vld [vmem:[%s30830_s14 + $0x258] sm:$0xff]  }
  0x5f   : > { %18408 = vmatmul.mubr.bf16.vlgmr.msra.gmra.mrb[0].mxu0 %v1735_v49  ;;  %v28606_v49 = vld [vmem:[%s30830_s14 + $0x268] sm:$0xff]  }
  0x60   : > { %18448 = vmatmul.mubr.bf16.vlgmr.msra.gmra.mrb[0].mxu1 %v1737_v50  ;;  %25706 = vmatpush3.bf16.msra.mxu0 %v28555_v48  ;;  %v28605_v48 = vld [vmem:[%s30830_s14 + $0x2a0] sm:$0xff]   ;;  %v28607_v50 = vld [vmem:[%s30830_s14 + $0x2e8] sm:$0xff]  }
  0x61   : > { %25728 = vmatpush3.bf16.msra.mxu1 %v28556_v51  ;;  %25707 = vmatprep.subr.bf16.mxu0 %v28557_v54  ;;  %v28608_v51 = vld [vmem:[%s30830_s14 + $0x228] sm:$0xff]   ;;  %v28611_v54 = vld [vmem:[%s30830_s14 + $0x2f0] sm:$0xff]  }
  0x62   : > { %25729 = vmatprep.subr.bf16.mxu1 %v28558_v55  ;;  %18487 = vmatprep.mubr.bf16.mxu0 %v1740_v22  ;;  %v265_v55 = vld [vmem:[%s30840_s12 + $0x10] sm:$0xff]  ;;  %v28634_v22 = vld [vmem:[%s30830_s14 + $0x398] sm:$0xff]  }
  0x63   : > { %18527 = vmatprep.mubr.bf16.mxu1 %v1742_v25  ;;  %v28637_v25 = vld [vmem:[%s30830_s14 + $0x320] sm:$0xff]  }
  0x64   : > { %25708 = vmatpush3.bf16.msra.mxu0 %v28559_v56  ;;  %v28612_v56 = vld [vmem:[%s30830_s14 + $0x230] sm:$0xff]  }
  0x65   : > { %25730 = vmatpush3.bf16.msra.mxu1 %v28560_v57  ;;  %25709 = vmatprep.subr.bf16.mxu0 %v28561_v58  ;;  %v432_v57 = vrot.slane %v265_v55, %v30878_v43  ;;  %v425_v58 = vcombine.high %v265_v55, %v265_v55  ;;  %v28657_v55 = vld [vmem:[%s30830_s14 + $0x4c8] sm:$0xff]  }
  0x66   : > { %25731 = vmatprep.subr.bf16.mxu1 %v28562_v59  ;;  %v28613_v59 = vld [vmem:[%s30830_s14 + $0x2b0] sm:$0xff]  }
  0x68   : > { %25710 = vmatpush3.bf16.msra.mxu0 %v28563_v60  ;;  %v28614_v60 = vld [vmem:[%s30830_s14 + $0x278] sm:$0xff]  }
  0x69   : > { %25732 = vmatpush3.bf16.msra.mxu1 %v28564_v61  ;;  %25711 = vmatprep.subr.bf16.mxu0 %v28565_v62  ;;  %v440_v61 = vcombine.high %v432_v57, %v432_v57  ;;  %v439_v62 = vrot.slane %v425_v58, %v30878_v43  ;;  %v28660_v58 = vld [vmem:[%s30830_s14 + $0x450] sm:$0xff]  }
  0x6a   : > { %25733 = vmatprep.subr.bf16.mxu1 %v28566_v63  ;;  %v28615_v63 = vld [vmem:[%s30830_s14 + $0x2f8] sm:$0xff]  }
  0x6c   : > { %25712 = vmatpush3.bf16.msra.mxu0 %v28567_v0  ;;  %v28616_v0 = vld [vmem:[%s30830_s14 + $0x238] sm:$0xff]  }
  0x6d   : > { %25734 = vmatpush3.bf16.msra.mxu1 %v28568_v1  ;;  %25713 = vmatprep.subr.bf16.mxu0 %v28569_v2  ;;  %v1744_v1 = vpack.c.bf16 %v440_v61, %v440_v61  ;;  %v441_v2 = vcombine.high %v439_v62, %v439_v62  ;;  %v28663_v61 = vld [vmem:[%s30830_s14 + $0x490] sm:$0xff]  }
  0x6e   : > { %25735 = vmatprep.subr.bf16.mxu1 %v28570_v3  ;;  %v28617_v3 = vld [vmem:[%s30830_s14 + $0x2b8] sm:$0xff]  }
  0x70   : > { %25714 = vmatpush3.bf16.msra.mxu0 %v28571_v4  ;;  %v1746_v4 = vpack.c.bf16 %v441_v2, %v441_v2  ;;  %v28668_v2 = vld [vmem:[%s30830_s14 + $0x460] sm:$0xff]  }
  0x71   : > { %25736 = vmatpush3.bf16.msra.mxu1 %v28572_v5  ;;  %25715 = vmatprep.subr.bf16.mxu0 %v28573_v6  ;;  %v28619_v5 = vld [vmem:[%s30830_s14 + $0x340] sm:$0xff]  }
  0x72   : > { %25737 = vmatprep.subr.bf16.mxu1 %v28574_v7  ;;  %v28620_v6 = vld [vmem:[%s30830_s14 + $0x3c0] sm:$0xff]  }
  0x73   : > { %v28621_v7 = vld [vmem:[%s30830_s14 + $0x300] sm:$0xff]  }
  0x74   : > { %25716 = vmatpush3.bf16.msra.mxu0 %v28575_v8  ;;  %v1743_v8 = vpack.c.bf16 %v432_v57, %v432_v57  ;;  %v28659_v57 = vld [vmem:[%s30830_s14 + $0x488] sm:$0xff]  }
  0x75   : > { %25738 = vmatpush3.bf16.msra.mxu1 %v28576_v9  ;;  %25717 = vmatprep.subr.bf16.mxu0 %v28577_v10  ;;  %v1745_v9 = vpack.c.bf16 %v439_v62, %v439_v62  ;;  %v28622_v10 = vld [vmem:[%s30830_s14 + $0x380] sm:$0xff]   ;;  %v28664_v62 = vld [vmem:[%s30830_s14 + $0x458] sm:$0xff]  }
  0x76   : > { %25739 = vmatprep.subr.bf16.mxu1 %v28578_v11  ;;  %v28623_v11 = vld [vmem:[%s30830_s14 + $0x348] sm:$0xff]  }
  0x78   : > { %25718 = vmatpush3.bf16.msra.mxu0 %v28579_v13  ;;  %v28625_v13 = vld [vmem:[%s30830_s14 + $0x308] sm:$0xff]  }
  0x79   : > { %25740 = vmatpush3.bf16.msra.mxu1 %v28580_v16  ;;  %25719 = vmatprep.subr.bf16.mxu0 %v28581_v17  ;;  %v28628_v16 = vld [vmem:[%s30830_s14 + $0x3d0] sm:$0xff]  }
  0x7a   : > { %25741 = vmatprep.subr.bf16.mxu1 %v28582_v20  ;;  %v28629_v17 = vld [vmem:[%s30830_s14 + $0x310] sm:$0xff]   ;;  %v28632_v20 = vld [vmem:[%s30830_s14 + $0x3d8] sm:$0xff]  }
  0x7c   : > { %25720 = vmatpush3.bf16.msra.mxu0 %v28583_v21  ;;  %v28633_v21 = vld [vmem:[%s30830_s14 + $0x318] sm:$0xff]  }
  0x7d   : > { %25742 = vmatpush3.bf16.msra.mxu1 %v28584_v24  ;;  %25749 = vmatprep.subr.bf16.mxu0 %v28586_v26  ;;  %v28636_v24 = vld [vmem:[%s30830_s14 + $0x3e0] sm:$0xff]  }
  0x7e   : > { %25771 = vmatprep.subr.bf16.mxu1 %v28587_v27  ;;  %v28638_v26 = vld [vmem:[%s30830_s14 + $0x3a0] sm:$0xff]   ;;  %v28639_v27 = vld [vmem:[%s30830_s14 + $0x368] sm:$0xff]  }
  0x7f   : > { %18488 = vmatmul.mubr.bf16.vlgmr.msra.gmra.mrb[4].mxu0 %v1739_v29  ;;  %v28641_v29 = vld [vmem:[%s30830_s14 + $0x328] sm:$0xff]  }
  0x80   : > { %18528 = vmatmul.mubr.bf16.vlgmr.msra.gmra.mrb[4].mxu1 %v1741_v30  ;;  %25750 = vmatpush3.bf16.msra.mxu0 %v28588_v28  ;;  %v28640_v28 = vld [vmem:[%s30830_s14 + $0x3e8] sm:$0xff]  }
  0x81   : > { %25772 = vmatpush3.bf16.msra.mxu1 %v28589_v31  ;;  %25751 = vmatprep.subr.bf16.mxu0 %v28590_v32  ;;  %v28642_v30 = vld [vmem:[%s30830_s14 + $0x3a8] sm:$0xff]   ;;  %v28643_v31 = vld [vmem:[%s30830_s14 + $0x370] sm:$0xff]  }
  0x82   : > { %25773 = vmatprep.subr.bf16.mxu1 %v28591_v33  ;;  %18567 = vmatprep.mubr.bf16.mxu0 %v1744_v1  ;;  %v28644_v32 = vld [vmem:[%s30830_s14 + $0x3f0] sm:$0xff]   ;;  %v28667_v1 = vld [vmem:[%s30830_s14 + $0x498] sm:$0xff]  }
  0x83   : > { %18607 = vmatprep.mubr.bf16.mxu1 %v1746_v4  ;;  %v28645_v33 = vld [vmem:[%s30830_s14 + $0x330] sm:$0xff]   ;;  %v28670_v4 = vld [vmem:[%s30830_s14 + $0x420] sm:$0xff]  }
  0x84   : > { %25752 = vmatpush3.bf16.msra.mxu0 %v28592_v34  ;;  %v266_v34 = vld [vmem:[%s30840_s12 + $0x18] sm:$0xff] }
  0x85   : > { %25774 = vmatpush3.bf16.msra.mxu1 %v28593_v35  ;;  %25753 = vmatprep.subr.bf16.mxu0 %v28594_v36  ;;  %v28646_v35 = vld [vmem:[%s30830_s14 + $0x3b0] sm:$0xff]   ;;  %v449_v36 = vrot.slane %v266_v34, %v30878_v43 }
  0x86   : > { %25775 = vmatprep.subr.bf16.mxu1 %v28595_v37  ;;  %v442_v37 = vcombine.high %v266_v34, %v266_v34  ;;  %v28691_v34 = vld [vmem:[%s30830_s14 + $0x508] sm:$0xff]  }
  0x88   : > { %25754 = vmatpush3.bf16.msra.mxu0 %v28596_v38  ;;  %v28647_v38 = vld [vmem:[%s30830_s14 + $0x378] sm:$0xff]  }
  0x89   : > { %25776 = vmatpush3.bf16.msra.mxu1 %v28597_v39  ;;  %25755 = vmatprep.subr.bf16.mxu0 %v28598_v40  ;;  %v28648_v39 = vld [vmem:[%s30830_s14 + $0x3f8] sm:$0xff]   ;;  %v457_v40 = vcombine.high %v449_v36, %v449_v36 }
  0x8a   : > { %25777 = vmatprep.subr.bf16.mxu1 %v28599_v41  ;;  %v456_v41 = vrot.slane %v442_v37, %v30878_v43  ;;  %v28694_v37 = vld [vmem:[%s30830_s14 + $0x5d0] sm:$0xff]  }
  0x8c   : > { %25756 = vmatpush3.bf16.msra.mxu0 %v28600_v42  ;;  %v28649_v42 = vld [vmem:[%s30830_s14 + $0x338] sm:$0xff]  }
  0x8d   : > { %25778 = vmatpush3.bf16.msra.mxu1 %v28601_v44  ;;  %25757 = vmatprep.subr.bf16.mxu0 %v28602_v45  ;;  %v28650_v44 = vld [vmem:[%s30830_s14 + $0x3b8] sm:$0xff]   ;;  %v1748_v45 = vpack.c.bf16 %v457_v40, %v457_v40 }
  0x8e   : > { %25779 = vmatprep.subr.bf16.mxu1 %v28603_v46  ;;  %v458_v46 = vcombine.high %v456_v41, %v456_v41  ;;  %v28697_v40 = vld [vmem:[%s30830_s14 + $0x558] sm:$0xff]  }
  0x90   : > { %25758 = vmatpush3.bf16.msra.mxu0 %v28604_v47  ;;  %v28652_v47 = vld [vmem:[%s30830_s14 + $0x440] sm:$0xff]  }
  0x91   : > { %25780 = vmatpush3.bf16.msra.mxu1 %v28605_v48  ;;  %25759 = vmatprep.subr.bf16.mxu0 %v28606_v49  ;;  %v1750_v48 = vpack.c.bf16 %v458_v46, %v458_v46  ;;  %v28653_v49 = vld [vmem:[%s30830_s14 + $0x4c0] sm:$0xff]  }
  0x92   : > { %25781 = vmatprep.subr.bf16.mxu1 %v28607_v50  ;;  %v28654_v50 = vld [vmem:[%s30830_s14 + $0x400] sm:$0xff]  }
  0x93   : > { %v28702_v46 = vld [vmem:[%s30830_s14 + $0x5e0] sm:$0xff]  }
  0x94   : > { %25760 = vmatpush3.bf16.msra.mxu0 %v28608_v51  ;;  %v1747_v51 = vpack.c.bf16 %v449_v36, %v449_v36  ;;  %v28693_v36 = vld [vmem:[%s30830_s14 + $0x550] sm:$0xff]  }
  0x95   : > { %25782 = vmatpush3.bf16.msra.mxu1 %v28609_v52  ;;  %25761 = vmatprep.subr.bf16.mxu0 %v28610_v53  ;;  %v1749_v52 = vpack.c.bf16 %v456_v41, %v456_v41  ;;  %v28655_v53 = vld [vmem:[%s30830_s14 + $0x480] sm:$0xff]   ;;  %v28698_v41 = vld [vmem:[%s30830_s14 + $0x5d8] sm:$0xff]  }
  0x96   : > { %25783 = vmatprep.subr.bf16.mxu1 %v28611_v54  ;;  %v28656_v54 = vld [vmem:[%s30830_s14 + $0x448] sm:$0xff]  }
  0x98   : > { %25762 = vmatpush3.bf16.msra.mxu0 %v28612_v56  ;;  %v28658_v56 = vld [vmem:[%s30830_s14 + $0x408] sm:$0xff]  }
  0x99   : > { %25784 = vmatpush3.bf16.msra.mxu1 %v28613_v59  ;;  %25763 = vmatprep.subr.bf16.mxu0 %v28614_v60  ;;  %v28661_v59 = vld [vmem:[%s30830_s14 + $0x4d0] sm:$0xff]  }
  0x9a   : > { %25785 = vmatprep.subr.bf16.mxu1 %v28615_v63  ;;  %v28662_v60 = vld [vmem:[%s30830_s14 + $0x410] sm:$0xff]   ;;  %v28665_v63 = vld [vmem:[%s30830_s14 + $0x4d8] sm:$0xff]  }
  0x9c   : > { %25764 = vmatpush3.bf16.msra.mxu0 %v28616_v0  ;;  %v28666_v0 = vld [vmem:[%s30830_s14 + $0x418] sm:$0xff]  }
  0x9d   : > { %25786 = vmatpush3.bf16.msra.mxu1 %v28617_v3  ;;  %25793 = vmatprep.subr.bf16.mxu0 %v28619_v5  ;;  %v28669_v3 = vld [vmem:[%s30830_s14 + $0x4e0] sm:$0xff]  }
  0x9e   : > { %25815 = vmatprep.subr.bf16.mxu1 %v28620_v6  ;;  %v28671_v5 = vld [vmem:[%s30830_s14 + $0x4a0] sm:$0xff]   ;;  %v28672_v6 = vld [vmem:[%s30830_s14 + $0x468] sm:$0xff]  }
  0x9f   : > { %18568 = vmatmul.mubr.bf16.vlgmr.msra.gmra.mrb[8].mxu0 %v1743_v8  ;;  %v28674_v8 = vld [vmem:[%s30830_s14 + $0x428] sm:$0xff]  }
  0xa0   : > { %18608 = vmatmul.mubr.bf16.vlgmr.msra.gmra.mrb[8].mxu1 %v1745_v9  ;;  %25794 = vmatpush3.bf16.msra.mxu0 %v28621_v7  ;;  %v28673_v7 = vld [vmem:[%s30830_s14 + $0x4e8] sm:$0xff]  }
  0xa1   : > { %25816 = vmatpush3.bf16.msra.mxu1 %v28622_v10  ;;  %25795 = vmatprep.subr.bf16.mxu0 %v28623_v11  ;;  %v28675_v9 = vld [vmem:[%s30830_s14 + $0x4a8] sm:$0xff]   ;;  %v28676_v10 = vld [vmem:[%s30830_s14 + $0x470] sm:$0xff]  }
  0xa2   : > { %25817 = vmatprep.subr.bf16.mxu1 %v28624_v12  ;;  %18647 = vmatprep.mubr.bf16.mxu0 %v1748_v45  ;;  %v28677_v11 = vld [vmem:[%s30830_s14 + $0x4f0] sm:$0xff]   ;;  %v28701_v45 = vld [vmem:[%s30830_s14 + $0x560] sm:$0xff]  }
  0xa3   : > { %18687 = vmatprep.mubr.bf16.mxu1 %v1750_v48  ;;  %v28678_v12 = vld [vmem:[%s30830_s14 + $0x430] sm:$0xff]   ;;  %v28704_v48 = vld [vmem:[%s30830_s14 + $0x5a0] sm:$0xff]  }
  0xa4   : > { %25796 = vmatpush3.bf16.msra.mxu0 %v28625_v13  ;;  %v267_v13 = vld [vmem:[%s30840_s12 + $0x20] sm:$0xff] }
  0xa5   : > { %25818 = vmatpush3.bf16.msra.mxu1 %v28626_v14  ;;  %25797 = vmatprep.subr.bf16.mxu0 %v28627_v15  ;;  %v28679_v14 = vld [vmem:[%s30830_s14 + $0x4b0] sm:$0xff]   ;;  %v466_v15 = vrot.slane %v267_v13, %v30878_v43 }
  0xa6   : > { %25819 = vmatprep.subr.bf16.mxu1 %v28628_v16  ;;  %v459_v16 = vcombine.high %v267_v13, %v267_v13  ;;  %v28724_v13 = vld [vmem:[%s30830_s14 + $0x608] sm:$0xff]  }
  0xa8   : > { %25798 = vmatpush3.bf16.msra.mxu0 %v28629_v17  ;;  %v28680_v17 = vld [vmem:[%s30830_s14 + $0x478] sm:$0xff]  }
  0xa9   : > { %25820 = vmatpush3.bf16.msra.mxu1 %v28630_v18  ;;  %25799 = vmatprep.subr.bf16.mxu0 %v28631_v19  ;;  %v28681_v18 = vld [vmem:[%s30830_s14 + $0x4f8] sm:$0xff]   ;;  %v474_v19 = vcombine.high %v466_v15, %v466_v15 }
  0xaa   : > { %25821 = vmatprep.subr.bf16.mxu1 %v28632_v20  ;;  %v473_v20 = vrot.slane %v459_v16, %v30878_v43  ;;  %v28727_v16 = vld [vmem:[%s30830_s14 + $0x6d0] sm:$0xff]  }
  0xac   : > { %25800 = vmatpush3.bf16.msra.mxu0 %v28633_v21  ;;  %v28682_v21 = vld [vmem:[%s30830_s14 + $0x438] sm:$0xff]  }
  0xad   : > { %25822 = vmatpush3.bf16.msra.mxu1 %v28634_v22  ;;  %25801 = vmatprep.subr.bf16.mxu0 %v28635_v23  ;;  %v28683_v22 = vld [vmem:[%s30830_s14 + $0x4b8] sm:$0xff]   ;;  %v1752_v23 = vpack.c.bf16 %v474_v19, %v474_v19 }
  0xae   : > { %25823 = vmatprep.subr.bf16.mxu1 %v28636_v24  ;;  %v475_v24 = vcombine.high %v473_v20, %v473_v20  ;;  %v28730_v19 = vld [vmem:[%s30830_s14 + $0x658] sm:$0xff]  }
  0xb0   : > { %25802 = vmatpush3.bf16.msra.mxu0 %v28637_v25  ;;  %v28685_v25 = vld [vmem:[%s30830_s14 + $0x540] sm:$0xff]  }
  0xb1   : > { %25824 = vmatpush3.bf16.msra.mxu1 %v28638_v26  ;;  %25803 = vmatprep.subr.bf16.mxu0 %v28639_v27  ;;  %v1754_v26 = vpack.c.bf16 %v475_v24, %v475_v24  ;;  %v28686_v27 = vld [vmem:[%s30830_s14 + $0x5c0] sm:$0xff]  }
  0xb2   : > { %25825 = vmatprep.subr.bf16.mxu1 %v28640_v28  ;;  %v28687_v28 = vld [vmem:[%s30830_s14 + $0x500] sm:$0xff]  }
  0xb3   : > { %v28735_v24 = vld [vmem:[%s30830_s14 + $0x6e0] sm:$0xff]  }
  0xb4   : > { %25804 = vmatpush3.bf16.msra.mxu0 %v28641_v29  ;;  %v1751_v29 = vpack.c.bf16 %v466_v15, %v466_v15  ;;  %v28726_v15 = vld [vmem:[%s30830_s14 + $0x650] sm:$0xff]  }
  0xb5   : > { %25826 = vmatpush3.bf16.msra.mxu1 %v28642_v30  ;;  %25805 = vmatprep.subr.bf16.mxu0 %v28643_v31  ;;  %v1753_v30 = vpack.c.bf16 %v473_v20, %v473_v20  ;;  %v28688_v31 = vld [vmem:[%s30830_s14 + $0x580] sm:$0xff]   ;;  %v28731_v20 = vld [vmem:[%s30830_s14 + $0x6d8] sm:$0xff]  }
  0xb6   : > { %25827 = vmatprep.subr.bf16.mxu1 %v28644_v32  ;;  %v28689_v32 = vld [vmem:[%s30830_s14 + $0x548] sm:$0xff]  }
  0xb8   : > { %25806 = vmatpush3.bf16.msra.mxu0 %v28645_v33  ;;  %v28690_v33 = vld [vmem:[%s30830_s14 + $0x5c8] sm:$0xff]  }
  0xb9   : > { %25828 = vmatpush3.bf16.msra.mxu1 %v28646_v35  ;;  %25807 = vmatprep.subr.bf16.mxu0 %v28647_v38  ;;  %v28692_v35 = vld [vmem:[%s30830_s14 + $0x588] sm:$0xff]   ;;  %v28695_v38 = vld [vmem:[%s30830_s14 + $0x510] sm:$0xff]  }
  0xba   : > { %25829 = vmatprep.subr.bf16.mxu1 %v28648_v39  ;;  %v28696_v39 = vld [vmem:[%s30830_s14 + $0x590] sm:$0xff]  }
  0xbc   : > { %25808 = vmatpush3.bf16.msra.mxu0 %v28649_v42  ;;  %v28699_v42 = vld [vmem:[%s30830_s14 + $0x518] sm:$0xff]  }
  0xbd   : > { %25830 = vmatpush3.bf16.msra.mxu1 %v28650_v44  ;;  %25837 = vmatprep.subr.bf16.mxu0 %v28652_v47  ;;  %v28700_v44 = vld [vmem:[%s30830_s14 + $0x598] sm:$0xff]   ;;  %v28703_v47 = vld [vmem:[%s30830_s14 + $0x520] sm:$0xff]  }
  0xbe   : > { %25859 = vmatprep.subr.bf16.mxu1 %v28653_v49  ;;  %v28705_v49 = vld [vmem:[%s30830_s14 + $0x568] sm:$0xff]  }
  0xbf   : > { %18648 = vmatmul.mubr.bf16.vlgmr.msra.gmra.mrb[12].mxu0 %v1747_v51  ;;  %v28707_v51 = vld [vmem:[%s30830_s14 + $0x528] sm:$0xff]  }
  0xc0   : > { %18688 = vmatmul.mubr.bf16.vlgmr.msra.gmra.mrb[12].mxu1 %v1749_v52  ;;  %25838 = vmatpush3.bf16.msra.mxu0 %v28654_v50  ;;  %v28706_v50 = vld [vmem:[%s30830_s14 + $0x5e8] sm:$0xff]  }
  0xc1   : > { %25860 = vmatpush3.bf16.msra.mxu1 %v28655_v53  ;;  %25839 = vmatprep.subr.bf16.mxu0 %v28656_v54  ;;  %v28708_v52 = vld [vmem:[%s30830_s14 + $0x5a8] sm:$0xff]   ;;  %v28709_v53 = vld [vmem:[%s30830_s14 + $0x570] sm:$0xff]  }
  0xc2   : > { %25861 = vmatprep.subr.bf16.mxu1 %v28657_v55  ;;  %18727 = vmatprep.mubr.bf16.mxu0 %v1752_v23  ;;  %v28710_v54 = vld [vmem:[%s30830_s14 + $0x5f0] sm:$0xff]   ;;  %v28734_v23 = vld [vmem:[%s30830_s14 + $0x660] sm:$0xff]  }
  0xc3   : > { %18767 = vmatprep.mubr.bf16.mxu1 %v1754_v26  ;;  %v28711_v55 = vld [vmem:[%s30830_s14 + $0x530] sm:$0xff]   ;;  %v28737_v26 = vld [vmem:[%s30830_s14 + $0x6a0] sm:$0xff]  }
  0xc4   : > { %25840 = vmatpush3.bf16.msra.mxu0 %v28658_v56  ;;  %v268_v56 = vld [vmem:[%s30840_s12 + $0x28] sm:$0xff] }
  0xc5   : > { %25862 = vmatpush3.bf16.msra.mxu1 %v28659_v57  ;;  %25841 = vmatprep.subr.bf16.mxu0 %v28660_v58  ;;  %v28712_v57 = vld [vmem:[%s30830_s14 + $0x5b0] sm:$0xff]   ;;  %v483_v58 = vrot.slane %v268_v56, %v30878_v43 }
  0xc6   : > { %25863 = vmatprep.subr.bf16.mxu1 %v28661_v59  ;;  %v476_v59 = vcombine.high %v268_v56, %v268_v56  ;;  %v28757_v56 = vld [vmem:[%s30830_s14 + $0x708] sm:$0xff]  }
  0xc8   : > { %25842 = vmatpush3.bf16.msra.mxu0 %v28662_v60  ;;  %v28713_v60 = vld [vmem:[%s30830_s14 + $0x578] sm:$0xff]  }
  0xc9   : > { %25864 = vmatpush3.bf16.msra.mxu1 %v28663_v61  ;;  %25843 = vmatprep.subr.bf16.mxu0 %v28664_v62  ;;  %v28714_v61 = vld [vmem:[%s30830_s14 + $0x5f8] sm:$0xff]   ;;  %v491_v62 = vcombine.high %v483_v58, %v483_v58 }
  0xca   : > { %25865 = vmatprep.subr.bf16.mxu1 %v28665_v63  ;;  %v490_v63 = vrot.slane %v476_v59, %v30878_v43  ;;  %v28760_v59 = vld [vmem:[%s30830_s14 + $0x7d0] sm:$0xff]  }
  0xcc   : > { %25844 = vmatpush3.bf16.msra.mxu0 %v28666_v0  ;;  %v28715_v0 = vld [vmem:[%s30830_s14 + $0x538] sm:$0xff]  }
  0xcd   : > { %25866 = vmatpush3.bf16.msra.mxu1 %v28667_v1  ;;  %25845 = vmatprep.subr.bf16.mxu0 %v28668_v2  ;;  %v28716_v1 = vld [vmem:[%s30830_s14 + $0x5b8] sm:$0xff]   ;;  %v1756_v2 = vpack.c.bf16 %v491_v62, %v491_v62 }
  0xce   : > { %25867 = vmatprep.subr.bf16.mxu1 %v28669_v3  ;;  %v492_v3 = vcombine.high %v490_v63, %v490_v63  ;;  %v28763_v62 = vld [vmem:[%s30830_s14 + $0x758] sm:$0xff]  }
  0xd0   : > { %25846 = vmatpush3.bf16.msra.mxu0 %v28670_v4  ;;  %v28718_v4 = vld [vmem:[%s30830_s14 + $0x640] sm:$0xff]  }
  0xd1   : > { %25868 = vmatpush3.bf16.msra.mxu1 %v28671_v5  ;;  %25847 = vmatprep.subr.bf16.mxu0 %v28672_v6  ;;  %v1758_v5 = vpack.c.bf16 %v492_v3, %v492_v3  ;;  %v28719_v6 = vld [vmem:[%s30830_s14 + $0x6c0] sm:$0xff]  }
  0xd2   : > { %25869 = vmatprep.subr.bf16.mxu1 %v28673_v7  ;;  %v28720_v7 = vld [vmem:[%s30830_s14 + $0x600] sm:$0xff]  }
  0xd3   : > { %v28768_v3 = vld [vmem:[%s30830_s14 + $0x7e0] sm:$0xff]  }
  0xd4   : > { %25848 = vmatpush3.bf16.msra.mxu0 %v28674_v8  ;;  %v1755_v8 = vpack.c.bf16 %v483_v58, %v483_v58  ;;  %v28759_v58 = vld [vmem:[%s30830_s14 + $0x750] sm:$0xff]  }
  0xd5   : > { %25870 = vmatpush3.bf16.msra.mxu1 %v28675_v9  ;;  %25849 = vmatprep.subr.bf16.mxu0 %v28676_v10  ;;  %v1757_v9 = vpack.c.bf16 %v490_v63, %v490_v63  ;;  %v28721_v10 = vld [vmem:[%s30830_s14 + $0x680] sm:$0xff]   ;;  %v28764_v63 = vld [vmem:[%s30830_s14 + $0x7d8] sm:$0xff]  }
  0xd6   : > { %25871 = vmatprep.subr.bf16.mxu1 %v28677_v11  ;;  %v28722_v11 = vld [vmem:[%s30830_s14 + $0x648] sm:$0xff]  }
  0xd8   : > { %25850 = vmatpush3.bf16.msra.mxu0 %v28678_v12  ;;  %v28723_v12 = vld [vmem:[%s30830_s14 + $0x6c8] sm:$0xff]  }
  0xd9   : > { %25872 = vmatpush3.bf16.msra.mxu1 %v28679_v14  ;;  %25851 = vmatprep.subr.bf16.mxu0 %v28680_v17  ;;  %v28725_v14 = vld [vmem:[%s30830_s14 + $0x688] sm:$0xff]   ;;  %v28728_v17 = vld [vmem:[%s30830_s14 + $0x610] sm:$0xff]  }
  0xda   : > { %25873 = vmatprep.subr.bf16.mxu1 %v28681_v18  ;;  %v28729_v18 = vld [vmem:[%s30830_s14 + $0x690] sm:$0xff]  }
  0xdc   : > { %25852 = vmatpush3.bf16.msra.mxu0 %v28682_v21  ;;  %v28732_v21 = vld [vmem:[%s30830_s14 + $0x618] sm:$0xff]  }
  0xdd   : > { %25874 = vmatpush3.bf16.msra.mxu1 %v28683_v22  ;;  %25881 = vmatprep.subr.bf16.mxu0 %v28685_v25  ;;  %v28733_v22 = vld [vmem:[%s30830_s14 + $0x698] sm:$0xff]   ;;  %v28736_v25 = vld [vmem:[%s30830_s14 + $0x620] sm:$0xff]  }
  0xde   : > { %25903 = vmatprep.subr.bf16.mxu1 %v28686_v27  ;;  %v28738_v27 = vld [vmem:[%s30830_s14 + $0x668] sm:$0xff]  }
  0xdf   : > { %18728 = vmatmul.mubr.bf16.vlgmr.msra.gmra.mrb[16].mxu0 %v1751_v29  ;;  %v28740_v29 = vld [vmem:[%s30830_s14 + $0x628] sm:$0xff]  }
  0xe0   : > { %18768 = vmatmul.mubr.bf16.vlgmr.msra.gmra.mrb[16].mxu1 %v1753_v30  ;;  %25882 = vmatpush3.bf16.msra.mxu0 %v28687_v28  ;;  %v28739_v28 = vld [vmem:[%s30830_s14 + $0x6e8] sm:$0xff]  }
  0xe1   : > { %25904 = vmatpush3.bf16.msra.mxu1 %v28688_v31  ;;  %25883 = vmatprep.subr.bf16.mxu0 %v28689_v32  ;;  %v28741_v30 = vld [vmem:[%s30830_s14 + $0x6a8] sm:$0xff]   ;;  %v28742_v31 = vld [vmem:[%s30830_s14 + $0x670] sm:$0xff]  }
  0xe2   : > { %25905 = vmatprep.subr.bf16.mxu1 %v28690_v33  ;;  %18807 = vmatprep.mubr.bf16.mxu0 %v1756_v2  ;;  %v28743_v32 = vld [vmem:[%s30830_s14 + $0x6f0] sm:$0xff]   ;;  %v28767_v2 = vld [vmem:[%s30830_s14 + $0x760] sm:$0xff]  }
  0xe3   : > { %18847 = vmatprep.mubr.bf16.mxu1 %v1758_v5  ;;  %v28744_v33 = vld [vmem:[%s30830_s14 + $0x630] sm:$0xff]   ;;  %v28770_v5 = vld [vmem:[%s30830_s14 + $0x7a0] sm:$0xff]  }
  0xe4   : > { %25884 = vmatpush3.bf16.msra.mxu0 %v28691_v34  ;;  %v28745_v34 = vld [vmem:[%s30830_s14 + $0x6b0] sm:$0xff]  }
  0xe5   : > { %25906 = vmatpush3.bf16.msra.mxu1 %v28692_v35  ;;  %25885 = vmatprep.subr.bf16.mxu0 %v28693_v36  ;;  %v269_v35 = vld [vmem:[%s30840_s12 + $0x30] sm:$0xff]  ;;  %v28746_v36 = vld [vmem:[%s30830_s14 + $0x678] sm:$0xff]  }
  0xe6   : > { %25907 = vmatprep.subr.bf16.mxu1 %v28694_v37  ;;  %v500_v37 = vrot.slane %v269_v35, %v30878_v43 }
  0xe8   : > { %25886 = vmatpush3.bf16.msra.mxu0 %v28695_v38  ;;  %v493_v38 = vcombine.high %v269_v35, %v269_v35  ;;  %v28784_v35 = vld [vmem:[%s30830_s14 + $0x840] sm:$0xff]  }
  0xe9   : > { %25908 = vmatpush3.bf16.msra.mxu1 %v28696_v39  ;;  %25887 = vmatprep.subr.bf16.mxu0 %v28697_v40  ;;  %v28747_v39 = vld [vmem:[%s30830_s14 + $0x6f8] sm:$0xff]  }
  0xea   : > { %25909 = vmatprep.subr.bf16.mxu1 %v28698_v41  ;;  %v28748_v40 = vld [vmem:[%s30830_s14 + $0x638] sm:$0xff]   ;;  %v508_v41 = vcombine.high %v500_v37, %v500_v37 }
  0xec   : > { %25888 = vmatpush3.bf16.msra.mxu0 %v28699_v42  ;;  %v507_v42 = vrot.slane %v493_v38, %v30878_v43  ;;  %v28786_v38 = vld [vmem:[%s30830_s14 + $0x800] sm:$0xff]  }
  0xed   : > { %25910 = vmatpush3.bf16.msra.mxu1 %v28700_v44  ;;  %25889 = vmatprep.subr.bf16.mxu0 %v28701_v45  ;;  %v28749_v44 = vld [vmem:[%s30830_s14 + $0x6b8] sm:$0xff]   ;;  %v1760_v45 = vpack.c.bf16 %v508_v41, %v508_v41 }
  0xee   : > { %25911 = vmatprep.subr.bf16.mxu1 %v28702_v46  ;;  %v509_v46 = vcombine.high %v507_v42, %v507_v42 }
  0xf0   : > { %25890 = vmatpush3.bf16.msra.mxu0 %v28703_v47  ;;  %v28751_v47 = vld [vmem:[%s30830_s14 + $0x740] sm:$0xff]  }
  0xf1   : > { %25912 = vmatpush3.bf16.msra.mxu1 %v28704_v48  ;;  %25891 = vmatprep.subr.bf16.mxu0 %v28705_v49  ;;  %v28752_v48 = vld [vmem:[%s30830_s14 + $0x7c0] sm:$0xff]   ;;  %v1762_v49 = vpack.c.bf16 %v509_v46, %v509_v46  ;;  %v28790_v46 = vld [vmem:[%s30830_s14 + $0x808] sm:$0xff]  }
  0xf2   : > { %25913 = vmatprep.subr.bf16.mxu1 %v28706_v50  ;;  %v28753_v50 = vld [vmem:[%s30830_s14 + $0x700] sm:$0xff]  }
  0xf4   : > { %25892 = vmatpush3.bf16.msra.mxu0 %v28707_v51  ;;  %v1759_v51 = vpack.c.bf16 %v500_v37, %v500_v37  ;;  %v28785_v37 = vld [vmem:[%s30830_s14 + $0x8c0] sm:$0xff]  }
  0xf5   : > { %25914 = vmatpush3.bf16.msra.mxu1 %v28708_v52  ;;  %25893 = vmatprep.subr.bf16.mxu0 %v28709_v53  ;;  %v1761_v52 = vpack.c.bf16 %v507_v42, %v507_v42  ;;  %v28754_v53 = vld [vmem:[%s30830_s14 + $0x780] sm:$0xff]  }
  0xf6   : > { %25915 = vmatprep.subr.bf16.mxu1 %v28710_v54  ;;  %v28755_v54 = vld [vmem:[%s30830_s14 + $0x748] sm:$0xff]   ;;  %v28787_v42 = vld [vmem:[%s30830_s14 + $0x880] sm:$0xff]  }
  0xf8   : > { %25894 = vmatpush3.bf16.msra.mxu0 %v28711_v55  ;;  %v28756_v55 = vld [vmem:[%s30830_s14 + $0x7c8] sm:$0xff]  }
  0xf9   : > { %25916 = vmatpush3.bf16.msra.mxu1 %v28712_v57  ;;  %25895 = vmatprep.subr.bf16.mxu0 %v28713_v60  ;;  %v28758_v57 = vld [vmem:[%s30830_s14 + $0x788] sm:$0xff]   ;;  %v28761_v60 = vld [vmem:[%s30830_s14 + $0x710] sm:$0xff]  }
  0xfa   : > { %25917 = vmatprep.subr.bf16.mxu1 %v28714_v61  ;;  %v28762_v61 = vld [vmem:[%s30830_s14 + $0x790] sm:$0xff]  }
  0xfc   : > { %25896 = vmatpush3.bf16.msra.mxu0 %v28715_v0  ;;  %v28765_v0 = vld [vmem:[%s30830_s14 + $0x718] sm:$0xff]  }
  0xfd   : > { %25918 = vmatpush3.bf16.msra.mxu1 %v28716_v1  ;;  %25925 = vmatprep.subr.bf16.mxu0 %v28718_v4  ;;  %v28766_v1 = vld [vmem:[%s30830_s14 + $0x798] sm:$0xff]   ;;  %v28769_v4 = vld [vmem:[%s30830_s14 + $0x720] sm:$0xff]  }
  0xfe   : > { %25947 = vmatprep.subr.bf16.mxu1 %v28719_v6  ;;  %v28771_v6 = vld [vmem:[%s30830_s14 + $0x768] sm:$0xff]  }
  0xff   : > { %18808 = vmatmul.mubr.bf16.vlgmr.msra.gmra.mrb[20].mxu0 %v1755_v8  ;;  %v28773_v8 = vld [vmem:[%s30830_s14 + $0x728] sm:$0xff]  }
 0x100   : > { %18848 = vmatmul.mubr.bf16.vlgmr.msra.gmra.mrb[20].mxu1 %v1757_v9  ;;  %25926 = vmatpush3.bf16.msra.mxu0 %v28720_v7  ;;  %v28772_v7 = vld [vmem:[%s30830_s14 + $0x7e8] sm:$0xff]  }
 0x101   : > { %25948 = vmatpush3.bf16.msra.mxu1 %v28721_v10  ;;  %25927 = vmatprep.subr.bf16.mxu0 %v28722_v11  ;;  %v28774_v9 = vld [vmem:[%s30830_s14 + $0x7a8] sm:$0xff]   ;;  %v28775_v10 = vld [vmem:[%s30830_s14 + $0x770] sm:$0xff]  }
 0x102   : > { %25949 = vmatprep.subr.bf16.mxu1 %v28723_v12  ;;  %18887 = vmatprep.mubr.bf16.mxu0 %v1760_v45  ;;  %v28776_v11 = vld [vmem:[%s30830_s14 + $0x7f0] sm:$0xff]   ;;  %v28789_v45 = vld [vmem:[%s30830_s14 + $0x8c8] sm:$0xff]  }
 0x103   : > { %18927 = vmatprep.mubr.bf16.mxu1 %v1762_v49  ;;  %v28793_v49 = vld [vmem:[%s30830_s14 + $0x8d0] sm:$0xff]  }
 0x104   : > { %25928 = vmatpush3.bf16.msra.mxu0 %v28724_v13 }
 0x105   : > { %25950 = vmatpush3.bf16.msra.mxu1 %v28725_v14  ;;  %25929 = vmatprep.subr.bf16.mxu0 %v28726_v15  ;;  %v28777_v14 = vld [vmem:[%s30830_s14 + $0x730] sm:$0xff]  }
 0x106   : > { %25951 = vmatprep.subr.bf16.mxu1 %v28727_v16  ;;  %v28778_v15 = vld [vmem:[%s30830_s14 + $0x7b0] sm:$0xff]  }
 0x108   : > { %25930 = vmatpush3.bf16.msra.mxu0 %v28728_v17 }
 0x109   : > { %25952 = vmatpush3.bf16.msra.mxu1 %v28729_v18  ;;  %25931 = vmatprep.subr.bf16.mxu0 %v28730_v19  ;;  %v28779_v18 = vld [vmem:[%s30830_s14 + $0x778] sm:$0xff]  }
 0x10a   : > { %25953 = vmatprep.subr.bf16.mxu1 %v28731_v20  ;;  %v28780_v19 = vld [vmem:[%s30830_s14 + $0x7f8] sm:$0xff]  }
 0x10b   : > { %v270_v20 = vld [vmem:[%s30840_s12 + $0x38] sm:$0xff] }
 0x10c   : > { %25932 = vmatpush3.bf16.msra.mxu0 %v28732_v21 }
 0x10d   : > { %25954 = vmatpush3.bf16.msra.mxu1 %v28733_v22  ;;  %25933 = vmatprep.subr.bf16.mxu0 %v28734_v23 }
 0x10e   : > { %25955 = vmatprep.subr.bf16.mxu1 %v28735_v24 }
 0x110   : > { %25934 = vmatpush3.bf16.msra.mxu0 %v28736_v25  ;;  %v517_v25 = vrot.slane %v270_v20, %v30878_v43 }
 0x111   : > { %25956 = vmatpush3.bf16.msra.mxu1 %v28737_v26  ;;  %25935 = vmatprep.subr.bf16.mxu0 %v28738_v27 }
 0x112   : > { %25957 = vmatprep.subr.bf16.mxu1 %v28739_v28  ;;  %v510_v28 = vcombine.high %v270_v20, %v270_v20  ;;  %v28814_v20 = vld [vmem:[%s30830_s14 + $0x838] sm:$0xff]  }
 0x114   : > { %25936 = vmatpush3.bf16.msra.mxu0 %v28740_v29 }
 0x115   : > { %25958 = vmatpush3.bf16.msra.mxu1 %v28741_v30  ;;  %25937 = vmatprep.subr.bf16.mxu0 %v28742_v31  ;;  %v28781_v30 = vld [vmem:[%s30830_s14 + $0x738] sm:$0xff]   ;;  %v525_v31 = vcombine.high %v517_v25, %v517_v25 }
 0x116   : > { %25959 = vmatprep.subr.bf16.mxu1 %v28743_v32  ;;  %v28782_v32 = vld [vmem:[%s30830_s14 + $0x7b8] sm:$0xff]  }
 0x118   : > { %25938 = vmatpush3.bf16.msra.mxu0 %v28744_v33  ;;  %v524_v33 = vrot.slane %v510_v28, %v30878_v43  ;;  %v28818_v28 = vld [vmem:[%s30830_s14 + $0x9c0] sm:$0xff]  }
 0x119   : > { %25960 = vmatpush3.bf16.msra.mxu1 %v28745_v34  ;;  %25939 = vmatprep.subr.bf16.mxu0 %v28746_v36  ;;  %v1764_v34 = vpack.c.bf16 %v525_v31, %v525_v31 }
 0x11a   : > { %25961 = vmatprep.subr.bf16.mxu1 %v28747_v39  ;;  %v526_v36 = vcombine.high %v524_v33, %v524_v33  ;;  %v1765_v41 = vpack.c.bf16 %v524_v33, %v524_v33  ;;  %v28820_v33 = vld [vmem:[%s30830_s14 + $0x980] sm:$0xff]  }
 0x11c   : > { %25940 = vmatpush3.bf16.msra.mxu0 %v28748_v40  ;;  %v1766_v39 = vpack.c.bf16 %v526_v36, %v526_v36  ;;  %v1763_v40 = vpack.c.bf16 %v517_v25, %v517_v25  ;;  %v28817_v25 = vld [vmem:[%s30830_s14 + $0x940] sm:$0xff]   ;;  %v28823_v36 = vld [vmem:[%s30830_s14 + $0x908] sm:$0xff]  }
 0x11d   : > { %25962 = vmatpush3.bf16.msra.mxu1 %v28749_v44  ;;  %25969 = vmatprep.subr.bf16.mxu0 %v28751_v47  ;;  %v28788_v44 = vld [vmem:[%s30830_s14 + $0x848] sm:$0xff]  }
 0x11e   : > { %25991 = vmatprep.subr.bf16.mxu1 %v28752_v48  ;;  %v28791_v47 = vld [vmem:[%s30830_s14 + $0x888] sm:$0xff]   ;;  %v28792_v48 = vld [vmem:[%s30830_s14 + $0x850] sm:$0xff]  }
 0x11f   : > { %18888 = vmatmul.mubr.bf16.vlgmr.msra.gmra.mrb[24].mxu0 %v1759_v51  ;;  %v28795_v51 = vld [vmem:[%s30830_s14 + $0x890] sm:$0xff]  }
 0x120   : > { %18928 = vmatmul.mubr.bf16.vlgmr.msra.gmra.mrb[24].mxu1 %v1761_v52  ;;  %25970 = vmatpush3.bf16.msra.mxu0 %v28753_v50  ;;  %v28794_v50 = vld [vmem:[%s30830_s14 + $0x810] sm:$0xff]   ;;  %v28796_v52 = vld [vmem:[%s30830_s14 + $0x858] sm:$0xff]  }
 0x121   : > { %25992 = vmatpush3.bf16.msra.mxu1 %v28754_v53  ;;  %25971 = vmatprep.subr.bf16.mxu0 %v28755_v54  ;;  %v28797_v53 = vld [vmem:[%s30830_s14 + $0x8d8] sm:$0xff]  }
 0x122   : > { %25993 = vmatprep.subr.bf16.mxu1 %v28756_v55  ;;  %18967 = vmatprep.mubr.bf16.mxu0 %v1764_v34  ;;  %v28798_v54 = vld [vmem:[%s30830_s14 + $0x818] sm:$0xff]   ;;  %v28821_v34 = vld [vmem:[%s30830_s14 + $0x948] sm:$0xff]  }
 0x123   : > { %19007 = vmatprep.mubr.bf16.mxu1 %v1766_v39  ;;  %v28799_v55 = vld [vmem:[%s30830_s14 + $0x898] sm:$0xff]   ;;  %v28826_v39 = vld [vmem:[%s30830_s14 + $0x9d0] sm:$0xff]  }
 0x124   : > { %25972 = vmatpush3.bf16.msra.mxu0 %v28757_v56  ;;  %v28800_v56 = vld [vmem:[%s30830_s14 + $0x860] sm:$0xff]  }
 0x125   : > { %25994 = vmatpush3.bf16.msra.mxu1 %v28758_v57  ;;  %25973 = vmatprep.subr.bf16.mxu0 %v28759_v58  ;;  %v28801_v57 = vld [vmem:[%s30830_s14 + $0x8e0] sm:$0xff]  }
 0x126   : > { %25995 = vmatprep.subr.bf16.mxu1 %v28760_v59  ;;  %v28802_v58 = vld [vmem:[%s30830_s14 + $0x820] sm:$0xff]  }
 0x127   : > { %v28803_v59 = vld [vmem:[%s30830_s14 + $0x8a0] sm:$0xff]  }
 0x128   : > { %25974 = vmatpush3.bf16.msra.mxu0 %v28761_v60  ;;  %v28804_v60 = vld [vmem:[%s30830_s14 + $0x868] sm:$0xff]  }
 0x129   : > { %25996 = vmatpush3.bf16.msra.mxu1 %v28762_v61  ;;  %25975 = vmatprep.subr.bf16.mxu0 %v28763_v62  ;;  %v28805_v61 = vld [vmem:[%s30830_s14 + $0x8e8] sm:$0xff]  }
 0x12a   : > { %25997 = vmatprep.subr.bf16.mxu1 %v28764_v63  ;;  %v28806_v62 = vld [vmem:[%s30830_s14 + $0x828] sm:$0xff]  }
 0x12b   : > { %v28807_v63 = vld [vmem:[%s30830_s14 + $0x8a8] sm:$0xff]  }
 0x12c   : > { %25976 = vmatpush3.bf16.msra.mxu0 %v28765_v0  ;;  %v28808_v0 = vld [vmem:[%s30830_s14 + $0x870] sm:$0xff]  }
 0x12d   : > { %25998 = vmatpush3.bf16.msra.mxu1 %v28766_v1  ;;  %25977 = vmatprep.subr.bf16.mxu0 %v28767_v2  ;;  %v28809_v1 = vld [vmem:[%s30830_s14 + $0x8f0] sm:$0xff]  }
 0x12e   : > { %25999 = vmatprep.subr.bf16.mxu1 %v28768_v3 }
 0x130   : > { %25978 = vmatpush3.bf16.msra.mxu0 %v28769_v4  ;;  %v28810_v4 = vld [vmem:[%s30830_s14 + $0x830] sm:$0xff]  }
 0x131   : > { %26000 = vmatpush3.bf16.msra.mxu1 %v28770_v5  ;;  %25979 = vmatprep.subr.bf16.mxu0 %v28771_v6  ;;  %v28811_v5 = vld [vmem:[%s30830_s14 + $0x8b0] sm:$0xff]  }
 0x132   : > { %26001 = vmatprep.subr.bf16.mxu1 %v28772_v7  ;;  %v25677_v12 = vpop.f32.mrb[0].mxu0 }
 0x133   : > { %v25699_v13 = vpop.f32.mrb[0].mxu1  ;;  %v25678_v16 = vpop.f32.mrb[1].mxu0 }
 0x134   : > { %v25700_v17 = vpop.f32.mrb[1].mxu1  ;;  %v25679_v21 = vadd.f32 %v25678_v16, %v25677_v12  ;;  %v25680_v23 = vpop.f32.mrb[2].mxu0  ;;  %25980 = vmatpush3.bf16.msra.mxu0 %v28773_v8  ;;  %v28812_v8 = vld [vmem:[%s30830_s14 + $0x878] sm:$0xff]  }
 0x135   : > { %v25701_v22 = vadd.f32 %v25700_v17, %v25699_v13  ;;  %v25702_v24 = vpop.f32.mrb[2].mxu1  ;;  %26002 = vmatpush3.bf16.msra.mxu1 %v28774_v9  ;;  %v25681_v26 = vpop.f32.mrb[3].mxu0  ;;  %25981 = vmatprep.subr.bf16.mxu0 %v28775_v10  ;;  %v28813_v13 = vld [vmem:[%s30830_s14 + $0x8f8] sm:$0xff]  }
 0x136   : > { %v25703_v27 = vpop.f32.mrb[3].mxu1  ;;  %26003 = vmatprep.subr.bf16.mxu1 %v28776_v11 }
 0x137   : > { %v31122_v29 = vadd.f32 %v25701_v22, %v25679_v21  ;;  %v28815_v21 = vld [vmem:[%s30830_s14 + $0x8b8] sm:$0xff]  }
 0x138   : > { %25982 = vmatpush3.bf16.msra.mxu0 %v28777_v14  ;;  %v271_v14 = vld [vmem:[%s30840_s12 + $0x40] sm:$0xff] }
 0x139   : > { %26004 = vmatpush3.bf16.msra.mxu1 %v28778_v15  ;;  %25983 = vmatprep.subr.bf16.mxu0 %v28779_v18  ;;  %v534_v17 = vrot.slane %v271_v14, %v30878_v43  ;;  %v527_v18 = vcombine.high %v271_v14, %v271_v14 }
 0x13a   : > { %26005 = vmatprep.subr.bf16.mxu1 %v28780_v19 }
 0x13b   : > { %v542_v22 = vcombine.high %v534_v17, %v534_v17  ;;  %v541_v23 = vrot.slane %v527_v18, %v30878_v43  ;;  %v1767_v31 = vpack.c.bf16 %v534_v17, %v534_v17  ;;  %v28851_v17 = vld [vmem:[%s30830_s14 + $0xac0] sm:$0xff]  }
 0x13c   : > { %25984 = vmatpush3.bf16.msra.mxu0 %v28781_v30 }
 0x13d   : > { %26006 = vmatpush3.bf16.msra.mxu1 %v28782_v32  ;;  %26013 = vmatprep.subr.bf16.mxu0 %v28784_v35  ;;  %v1768_v26 = vpack.c.bf16 %v542_v22, %v542_v22  ;;  %v543_v27 = vcombine.high %v541_v23, %v541_v23  ;;  %v1769_v32 = vpack.c.bf16 %v541_v23, %v541_v23  ;;  %v28822_v35 = vld [vmem:[%s30830_s14 + $0x9c8] sm:$0xff]   ;;  %v28853_v23 = vld [vmem:[%s30830_s14 + $0xa80] sm:$0xff]  }
 0x13e   : > { %26035 = vmatprep.subr.bf16.mxu1 %v28785_v37  ;;  %v28824_v37 = vld [vmem:[%s30830_s14 + $0x988] sm:$0xff]  }
 0x13f   : > { %18968 = vmatmul.mubr.bf16.vlgmr.msra.gmra.mrb[28].mxu0 %v1763_v40  ;;  %v1770_v30 = vpack.c.bf16 %v543_v27, %v543_v27  ;;  %v28827_v40 = vld [vmem:[%s30830_s14 + $0x910] sm:$0xff]   ;;  %v28856_v27 = vld [vmem:[%s30830_s14 + $0xa08] sm:$0xff]  }
 0x140   : > { %19008 = vmatmul.mubr.bf16.vlgmr.msra.gmra.mrb[28].mxu1 %v1765_v41  ;;  %26014 = vmatpush3.bf16.msra.mxu0 %v28786_v38  ;;  %v28825_v38 = vld [vmem:[%s30830_s14 + $0x950] sm:$0xff]  }
 0x141   : > { %26036 = vmatpush3.bf16.msra.mxu1 %v28787_v42  ;;  %26015 = vmatprep.subr.bf16.mxu0 %v28788_v44  ;;  %v28828_v41 = vld [vmem:[%s30830_s14 + $0x990] sm:$0xff]   ;;  %v28829_v42 = vld [vmem:[%s30830_s14 + $0x958] sm:$0xff]  }
 0x142   : > { %26037 = vmatprep.subr.bf16.mxu1 %v28789_v45  ;;  %19047 = vmatprep.mubr.bf16.mxu0 %v1768_v26  ;;  %v28830_v44 = vld [vmem:[%s30830_s14 + $0x9d8] sm:$0xff]   ;;  %v28855_v26 = vld [vmem:[%s30830_s14 + $0xac8] sm:$0xff]  }
 0x143   : > { %19087 = vmatprep.mubr.bf16.mxu1 %v1770_v30  ;;  %v28831_v45 = vld [vmem:[%s30830_s14 + $0x918] sm:$0xff]   ;;  %v28859_v30 = vld [vmem:[%s30830_s14 + $0xad0] sm:$0xff]  }
 0x144   : > { %26016 = vmatpush3.bf16.msra.mxu0 %v28790_v46  ;;  %v28832_v46 = vld [vmem:[%s30830_s14 + $0x998] sm:$0xff]  }
 0x145   : > { %26038 = vmatpush3.bf16.msra.mxu1 %v28791_v47  ;;  %26017 = vmatprep.subr.bf16.mxu0 %v28792_v48  ;;  %v28833_v47 = vld [vmem:[%s30830_s14 + $0x960] sm:$0xff]  }
 0x146   : > { %26039 = vmatprep.subr.bf16.mxu1 %v28793_v49  ;;  %v28834_v48 = vld [vmem:[%s30830_s14 + $0x9e0] sm:$0xff]  }
 0x147   : > { %v28835_v49 = vld [vmem:[%s30830_s14 + $0x920] sm:$0xff]  }
 0x148   : > { %26018 = vmatpush3.bf16.msra.mxu0 %v28794_v50  ;;  %v28836_v50 = vld [vmem:[%s30830_s14 + $0x9a0] sm:$0xff]  }
 0x149   : > { %26040 = vmatpush3.bf16.msra.mxu1 %v28795_v51  ;;  %26019 = vmatprep.subr.bf16.mxu0 %v28796_v52  ;;  %v28837_v51 = vld [vmem:[%s30830_s14 + $0x968] sm:$0xff]  }
 0x14a   : > { %26041 = vmatprep.subr.bf16.mxu1 %v28797_v53  ;;  %v28838_v52 = vld [vmem:[%s30830_s14 + $0x9e8] sm:$0xff]  }
 0x14b   : > { %v28839_v53 = vld [vmem:[%s30830_s14 + $0x928] sm:$0xff]  }
 0x14c   : > { %26020 = vmatpush3.bf16.msra.mxu0 %v28798_v54  ;;  %v28840_v54 = vld [vmem:[%s30830_s14 + $0x9a8] sm:$0xff]  }
 0x14d   : > { %26042 = vmatpush3.bf16.msra.mxu1 %v28799_v55  ;;  %26021 = vmatprep.subr.bf16.mxu0 %v28800_v56  ;;  %v28841_v55 = vld [vmem:[%s30830_s14 + $0x970] sm:$0xff]  }
 0x14e   : > { %26043 = vmatprep.subr.bf16.mxu1 %v28801_v57  ;;  %v28842_v56 = vld [vmem:[%s30830_s14 + $0x9f0] sm:$0xff]  }
 0x150   : > { %26022 = vmatpush3.bf16.msra.mxu0 %v28802_v58 }
 0x151   : > { %26044 = vmatpush3.bf16.msra.mxu1 %v28803_v59  ;;  %26023 = vmatprep.subr.bf16.mxu0 %v28804_v60  ;;  %v28843_v59 = vld [vmem:[%s30830_s14 + $0x930] sm:$0xff]  }
 0x152   : > { %26045 = vmatprep.subr.bf16.mxu1 %v28805_v61  ;;  %v25721_v2 = vpop.f32.mrb[4].mxu0  ;;  %v28844_v60 = vld [vmem:[%s30830_s14 + $0x9b0] sm:$0xff]  }
 0x153   : > { %v25743_v3 = vpop.f32.mrb[4].mxu1  ;;  %v25722_v6 = vpop.f32.mrb[5].mxu0 }
 0x154   : > { %v25744_v7 = vpop.f32.mrb[5].mxu1  ;;  %v25723_v9 = vadd.f32 %v25722_v6, %v25721_v2  ;;  %v25724_v11 = vpop.f32.mrb[6].mxu0  ;;  %26024 = vmatpush3.bf16.msra.mxu0 %v28806_v62 }
 0x155   : > { %v25745_v10 = vadd.f32 %v25744_v7, %v25743_v3  ;;  %v25746_v12 = vpop.f32.mrb[6].mxu1  ;;  %26046 = vmatpush3.bf16.msra.mxu1 %v28807_v63  ;;  %v25725_v15 = vpop.f32.mrb[7].mxu0  ;;  %26025 = vmatprep.subr.bf16.mxu0 %v28808_v0  ;;  %v28845_v3 = vld [vmem:[%s30830_s14 + $0x978] sm:$0xff]  }
 0x156   : > { %v25747_v16 = vpop.f32.mrb[7].mxu1  ;;  %26047 = vmatprep.subr.bf16.mxu1 %v28809_v1  ;;  %v18490_v19 = vadd.f32 %v25723_v9, %v31122_v29  ;;  %v28819_v29 = vld [vmem:[%s30830_s14 + $0x900] sm:$0xff]   ;;  %v28847_v9 = vld [vmem:[%s30830_s14 + $0x938] sm:$0xff]  }
 0x157   : > { %v28850_v16 = vld [vmem:[%s30830_s14 + $0xa40] sm:$0xff]  }
 0x158   : > { %v31163_v24 = vadd.f32 %v25745_v10, %v18490_v19  ;;  %26026 = vmatpush3.bf16.msra.mxu0 %v28810_v4  ;;  %v28846_v4 = vld [vmem:[%s30830_s14 + $0x9f8] sm:$0xff]  }
 0x159   : > { %26048 = vmatpush3.bf16.msra.mxu1 %v28811_v5  ;;  %26027 = vmatprep.subr.bf16.mxu0 %v28812_v8  ;;  %v272_v8 = vld [vmem:[%s30840_s12 + $0x48] sm:$0xff] }
 0x15a   : > { %26049 = vmatprep.subr.bf16.mxu1 %v28813_v13  ;;  %v551_v10 = vrot.slane %v272_v8, %v30878_v43  ;;  %v544_v11 = vcombine.high %v272_v8, %v272_v8  ;;  %v28848_v13 = vld [vmem:[%s30830_s14 + $0x9b8] sm:$0xff]   ;;  %v28884_v8 = vld [vmem:[%s30830_s14 + $0xbc0] sm:$0xff]  }
 0x15c   : > { %26028 = vmatpush3.bf16.msra.mxu0 %v28814_v20  ;;  %v559_v14 = vcombine.high %v551_v10, %v551_v10  ;;  %v558_v15 = vrot.slane %v544_v11, %v30878_v43  ;;  %v1771_v20 = vpack.c.bf16 %v551_v10, %v551_v10  ;;  %v28885_v10 = vld [vmem:[%s30830_s14 + $0xb00] sm:$0xff]  }
 0x15d   : > { %26050 = vmatpush3.bf16.msra.mxu1 %v28815_v21  ;;  %26057 = vmatprep.subr.bf16.mxu0 %v28817_v25  ;;  %v28852_v21 = vld [vmem:[%s30830_s14 + $0xa00] sm:$0xff]   ;;  %v28854_v25 = vld [vmem:[%s30830_s14 + $0xa48] sm:$0xff]  }
 0x15e   : > { %26079 = vmatprep.subr.bf16.mxu1 %v28818_v28  ;;  %v1772_v18 = vpack.c.bf16 %v559_v14, %v559_v14  ;;  %v560_v19 = vcombine.high %v558_v15, %v558_v15  ;;  %v1773_v22 = vpack.c.bf16 %v558_v15, %v558_v15  ;;  %v28857_v28 = vld [vmem:[%s30830_s14 + $0xa88] sm:$0xff]  }
 0x15f   : > { %19048 = vmatmul.mubr.bf16.vlgmr.msra.gmra.mrb[32].mxu0 %v1767_v31  ;;  %v28860_v31 = vld [vmem:[%s30830_s14 + $0xa10] sm:$0xff]   ;;  %v28887_v15 = vld [vmem:[%s30830_s14 + $0xb48] sm:$0xff]  }
 0x160   : > { %19088 = vmatmul.mubr.bf16.vlgmr.msra.gmra.mrb[32].mxu1 %v1769_v32  ;;  %26058 = vmatpush3.bf16.msra.mxu0 %v28819_v29  ;;  %v28858_v29 = vld [vmem:[%s30830_s14 + $0xa50] sm:$0xff]  }
 0x161   : > { %26080 = vmatpush3.bf16.msra.mxu1 %v28820_v33  ;;  %26059 = vmatprep.subr.bf16.mxu0 %v28821_v34  ;;  %v28861_v32 = vld [vmem:[%s30830_s14 + $0xa90] sm:$0xff]   ;;  %v28862_v33 = vld [vmem:[%s30830_s14 + $0xa58] sm:$0xff]  }
 0x162   : > { %26081 = vmatprep.subr.bf16.mxu1 %v28822_v35  ;;  %19127 = vmatprep.mubr.bf16.mxu0 %v1772_v18  ;;  %v28863_v34 = vld [vmem:[%s30830_s14 + $0xad8] sm:$0xff]   ;;  %v28889_v18 = vld [vmem:[%s30830_s14 + $0xb08] sm:$0xff]  }
 0x163   : > { %v28864_v35 = vld [vmem:[%s30830_s14 + $0xa18] sm:$0xff]  }
 0x164   : > { %26060 = vmatpush3.bf16.msra.mxu0 %v28823_v36  ;;  %v28865_v36 = vld [vmem:[%s30830_s14 + $0xa98] sm:$0xff]  }
 0x165   : > { %26082 = vmatpush3.bf16.msra.mxu1 %v28824_v37  ;;  %26061 = vmatprep.subr.bf16.mxu0 %v28825_v38  ;;  %v28866_v37 = vld [vmem:[%s30830_s14 + $0xa60] sm:$0xff]  }
 0x166   : > { %26083 = vmatprep.subr.bf16.mxu1 %v28826_v39  ;;  %v28867_v38 = vld [vmem:[%s30830_s14 + $0xae0] sm:$0xff]  }
 0x167   : > { %v28868_v39 = vld [vmem:[%s30830_s14 + $0xa20] sm:$0xff]  }
 0x168   : > { %26062 = vmatpush3.bf16.msra.mxu0 %v28827_v40  ;;  %v28869_v40 = vld [vmem:[%s30830_s14 + $0xaa0] sm:$0xff]  }
 0x169   : > { %26084 = vmatpush3.bf16.msra.mxu1 %v28828_v41  ;;  %26063 = vmatprep.subr.bf16.mxu0 %v28829_v42  ;;  %v28870_v41 = vld [vmem:[%s30830_s14 + $0xa68] sm:$0xff]  }
 0x16a   : > { %26085 = vmatprep.subr.bf16.mxu1 %v28830_v44  ;;  %v28871_v42 = vld [vmem:[%s30830_s14 + $0xae8] sm:$0xff]  }
 0x16b   : > { %v28872_v44 = vld [vmem:[%s30830_s14 + $0xa28] sm:$0xff]  }
 0x16c   : > { %26064 = vmatpush3.bf16.msra.mxu0 %v28831_v45  ;;  %v28873_v45 = vld [vmem:[%s30830_s14 + $0xaa8] sm:$0xff]  }
 0x16d   : > { %26086 = vmatpush3.bf16.msra.mxu1 %v28832_v46  ;;  %26065 = vmatprep.subr.bf16.mxu0 %v28833_v47  ;;  %v28874_v46 = vld [vmem:[%s30830_s14 + $0xa70] sm:$0xff]  }
 0x16e   : > { %26087 = vmatprep.subr.bf16.mxu1 %v28834_v48 }
 0x170   : > { %26066 = vmatpush3.bf16.msra.mxu0 %v28835_v49  ;;  %v28875_v49 = vld [vmem:[%s30830_s14 + $0xaf0] sm:$0xff]  }
 0x171   : > { %26088 = vmatpush3.bf16.msra.mxu1 %v28836_v50  ;;  %26067 = vmatprep.subr.bf16.mxu0 %v28837_v51  ;;  %v28876_v50 = vld [vmem:[%s30830_s14 + $0xa30] sm:$0xff]  }
 0x172   : > { %26089 = vmatprep.subr.bf16.mxu1 %v28838_v52  ;;  %v25765_v57 = vpop.f32.mrb[8].mxu0 }
 0x173   : > { %v25787_v58 = vpop.f32.mrb[8].mxu1  ;;  %v25766_v61 = vpop.f32.mrb[9].mxu0 }
 0x174   : > { %v25788_v62 = vpop.f32.mrb[9].mxu1  ;;  %v25767_v63 = vadd.f32 %v25766_v61, %v25765_v57  ;;  %v25768_v1 = vpop.f32.mrb[10].mxu0  ;;  %26068 = vmatpush3.bf16.msra.mxu0 %v28839_v53  ;;  %v28877_v53 = vld [vmem:[%s30830_s14 + $0xab0] sm:$0xff]  }
 0x175   : > { %v25789_v0 = vadd.f32 %v25788_v62, %v25787_v58  ;;  %v25790_v2 = vpop.f32.mrb[10].mxu1  ;;  %26090 = vmatpush3.bf16.msra.mxu1 %v28840_v54  ;;  %v25769_v5 = vpop.f32.mrb[11].mxu0  ;;  %26069 = vmatprep.subr.bf16.mxu0 %v28841_v55  ;;  %v28878_v58 = vld [vmem:[%s30830_s14 + $0xa78] sm:$0xff]  }
 0x176   : > { %v25791_v6 = vpop.f32.mrb[11].mxu1  ;;  %26091 = vmatprep.subr.bf16.mxu1 %v28842_v56  ;;  %v18570_v7 = vadd.f32 %v25767_v63, %v31163_v24  ;;  %v1774_v24 = vpack.c.bf16 %v560_v19, %v560_v19  ;;  %v28880_v63 = vld [vmem:[%s30830_s14 + $0xa38] sm:$0xff]   ;;  %v28883_v5 = vld [vmem:[%s30830_s14 + $0xb40] sm:$0xff]   ;;  %v28890_v19 = vld [vmem:[%s30830_s14 + $0xb88] sm:$0xff]  }
 0x177   : > { %v28881_v2 = vld [vmem:[%s30830_s14 + $0xab8] sm:$0xff]  }
 0x178   : > { %v31199_v12 = vadd.f32 %v25789_v0, %v18570_v7  ;;  %26070 = vmatpush3.bf16.msra.mxu0 %v28843_v59  ;;  %19167 = vmatprep.mubr.bf16.mxu1 %v1774_v24  ;;  %v28879_v59 = vld [vmem:[%s30830_s14 + $0xaf8] sm:$0xff]   ;;  %v273_v0 = vld [vmem:[%s30840_s12 + $0x50] sm:$0xff] }
 0x179   : > { %26092 = vmatpush3.bf16.msra.mxu1 %v28844_v60  ;;  %26071 = vmatprep.subr.bf16.mxu0 %v28845_v3  ;;  %v568_v3 = vrot.slane %v273_v0, %v30878_v43  ;;  %v28895_v24 = vld [vmem:[%s30830_s14 + $0xb58] sm:$0xff]  }
 0x17a   : > { %26093 = vmatprep.subr.bf16.mxu1 %v28846_v4  ;;  %v561_v4 = vcombine.high %v273_v0, %v273_v0 }
 0x17b   : > { %v576_v6 = vcombine.high %v568_v3, %v568_v3 }
 0x17c   : > { %26072 = vmatpush3.bf16.msra.mxu0 %v28847_v9  ;;  %v575_v7 = vrot.slane %v561_v4, %v30878_v43  ;;  %v1775_v9 = vpack.c.bf16 %v568_v3, %v568_v3  ;;  %v28918_v3 = vld [vmem:[%s30830_s14 + $0xc00] sm:$0xff]  }
 0x17d   : > { %26094 = vmatpush3.bf16.msra.mxu1 %v28848_v13  ;;  %26101 = vmatprep.subr.bf16.mxu0 %v28850_v16  ;;  %v1776_v11 = vpack.c.bf16 %v576_v6, %v576_v6  ;;  %v28886_v13 = vld [vmem:[%s30830_s14 + $0xb80] sm:$0xff]  }
 0x17e   : > { %26123 = vmatprep.subr.bf16.mxu1 %v28851_v17  ;;  %v1777_v14 = vpack.c.bf16 %v575_v7, %v575_v7  ;;  %v28888_v17 = vld [vmem:[%s30830_s14 + $0xbc8] sm:$0xff]  }
 0x17f   : > { %19128 = vmatmul.mubr.bf16.vlgmr.msra.gmra.mrb[36].mxu0 %v1771_v20  ;;  %v28891_v20 = vld [vmem:[%s30830_s14 + $0xb50] sm:$0xff]  }
 0x180   : > { %19168 = vmatmul.mubr.bf16.vlgmr.msra.gmra.mrb[36].mxu1 %v1773_v22  ;;  %26102 = vmatpush3.bf16.msra.mxu0 %v28852_v21  ;;  %v28892_v21 = vld [vmem:[%s30830_s14 + $0xbd0] sm:$0xff]  }
 0x181   : > { %26124 = vmatpush3.bf16.msra.mxu1 %v28853_v23  ;;  %26103 = vmatprep.subr.bf16.mxu0 %v28854_v25  ;;  %v28893_v22 = vld [vmem:[%s30830_s14 + $0xb10] sm:$0xff]   ;;  %v28896_v25 = vld [vmem:[%s30830_s14 + $0xbd8] sm:$0xff]  }
 0x182   : > { %26125 = vmatprep.subr.bf16.mxu1 %v28855_v26  ;;  %19207 = vmatprep.mubr.bf16.mxu0 %v1776_v11  ;;  %v28894_v23 = vld [vmem:[%s30830_s14 + $0xb90] sm:$0xff]   ;;  %v28897_v26 = vld [vmem:[%s30830_s14 + $0xb18] sm:$0xff]   ;;  %v28923_v11 = vld [vmem:[%s30830_s14 + $0xc88] sm:$0xff]  }
 0x184   : > { %26104 = vmatpush3.bf16.msra.mxu0 %v28856_v27  ;;  %v28898_v27 = vld [vmem:[%s30830_s14 + $0xb98] sm:$0xff]  }
 0x185   : > { %26126 = vmatpush3.bf16.msra.mxu1 %v28857_v28  ;;  %26105 = vmatprep.subr.bf16.mxu0 %v28858_v29  ;;  %v28899_v28 = vld [vmem:[%s30830_s14 + $0xb60] sm:$0xff]  }
 0x186   : > { %26127 = vmatprep.subr.bf16.mxu1 %v28859_v30  ;;  %v28900_v29 = vld [vmem:[%s30830_s14 + $0xbe0] sm:$0xff]  }
 0x187   : > { %v28901_v30 = vld [vmem:[%s30830_s14 + $0xb20] sm:$0xff]  }
 0x188   : > { %26106 = vmatpush3.bf16.msra.mxu0 %v28860_v31  ;;  %v28902_v31 = vld [vmem:[%s30830_s14 + $0xba0] sm:$0xff]  }
 0x189   : > { %26128 = vmatpush3.bf16.msra.mxu1 %v28861_v32  ;;  %26107 = vmatprep.subr.bf16.mxu0 %v28862_v33  ;;  %v28903_v32 = vld [vmem:[%s30830_s14 + $0xb68] sm:$0xff]  }
 0x18a   : > { %26129 = vmatprep.subr.bf16.mxu1 %v28863_v34  ;;  %v28904_v33 = vld [vmem:[%s30830_s14 + $0xbe8] sm:$0xff]  }
 0x18b   : > { %v28905_v34 = vld [vmem:[%s30830_s14 + $0xb28] sm:$0xff]  }
 0x18c   : > { %26108 = vmatpush3.bf16.msra.mxu0 %v28864_v35  ;;  %v28906_v35 = vld [vmem:[%s30830_s14 + $0xba8] sm:$0xff]  }
 0x18d   : > { %26130 = vmatpush3.bf16.msra.mxu1 %v28865_v36  ;;  %26109 = vmatprep.subr.bf16.mxu0 %v28866_v37  ;;  %v28907_v36 = vld [vmem:[%s30830_s14 + $0xb70] sm:$0xff]  }
 0x18e   : > { %26131 = vmatprep.subr.bf16.mxu1 %v28867_v38 }
 0x190   : > { %26110 = vmatpush3.bf16.msra.mxu0 %v28868_v39  ;;  %v28908_v39 = vld [vmem:[%s30830_s14 + $0xbf0] sm:$0xff]  }
 0x191   : > { %26132 = vmatpush3.bf16.msra.mxu1 %v28869_v40  ;;  %26111 = vmatprep.subr.bf16.mxu0 %v28870_v41  ;;  %v28909_v40 = vld [vmem:[%s30830_s14 + $0xb30] sm:$0xff]  }
 0x192   : > { %v25809_v47 = vpop.f32.mrb[12].mxu0  ;;  %26133 = vmatprep.subr.bf16.mxu1 %v28871_v42 }
 0x193   : > { %v25831_v48 = vpop.f32.mrb[12].mxu1  ;;  %v25810_v51 = vpop.f32.mrb[13].mxu0 }
 0x194   : > { %v25832_v52 = vpop.f32.mrb[13].mxu1  ;;  %v25811_v54 = vadd.f32 %v25810_v51, %v25809_v47  ;;  %v25812_v56 = vpop.f32.mrb[14].mxu0  ;;  %26112 = vmatpush3.bf16.msra.mxu0 %v28872_v44 }
 0x195   : > { %v25833_v55 = vadd.f32 %v25832_v52, %v25831_v48  ;;  %v25834_v57 = vpop.f32.mrb[14].mxu1  ;;  %26134 = vmatpush3.bf16.msra.mxu1 %v28873_v45  ;;  %v25813_v60 = vpop.f32.mrb[15].mxu0  ;;  %26113 = vmatprep.subr.bf16.mxu0 %v28874_v46  ;;  %v28910_v48 = vld [vmem:[%s30830_s14 + $0xbb0] sm:$0xff]  }
 0x196   : > { %v25835_v61 = vpop.f32.mrb[15].mxu1  ;;  %v18650_v62 = vadd.f32 %v25811_v54, %v31199_v12  ;;  %26135 = vmatprep.subr.bf16.mxu1 %v28875_v49  ;;  %v577_v12 = vcombine.high %v575_v7, %v575_v7  ;;  %v28911_v49 = vld [vmem:[%s30830_s14 + $0xb78] sm:$0xff]   ;;  %v28919_v7 = vld [vmem:[%s30830_s14 + $0xc80] sm:$0xff]  }
 0x197   : > { %v28913_v54 = vld [vmem:[%s30830_s14 + $0xb38] sm:$0xff]  }
 0x198   : > { %v31236_v1 = vadd.f32 %v25833_v55, %v18650_v62  ;;  %26114 = vmatpush3.bf16.msra.mxu0 %v28876_v50  ;;  %v1778_v16 = vpack.c.bf16 %v577_v12, %v577_v12  ;;  %v274_v56 = vld [vmem:[%s30840_s12 + $0x58] sm:$0xff] }
 0x199   : > { %26136 = vmatpush3.bf16.msra.mxu1 %v28877_v53  ;;  %26115 = vmatprep.subr.bf16.mxu0 %v28878_v58  ;;  %v28912_v53 = vld [vmem:[%s30830_s14 + $0xbf8] sm:$0xff]   ;;  %v585_v57 = vrot.slane %v274_v56, %v30878_v43  ;;  %v578_v58 = vcombine.high %v274_v56, %v274_v56  ;;  %v28925_v12 = vld [vmem:[%s30830_s14 + $0xcd0] sm:$0xff]   ;;  %v28951_v56 = vld [vmem:[%s30830_s14 + $0xd00] sm:$0xff]  }
 0x19a   : > { %26137 = vmatprep.subr.bf16.mxu1 %v28879_v59  ;;  %19247 = vmatprep.mubr.bf16.mxu1 %v1778_v16  ;;  %v28916_v59 = vld [vmem:[%s30830_s14 + $0xc40] sm:$0xff]   ;;  %v28914_v60 = vld [vmem:[%s30830_s14 + $0xbb8] sm:$0xff]  }
 0x19b   : > { %v593_v61 = vcombine.high %v585_v57, %v585_v57  ;;  %v592_v62 = vrot.slane %v578_v58, %v30878_v43  ;;  %v1779_v0 = vpack.c.bf16 %v585_v57, %v585_v57  ;;  %v28929_v16 = vld [vmem:[%s30830_s14 + $0xcd8] sm:$0xff]  }
 0x19c   : > { %26116 = vmatpush3.bf16.msra.mxu0 %v28880_v63  ;;  %v28917_v63 = vld [vmem:[%s30830_s14 + $0xcc0] sm:$0xff]  }
 0x19d   : > { %26138 = vmatpush3.bf16.msra.mxu1 %v28881_v2  ;;  %26145 = vmatprep.subr.bf16.mxu0 %v28883_v5  ;;  %v594_v2 = vcombine.high %v592_v62, %v592_v62  ;;  %v1781_v4 = vpack.c.bf16 %v592_v62, %v592_v62  ;;  %v28920_v5 = vld [vmem:[%s30830_s14 + $0xc48] sm:$0xff]  }
 0x19e   : > { %26167 = vmatprep.subr.bf16.mxu1 %v28884_v8  ;;  %v28921_v8 = vld [vmem:[%s30830_s14 + $0xcc8] sm:$0xff]  }
 0x19f   : > { %19208 = vmatmul.mubr.bf16.vlgmr.msra.gmra.mrb[40].mxu0 %v1775_v9  ;;  %v1782_v6 = vpack.c.bf16 %v594_v2, %v594_v2  ;;  %v28922_v9 = vld [vmem:[%s30830_s14 + $0xc08] sm:$0xff]   ;;  %v28957_v2 = vld [vmem:[%s30830_s14 + $0xd50] sm:$0xff]  }
 0x1a0   : > { %26146 = vmatpush3.bf16.msra.mxu0 %v28885_v10  ;;  %19248 = vmatmul.mubr.bf16.vlgmr.msra.gmra.mrb[40].mxu1 %v1777_v14  ;;  %v28924_v10 = vld [vmem:[%s30830_s14 + $0xc50] sm:$0xff]   ;;  %v28928_v14 = vld [vmem:[%s30830_s14 + $0xc58] sm:$0xff]  }
 0x1a1   : > { %26147 = vmatprep.subr.bf16.mxu0 %v28887_v15  ;;  %26168 = vmatpush3.bf16.msra.mxu1 %v28886_v13  ;;  %v28926_v13 = vld [vmem:[%s30830_s14 + $0xc10] sm:$0xff]  }
 0x1a2   : > { %26169 = vmatprep.subr.bf16.mxu1 %v28888_v17  ;;  %19327 = vmatprep.mubr.bf16.mxu1 %v1782_v6  ;;  %v28927_v15 = vld [vmem:[%s30830_s14 + $0xc90] sm:$0xff]   ;;  %v28930_v17 = vld [vmem:[%s30830_s14 + $0xc18] sm:$0xff]  }
 0x1a3   : > { %v28961_v6 = vld [vmem:[%s30830_s14 + $0xd58] sm:$0xff]  }
 0x1a4   : > { %26148 = vmatpush3.bf16.msra.mxu0 %v28889_v18  ;;  %v28932_v18 = vld [vmem:[%s30830_s14 + $0xc60] sm:$0xff]  }
 0x1a5   : > { %26149 = vmatprep.subr.bf16.mxu0 %v28891_v20  ;;  %26170 = vmatpush3.bf16.msra.mxu1 %v28890_v19  ;;  %v28931_v19 = vld [vmem:[%s30830_s14 + $0xc98] sm:$0xff]   ;;  %v28933_v20 = vld [vmem:[%s30830_s14 + $0xce0] sm:$0xff]  }
 0x1a6   : > { %26171 = vmatprep.subr.bf16.mxu1 %v28892_v21  ;;  %v28934_v21 = vld [vmem:[%s30830_s14 + $0xc20] sm:$0xff]  }
 0x1a8   : > { %26150 = vmatpush3.bf16.msra.mxu0 %v28893_v22  ;;  %v28936_v22 = vld [vmem:[%s30830_s14 + $0xc68] sm:$0xff]  }
 0x1a9   : > { %26151 = vmatprep.subr.bf16.mxu0 %v28895_v24  ;;  %26172 = vmatpush3.bf16.msra.mxu1 %v28894_v23  ;;  %v28935_v23 = vld [vmem:[%s30830_s14 + $0xca0] sm:$0xff]   ;;  %v28937_v24 = vld [vmem:[%s30830_s14 + $0xce8] sm:$0xff]  }
 0x1aa   : > { %26173 = vmatprep.subr.bf16.mxu1 %v28896_v25  ;;  %v28938_v25 = vld [vmem:[%s30830_s14 + $0xc28] sm:$0xff]  }
 0x1ac   : > { %26152 = vmatpush3.bf16.msra.mxu0 %v28897_v26 }
 0x1ad   : > { %26153 = vmatprep.subr.bf16.mxu0 %v28899_v28  ;;  %26174 = vmatpush3.bf16.msra.mxu1 %v28898_v27  ;;  %v28939_v28 = vld [vmem:[%s30830_s14 + $0xca8] sm:$0xff]  }
 0x1ae   : > { %26175 = vmatprep.subr.bf16.mxu1 %v28900_v29  ;;  %v28940_v29 = vld [vmem:[%s30830_s14 + $0xc70] sm:$0xff]  }
 0x1b0   : > { %26154 = vmatpush3.bf16.msra.mxu0 %v28901_v30 }
 0x1b1   : > { %26155 = vmatprep.subr.bf16.mxu0 %v28903_v32  ;;  %26176 = vmatpush3.bf16.msra.mxu1 %v28902_v31 }
 0x1b2   : > { %v25853_v37 = vpop.f32.mrb[16].mxu0  ;;  %26177 = vmatprep.subr.bf16.mxu1 %v28904_v33 }
 0x1b3   : > { %v25875_v38 = vpop.f32.mrb[16].mxu1  ;;  %v25854_v41 = vpop.f32.mrb[17].mxu0 }
 0x1b4   : > { %v25876_v42 = vpop.f32.mrb[17].mxu1  ;;  %v25855_v44 = vadd.f32 %v25854_v41, %v25853_v37  ;;  %v25856_v46 = vpop.f32.mrb[18].mxu0  ;;  %26156 = vmatpush3.bf16.msra.mxu0 %v28905_v34  ;;  %v28942_v37 = vld [vmem:[%s30830_s14 + $0xc30] sm:$0xff]  }
 0x1b5   : > { %v25877_v45 = vadd.f32 %v25876_v42, %v25875_v38  ;;  %v25878_v47 = vpop.f32.mrb[18].mxu1  ;;  %v25857_v50 = vpop.f32.mrb[19].mxu0  ;;  %26157 = vmatprep.subr.bf16.mxu0 %v28907_v36  ;;  %26178 = vmatpush3.bf16.msra.mxu1 %v28906_v35  ;;  %v28941_v36 = vld [vmem:[%s30830_s14 + $0xcf0] sm:$0xff]   ;;  %v28944_v42 = vld [vmem:[%s30830_s14 + $0xc78] sm:$0xff]  }
 0x1b6   : > { %v25879_v51 = vpop.f32.mrb[19].mxu1  ;;  %v18730_v52 = vadd.f32 %v25855_v44, %v31236_v1  ;;  %26179 = vmatprep.subr.bf16.mxu1 %v28908_v39  ;;  %v1780_v1 = vpack.c.bf16 %v593_v61, %v593_v61  ;;  %v28945_v44 = vld [vmem:[%s30830_s14 + $0xcf8] sm:$0xff]   ;;  %v28949_v50 = vld [vmem:[%s30830_s14 + $0xd40] sm:$0xff]   ;;  %v28953_v61 = vld [vmem:[%s30830_s14 + $0xd48] sm:$0xff]  }
 0x1b7   : > { %v28946_v46 = vld [vmem:[%s30830_s14 + $0xc38] sm:$0xff]  }
 0x1b8   : > { %v31273_v55 = vadd.f32 %v25877_v45, %v18730_v52  ;;  %26158 = vmatpush3.bf16.msra.mxu0 %v28909_v40  ;;  %19287 = vmatprep.mubr.bf16.mxu0 %v1780_v1  ;;  %v28943_v40 = vld [vmem:[%s30830_s14 + $0xcb0] sm:$0xff]   ;;  %v275_v47 = vld [vmem:[%s30840_s12 + $0x60] sm:$0xff]  ;;  %v28956_v1 = vld [vmem:[%s30830_s14 + $0xd88] sm:$0xff]  }
 0x1b9   : > { %26159 = vmatprep.subr.bf16.mxu0 %v28911_v49  ;;  %26180 = vmatpush3.bf16.msra.mxu1 %v28910_v48  ;;  %v602_v48 = vrot.slane %v275_v47, %v30878_v43  ;;  %v595_v49 = vcombine.high %v275_v47, %v275_v47  ;;  %v28947_v51 = vld [vmem:[%s30830_s14 + $0xcb8] sm:$0xff]  }
 0x1ba   : > { %26181 = vmatprep.subr.bf16.mxu1 %v28912_v53 }
 0x1bb   : > { %v610_v52 = vcombine.high %v602_v48, %v602_v48  ;;  %v609_v53 = vrot.slane %v595_v49, %v30878_v43  ;;  %v28984_v49 = vld [vmem:[%s30830_s14 + $0xe00] sm:$0xff]  }
 0x1bc   : > { %26160 = vmatpush3.bf16.msra.mxu0 %v28913_v54  ;;  %v28950_v54 = vld [vmem:[%s30830_s14 + $0xdc0] sm:$0xff]  }
 0x1bd   : > { %26189 = vmatprep.subr.bf16.mxu0 %v28916_v59  ;;  %26182 = vmatpush3.bf16.msra.mxu1 %v28914_v60  ;;  %v1784_v57 = vpack.c.bf16 %v610_v52, %v610_v52  ;;  %v611_v58 = vcombine.high %v609_v53, %v609_v53  ;;  %v28952_v59 = vld [vmem:[%s30830_s14 + $0xd80] sm:$0xff]   ;;  %v1785_v60 = vpack.c.bf16 %v609_v53, %v609_v53 }
 0x1be   : > { %26211 = vmatprep.subr.bf16.mxu1 %v28917_v63  ;;  %v28954_v63 = vld [vmem:[%s30830_s14 + $0xdc8] sm:$0xff]   ;;  %v28985_v53 = vld [vmem:[%s30830_s14 + $0xe80] sm:$0xff]  }
 0x1bf   : > { %19288 = vmatmul.mubr.bf16.vlgmr.msra.gmra.mrb[44].mxu0 %v1779_v0  ;;  %v1786_v62 = vpack.c.bf16 %v611_v58, %v611_v58  ;;  %v28955_v0 = vld [vmem:[%s30830_s14 + $0xd08] sm:$0xff]   ;;  %v28991_v58 = vld [vmem:[%s30830_s14 + $0xed0] sm:$0xff]  }
 0x1c0   : > { %26190 = vmatpush3.bf16.msra.mxu0 %v28918_v3  ;;  %19328 = vmatmul.mubr.bf16.vlgmr.msra.gmra.mrb[44].mxu1 %v1781_v4  ;;  %v28958_v3 = vld [vmem:[%s30830_s14 + $0xdd0] sm:$0xff]  }
 0x1c1   : > { %26191 = vmatprep.subr.bf16.mxu0 %v28920_v5  ;;  %26212 = vmatpush3.bf16.msra.mxu1 %v28919_v7  ;;  %v28959_v4 = vld [vmem:[%s30830_s14 + $0xd10] sm:$0xff]   ;;  %v28962_v7 = vld [vmem:[%s30830_s14 + $0xdd8] sm:$0xff]  }
 0x1c2   : > { %26213 = vmatprep.subr.bf16.mxu1 %v28921_v8  ;;  %19367 = vmatprep.mubr.bf16.mxu0 %v1784_v57  ;;  %v28960_v5 = vld [vmem:[%s30830_s14 + $0xd90] sm:$0xff]   ;;  %v28963_v8 = vld [vmem:[%s30830_s14 + $0xd18] sm:$0xff]   ;;  %v28989_v57 = vld [vmem:[%s30830_s14 + $0xe88] sm:$0xff]  }
 0x1c3   : > { %19407 = vmatprep.mubr.bf16.mxu1 %v1786_v62  ;;  %v28995_v62 = vld [vmem:[%s30830_s14 + $0xed8] sm:$0xff]  }
 0x1c4   : > { %26192 = vmatpush3.bf16.msra.mxu0 %v28922_v9  ;;  %v28964_v9 = vld [vmem:[%s30830_s14 + $0xd98] sm:$0xff]  }
 0x1c5   : > { %26193 = vmatprep.subr.bf16.mxu0 %v28924_v10  ;;  %26214 = vmatpush3.bf16.msra.mxu1 %v28923_v11  ;;  %v28965_v10 = vld [vmem:[%s30830_s14 + $0xd60] sm:$0xff]  }
 0x1c6   : > { %26215 = vmatprep.subr.bf16.mxu1 %v28925_v12  ;;  %v28966_v11 = vld [vmem:[%s30830_s14 + $0xde0] sm:$0xff]  }
 0x1c7   : > { %v28967_v12 = vld [vmem:[%s30830_s14 + $0xd20] sm:$0xff]  }
 0x1c8   : > { %26194 = vmatpush3.bf16.msra.mxu0 %v28926_v13  ;;  %v28968_v13 = vld [vmem:[%s30830_s14 + $0xda0] sm:$0xff]  }
 0x1c9   : > { %26195 = vmatprep.subr.bf16.mxu0 %v28928_v14  ;;  %26216 = vmatpush3.bf16.msra.mxu1 %v28927_v15  ;;  %v28969_v14 = vld [vmem:[%s30830_s14 + $0xd68] sm:$0xff]  }
 0x1ca   : > { %26217 = vmatprep.subr.bf16.mxu1 %v28929_v16  ;;  %v28970_v15 = vld [vmem:[%s30830_s14 + $0xde8] sm:$0xff]  }
 0x1cb   : > { %v28971_v16 = vld [vmem:[%s30830_s14 + $0xd28] sm:$0xff]  }
 0x1cc   : > { %26196 = vmatpush3.bf16.msra.mxu0 %v28930_v17 }
 0x1cd   : > { %26197 = vmatprep.subr.bf16.mxu0 %v28932_v18  ;;  %26218 = vmatpush3.bf16.msra.mxu1 %v28931_v19  ;;  %v28972_v19 = vld [vmem:[%s30830_s14 + $0xda8] sm:$0xff]  }
 0x1ce   : > { %26219 = vmatprep.subr.bf16.mxu1 %v28933_v20  ;;  %v28973_v20 = vld [vmem:[%s30830_s14 + $0xd70] sm:$0xff]  }
 0x1d0   : > { %26198 = vmatpush3.bf16.msra.mxu0 %v28934_v21 }
 0x1d1   : > { %26199 = vmatprep.subr.bf16.mxu0 %v28936_v22  ;;  %26220 = vmatpush3.bf16.msra.mxu1 %v28935_v23 }
 0x1d2   : > { %v25897_v26 = vpop.f32.mrb[20].mxu0  ;;  %26221 = vmatprep.subr.bf16.mxu1 %v28937_v24 }
 0x1d3   : > { %v25919_v27 = vpop.f32.mrb[20].mxu1  ;;  %v25898_v30 = vpop.f32.mrb[21].mxu0 }
 0x1d4   : > { %v25920_v31 = vpop.f32.mrb[21].mxu1  ;;  %v25899_v32 = vadd.f32 %v25898_v30, %v25897_v26  ;;  %v25900_v34 = vpop.f32.mrb[22].mxu0  ;;  %26200 = vmatpush3.bf16.msra.mxu0 %v28938_v25 }
 0x1d5   : > { %v25921_v33 = vadd.f32 %v25920_v31, %v25919_v27  ;;  %v25922_v35 = vpop.f32.mrb[22].mxu1  ;;  %v25901_v38 = vpop.f32.mrb[23].mxu0  ;;  %26201 = vmatprep.subr.bf16.mxu0 %v28940_v29  ;;  %26222 = vmatpush3.bf16.msra.mxu1 %v28939_v28  ;;  %v28974_v27 = vld [vmem:[%s30830_s14 + $0xdf0] sm:$0xff]  }
 0x1d6   : > { %v25923_v39 = vpop.f32.mrb[23].mxu1  ;;  %v18810_v41 = vadd.f32 %v25899_v32, %v31273_v55  ;;  %26223 = vmatprep.subr.bf16.mxu1 %v28941_v36  ;;  %v1783_v55 = vpack.c.bf16 %v602_v48, %v602_v48  ;;  %v28975_v28 = vld [vmem:[%s30830_s14 + $0xd30] sm:$0xff]   ;;  %v28978_v35 = vld [vmem:[%s30830_s14 + $0xdf8] sm:$0xff]  }
 0x1d7   : > { %v28976_v32 = vld [vmem:[%s30830_s14 + $0xdb0] sm:$0xff]   ;;  %v28979_v36 = vld [vmem:[%s30830_s14 + $0xd38] sm:$0xff]  }
 0x1d8   : > { %v31310_v45 = vadd.f32 %v25921_v33, %v18810_v41  ;;  %26202 = vmatpush3.bf16.msra.mxu0 %v28942_v37  ;;  %v28977_v33 = vld [vmem:[%s30830_s14 + $0xd78] sm:$0xff]   ;;  %v276_v37 = vld [vmem:[%s30840_s12 + $0x68] sm:$0xff] }
 0x1d9   : > { %26203 = vmatprep.subr.bf16.mxu0 %v28944_v42  ;;  %26224 = vmatpush3.bf16.msra.mxu1 %v28943_v40  ;;  %v619_v38 = vrot.slane %v276_v37, %v30878_v43  ;;  %v612_v39 = vcombine.high %v276_v37, %v276_v37  ;;  %v28982_v40 = vld [vmem:[%s30830_s14 + $0xe40] sm:$0xff]   ;;  %v28980_v41 = vld [vmem:[%s30830_s14 + $0xdb8] sm:$0xff]  }
 0x1da   : > { %26225 = vmatprep.subr.bf16.mxu1 %v28945_v44  ;;  %v29017_v37 = vld [vmem:[%s30830_s14 + $0xf00] sm:$0xff]  }
 0x1db   : > { %v627_v42 = vcombine.high %v619_v38, %v619_v38  ;;  %v626_v44 = vrot.slane %v612_v39, %v30878_v43 }
 0x1dc   : > { %26204 = vmatpush3.bf16.msra.mxu0 %v28946_v46  ;;  %v1787_v46 = vpack.c.bf16 %v619_v38, %v619_v38 }
 0x1dd   : > { %26233 = vmatprep.subr.bf16.mxu0 %v28949_v50  ;;  %26226 = vmatpush3.bf16.msra.mxu1 %v28947_v51  ;;  %v1788_v47 = vpack.c.bf16 %v627_v42, %v627_v42  ;;  %v628_v48 = vcombine.high %v626_v44, %v626_v44  ;;  %v1789_v50 = vpack.c.bf16 %v626_v44, %v626_v44  ;;  %v28986_v51 = vld [vmem:[%s30830_s14 + $0xe48] sm:$0xff]  }
 0x1de   : > { %26255 = vmatprep.subr.bf16.mxu1 %v28950_v54  ;;  %v28987_v54 = vld [vmem:[%s30830_s14 + $0xec8] sm:$0xff]  }
 0x1df   : > { %19368 = vmatmul.mubr.bf16.vlgmr.msra.gmra.mrb[48].mxu0 %v1783_v55  ;;  %v1790_v52 = vpack.c.bf16 %v628_v48, %v628_v48  ;;  %v28988_v55 = vld [vmem:[%s30830_s14 + $0xe08] sm:$0xff]   ;;  %v29023_v48 = vld [vmem:[%s30830_s14 + $0xf50] sm:$0xff]  }
 0x1e0   : > { %26234 = vmatpush3.bf16.msra.mxu0 %v28951_v56  ;;  %19408 = vmatmul.mubr.bf16.vlgmr.msra.gmra.mrb[48].mxu1 %v1785_v60  ;;  %v28990_v56 = vld [vmem:[%s30830_s14 + $0xe50] sm:$0xff]   ;;  %v28994_v60 = vld [vmem:[%s30830_s14 + $0xe58] sm:$0xff]   ;;  %v29019_v42 = vld [vmem:[%s30830_s14 + $0xf48] sm:$0xff]  }
 0x1e1   : > { %26235 = vmatprep.subr.bf16.mxu0 %v28953_v61  ;;  %26256 = vmatpush3.bf16.msra.mxu1 %v28952_v59  ;;  %v28992_v59 = vld [vmem:[%s30830_s14 + $0xe10] sm:$0xff]  }
 0x1e2   : > { %26257 = vmatprep.subr.bf16.mxu1 %v28954_v63  ;;  %19447 = vmatprep.mubr.bf16.mxu0 %v1788_v47  ;;  %v28993_v61 = vld [vmem:[%s30830_s14 + $0xe90] sm:$0xff]   ;;  %v28996_v63 = vld [vmem:[%s30830_s14 + $0xe18] sm:$0xff]   ;;  %v29022_v47 = vld [vmem:[%s30830_s14 + $0xf88] sm:$0xff]  }
 0x1e3   : > { %19487 = vmatprep.mubr.bf16.mxu1 %v1790_v52  ;;  %v29027_v52 = vld [vmem:[%s30830_s14 + $0xf58] sm:$0xff]  }
 0x1e4   : > { %26236 = vmatpush3.bf16.msra.mxu0 %v28955_v0  ;;  %v28998_v0 = vld [vmem:[%s30830_s14 + $0xe60] sm:$0xff]  }
 0x1e5   : > { %26237 = vmatprep.subr.bf16.mxu0 %v28957_v2  ;;  %26258 = vmatpush3.bf16.msra.mxu1 %v28956_v1  ;;  %v28997_v1 = vld [vmem:[%s30830_s14 + $0xe98] sm:$0xff]   ;;  %v28999_v2 = vld [vmem:[%s30830_s14 + $0xee0] sm:$0xff]  }
 0x1e6   : > { %26259 = vmatprep.subr.bf16.mxu1 %v28958_v3  ;;  %v29000_v3 = vld [vmem:[%s30830_s14 + $0xe20] sm:$0xff]  }
 0x1e8   : > { %26238 = vmatpush3.bf16.msra.mxu0 %v28959_v4  ;;  %v29002_v4 = vld [vmem:[%s30830_s14 + $0xe68] sm:$0xff]  }
 0x1e9   : > { %26239 = vmatprep.subr.bf16.mxu0 %v28961_v6  ;;  %26260 = vmatpush3.bf16.msra.mxu1 %v28960_v5  ;;  %v29001_v5 = vld [vmem:[%s30830_s14 + $0xea0] sm:$0xff]  }
 0x1ea   : > { %26261 = vmatprep.subr.bf16.mxu1 %v28962_v7 }
 0x1ec   : > { %26240 = vmatpush3.bf16.msra.mxu0 %v28963_v8  ;;  %v29003_v8 = vld [vmem:[%s30830_s14 + $0xee8] sm:$0xff]  }
 0x1ed   : > { %26241 = vmatprep.subr.bf16.mxu0 %v28965_v10  ;;  %26262 = vmatpush3.bf16.msra.mxu1 %v28964_v9  ;;  %v29004_v9 = vld [vmem:[%s30830_s14 + $0xe28] sm:$0xff]  }
 0x1ee   : > { %26263 = vmatprep.subr.bf16.mxu1 %v28966_v11 }
 0x1f0   : > { %26242 = vmatpush3.bf16.msra.mxu0 %v28967_v12  ;;  %v29005_v12 = vld [vmem:[%s30830_s14 + $0xea8] sm:$0xff]  }
 0x1f1   : > { %26243 = vmatprep.subr.bf16.mxu0 %v28969_v14  ;;  %26264 = vmatpush3.bf16.msra.mxu1 %v28968_v13 }
 0x1f2   : > { %v25941_v17 = vpop.f32.mrb[24].mxu0  ;;  %26265 = vmatprep.subr.bf16.mxu1 %v28970_v15 }
 0x1f3   : > { %v25963_v18 = vpop.f32.mrb[24].mxu1  ;;  %v25942_v21 = vpop.f32.mrb[25].mxu0 }
 0x1f4   : > { %v25964_v22 = vpop.f32.mrb[25].mxu1  ;;  %v25943_v23 = vadd.f32 %v25942_v21, %v25941_v17  ;;  %v25944_v25 = vpop.f32.mrb[26].mxu0  ;;  %26244 = vmatpush3.bf16.msra.mxu0 %v28971_v16  ;;  %v29006_v17 = vld [vmem:[%s30830_s14 + $0xe70] sm:$0xff]  }
 0x1f5   : > { %v25965_v24 = vadd.f32 %v25964_v22, %v25963_v18  ;;  %v25966_v26 = vpop.f32.mrb[26].mxu1  ;;  %v25945_v29 = vpop.f32.mrb[27].mxu0  ;;  %26245 = vmatprep.subr.bf16.mxu0 %v28973_v20  ;;  %26266 = vmatpush3.bf16.msra.mxu1 %v28972_v19  ;;  %v29007_v18 = vld [vmem:[%s30830_s14 + $0xef0] sm:$0xff]   ;;  %v29010_v25 = vld [vmem:[%s30830_s14 + $0xe78] sm:$0xff]  }
 0x1f6   : > { %v25967_v30 = vpop.f32.mrb[27].mxu1  ;;  %v18890_v31 = vadd.f32 %v25943_v23, %v31310_v45  ;;  %26267 = vmatprep.subr.bf16.mxu1 %v28974_v27  ;;  %v28983_v45 = vld [vmem:[%s30830_s14 + $0xec0] sm:$0xff]   ;;  %v29008_v22 = vld [vmem:[%s30830_s14 + $0xe30] sm:$0xff]   ;;  %v29011_v26 = vld [vmem:[%s30830_s14 + $0xef8] sm:$0xff]  }
 0x1f7   : > { %v29009_v23 = vld [vmem:[%s30830_s14 + $0xeb0] sm:$0xff]   ;;  %v29012_v27 = vld [vmem:[%s30830_s14 + $0xe38] sm:$0xff]  }
 0x1f8   : > { %v31347_v34 = vadd.f32 %v25965_v24, %v18890_v31  ;;  %26246 = vmatpush3.bf16.msra.mxu0 %v28975_v28  ;;  %v277_v28 = vld [vmem:[%s30840_s12 + $0x70] sm:$0xff]  ;;  %v29015_v31 = vld [vmem:[%s30830_s14 + $0xf40] sm:$0xff]  }
 0x1f9   : > { %26247 = vmatprep.subr.bf16.mxu0 %v28977_v33  ;;  %26268 = vmatpush3.bf16.msra.mxu1 %v28976_v32  ;;  %v636_v29 = vrot.slane %v277_v28, %v30878_v43  ;;  %v629_v30 = vcombine.high %v277_v28, %v277_v28  ;;  %v29013_v32 = vld [vmem:[%s30830_s14 + $0xeb8] sm:$0xff]   ;;  %v29050_v28 = vld [vmem:[%s30830_s14 + $0x1000] sm:$0xff]  }
 0x1fa   : > { %26269 = vmatprep.subr.bf16.mxu1 %v28978_v35  ;;  %v29016_v35 = vld [vmem:[%s30830_s14 + $0xfc0] sm:$0xff]  }
 0x1fb   : > { %v644_v33 = vcombine.high %v636_v29, %v636_v29 }
 0x1fc   : > { %26248 = vmatpush3.bf16.msra.mxu0 %v28979_v36  ;;  %v1791_v36 = vpack.c.bf16 %v636_v29, %v636_v29 }
 0x1fd   : > { %26277 = vmatprep.subr.bf16.mxu0 %v28982_v40  ;;  %26270 = vmatpush3.bf16.msra.mxu1 %v28980_v41  ;;  %v1792_v38 = vpack.c.bf16 %v644_v33, %v644_v33  ;;  %v29018_v40 = vld [vmem:[%s30830_s14 + $0xf80] sm:$0xff]   ;;  %v29052_v33 = vld [vmem:[%s30830_s14 + $0x1048] sm:$0xff]  }
 0x1fe   : > { %26299 = vmatprep.subr.bf16.mxu1 %v28983_v45  ;;  %v29020_v45 = vld [vmem:[%s30830_s14 + $0xfc8] sm:$0xff]  }
 0x1ff   : > { %19448 = vmatmul.mubr.bf16.vlgmr.msra.gmra.mrb[52].mxu0 %v1787_v46  ;;  %v29021_v46 = vld [vmem:[%s30830_s14 + $0xf08] sm:$0xff]  }
 0x200   : > { %26278 = vmatpush3.bf16.msra.mxu0 %v28984_v49  ;;  %19488 = vmatmul.mubr.bf16.vlgmr.msra.gmra.mrb[52].mxu1 %v1789_v50  ;;  %v29024_v49 = vld [vmem:[%s30830_s14 + $0xfd0] sm:$0xff]  }
 0x201   : > { %26279 = vmatprep.subr.bf16.mxu0 %v28986_v51  ;;  %26300 = vmatpush3.bf16.msra.mxu1 %v28985_v53  ;;  %v29025_v50 = vld [vmem:[%s30830_s14 + $0xf10] sm:$0xff]   ;;  %v29028_v53 = vld [vmem:[%s30830_s14 + $0xfd8] sm:$0xff]  }
 0x202   : > { %26301 = vmatprep.subr.bf16.mxu1 %v28987_v54  ;;  %19527 = vmatprep.mubr.bf16.mxu0 %v1792_v38  ;;  %v29026_v51 = vld [vmem:[%s30830_s14 + $0xf90] sm:$0xff]   ;;  %v29029_v54 = vld [vmem:[%s30830_s14 + $0xf18] sm:$0xff]  }
 0x203   : > { %v29056_v38 = vld [vmem:[%s30830_s14 + $0x1050] sm:$0xff]  }
 0x204   : > { %26280 = vmatpush3.bf16.msra.mxu0 %v28988_v55  ;;  %v29030_v55 = vld [vmem:[%s30830_s14 + $0xf98] sm:$0xff]  }
 0x205   : > { %26281 = vmatprep.subr.bf16.mxu0 %v28990_v56  ;;  %26302 = vmatpush3.bf16.msra.mxu1 %v28989_v57  ;;  %v29031_v56 = vld [vmem:[%s30830_s14 + $0xf60] sm:$0xff]  }
 0x206   : > { %26303 = vmatprep.subr.bf16.mxu1 %v28991_v58  ;;  %v29032_v57 = vld [vmem:[%s30830_s14 + $0xfe0] sm:$0xff]  }
 0x207   : > { %v29033_v58 = vld [vmem:[%s30830_s14 + $0xf20] sm:$0xff]  }
 0x208   : > { %26282 = vmatpush3.bf16.msra.mxu0 %v28992_v59  ;;  %v29034_v59 = vld [vmem:[%s30830_s14 + $0xfa0] sm:$0xff]  }
 0x209   : > { %26283 = vmatprep.subr.bf16.mxu0 %v28994_v60  ;;  %26304 = vmatpush3.bf16.msra.mxu1 %v28993_v61  ;;  %v29035_v60 = vld [vmem:[%s30830_s14 + $0xf68] sm:$0xff]  }
 0x20a   : > { %26305 = vmatprep.subr.bf16.mxu1 %v28995_v62 }
 0x20c   : > { %26284 = vmatpush3.bf16.msra.mxu0 %v28996_v63  ;;  %v29036_v63 = vld [vmem:[%s30830_s14 + $0xfe8] sm:$0xff]  }
 0x20d   : > { %26285 = vmatprep.subr.bf16.mxu0 %v28998_v0  ;;  %26306 = vmatpush3.bf16.msra.mxu1 %v28997_v1  ;;  %v29037_v0 = vld [vmem:[%s30830_s14 + $0xf28] sm:$0xff]  }
 0x20e   : > { %26307 = vmatprep.subr.bf16.mxu1 %v28999_v2 }
 0x210   : > { %26286 = vmatpush3.bf16.msra.mxu0 %v29000_v3 }
 0x211   : > { %26287 = vmatprep.subr.bf16.mxu0 %v29002_v4  ;;  %26308 = vmatpush3.bf16.msra.mxu1 %v29001_v5 }
 0x212   : > { %v25985_v6 = vpop.f32.mrb[28].mxu0  ;;  %26309 = vmatprep.subr.bf16.mxu1 %v29003_v8  ;;  %v29039_v8 = vld [vmem:[%s30830_s14 + $0xf70] sm:$0xff]  }
 0x213   : > { %v26007_v7 = vpop.f32.mrb[28].mxu1  ;;  %v25986_v10 = vpop.f32.mrb[29].mxu0 }
 0x214   : > { %v26008_v11 = vpop.f32.mrb[29].mxu1  ;;  %v25987_v13 = vadd.f32 %v25986_v10, %v25985_v6  ;;  %v25988_v15 = vpop.f32.mrb[30].mxu0  ;;  %26288 = vmatpush3.bf16.msra.mxu0 %v29004_v9 }
 0x215   : > { %v26009_v14 = vadd.f32 %v26008_v11, %v26007_v7  ;;  %v26010_v16 = vpop.f32.mrb[30].mxu1  ;;  %v25989_v19 = vpop.f32.mrb[31].mxu0  ;;  %26289 = vmatprep.subr.bf16.mxu0 %v29006_v17  ;;  %26310 = vmatpush3.bf16.msra.mxu1 %v29005_v12  ;;  %v29038_v7 = vld [vmem:[%s30830_s14 + $0xfa8] sm:$0xff]   ;;  %v29040_v12 = vld [vmem:[%s30830_s14 + $0xff0] sm:$0xff]   ;;  %v29044_v17 = vld [vmem:[%s30830_s14 + $0xff8] sm:$0xff]  }
 0x216   : > { %v26011_v20 = vpop.f32.mrb[31].mxu1  ;;  %v18970_v21 = vadd.f32 %v25987_v13, %v31347_v34  ;;  %26311 = vmatprep.subr.bf16.mxu1 %v29007_v18  ;;  %v643_v34 = vrot.slane %v629_v30, %v30878_v43  ;;  %v29041_v13 = vld [vmem:[%s30830_s14 + $0xf30] sm:$0xff]   ;;  %v29043_v16 = vld [vmem:[%s30830_s14 + $0xf78] sm:$0xff]  }
 0x217   : > { %v29042_v15 = vld [vmem:[%s30830_s14 + $0xfb0] sm:$0xff]   ;;  %v29045_v18 = vld [vmem:[%s30830_s14 + $0xf38] sm:$0xff]  }
 0x218   : > { %v31384_v24 = vadd.f32 %v26009_v14, %v18970_v21  ;;  %26290 = vmatpush3.bf16.msra.mxu0 %v29008_v22  ;;  %v645_v39 = vcombine.high %v643_v34, %v643_v34  ;;  %v1793_v41 = vpack.c.bf16 %v643_v34, %v643_v34  ;;  %v278_v19 = vld [vmem:[%s30840_s12 + $0x78] sm:$0xff]  ;;  %v29048_v22 = vld [vmem:[%s30830_s14 + $0x1040] sm:$0xff]  }
 0x219   : > { %26291 = vmatprep.subr.bf16.mxu0 %v29010_v25  ;;  %26312 = vmatpush3.bf16.msra.mxu1 %v29009_v23  ;;  %v653_v20 = vrot.slane %v278_v19, %v30878_v43  ;;  %v646_v21 = vcombine.high %v278_v19, %v278_v19  ;;  %v29046_v23 = vld [vmem:[%s30830_s14 + $0xfb8] sm:$0xff]   ;;  %v29083_v19 = vld [vmem:[%s30830_s14 + $0x1100] sm:$0xff]  }
 0x21a   : > { %26313 = vmatprep.subr.bf16.mxu1 %v29011_v26  ;;  %v1794_v44 = vpack.c.bf16 %v645_v39, %v645_v39  ;;  %v29049_v26 = vld [vmem:[%s30830_s14 + $0x10c0] sm:$0xff]   ;;  %v29057_v39 = vld [vmem:[%s30830_s14 + $0x10d0] sm:$0xff]  }
 0x21b   : > { %v660_v25 = vrot.slane %v646_v21, %v30878_v43 }
 0x21c   : > { %26292 = vmatpush3.bf16.msra.mxu0 %v29012_v27  ;;  %19567 = vmatprep.mubr.bf16.mxu1 %v1794_v44  ;;  %v1795_v27 = vpack.c.bf16 %v653_v20, %v653_v20  ;;  %v29061_v44 = vld [vmem:[%s30830_s14 + $0x10d8] sm:$0xff]  }
 0x21d   : > { %26321 = vmatprep.subr.bf16.mxu0 %v29015_v31  ;;  %26314 = vmatpush3.bf16.msra.mxu1 %v29013_v32  ;;  %v662_v30 = vcombine.high %v660_v25, %v660_v25  ;;  %v29051_v31 = vld [vmem:[%s30830_s14 + $0x1080] sm:$0xff]   ;;  %v1797_v32 = vpack.c.bf16 %v660_v25, %v660_v25 }
 0x21e   : > { %26343 = vmatprep.subr.bf16.mxu1 %v29016_v35  ;;  %v29053_v35 = vld [vmem:[%s30830_s14 + $0x10c8] sm:$0xff]  }
 0x21f   : > { %19528 = vmatmul.mubr.bf16.vlgmr.msra.gmra.mrb[56].mxu0 %v1791_v36  ;;  %v1798_v34 = vpack.c.bf16 %v662_v30, %v662_v30  ;;  %v29054_v36 = vld [vmem:[%s30830_s14 + $0x1008] sm:$0xff]   ;;  %v29090_v30 = vld [vmem:[%s30830_s14 + $0x11d0] sm:$0xff]  }
 0x220   : > { %26322 = vmatpush3.bf16.msra.mxu0 %v29017_v37  ;;  %19568 = vmatmul.mubr.bf16.vlgmr.msra.gmra.mrb[56].mxu1 %v1793_v41  ;;  %v29055_v37 = vld [vmem:[%s30830_s14 + $0x1088] sm:$0xff]   ;;  %v29059_v41 = vld [vmem:[%s30830_s14 + $0x1090] sm:$0xff]  }
 0x221   : > { %26323 = vmatprep.subr.bf16.mxu0 %v29019_v42  ;;  %26344 = vmatpush3.bf16.msra.mxu1 %v29018_v40  ;;  %v29058_v40 = vld [vmem:[%s30830_s14 + $0x1010] sm:$0xff]   ;;  %v29060_v42 = vld [vmem:[%s30830_s14 + $0x1058] sm:$0xff]  }
 0x222   : > { %26345 = vmatprep.subr.bf16.mxu1 %v29020_v45  ;;  %19647 = vmatprep.mubr.bf16.mxu1 %v1798_v34  ;;  %v29062_v45 = vld [vmem:[%s30830_s14 + $0x1018] sm:$0xff]  }
 0x223   : > { %v29094_v34 = vld [vmem:[%s30830_s14 + $0x11d8] sm:$0xff]  }
 0x224   : > { %26324 = vmatpush3.bf16.msra.mxu0 %v29021_v46  ;;  %v29063_v46 = vld [vmem:[%s30830_s14 + $0x1098] sm:$0xff]  }
 0x225   : > { %26325 = vmatprep.subr.bf16.mxu0 %v29023_v48  ;;  %26346 = vmatpush3.bf16.msra.mxu1 %v29022_v47  ;;  %v29064_v47 = vld [vmem:[%s30830_s14 + $0x1060] sm:$0xff]  }
 0x226   : > { %26347 = vmatprep.subr.bf16.mxu1 %v29024_v49  ;;  %v29065_v48 = vld [vmem:[%s30830_s14 + $0x10e0] sm:$0xff]  }
 0x227   : > { %v29066_v49 = vld [vmem:[%s30830_s14 + $0x1020] sm:$0xff]  }
 0x228   : > { %26326 = vmatpush3.bf16.msra.mxu0 %v29025_v50  ;;  %v29067_v50 = vld [vmem:[%s30830_s14 + $0x10a0] sm:$0xff]  }
 0x229   : > { %26327 = vmatprep.subr.bf16.mxu0 %v29027_v52  ;;  %26348 = vmatpush3.bf16.msra.mxu1 %v29026_v51  ;;  %v29068_v52 = vld [vmem:[%s30830_s14 + $0x1068] sm:$0xff]  }
 0x22a   : > { %26349 = vmatprep.subr.bf16.mxu1 %v29028_v53 }
 0x22c   : > { %26328 = vmatpush3.bf16.msra.mxu0 %v29029_v54 }
 0x22d   : > { %26329 = vmatprep.subr.bf16.mxu0 %v29031_v56  ;;  %26350 = vmatpush3.bf16.msra.mxu1 %v29030_v55  ;;  %v29069_v55 = vld [vmem:[%s30830_s14 + $0x10e8] sm:$0xff]  }
 0x22e   : > { %26351 = vmatprep.subr.bf16.mxu1 %v29032_v57  ;;  %v29070_v56 = vld [vmem:[%s30830_s14 + $0x1028] sm:$0xff]  }
 0x230   : > { %26330 = vmatpush3.bf16.msra.mxu0 %v29033_v58 }
 0x231   : > { %26331 = vmatprep.subr.bf16.mxu0 %v29035_v60  ;;  %26352 = vmatpush3.bf16.msra.mxu1 %v29034_v59 }
 0x232   : > { %v26029_v61 = vpop.f32.mrb[32].mxu0  ;;  %26353 = vmatprep.subr.bf16.mxu1 %v29036_v63 }
 0x233   : > { %v26051_v62 = vpop.f32.mrb[32].mxu1  ;;  %v26030_v1 = vpop.f32.mrb[33].mxu0 }
 0x234   : > { %v26052_v2 = vpop.f32.mrb[33].mxu1  ;;  %v26031_v3 = vadd.f32 %v26030_v1, %v26029_v61  ;;  %v26032_v5 = vpop.f32.mrb[34].mxu0  ;;  %26332 = vmatpush3.bf16.msra.mxu0 %v29037_v0  ;;  %v29072_v0 = vld [vmem:[%s30830_s14 + $0x1070] sm:$0xff]  }
 0x235   : > { %v26053_v4 = vadd.f32 %v26052_v2, %v26051_v62  ;;  %v26054_v6 = vpop.f32.mrb[34].mxu1  ;;  %v26033_v9 = vpop.f32.mrb[35].mxu0  ;;  %26333 = vmatprep.subr.bf16.mxu0 %v29039_v8  ;;  %26354 = vmatpush3.bf16.msra.mxu1 %v29038_v7  ;;  %v29071_v62 = vld [vmem:[%s30830_s14 + $0x10a8] sm:$0xff]   ;;  %v29074_v5 = vld [vmem:[%s30830_s14 + $0x1030] sm:$0xff]   ;;  %v29076_v7 = vld [vmem:[%s30830_s14 + $0x1078] sm:$0xff]  }
 0x236   : > { %v26055_v10 = vpop.f32.mrb[35].mxu1  ;;  %v19050_v11 = vadd.f32 %v26031_v3, %v31384_v24  ;;  %26355 = vmatprep.subr.bf16.mxu1 %v29040_v12  ;;  %v661_v24 = vcombine.high %v653_v20, %v653_v20  ;;  %v29073_v3 = vld [vmem:[%s30830_s14 + $0x10f0] sm:$0xff]   ;;  %v29077_v8 = vld [vmem:[%s30830_s14 + $0x10f8] sm:$0xff]  }
 0x237   : > { %v29075_v6 = vld [vmem:[%s30830_s14 + $0x10b0] sm:$0xff]   ;;  %v29078_v9 = vld [vmem:[%s30830_s14 + $0x1038] sm:$0xff]  }
 0x238   : > { %v31421_v14 = vadd.f32 %v26053_v4, %v19050_v11  ;;  %26334 = vmatpush3.bf16.msra.mxu0 %v29041_v13  ;;  %v1796_v29 = vpack.c.bf16 %v661_v24, %v661_v24  ;;  %v279_v10 = vld [vmem:[%s30840_s12 + $0x80] sm:$0xff]  ;;  %v29085_v24 = vld [vmem:[%s30830_s14 + $0x1148] sm:$0xff]  }
 0x239   : > { %26335 = vmatprep.subr.bf16.mxu0 %v29043_v16  ;;  %26356 = vmatpush3.bf16.msra.mxu1 %v29042_v15  ;;  %v29079_v11 = vld [vmem:[%s30830_s14 + $0x10b8] sm:$0xff]   ;;  %v670_v12 = vrot.slane %v279_v10, %v30878_v43  ;;  %v663_v13 = vcombine.high %v279_v10, %v279_v10 }
 0x23a   : > { %26357 = vmatprep.subr.bf16.mxu1 %v29044_v17  ;;  %19607 = vmatprep.mubr.bf16.mxu0 %v1796_v29  ;;  %v29082_v17 = vld [vmem:[%s30830_s14 + $0x11c0] sm:$0xff]   ;;  %v29089_v29 = vld [vmem:[%s30830_s14 + $0x1150] sm:$0xff]  }
 0x23b   : > { %v678_v15 = vcombine.high %v670_v12, %v670_v12  ;;  %v677_v16 = vrot.slane %v663_v13, %v30878_v43 }
 0x23c   : > { %26336 = vmatpush3.bf16.msra.mxu0 %v29045_v18  ;;  %v1799_v18 = vpack.c.bf16 %v670_v12, %v670_v12  ;;  %v29116_v12 = vld [vmem:[%s30830_s14 + $0x1200] sm:$0xff]  }
 0x23d   : > { %26365 = vmatprep.subr.bf16.mxu0 %v29048_v22  ;;  %26358 = vmatpush3.bf16.msra.mxu1 %v29046_v23  ;;  %v1800_v20 = vpack.c.bf16 %v678_v15, %v678_v15  ;;  %v679_v21 = vcombine.high %v677_v16, %v677_v16  ;;  %v29084_v22 = vld [vmem:[%s30830_s14 + $0x1180] sm:$0xff]   ;;  %v1801_v23 = vpack.c.bf16 %v677_v16, %v677_v16 }
 0x23e   : > { %26387 = vmatprep.subr.bf16.mxu1 %v29049_v26  ;;  %v29086_v26 = vld [vmem:[%s30830_s14 + $0x11c8] sm:$0xff]   ;;  %v29117_v16 = vld [vmem:[%s30830_s14 + $0x1280] sm:$0xff]  }
 0x23f   : > { %19608 = vmatmul.mubr.bf16.vlgmr.msra.gmra.mrb[60].mxu0 %v1795_v27  ;;  %v1802_v25 = vpack.c.bf16 %v679_v21, %v679_v21  ;;  %v29087_v27 = vld [vmem:[%s30830_s14 + $0x1108] sm:$0xff]   ;;  %v29123_v21 = vld [vmem:[%s30830_s14 + $0x12d0] sm:$0xff]  }
 0x240   : > { %26366 = vmatpush3.bf16.msra.mxu0 %v29050_v28  ;;  %19648 = vmatmul.mubr.bf16.vlgmr.msra.gmra.mrb[60].mxu1 %v1797_v32  ;;  %v29088_v28 = vld [vmem:[%s30830_s14 + $0x1188] sm:$0xff]   ;;  %v29092_v32 = vld [vmem:[%s30830_s14 + $0x1190] sm:$0xff]  }
 0x241   : > { %26367 = vmatprep.subr.bf16.mxu0 %v29052_v33  ;;  %26388 = vmatpush3.bf16.msra.mxu1 %v29051_v31  ;;  %v29091_v31 = vld [vmem:[%s30830_s14 + $0x1110] sm:$0xff]   ;;  %v29093_v33 = vld [vmem:[%s30830_s14 + $0x1158] sm:$0xff]  }
 0x242   : > { %26389 = vmatprep.subr.bf16.mxu1 %v29053_v35  ;;  %19687 = vmatprep.mubr.bf16.mxu0 %v1800_v20  ;;  %v29095_v35 = vld [vmem:[%s30830_s14 + $0x1118] sm:$0xff]   ;;  %v29121_v20 = vld [vmem:[%s30830_s14 + $0x1288] sm:$0xff]  }
 0x243   : > { %19727 = vmatprep.mubr.bf16.mxu1 %v1802_v25  ;;  %v29127_v25 = vld [vmem:[%s30830_s14 + $0x12d8] sm:$0xff]  }
 0x244   : > { %26368 = vmatpush3.bf16.msra.mxu0 %v29054_v36  ;;  %v29096_v36 = vld [vmem:[%s30830_s14 + $0x1198] sm:$0xff]  }
 0x245   : > { %26369 = vmatprep.subr.bf16.mxu0 %v29056_v38  ;;  %26390 = vmatpush3.bf16.msra.mxu1 %v29055_v37  ;;  %v29097_v37 = vld [vmem:[%s30830_s14 + $0x1160] sm:$0xff]  }
 0x246   : > { %26391 = vmatprep.subr.bf16.mxu1 %v29057_v39  ;;  %v29098_v38 = vld [vmem:[%s30830_s14 + $0x11e0] sm:$0xff]  }
 0x247   : > { %v29099_v39 = vld [vmem:[%s30830_s14 + $0x1120] sm:$0xff]  }
 0x248   : > { %26370 = vmatpush3.bf16.msra.mxu0 %v29058_v40  ;;  %v29100_v40 = vld [vmem:[%s30830_s14 + $0x11a0] sm:$0xff]  }
 0x249   : > { %26371 = vmatprep.subr.bf16.mxu0 %v29060_v42  ;;  %26392 = vmatpush3.bf16.msra.mxu1 %v29059_v41  ;;  %v29101_v42 = vld [vmem:[%s30830_s14 + $0x1168] sm:$0xff]  }
 0x24a   : > { %26393 = vmatprep.subr.bf16.mxu1 %v29061_v44 }
 0x24c   : > { %26372 = vmatpush3.bf16.msra.mxu0 %v29062_v45  ;;  %v29102_v45 = vld [vmem:[%s30830_s14 + $0x11e8] sm:$0xff]  }
 0x24d   : > { %26373 = vmatprep.subr.bf16.mxu0 %v29064_v47  ;;  %26394 = vmatpush3.bf16.msra.mxu1 %v29063_v46 }
 0x24e   : > { %26395 = vmatprep.subr.bf16.mxu1 %v29065_v48 }
 0x250   : > { %26374 = vmatpush3.bf16.msra.mxu0 %v29066_v49 }
 0x251   : > { %26375 = vmatprep.subr.bf16.mxu0 %v29068_v52  ;;  %26396 = vmatpush3.bf16.msra.mxu1 %v29067_v50  ;;  %v29103_v50 = vld [vmem:[%s30830_s14 + $0x1128] sm:$0xff]  }
 0x252   : > { %v26073_v51 = vpop.f32.mrb[36].mxu0  ;;  %26397 = vmatprep.subr.bf16.mxu1 %v29069_v55 }
 0x253   : > { %v26095_v53 = vpop.f32.mrb[36].mxu1  ;;  %v26074_v54 = vpop.f32.mrb[37].mxu0 }
 0x254   : > { %v26075_v57 = vadd.f32 %v26074_v54, %v26073_v51  ;;  %v26096_v58 = vpop.f32.mrb[37].mxu1  ;;  %v26076_v59 = vpop.f32.mrb[38].mxu0  ;;  %26376 = vmatpush3.bf16.msra.mxu0 %v29070_v56  ;;  %v29104_v51 = vld [vmem:[%s30830_s14 + $0x11a8] sm:$0xff]   ;;  %v29105_v56 = vld [vmem:[%s30830_s14 + $0x1170] sm:$0xff]  }
 0x255   : > { %v26097_v60 = vadd.f32 %v26096_v58, %v26095_v53  ;;  %v26098_v61 = vpop.f32.mrb[38].mxu1  ;;  %v26077_v63 = vpop.f32.mrb[39].mxu0  ;;  %26377 = vmatprep.subr.bf16.mxu0 %v29072_v0  ;;  %26398 = vmatpush3.bf16.msra.mxu1 %v29071_v62  ;;  %v29106_v58 = vld [vmem:[%s30830_s14 + $0x11f0] sm:$0xff]   ;;  %v29111_v0 = vld [vmem:[%s30830_s14 + $0x1138] sm:$0xff]  }
 0x256   : > { %v19130_v1 = vadd.f32 %v26075_v57, %v31421_v14  ;;  %v26099_v2 = vpop.f32.mrb[39].mxu1  ;;  %26399 = vmatprep.subr.bf16.mxu1 %v29073_v3  ;;  %v29081_v14 = vld [vmem:[%s30830_s14 + $0x1140] sm:$0xff]   ;;  %v29109_v61 = vld [vmem:[%s30830_s14 + $0x1178] sm:$0xff]   ;;  %v29108_v62 = vld [vmem:[%s30830_s14 + $0x11b0] sm:$0xff]  }
 0x257   : > { %v29110_v63 = vld [vmem:[%s30830_s14 + $0x11f8] sm:$0xff]  }
 0x258   : > { %v31458_v4 = vadd.f32 %v26097_v60, %v19130_v1  ;;  %26378 = vmatpush3.bf16.msra.mxu0 %v29074_v5  ;;  %v29107_v60 = vld [vmem:[%s30830_s14 + $0x1130] sm:$0xff]   ;;  %v280_v1 = vld [vmem:[%s30840_s12 + $0x88] sm:$0xff]  ;;  %v29112_v5 = vld [vmem:[%s30830_s14 + $0x11b8] sm:$0xff]  }
 0x259   : > { %26379 = vmatprep.subr.bf16.mxu0 %v29076_v7  ;;  %26400 = vmatpush3.bf16.msra.mxu1 %v29075_v6  ;;  %v687_v2 = vrot.slane %v280_v1, %v30878_v43  ;;  %v680_v3 = vcombine.high %v280_v1, %v280_v1 }
 0x25a   : > { %26401 = vmatprep.subr.bf16.mxu1 %v29077_v8  ;;  %v29115_v8 = vld [vmem:[%s30830_s14 + $0x12c0] sm:$0xff]  }
 0x25b   : > { %v695_v6 = vcombine.high %v687_v2, %v687_v2  ;;  %v694_v7 = vrot.slane %v680_v3, %v30878_v43  ;;  %v29149_v3 = vld [vmem:[%s30830_s14 + $0x1300] sm:$0xff]  }
 0x25c   : > { %26380 = vmatpush3.bf16.msra.mxu0 %v29078_v9  ;;  %v1803_v9 = vpack.c.bf16 %v687_v2, %v687_v2 }
 0x25d   : > { %26409 = vmatprep.subr.bf16.mxu0 %v29081_v14  ;;  %26402 = vmatpush3.bf16.msra.mxu1 %v29079_v11  ;;  %v1804_v10 = vpack.c.bf16 %v695_v6, %v695_v6  ;;  %v696_v11 = vcombine.high %v694_v7, %v694_v7  ;;  %v1805_v13 = vpack.c.bf16 %v694_v7, %v694_v7  ;;  %v29118_v14 = vld [vmem:[%s30830_s14 + $0x1248] sm:$0xff]   ;;  %v29150_v7 = vld [vmem:[%s30830_s14 + $0x1380] sm:$0xff]  }
 0x25e   : > { %26431 = vmatprep.subr.bf16.mxu1 %v29082_v17  ;;  %v29119_v17 = vld [vmem:[%s30830_s14 + $0x12c8] sm:$0xff]  }
 0x25f   : > { %19688 = vmatmul.mubr.bf16.vlgmr.msra.gmra.mrb[64].mxu0 %v1799_v18  ;;  %v1806_v15 = vpack.c.bf16 %v696_v11, %v696_v11  ;;  %v29120_v18 = vld [vmem:[%s30830_s14 + $0x1208] sm:$0xff]  }
 0x260   : > { %26410 = vmatpush3.bf16.msra.mxu0 %v29083_v19  ;;  %19728 = vmatmul.mubr.bf16.vlgmr.msra.gmra.mrb[64].mxu1 %v1801_v23  ;;  %v29122_v19 = vld [vmem:[%s30830_s14 + $0x1250] sm:$0xff]   ;;  %v29126_v23 = vld [vmem:[%s30830_s14 + $0x1258] sm:$0xff]   ;;  %v29154_v11 = vld [vmem:[%s30830_s14 + $0x1388] sm:$0xff]  }
 0x261   : > { %26411 = vmatprep.subr.bf16.mxu0 %v29085_v24  ;;  %26432 = vmatpush3.bf16.msra.mxu1 %v29084_v22  ;;  %v29124_v22 = vld [vmem:[%s30830_s14 + $0x1210] sm:$0xff]  }
 0x262   : > { %26433 = vmatprep.subr.bf16.mxu1 %v29086_v26  ;;  %19767 = vmatprep.mubr.bf16.mxu0 %v1804_v10  ;;  %v29125_v24 = vld [vmem:[%s30830_s14 + $0x1290] sm:$0xff]   ;;  %v29128_v26 = vld [vmem:[%s30830_s14 + $0x1218] sm:$0xff]  }
 0x263   : > { %19807 = vmatprep.mubr.bf16.mxu1 %v1806_v15  ;;  %v29155_v10 = vld [vmem:[%s30830_s14 + $0x1350] sm:$0xff]  }
 0x264   : > { %26412 = vmatpush3.bf16.msra.mxu0 %v29087_v27  ;;  %v29130_v27 = vld [vmem:[%s30830_s14 + $0x1260] sm:$0xff]   ;;  %v29158_v15 = vld [vmem:[%s30830_s14 + $0x1390] sm:$0xff]  }
 0x265   : > { %26413 = vmatprep.subr.bf16.mxu0 %v29089_v29  ;;  %26434 = vmatpush3.bf16.msra.mxu1 %v29088_v28  ;;  %v29129_v28 = vld [vmem:[%s30830_s14 + $0x1298] sm:$0xff]   ;;  %v29131_v29 = vld [vmem:[%s30830_s14 + $0x12e0] sm:$0xff]  }
 0x266   : > { %26435 = vmatprep.subr.bf16.mxu1 %v29090_v30  ;;  %v29132_v30 = vld [vmem:[%s30830_s14 + $0x1220] sm:$0xff]  }
 0x268   : > { %26414 = vmatpush3.bf16.msra.mxu0 %v29091_v31 }
 0x269   : > { %26415 = vmatprep.subr.bf16.mxu0 %v29093_v33  ;;  %26436 = vmatpush3.bf16.msra.mxu1 %v29092_v32  ;;  %v29134_v32 = vld [vmem:[%s30830_s14 + $0x1268] sm:$0xff]   ;;  %v29133_v33 = vld [vmem:[%s30830_s14 + $0x12a0] sm:$0xff]  }
 0x26a   : > { %26437 = vmatprep.subr.bf16.mxu1 %v29094_v34 }
 0x26c   : > { %26416 = vmatpush3.bf16.msra.mxu0 %v29095_v35 }
 0x26d   : > { %26417 = vmatprep.subr.bf16.mxu0 %v29097_v37  ;;  %26438 = vmatpush3.bf16.msra.mxu1 %v29096_v36  ;;  %v29135_v37 = vld [vmem:[%s30830_s14 + $0x12e8] sm:$0xff]  }
 0x26e   : > { %26439 = vmatprep.subr.bf16.mxu1 %v29098_v38 }
 0x270   : > { %26418 = vmatpush3.bf16.msra.mxu0 %v29099_v39  ;;  %v29136_v39 = vld [vmem:[%s30830_s14 + $0x1228] sm:$0xff]  }
 0x271   : > { %26419 = vmatprep.subr.bf16.mxu0 %v29101_v42  ;;  %26440 = vmatpush3.bf16.msra.mxu1 %v29100_v40 }
 0x272   : > { %v26117_v41 = vpop.f32.mrb[40].mxu0  ;;  %26441 = vmatprep.subr.bf16.mxu1 %v29102_v45 }
 0x273   : > { %v26118_v44 = vpop.f32.mrb[41].mxu0  ;;  %v26139_v46 = vpop.f32.mrb[40].mxu1 }
 0x274   : > { %v26119_v47 = vadd.f32 %v26118_v44, %v26117_v41  ;;  %v26120_v48 = vpop.f32.mrb[42].mxu0  ;;  %v26140_v49 = vpop.f32.mrb[41].mxu1  ;;  %26420 = vmatpush3.bf16.msra.mxu0 %v29103_v50  ;;  %v29137_v41 = vld [vmem:[%s30830_s14 + $0x12a8] sm:$0xff]  }
 0x275   : > { %v26121_v52 = vpop.f32.mrb[43].mxu0  ;;  %v26141_v54 = vadd.f32 %v26140_v49, %v26139_v46  ;;  %v26142_v55 = vpop.f32.mrb[42].mxu1  ;;  %26421 = vmatprep.subr.bf16.mxu0 %v29105_v56  ;;  %26442 = vmatpush3.bf16.msra.mxu1 %v29104_v51  ;;  %v29139_v49 = vld [vmem:[%s30830_s14 + $0x12f0] sm:$0xff]  }
 0x276   : > { %v19210_v53 = vadd.f32 %v26119_v47, %v31458_v4  ;;  %v26143_v57 = vpop.f32.mrb[43].mxu1  ;;  %26443 = vmatprep.subr.bf16.mxu1 %v29106_v58  ;;  %v29114_v4 = vld [vmem:[%s30830_s14 + $0x1240] sm:$0xff]   ;;  %v29138_v47 = vld [vmem:[%s30830_s14 + $0x1270] sm:$0xff]   ;;  %v29144_v55 = vld [vmem:[%s30830_s14 + $0x1238] sm:$0xff]  }
 0x277   : > { %v29140_v51 = vld [vmem:[%s30830_s14 + $0x1230] sm:$0xff]  }
 0x278   : > { %v31496_v59 = vadd.f32 %v26141_v54, %v19210_v53  ;;  %26422 = vmatpush3.bf16.msra.mxu0 %v29107_v60  ;;  %v29141_v52 = vld [vmem:[%s30830_s14 + $0x12b0] sm:$0xff]   ;;  %v29142_v53 = vld [vmem:[%s30830_s14 + $0x1278] sm:$0xff]  }
 0x279   : > { %26423 = vmatprep.subr.bf16.mxu0 %v29109_v61  ;;  %26444 = vmatpush3.bf16.msra.mxu1 %v29108_v62  ;;  %v29143_v54 = vld [vmem:[%s30830_s14 + $0x12f8] sm:$0xff]   ;;  %v281_v56 = vld [vmem:[%s30840_s12 + $0x90] sm:$0xff] }
 0x27a   : > { %26445 = vmatprep.subr.bf16.mxu1 %v29110_v63  ;;  %v704_v57 = vrot.slane %v281_v56, %v30878_v43  ;;  %v697_v58 = vcombine.high %v281_v56, %v281_v56  ;;  %v29145_v60 = vld [vmem:[%s30830_s14 + $0x12b8] sm:$0xff]   ;;  %v29148_v63 = vld [vmem:[%s30830_s14 + $0x13c0] sm:$0xff]  }
 0x27b   : > { %v29182_v56 = vld [vmem:[%s30830_s14 + $0x1400] sm:$0xff]  }
 0x27c   : > { %26424 = vmatpush3.bf16.msra.mxu0 %v29111_v0  ;;  %v712_v61 = vcombine.high %v704_v57, %v704_v57  ;;  %v711_v62 = vrot.slane %v697_v58, %v30878_v43  ;;  %v1807_v0 = vpack.c.bf16 %v704_v57, %v704_v57 }
 0x27d   : > { %26453 = vmatprep.subr.bf16.mxu0 %v29114_v4  ;;  %26446 = vmatpush3.bf16.msra.mxu1 %v29112_v5  ;;  %v29151_v5 = vld [vmem:[%s30830_s14 + $0x1348] sm:$0xff]  }
 0x27e   : > { %26475 = vmatprep.subr.bf16.mxu1 %v29115_v8  ;;  %v1808_v1 = vpack.c.bf16 %v712_v61, %v712_v61  ;;  %v713_v2 = vcombine.high %v711_v62, %v711_v62  ;;  %v1809_v4 = vpack.c.bf16 %v711_v62, %v711_v62  ;;  %v29152_v8 = vld [vmem:[%s30830_s14 + $0x13c8] sm:$0xff]  }
 0x27f   : > { %19768 = vmatmul.mubr.bf16.vlgmr.msra.gmra.mrb[68].mxu0 %v1803_v9  ;;  %v29153_v9 = vld [vmem:[%s30830_s14 + $0x1308] sm:$0xff]  }
 0x280   : > { %26454 = vmatpush3.bf16.msra.mxu0 %v29116_v12  ;;  %19808 = vmatmul.mubr.bf16.vlgmr.msra.gmra.mrb[68].mxu1 %v1805_v13  ;;  %v1810_v6 = vpack.c.bf16 %v713_v2, %v713_v2  ;;  %v29156_v12 = vld [vmem:[%s30830_s14 + $0x13d0] sm:$0xff]   ;;  %v29184_v61 = vld [vmem:[%s30830_s14 + $0x1448] sm:$0xff]  }
 0x281   : > { %26455 = vmatprep.subr.bf16.mxu0 %v29118_v14  ;;  %26476 = vmatpush3.bf16.msra.mxu1 %v29117_v16  ;;  %v29157_v13 = vld [vmem:[%s30830_s14 + $0x1310] sm:$0xff]   ;;  %v29159_v14 = vld [vmem:[%s30830_s14 + $0x1358] sm:$0xff]  }
 0x282   : > { %26477 = vmatprep.subr.bf16.mxu1 %v29119_v17  ;;  %19847 = vmatprep.mubr.bf16.mxu0 %v1808_v1  ;;  %v29160_v16 = vld [vmem:[%s30830_s14 + $0x13d8] sm:$0xff]   ;;  %v29187_v1 = vld [vmem:[%s30830_s14 + $0x1488] sm:$0xff]   ;;  %v29188_v2 = vld [vmem:[%s30830_s14 + $0x1450] sm:$0xff]  }
 0x283   : > { %19887 = vmatprep.mubr.bf16.mxu1 %v1810_v6  ;;  %v29161_v17 = vld [vmem:[%s30830_s14 + $0x1318] sm:$0xff]  }
 0x284   : > { %26456 = vmatpush3.bf16.msra.mxu0 %v29120_v18  ;;  %v29163_v18 = vld [vmem:[%s30830_s14 + $0x1360] sm:$0xff]   ;;  %v29192_v6 = vld [vmem:[%s30830_s14 + $0x1458] sm:$0xff]  }
 0x285   : > { %26457 = vmatprep.subr.bf16.mxu0 %v29122_v19  ;;  %26478 = vmatpush3.bf16.msra.mxu1 %v29121_v20  ;;  %v29162_v19 = vld [vmem:[%s30830_s14 + $0x1398] sm:$0xff]   ;;  %v29164_v20 = vld [vmem:[%s30830_s14 + $0x13e0] sm:$0xff]  }
 0x286   : > { %26479 = vmatprep.subr.bf16.mxu1 %v29123_v21  ;;  %v29165_v21 = vld [vmem:[%s30830_s14 + $0x1320] sm:$0xff]  }
 0x288   : > { %26458 = vmatpush3.bf16.msra.mxu0 %v29124_v22 }
 0x289   : > { %26459 = vmatprep.subr.bf16.mxu0 %v29126_v23  ;;  %26480 = vmatpush3.bf16.msra.mxu1 %v29125_v24  ;;  %v29167_v23 = vld [vmem:[%s30830_s14 + $0x1368] sm:$0xff]   ;;  %v29166_v24 = vld [vmem:[%s30830_s14 + $0x13a0] sm:$0xff]  }
 0x28a   : > { %26481 = vmatprep.subr.bf16.mxu1 %v29127_v25 }
 0x28c   : > { %26460 = vmatpush3.bf16.msra.mxu0 %v29128_v26 }
 0x28d   : > { %26461 = vmatprep.subr.bf16.mxu0 %v29130_v27  ;;  %26482 = vmatpush3.bf16.msra.mxu1 %v29129_v28  ;;  %v29168_v28 = vld [vmem:[%s30830_s14 + $0x13e8] sm:$0xff]  }
 0x28e   : > { %26483 = vmatprep.subr.bf16.mxu1 %v29131_v29 }
 0x290   : > { %26462 = vmatpush3.bf16.msra.mxu0 %v29132_v30  ;;  %v29169_v30 = vld [vmem:[%s30830_s14 + $0x1328] sm:$0xff]  }
 0x291   : > { %26463 = vmatprep.subr.bf16.mxu0 %v29134_v32  ;;  %26484 = vmatpush3.bf16.msra.mxu1 %v29133_v33  ;;  %v29170_v32 = vld [vmem:[%s30830_s14 + $0x13a8] sm:$0xff]  }
 0x292   : > { %v26161_v31 = vpop.f32.mrb[44].mxu0  ;;  %26485 = vmatprep.subr.bf16.mxu1 %v29135_v37  ;;  %v29171_v37 = vld [vmem:[%s30830_s14 + $0x1370] sm:$0xff]  }
 0x293   : > { %v26162_v34 = vpop.f32.mrb[45].mxu0  ;;  %v26183_v35 = vpop.f32.mrb[44].mxu1 }
 0x294   : > { %v26163_v36 = vadd.f32 %v26162_v34, %v26161_v31  ;;  %v26164_v38 = vpop.f32.mrb[46].mxu0  ;;  %v26184_v40 = vpop.f32.mrb[45].mxu1  ;;  %26464 = vmatpush3.bf16.msra.mxu0 %v29136_v39  ;;  %v29172_v39 = vld [vmem:[%s30830_s14 + $0x13f0] sm:$0xff]  }
 0x295   : > { %v26165_v42 = vpop.f32.mrb[47].mxu0  ;;  %v26185_v45 = vadd.f32 %v26184_v40, %v26183_v35  ;;  %v26186_v46 = vpop.f32.mrb[46].mxu1  ;;  %26465 = vmatprep.subr.bf16.mxu0 %v29138_v47  ;;  %26486 = vmatpush3.bf16.msra.mxu1 %v29137_v41  ;;  %v29173_v41 = vld [vmem:[%s30830_s14 + $0x1330] sm:$0xff]  }
 0x296   : > { %v19290_v44 = vadd.f32 %v26163_v36, %v31496_v59  ;;  %v26187_v48 = vpop.f32.mrb[47].mxu1  ;;  %26487 = vmatprep.subr.bf16.mxu1 %v29139_v49  ;;  %v29147_v59 = vld [vmem:[%s30830_s14 + $0x1340] sm:$0xff]   ;;  %v29174_v42 = vld [vmem:[%s30830_s14 + $0x13b0] sm:$0xff]   ;;  %v29177_v46 = vld [vmem:[%s30830_s14 + $0x1338] sm:$0xff]  }
 0x297   : > { %v282_v47 = vld [vmem:[%s30840_s12 + $0x98] sm:$0xff] }
 0x298   : > { %v31534_v50 = vadd.f32 %v26185_v45, %v19290_v44  ;;  %26466 = vmatpush3.bf16.msra.mxu0 %v29140_v51  ;;  %v29175_v44 = vld [vmem:[%s30830_s14 + $0x1378] sm:$0xff]   ;;  %v721_v49 = vrot.slane %v282_v47, %v30878_v43  ;;  %v29180_v51 = vld [vmem:[%s30830_s14 + $0x1440] sm:$0xff]  }
 0x299   : > { %26467 = vmatprep.subr.bf16.mxu0 %v29142_v53  ;;  %26488 = vmatpush3.bf16.msra.mxu1 %v29141_v52  ;;  %v29176_v45 = vld [vmem:[%s30830_s14 + $0x13f8] sm:$0xff]  }
 0x29a   : > { %26489 = vmatprep.subr.bf16.mxu1 %v29143_v54  ;;  %v29178_v48 = vld [vmem:[%s30830_s14 + $0x13b8] sm:$0xff]   ;;  %v729_v52 = vcombine.high %v721_v49, %v721_v49  ;;  %v29181_v54 = vld [vmem:[%s30830_s14 + $0x14c0] sm:$0xff]  }
 0x29c   : > { %26468 = vmatpush3.bf16.msra.mxu0 %v29144_v55  ;;  %v1811_v55 = vpack.c.bf16 %v721_v49, %v721_v49  ;;  %v1812_v57 = vpack.c.bf16 %v729_v52, %v729_v52  ;;  %v29217_v52 = vld [vmem:[%s30830_s14 + $0x1548] sm:$0xff]  }
 0x29d   : > { %26497 = vmatprep.subr.bf16.mxu0 %v29147_v59  ;;  %26490 = vmatpush3.bf16.msra.mxu1 %v29145_v60  ;;  %v29183_v59 = vld [vmem:[%s30830_s14 + $0x1480] sm:$0xff]  }
 0x29e   : > { %26519 = vmatprep.subr.bf16.mxu1 %v29148_v63  ;;  %v29185_v63 = vld [vmem:[%s30830_s14 + $0x14c8] sm:$0xff]  }
 0x29f   : > { %19848 = vmatmul.mubr.bf16.vlgmr.msra.gmra.mrb[72].mxu0 %v1807_v0  ;;  %v29186_v0 = vld [vmem:[%s30830_s14 + $0x1408] sm:$0xff]  }
 0x2a0   : > { %26498 = vmatpush3.bf16.msra.mxu0 %v29149_v3  ;;  %19888 = vmatmul.mubr.bf16.vlgmr.msra.gmra.mrb[72].mxu1 %v1809_v4  ;;  %v29189_v3 = vld [vmem:[%s30830_s14 + $0x14d0] sm:$0xff]  }
 0x2a1   : > { %26499 = vmatprep.subr.bf16.mxu0 %v29151_v5  ;;  %26520 = vmatpush3.bf16.msra.mxu1 %v29150_v7  ;;  %v29190_v4 = vld [vmem:[%s30830_s14 + $0x1410] sm:$0xff]   ;;  %v29193_v7 = vld [vmem:[%s30830_s14 + $0x14d8] sm:$0xff]  }
 0x2a2   : > { %26521 = vmatprep.subr.bf16.mxu1 %v29152_v8  ;;  %19927 = vmatprep.mubr.bf16.mxu0 %v1812_v57  ;;  %v29191_v5 = vld [vmem:[%s30830_s14 + $0x1490] sm:$0xff]   ;;  %v29194_v8 = vld [vmem:[%s30830_s14 + $0x1418] sm:$0xff]  }
 0x2a3   : > { %v29221_v57 = vld [vmem:[%s30830_s14 + $0x1550] sm:$0xff]  }
 0x2a4   : > { %26500 = vmatpush3.bf16.msra.mxu0 %v29153_v9  ;;  %v29195_v9 = vld [vmem:[%s30830_s14 + $0x1498] sm:$0xff]  }
 0x2a5   : > { %26501 = vmatprep.subr.bf16.mxu0 %v29155_v10  ;;  %26522 = vmatpush3.bf16.msra.mxu1 %v29154_v11  ;;  %v29196_v10 = vld [vmem:[%s30830_s14 + $0x1460] sm:$0xff]  }
 0x2a6   : > { %26523 = vmatprep.subr.bf16.mxu1 %v29156_v12  ;;  %v29197_v11 = vld [vmem:[%s30830_s14 + $0x14e0] sm:$0xff]  }
 0x2a7   : > { %v29198_v12 = vld [vmem:[%s30830_s14 + $0x1420] sm:$0xff]  }
 0x2a8   : > { %26502 = vmatpush3.bf16.msra.mxu0 %v29157_v13  ;;  %v29199_v13 = vld [vmem:[%s30830_s14 + $0x14a0] sm:$0xff]  }
 0x2a9   : > { %26503 = vmatprep.subr.bf16.mxu0 %v29159_v14  ;;  %26524 = vmatpush3.bf16.msra.mxu1 %v29158_v15  ;;  %v29200_v14 = vld [vmem:[%s30830_s14 + $0x1468] sm:$0xff]  }
 0x2aa   : > { %26525 = vmatprep.subr.bf16.mxu1 %v29160_v16  ;;  %v29201_v16 = vld [vmem:[%s30830_s14 + $0x14e8] sm:$0xff]  }
 0x2ac   : > { %26504 = vmatpush3.bf16.msra.mxu0 %v29161_v17 }
 0x2ad   : > { %26505 = vmatprep.subr.bf16.mxu0 %v29163_v18  ;;  %26526 = vmatpush3.bf16.msra.mxu1 %v29162_v19  ;;  %v29202_v18 = vld [vmem:[%s30830_s14 + $0x1428] sm:$0xff]  }
 0x2ae   : > { %26527 = vmatprep.subr.bf16.mxu1 %v29164_v20 }
 0x2b0   : > { %26506 = vmatpush3.bf16.msra.mxu0 %v29165_v21 }
 0x2b1   : > { %26507 = vmatprep.subr.bf16.mxu0 %v29167_v23  ;;  %26528 = vmatpush3.bf16.msra.mxu1 %v29166_v24  ;;  %v29203_v23 = vld [vmem:[%s30830_s14 + $0x14a8] sm:$0xff]  }
 0x2b2   : > { %v26205_v22 = vpop.f32.mrb[48].mxu0  ;;  %26529 = vmatprep.subr.bf16.mxu1 %v29168_v28 }
 0x2b3   : > { %v26206_v25 = vpop.f32.mrb[49].mxu0  ;;  %v26227_v26 = vpop.f32.mrb[48].mxu1 }
 0x2b4   : > { %v26207_v27 = vadd.f32 %v26206_v25, %v26205_v22  ;;  %v26208_v29 = vpop.f32.mrb[50].mxu0  ;;  %v26228_v31 = vpop.f32.mrb[49].mxu1  ;;  %26508 = vmatpush3.bf16.msra.mxu0 %v29169_v30  ;;  %v29204_v25 = vld [vmem:[%s30830_s14 + $0x1470] sm:$0xff]  }
 0x2b5   : > { %v26209_v33 = vpop.f32.mrb[51].mxu0  ;;  %v26229_v35 = vadd.f32 %v26228_v31, %v26227_v26  ;;  %v26230_v36 = vpop.f32.mrb[50].mxu1  ;;  %26509 = vmatprep.subr.bf16.mxu0 %v29171_v37  ;;  %26530 = vmatpush3.bf16.msra.mxu1 %v29170_v32  ;;  %v29205_v29 = vld [vmem:[%s30830_s14 + $0x14f0] sm:$0xff]   ;;  %v283_v37 = vld [vmem:[%s30840_s12 + $0xa0] sm:$0xff] }
 0x2b6   : > { %v19370_v34 = vadd.f32 %v26207_v27, %v31534_v50  ;;  %v26231_v38 = vpop.f32.mrb[51].mxu1  ;;  %26531 = vmatprep.subr.bf16.mxu1 %v29172_v39  ;;  %v714_v50 = vcombine.high %v282_v47, %v282_v47  ;;  %v29206_v31 = vld [vmem:[%s30830_s14 + $0x1430] sm:$0xff]   ;;  %v29208_v33 = vld [vmem:[%s30830_s14 + $0x1478] sm:$0xff]   ;;  %v731_v39 = vcombine.high %v283_v37, %v283_v37  ;;  %v29215_v47 = vld [vmem:[%s30830_s14 + $0x1500] sm:$0xff]  }
 0x2b7   : > { %v29210_v36 = vld [vmem:[%s30830_s14 + $0x1438] sm:$0xff]   ;;  %v738_v38 = vrot.slane %v283_v37, %v30878_v43  ;;  %v29248_v37 = vld [vmem:[%s30830_s14 + $0x1600] sm:$0xff]  }
 0x2b8   : > { %v31572_v40 = vadd.f32 %v26229_v35, %v19370_v34  ;;  %26510 = vmatpush3.bf16.msra.mxu0 %v29173_v41  ;;  %v728_v53 = vrot.slane %v714_v50, %v30878_v43  ;;  %v29207_v34 = vld [vmem:[%s30830_s14 + $0x14b0] sm:$0xff]   ;;  %v29209_v35 = vld [vmem:[%s30830_s14 + $0x14f8] sm:$0xff]   ;;  %v29216_v50 = vld [vmem:[%s30830_s14 + $0x1580] sm:$0xff]  }
 0x2b9   : > { %26511 = vmatprep.subr.bf16.mxu0 %v29175_v44  ;;  %26532 = vmatpush3.bf16.msra.mxu1 %v29174_v42  ;;  %v29211_v41 = vld [vmem:[%s30830_s14 + $0x14b8] sm:$0xff]   ;;  %v746_v42 = vcombine.high %v738_v38, %v738_v38  ;;  %v745_v44 = vrot.slane %v731_v39, %v30878_v43 }
 0x2ba   : > { %26533 = vmatprep.subr.bf16.mxu1 %v29176_v45  ;;  %v730_v58 = vcombine.high %v728_v53, %v728_v53  ;;  %v1813_v60 = vpack.c.bf16 %v728_v53, %v728_v53  ;;  %v29214_v45 = vld [vmem:[%s30830_s14 + $0x15c0] sm:$0xff]  }
 0x2bb   : > { %v747_v49 = vcombine.high %v745_v44, %v745_v44 }
 0x2bc   : > { %26512 = vmatpush3.bf16.msra.mxu0 %v29177_v46  ;;  %v1814_v62 = vpack.c.bf16 %v730_v58, %v730_v58  ;;  %v1815_v46 = vpack.c.bf16 %v738_v38, %v738_v38  ;;  %v29222_v58 = vld [vmem:[%s30830_s14 + $0x15d0] sm:$0xff]  }
 0x2bd   : > { %26541 = vmatprep.subr.bf16.mxu0 %v29180_v51  ;;  %26534 = vmatpush3.bf16.msra.mxu1 %v29178_v48  ;;  %v1816_v48 = vpack.c.bf16 %v746_v42, %v746_v42  ;;  %v1817_v51 = vpack.c.bf16 %v745_v44, %v745_v44  ;;  %v1818_v53 = vpack.c.bf16 %v747_v49, %v747_v49  ;;  %v29250_v42 = vld [vmem:[%s30830_s14 + $0x1648] sm:$0xff]   ;;  %v29255_v49 = vld [vmem:[%s30830_s14 + $0x16d0] sm:$0xff]  }
 0x2be   : > { %26563 = vmatprep.subr.bf16.mxu1 %v29181_v54  ;;  %19967 = vmatprep.mubr.bf16.mxu1 %v1814_v62  ;;  %v29218_v54 = vld [vmem:[%s30830_s14 + $0x15c8] sm:$0xff]   ;;  %v29226_v62 = vld [vmem:[%s30830_s14 + $0x15d8] sm:$0xff]  }
 0x2bf   : > { %19928 = vmatmul.mubr.bf16.vlgmr.msra.gmra.mrb[76].mxu0 %v1811_v55  ;;  %v29219_v55 = vld [vmem:[%s30830_s14 + $0x1508] sm:$0xff]  }
 0x2c0   : > { %26542 = vmatpush3.bf16.msra.mxu0 %v29182_v56  ;;  %19968 = vmatmul.mubr.bf16.vlgmr.msra.gmra.mrb[76].mxu1 %v1813_v60  ;;  %v29220_v56 = vld [vmem:[%s30830_s14 + $0x1588] sm:$0xff]   ;;  %v29224_v60 = vld [vmem:[%s30830_s14 + $0x1590] sm:$0xff]  }
 0x2c1   : > { %26543 = vmatprep.subr.bf16.mxu0 %v29184_v61  ;;  %26564 = vmatpush3.bf16.msra.mxu1 %v29183_v59  ;;  %v29223_v59 = vld [vmem:[%s30830_s14 + $0x1510] sm:$0xff]   ;;  %v29225_v61 = vld [vmem:[%s30830_s14 + $0x1558] sm:$0xff]  }
 0x2c2   : > { %26565 = vmatprep.subr.bf16.mxu1 %v29185_v63  ;;  %20007 = vmatprep.mubr.bf16.mxu0 %v1816_v48  ;;  %v29227_v63 = vld [vmem:[%s30830_s14 + $0x1518] sm:$0xff]   ;;  %v29254_v48 = vld [vmem:[%s30830_s14 + $0x1650] sm:$0xff]  }
 0x2c3   : > { %20047 = vmatprep.mubr.bf16.mxu1 %v1818_v53  ;;  %v29259_v53 = vld [vmem:[%s30830_s14 + $0x16d8] sm:$0xff]  }
 0x2c4   : > { %26544 = vmatpush3.bf16.msra.mxu0 %v29186_v0  ;;  %v29228_v0 = vld [vmem:[%s30830_s14 + $0x1598] sm:$0xff]  }
 0x2c5   : > { %26545 = vmatprep.subr.bf16.mxu0 %v29188_v2  ;;  %26566 = vmatpush3.bf16.msra.mxu1 %v29187_v1  ;;  %v29229_v1 = vld [vmem:[%s30830_s14 + $0x1560] sm:$0xff]  }
 0x2c6   : > { %26567 = vmatprep.subr.bf16.mxu1 %v29189_v3  ;;  %v29230_v2 = vld [vmem:[%s30830_s14 + $0x15e0] sm:$0xff]  }
 0x2c7   : > { %v29231_v3 = vld [vmem:[%s30830_s14 + $0x1520] sm:$0xff]  }
 0x2c8   : > { %26546 = vmatpush3.bf16.msra.mxu0 %v29190_v4  ;;  %v29232_v4 = vld [vmem:[%s30830_s14 + $0x15a0] sm:$0xff]  }
 0x2c9   : > { %26547 = vmatprep.subr.bf16.mxu0 %v29192_v6  ;;  %26568 = vmatpush3.bf16.msra.mxu1 %v29191_v5  ;;  %v29233_v5 = vld [vmem:[%s30830_s14 + $0x1568] sm:$0xff]  }
 0x2ca   : > { %26569 = vmatprep.subr.bf16.mxu1 %v29193_v7  ;;  %v29234_v7 = vld [vmem:[%s30830_s14 + $0x15e8] sm:$0xff]  }
 0x2cc   : > { %26548 = vmatpush3.bf16.msra.mxu0 %v29194_v8 }
 0x2cd   : > { %26549 = vmatprep.subr.bf16.mxu0 %v29196_v10  ;;  %26570 = vmatpush3.bf16.msra.mxu1 %v29195_v9  ;;  %v29235_v9 = vld [vmem:[%s30830_s14 + $0x1528] sm:$0xff]  }
 0x2ce   : > { %26571 = vmatprep.subr.bf16.mxu1 %v29197_v11 }
 0x2d0   : > { %26550 = vmatpush3.bf16.msra.mxu0 %v29198_v12 }
 0x2d1   : > { %26551 = vmatprep.subr.bf16.mxu0 %v29200_v14  ;;  %26572 = vmatpush3.bf16.msra.mxu1 %v29199_v13  ;;  %v29236_v13 = vld [vmem:[%s30830_s14 + $0x15a8] sm:$0xff]   ;;  %v29237_v14 = vld [vmem:[%s30830_s14 + $0x1570] sm:$0xff]  }
 0x2d2   : > { %v26249_v15 = vpop.f32.mrb[52].mxu0  ;;  %26573 = vmatprep.subr.bf16.mxu1 %v29201_v16 }
 0x2d3   : > { %v26250_v17 = vpop.f32.mrb[53].mxu0  ;;  %v26271_v19 = vpop.f32.mrb[52].mxu1 }
 0x2d4   : > { %v26251_v20 = vadd.f32 %v26250_v17, %v26249_v15  ;;  %v26252_v21 = vpop.f32.mrb[54].mxu0  ;;  %v26272_v22 = vpop.f32.mrb[53].mxu1  ;;  %26552 = vmatpush3.bf16.msra.mxu0 %v29202_v18 }
 0x2d5   : > { %v26253_v24 = vpop.f32.mrb[55].mxu0  ;;  %v26273_v27 = vadd.f32 %v26272_v22, %v26271_v19  ;;  %v26274_v28 = vpop.f32.mrb[54].mxu1  ;;  %26553 = vmatprep.subr.bf16.mxu0 %v29204_v25  ;;  %26574 = vmatpush3.bf16.msra.mxu1 %v29203_v23  ;;  %v29239_v22 = vld [vmem:[%s30830_s14 + $0x1530] sm:$0xff]   ;;  %v29241_v25 = vld [vmem:[%s30830_s14 + $0x1578] sm:$0xff]  }
 0x2d6   : > { %v19450_v26 = vadd.f32 %v26251_v20, %v31572_v40  ;;  %v26275_v30 = vpop.f32.mrb[55].mxu1  ;;  %26575 = vmatprep.subr.bf16.mxu1 %v29205_v29  ;;  %v29213_v40 = vld [vmem:[%s30830_s14 + $0x1540] sm:$0xff]   ;;  %v29238_v20 = vld [vmem:[%s30830_s14 + $0x15f0] sm:$0xff]  }
 0x2d7   : > { %v29240_v24 = vld [vmem:[%s30830_s14 + $0x15b0] sm:$0xff]   ;;  %v284_v28 = vld [vmem:[%s30840_s12 + $0xa8] sm:$0xff] }
 0x2d8   : > { %v31611_v32 = vadd.f32 %v26273_v27, %v19450_v26  ;;  %26554 = vmatpush3.bf16.msra.mxu0 %v29206_v31  ;;  %v29242_v26 = vld [vmem:[%s30830_s14 + $0x15f8] sm:$0xff]   ;;  %v755_v29 = vrot.slane %v284_v28, %v30878_v43  ;;  %v748_v30 = vcombine.high %v284_v28, %v284_v28  ;;  %v29246_v31 = vld [vmem:[%s30830_s14 + $0x1640] sm:$0xff]  }
 0x2d9   : > { %26555 = vmatprep.subr.bf16.mxu0 %v29208_v33  ;;  %26576 = vmatpush3.bf16.msra.mxu1 %v29207_v34  ;;  %v29243_v27 = vld [vmem:[%s30830_s14 + $0x1538] sm:$0xff]   ;;  %v29281_v28 = vld [vmem:[%s30830_s14 + $0x1700] sm:$0xff]  }
 0x2da   : > { %26577 = vmatprep.subr.bf16.mxu1 %v29209_v35  ;;  %v763_v33 = vcombine.high %v755_v29, %v755_v29  ;;  %v762_v34 = vrot.slane %v748_v30, %v30878_v43  ;;  %v29247_v35 = vld [vmem:[%s30830_s14 + $0x16c0] sm:$0xff]  }
 0x2dc   : > { %26556 = vmatpush3.bf16.msra.mxu0 %v29210_v36  ;;  %v1819_v36 = vpack.c.bf16 %v755_v29, %v755_v29  ;;  %v1820_v38 = vpack.c.bf16 %v763_v33, %v763_v33  ;;  %v764_v39 = vcombine.high %v762_v34, %v762_v34  ;;  %v29283_v33 = vld [vmem:[%s30830_s14 + $0x1748] sm:$0xff]  }
 0x2dd   : > { %26585 = vmatprep.subr.bf16.mxu0 %v29213_v40  ;;  %26578 = vmatpush3.bf16.msra.mxu1 %v29211_v41  ;;  %v29249_v40 = vld [vmem:[%s30830_s14 + $0x1680] sm:$0xff]   ;;  %v1821_v41 = vpack.c.bf16 %v762_v34, %v762_v34 }
 0x2de   : > { %26607 = vmatprep.subr.bf16.mxu1 %v29214_v45  ;;  %v1822_v44 = vpack.c.bf16 %v764_v39, %v764_v39  ;;  %v29251_v45 = vld [vmem:[%s30830_s14 + $0x16c8] sm:$0xff]   ;;  %v29288_v39 = vld [vmem:[%s30830_s14 + $0x17d0] sm:$0xff]  }
 0x2df   : > { %20008 = vmatmul.mubr.bf16.vlgmr.msra.gmra.mrb[80].mxu0 %v1815_v46  ;;  %v29252_v46 = vld [vmem:[%s30830_s14 + $0x1608] sm:$0xff]  }
 0x2e0   : > { %26586 = vmatpush3.bf16.msra.mxu0 %v29215_v47  ;;  %20048 = vmatmul.mubr.bf16.vlgmr.msra.gmra.mrb[80].mxu1 %v1817_v51  ;;  %v29253_v47 = vld [vmem:[%s30830_s14 + $0x1688] sm:$0xff]   ;;  %v29257_v51 = vld [vmem:[%s30830_s14 + $0x1690] sm:$0xff]  }
 0x2e1   : > { %26587 = vmatprep.subr.bf16.mxu0 %v29217_v52  ;;  %26608 = vmatpush3.bf16.msra.mxu1 %v29216_v50  ;;  %v29256_v50 = vld [vmem:[%s30830_s14 + $0x1610] sm:$0xff]   ;;  %v29258_v52 = vld [vmem:[%s30830_s14 + $0x1658] sm:$0xff]  }
 0x2e2   : > { %26609 = vmatprep.subr.bf16.mxu1 %v29218_v54  ;;  %20087 = vmatprep.mubr.bf16.mxu0 %v1820_v38  ;;  %v29260_v54 = vld [vmem:[%s30830_s14 + $0x1618] sm:$0xff]   ;;  %v29287_v38 = vld [vmem:[%s30830_s14 + $0x1750] sm:$0xff]  }
 0x2e3   : > { %20127 = vmatprep.mubr.bf16.mxu1 %v1822_v44  ;;  %v29292_v44 = vld [vmem:[%s30830_s14 + $0x17d8] sm:$0xff]  }
 0x2e4   : > { %26588 = vmatpush3.bf16.msra.mxu0 %v29219_v55  ;;  %v29261_v55 = vld [vmem:[%s30830_s14 + $0x1698] sm:$0xff]  }
 0x2e5   : > { %26589 = vmatprep.subr.bf16.mxu0 %v29221_v57  ;;  %26610 = vmatpush3.bf16.msra.mxu1 %v29220_v56  ;;  %v29262_v56 = vld [vmem:[%s30830_s14 + $0x1660] sm:$0xff]  }
 0x2e6   : > { %26611 = vmatprep.subr.bf16.mxu1 %v29222_v58  ;;  %v29263_v57 = vld [vmem:[%s30830_s14 + $0x16e0] sm:$0xff]  }
 0x2e7   : > { %v29264_v58 = vld [vmem:[%s30830_s14 + $0x1620] sm:$0xff]  }
 0x2e8   : > { %26590 = vmatpush3.bf16.msra.mxu0 %v29223_v59  ;;  %v29265_v59 = vld [vmem:[%s30830_s14 + $0x16a0] sm:$0xff]  }
 0x2e9   : > { %26591 = vmatprep.subr.bf16.mxu0 %v29225_v61  ;;  %26612 = vmatpush3.bf16.msra.mxu1 %v29224_v60  ;;  %v29266_v60 = vld [vmem:[%s30830_s14 + $0x1668] sm:$0xff]  }
 0x2ea   : > { %26613 = vmatprep.subr.bf16.mxu1 %v29226_v62  ;;  %v29267_v62 = vld [vmem:[%s30830_s14 + $0x16e8] sm:$0xff]  }
 0x2ec   : > { %26592 = vmatpush3.bf16.msra.mxu0 %v29227_v63 }
 0x2ed   : > { %26593 = vmatprep.subr.bf16.mxu0 %v29229_v1  ;;  %26614 = vmatpush3.bf16.msra.mxu1 %v29228_v0  ;;  %v29268_v0 = vld [vmem:[%s30830_s14 + $0x1628] sm:$0xff]  }
 0x2ee   : > { %26615 = vmatprep.subr.bf16.mxu1 %v29230_v2 }
 0x2f0   : > { %26594 = vmatpush3.bf16.msra.mxu0 %v29231_v3 }
 0x2f1   : > { %26595 = vmatprep.subr.bf16.mxu0 %v29233_v5  ;;  %26616 = vmatpush3.bf16.msra.mxu1 %v29232_v4  ;;  %v29269_v4 = vld [vmem:[%s30830_s14 + $0x16a8] sm:$0xff]   ;;  %v29270_v5 = vld [vmem:[%s30830_s14 + $0x1670] sm:$0xff]  }
 0x2f2   : > { %v26293_v6 = vpop.f32.mrb[56].mxu0  ;;  %26617 = vmatprep.subr.bf16.mxu1 %v29234_v7 }
 0x2f3   : > { %v26294_v8 = vpop.f32.mrb[57].mxu0  ;;  %v26315_v10 = vpop.f32.mrb[56].mxu1 }
 0x2f4   : > { %v26295_v11 = vadd.f32 %v26294_v8, %v26293_v6  ;;  %v26296_v12 = vpop.f32.mrb[58].mxu0  ;;  %v26316_v15 = vpop.f32.mrb[57].mxu1  ;;  %26596 = vmatpush3.bf16.msra.mxu0 %v29235_v9 }
 0x2f5   : > { %v26297_v16 = vpop.f32.mrb[59].mxu0  ;;  %v26317_v18 = vadd.f32 %v26316_v15, %v26315_v10  ;;  %v26318_v19 = vpop.f32.mrb[58].mxu1  ;;  %26597 = vmatprep.subr.bf16.mxu0 %v29237_v14  ;;  %26618 = vmatpush3.bf16.msra.mxu1 %v29236_v13  ;;  %v29272_v13 = vld [vmem:[%s30830_s14 + $0x1630] sm:$0xff]  }
 0x2f6   : > { %v19530_v17 = vadd.f32 %v26295_v11, %v31611_v32  ;;  %v26319_v21 = vpop.f32.mrb[59].mxu1  ;;  %26619 = vmatprep.subr.bf16.mxu1 %v29238_v20  ;;  %v29244_v32 = vld [vmem:[%s30830_s14 + $0x15b8] sm:$0xff]   ;;  %v29271_v11 = vld [vmem:[%s30830_s14 + $0x16f0] sm:$0xff]  }
 0x2f7   : > { %v29273_v15 = vld [vmem:[%s30830_s14 + $0x16b0] sm:$0xff]   ;;  %v29274_v16 = vld [vmem:[%s30830_s14 + $0x1678] sm:$0xff]  }
 0x2f8   : > { %v31649_v23 = vadd.f32 %v26317_v18, %v19530_v17  ;;  %26598 = vmatpush3.bf16.msra.mxu0 %v29239_v22  ;;  %v29275_v17 = vld [vmem:[%s30830_s14 + $0x16f8] sm:$0xff]   ;;  %v285_v19 = vld [vmem:[%s30840_s12 + $0xb0] sm:$0xff] }
 0x2f9   : > { %26599 = vmatprep.subr.bf16.mxu0 %v29241_v25  ;;  %26620 = vmatpush3.bf16.msra.mxu1 %v29240_v24  ;;  %v29276_v18 = vld [vmem:[%s30830_s14 + $0x1638] sm:$0xff]   ;;  %v772_v21 = vrot.slane %v285_v19, %v30878_v43  ;;  %v765_v22 = vcombine.high %v285_v19, %v285_v19  ;;  %v29314_v19 = vld [vmem:[%s30830_s14 + $0x1800] sm:$0xff]  }
 0x2fa   : > { %26621 = vmatprep.subr.bf16.mxu1 %v29242_v26  ;;  %v29277_v20 = vld [vmem:[%s30830_s14 + $0x16b8] sm:$0xff]   ;;  %v29280_v26 = vld [vmem:[%s30830_s14 + $0x17c0] sm:$0xff]  }
 0x2fb   : > { %v780_v24 = vcombine.high %v772_v21, %v772_v21  ;;  %v779_v25 = vrot.slane %v765_v22, %v30878_v43  ;;  %v29315_v22 = vld [vmem:[%s30830_s14 + $0x1880] sm:$0xff]  }
 0x2fc   : > { %26600 = vmatpush3.bf16.msra.mxu0 %v29243_v27  ;;  %v1823_v27 = vpack.c.bf16 %v772_v21, %v772_v21 }
 0x2fd   : > { %26629 = vmatprep.subr.bf16.mxu0 %v29246_v31  ;;  %26622 = vmatpush3.bf16.msra.mxu1 %v29244_v32  ;;  %v1824_v29 = vpack.c.bf16 %v780_v24, %v780_v24  ;;  %v781_v30 = vcombine.high %v779_v25, %v779_v25  ;;  %v29282_v31 = vld [vmem:[%s30830_s14 + $0x1780] sm:$0xff]   ;;  %v1825_v32 = vpack.c.bf16 %v779_v25, %v779_v25  ;;  %v29316_v24 = vld [vmem:[%s30830_s14 + $0x1848] sm:$0xff]  }
 0x2fe   : > { %26651 = vmatprep.subr.bf16.mxu1 %v29247_v35  ;;  %v29284_v35 = vld [vmem:[%s30830_s14 + $0x17c8] sm:$0xff]  }
 0x2ff   : > { %20088 = vmatmul.mubr.bf16.vlgmr.msra.gmra.mrb[84].mxu0 %v1819_v36  ;;  %v1826_v34 = vpack.c.bf16 %v781_v30, %v781_v30  ;;  %v29285_v36 = vld [vmem:[%s30830_s14 + $0x1708] sm:$0xff]   ;;  %v29321_v30 = vld [vmem:[%s30830_s14 + $0x18d0] sm:$0xff]  }
 0x300   : > { %26630 = vmatpush3.bf16.msra.mxu0 %v29248_v37  ;;  %20128 = vmatmul.mubr.bf16.vlgmr.msra.gmra.mrb[84].mxu1 %v1821_v41  ;;  %v29286_v37 = vld [vmem:[%s30830_s14 + $0x1788] sm:$0xff]   ;;  %v29290_v41 = vld [vmem:[%s30830_s14 + $0x1790] sm:$0xff]  }
 0x301   : > { %26631 = vmatprep.subr.bf16.mxu0 %v29250_v42  ;;  %26652 = vmatpush3.bf16.msra.mxu1 %v29249_v40  ;;  %v29289_v40 = vld [vmem:[%s30830_s14 + $0x1710] sm:$0xff]   ;;  %v29291_v42 = vld [vmem:[%s30830_s14 + $0x1758] sm:$0xff]  }
 0x302   : > { %26653 = vmatprep.subr.bf16.mxu1 %v29251_v45  ;;  %20167 = vmatprep.mubr.bf16.mxu0 %v1824_v29  ;;  %v29293_v45 = vld [vmem:[%s30830_s14 + $0x1718] sm:$0xff]   ;;  %v29320_v29 = vld [vmem:[%s30830_s14 + $0x1850] sm:$0xff]  }
 0x303   : > { %20207 = vmatprep.mubr.bf16.mxu1 %v1826_v34  ;;  %v29325_v34 = vld [vmem:[%s30830_s14 + $0x18d8] sm:$0xff]  }
 0x304   : > { %26632 = vmatpush3.bf16.msra.mxu0 %v29252_v46  ;;  %v29294_v46 = vld [vmem:[%s30830_s14 + $0x1798] sm:$0xff]  }
 0x305   : > { %26633 = vmatprep.subr.bf16.mxu0 %v29254_v48  ;;  %26654 = vmatpush3.bf16.msra.mxu1 %v29253_v47  ;;  %v29295_v47 = vld [vmem:[%s30830_s14 + $0x1760] sm:$0xff]  }
 0x306   : > { %26655 = vmatprep.subr.bf16.mxu1 %v29255_v49  ;;  %v29296_v48 = vld [vmem:[%s30830_s14 + $0x17e0] sm:$0xff]  }
 0x307   : > { %v29297_v49 = vld [vmem:[%s30830_s14 + $0x1720] sm:$0xff]  }
 0x308   : > { %26634 = vmatpush3.bf16.msra.mxu0 %v29256_v50  ;;  %v29298_v50 = vld [vmem:[%s30830_s14 + $0x17a0] sm:$0xff]  }
 0x309   : > { %26635 = vmatprep.subr.bf16.mxu0 %v29258_v52  ;;  %26656 = vmatpush3.bf16.msra.mxu1 %v29257_v51  ;;  %v29299_v51 = vld [vmem:[%s30830_s14 + $0x1768] sm:$0xff]  }
 0x30a   : > { %26657 = vmatprep.subr.bf16.mxu1 %v29259_v53  ;;  %v29300_v53 = vld [vmem:[%s30830_s14 + $0x17e8] sm:$0xff]  }
 0x30c   : > { %26636 = vmatpush3.bf16.msra.mxu0 %v29260_v54 }
 0x30d   : > { %26637 = vmatprep.subr.bf16.mxu0 %v29262_v56  ;;  %26658 = vmatpush3.bf16.msra.mxu1 %v29261_v55  ;;  %v29301_v55 = vld [vmem:[%s30830_s14 + $0x1728] sm:$0xff]  }
 0x30e   : > { %26659 = vmatprep.subr.bf16.mxu1 %v29263_v57 }
 0x310   : > { %26638 = vmatpush3.bf16.msra.mxu0 %v29264_v58 }
 0x311   : > { %26639 = vmatprep.subr.bf16.mxu0 %v29266_v60  ;;  %26660 = vmatpush3.bf16.msra.mxu1 %v29265_v59  ;;  %v29302_v60 = vld [vmem:[%s30830_s14 + $0x17a8] sm:$0xff]  }
 0x312   : > { %v26337_v61 = vpop.f32.mrb[60].mxu0  ;;  %26661 = vmatprep.subr.bf16.mxu1 %v29267_v62  ;;  %v29303_v62 = vld [vmem:[%s30830_s14 + $0x1770] sm:$0xff]  }
 0x313   : > { %v26338_v63 = vpop.f32.mrb[61].mxu0  ;;  %v26359_v1 = vpop.f32.mrb[60].mxu1 }
 0x314   : > { %v26339_v2 = vadd.f32 %v26338_v63, %v26337_v61  ;;  %v26340_v3 = vpop.f32.mrb[62].mxu0  ;;  %v26360_v6 = vpop.f32.mrb[61].mxu1  ;;  %26640 = vmatpush3.bf16.msra.mxu0 %v29268_v0 }
 0x315   : > { %v26341_v7 = vpop.f32.mrb[63].mxu0  ;;  %v26361_v9 = vadd.f32 %v26360_v6, %v26359_v1  ;;  %v26362_v10 = vpop.f32.mrb[62].mxu1  ;;  %26641 = vmatprep.subr.bf16.mxu0 %v29270_v5  ;;  %26662 = vmatpush3.bf16.msra.mxu1 %v29269_v4  ;;  %v29305_v4 = vld [vmem:[%s30830_s14 + $0x1730] sm:$0xff]   ;;  %v29307_v6 = vld [vmem:[%s30830_s14 + $0x1778] sm:$0xff]  }
 0x316   : > { %v19610_v8 = vadd.f32 %v26339_v2, %v31649_v23  ;;  %v26363_v12 = vpop.f32.mrb[63].mxu1  ;;  %26663 = vmatprep.subr.bf16.mxu1 %v29271_v11  ;;  %v29279_v23 = vld [vmem:[%s30830_s14 + $0x1740] sm:$0xff]   ;;  %v29304_v2 = vld [vmem:[%s30830_s14 + $0x17f0] sm:$0xff]  }
 0x317   : > { %v29306_v7 = vld [vmem:[%s30830_s14 + $0x17b0] sm:$0xff]  }
 0x318   : > { %v31687_v14 = vadd.f32 %v26361_v9, %v19610_v8  ;;  %26642 = vmatpush3.bf16.msra.mxu0 %v29272_v13  ;;  %v29308_v8 = vld [vmem:[%s30830_s14 + $0x17f8] sm:$0xff]   ;;  %v29312_v13 = vld [vmem:[%s30830_s14 + $0x1840] sm:$0xff]  }
 0x319   : > { %26643 = vmatprep.subr.bf16.mxu0 %v29274_v16  ;;  %26664 = vmatpush3.bf16.msra.mxu1 %v29273_v15  ;;  %v29309_v9 = vld [vmem:[%s30830_s14 + $0x1738] sm:$0xff]  }
 0x31a   : > { %26665 = vmatprep.subr.bf16.mxu1 %v29275_v17  ;;  %v286_v10 = vld [vmem:[%s30840_s12 + $0xb8] sm:$0xff]  ;;  %v29313_v17 = vld [vmem:[%s30830_s14 + $0x18c0] sm:$0xff]  }
 0x31b   : > { %v789_v11 = vrot.slane %v286_v10, %v30878_v43  ;;  %v782_v12 = vcombine.high %v286_v10, %v286_v10  ;;  %v29347_v10 = vld [vmem:[%s30830_s14 + $0x1900] sm:$0xff]  }
 0x31c   : > { %26644 = vmatpush3.bf16.msra.mxu0 %v29276_v18 }
 0x31d   : > { %26673 = vmatprep.subr.bf16.mxu0 %v29279_v23  ;;  %26666 = vmatpush3.bf16.msra.mxu1 %v29277_v20  ;;  %v797_v15 = vcombine.high %v789_v11, %v789_v11  ;;  %v796_v16 = vrot.slane %v782_v12, %v30878_v43  ;;  %v1827_v18 = vpack.c.bf16 %v789_v11, %v789_v11 }
 0x31e   : > { %26695 = vmatprep.subr.bf16.mxu1 %v29280_v26  ;;  %v29317_v26 = vld [vmem:[%s30830_s14 + $0x18c8] sm:$0xff]  }
 0x31f   : > { %20168 = vmatmul.mubr.bf16.vlgmr.msra.gmra.mrb[88].mxu0 %v1823_v27  ;;  %v1828_v20 = vpack.c.bf16 %v797_v15, %v797_v15  ;;  %v798_v21 = vcombine.high %v796_v16, %v796_v16  ;;  %v1829_v23 = vpack.c.bf16 %v796_v16, %v796_v16  ;;  %v29318_v27 = vld [vmem:[%s30830_s14 + $0x1808] sm:$0xff]  }
 0x320   : > { %26674 = vmatpush3.bf16.msra.mxu0 %v29281_v28  ;;  %20208 = vmatmul.mubr.bf16.vlgmr.msra.gmra.mrb[88].mxu1 %v1825_v32  ;;  %v29319_v28 = vld [vmem:[%s30830_s14 + $0x1888] sm:$0xff]   ;;  %v29323_v32 = vld [vmem:[%s30830_s14 + $0x1890] sm:$0xff]  }
 0x321   : > { %26675 = vmatprep.subr.bf16.mxu0 %v29283_v33  ;;  %26696 = vmatpush3.bf16.msra.mxu1 %v29282_v31  ;;  %v1830_v25 = vpack.c.bf16 %v798_v21, %v798_v21  ;;  %v29322_v31 = vld [vmem:[%s30830_s14 + $0x1810] sm:$0xff]   ;;  %v29324_v33 = vld [vmem:[%s30830_s14 + $0x1858] sm:$0xff]   ;;  %v29349_v15 = vld [vmem:[%s30830_s14 + $0x1948] sm:$0xff]  }
 0x322   : > { %26697 = vmatprep.subr.bf16.mxu1 %v29284_v35  ;;  %20247 = vmatprep.mubr.bf16.mxu0 %v1828_v20  ;;  %v29326_v35 = vld [vmem:[%s30830_s14 + $0x1818] sm:$0xff]   ;;  %v29353_v20 = vld [vmem:[%s30830_s14 + $0x1950] sm:$0xff]  }
 0x323   : > { %20287 = vmatprep.mubr.bf16.mxu1 %v1830_v25  ;;  %v29354_v21 = vld [vmem:[%s30830_s14 + $0x19d0] sm:$0xff]   ;;  %v29358_v25 = vld [vmem:[%s30830_s14 + $0x19d8] sm:$0xff]  }
 0x324   : > { %26676 = vmatpush3.bf16.msra.mxu0 %v29285_v36  ;;  %v29327_v36 = vld [vmem:[%s30830_s14 + $0x1898] sm:$0xff]  }
 0x325   : > { %26677 = vmatprep.subr.bf16.mxu0 %v29287_v38  ;;  %26698 = vmatpush3.bf16.msra.mxu1 %v29286_v37  ;;  %v29328_v37 = vld [vmem:[%s30830_s14 + $0x1860] sm:$0xff]  }
 0x326   : > { %26699 = vmatprep.subr.bf16.mxu1 %v29288_v39  ;;  %v29329_v38 = vld [vmem:[%s30830_s14 + $0x18e0] sm:$0xff]  }
 0x327   : > { %v29330_v39 = vld [vmem:[%s30830_s14 + $0x1820] sm:$0xff]  }
 0x328   : > { %26678 = vmatpush3.bf16.msra.mxu0 %v29289_v40  ;;  %v29331_v40 = vld [vmem:[%s30830_s14 + $0x18a0] sm:$0xff]  }
 0x329   : > { %26679 = vmatprep.subr.bf16.mxu0 %v29291_v42  ;;  %26700 = vmatpush3.bf16.msra.mxu1 %v29290_v41  ;;  %v29332_v41 = vld [vmem:[%s30830_s14 + $0x1868] sm:$0xff]  }
 0x32a   : > { %26701 = vmatprep.subr.bf16.mxu1 %v29292_v44  ;;  %v29333_v44 = vld [vmem:[%s30830_s14 + $0x18e8] sm:$0xff]  }
 0x32c   : > { %26680 = vmatpush3.bf16.msra.mxu0 %v29293_v45 }
 0x32d   : > { %26681 = vmatprep.subr.bf16.mxu0 %v29295_v47  ;;  %26702 = vmatpush3.bf16.msra.mxu1 %v29294_v46  ;;  %v29334_v46 = vld [vmem:[%s30830_s14 + $0x1828] sm:$0xff]  }
 0x32e   : > { %26703 = vmatprep.subr.bf16.mxu1 %v29296_v48 }
 0x330   : > { %26682 = vmatpush3.bf16.msra.mxu0 %v29297_v49 }
 0x331   : > { %26683 = vmatprep.subr.bf16.mxu0 %v29299_v51  ;;  %26704 = vmatpush3.bf16.msra.mxu1 %v29298_v50  ;;  %v29335_v50 = vld [vmem:[%s30830_s14 + $0x18a8] sm:$0xff]   ;;  %v29336_v51 = vld [vmem:[%s30830_s14 + $0x1870] sm:$0xff]  }
 0x332   : > { %v26381_v52 = vpop.f32.mrb[64].mxu0  ;;  %26705 = vmatprep.subr.bf16.mxu1 %v29300_v53 }
 0x333   : > { %v26382_v54 = vpop.f32.mrb[65].mxu0  ;;  %v26403_v56 = vpop.f32.mrb[64].mxu1 }
 0x334   : > { %v26383_v57 = vadd.f32 %v26382_v54, %v26381_v52  ;;  %v26384_v58 = vpop.f32.mrb[66].mxu0  ;;  %v26404_v59 = vpop.f32.mrb[65].mxu1  ;;  %26684 = vmatpush3.bf16.msra.mxu0 %v29301_v55 }
 0x335   : > { %v26385_v61 = vpop.f32.mrb[67].mxu0  ;;  %v26405_v0 = vadd.f32 %v26404_v59, %v26403_v56  ;;  %v26406_v1 = vpop.f32.mrb[66].mxu1  ;;  %26685 = vmatprep.subr.bf16.mxu0 %v29303_v62  ;;  %26706 = vmatpush3.bf16.msra.mxu1 %v29302_v60  ;;  %v29338_v59 = vld [vmem:[%s30830_s14 + $0x1830] sm:$0xff]   ;;  %v29340_v62 = vld [vmem:[%s30830_s14 + $0x1878] sm:$0xff]  }
 0x336   : > { %v19690_v63 = vadd.f32 %v26383_v57, %v31687_v14  ;;  %v26407_v3 = vpop.f32.mrb[67].mxu1  ;;  %26707 = vmatprep.subr.bf16.mxu1 %v29304_v2  ;;  %v29310_v14 = vld [vmem:[%s30830_s14 + $0x17b8] sm:$0xff]   ;;  %v29337_v57 = vld [vmem:[%s30830_s14 + $0x18f0] sm:$0xff]  }
 0x337   : > { %v29339_v61 = vld [vmem:[%s30830_s14 + $0x18b0] sm:$0xff]   ;;  %v287_v1 = vld [vmem:[%s30840_s12 + $0xc0] sm:$0xff] }
 0x338   : > { %v31725_v5 = vadd.f32 %v26405_v0, %v19690_v63  ;;  %26686 = vmatpush3.bf16.msra.mxu0 %v29305_v4  ;;  %v29341_v63 = vld [vmem:[%s30830_s14 + $0x18f8] sm:$0xff]   ;;  %v806_v2 = vrot.slane %v287_v1, %v30878_v43  ;;  %v799_v3 = vcombine.high %v287_v1, %v287_v1  ;;  %v29345_v4 = vld [vmem:[%s30830_s14 + $0x1940] sm:$0xff]  }
 0x339   : > { %26687 = vmatprep.subr.bf16.mxu0 %v29307_v6  ;;  %26708 = vmatpush3.bf16.msra.mxu1 %v29306_v7  ;;  %v29342_v0 = vld [vmem:[%s30830_s14 + $0x1838] sm:$0xff]   ;;  %v29380_v1 = vld [vmem:[%s30830_s14 + $0x1a00] sm:$0xff]  }
 0x33a   : > { %26709 = vmatprep.subr.bf16.mxu1 %v29308_v8  ;;  %v814_v6 = vcombine.high %v806_v2, %v806_v2  ;;  %v813_v7 = vrot.slane %v799_v3, %v30878_v43  ;;  %v29346_v8 = vld [vmem:[%s30830_s14 + $0x19c0] sm:$0xff]  }
 0x33c   : > { %26688 = vmatpush3.bf16.msra.mxu0 %v29309_v9  ;;  %v1831_v9 = vpack.c.bf16 %v806_v2, %v806_v2  ;;  %v1832_v11 = vpack.c.bf16 %v814_v6, %v814_v6  ;;  %v815_v12 = vcombine.high %v813_v7, %v813_v7  ;;  %v29382_v6 = vld [vmem:[%s30830_s14 + $0x1a48] sm:$0xff]  }
 0x33d   : > { %26717 = vmatprep.subr.bf16.mxu0 %v29312_v13  ;;  %26710 = vmatpush3.bf16.msra.mxu1 %v29310_v14  ;;  %v29348_v13 = vld [vmem:[%s30830_s14 + $0x1980] sm:$0xff]   ;;  %v1833_v14 = vpack.c.bf16 %v813_v7, %v813_v7 }
 0x33e   : > { %26739 = vmatprep.subr.bf16.mxu1 %v29313_v17  ;;  %v1834_v16 = vpack.c.bf16 %v815_v12, %v815_v12  ;;  %v29350_v17 = vld [vmem:[%s30830_s14 + $0x19c8] sm:$0xff]   ;;  %v29387_v12 = vld [vmem:[%s30830_s14 + $0x1ad0] sm:$0xff]  }
 0x33f   : > { %20248 = vmatmul.mubr.bf16.vlgmr.msra.gmra.mrb[92].mxu0 %v1827_v18  ;;  %v29351_v18 = vld [vmem:[%s30830_s14 + $0x1908] sm:$0xff]  }
 0x340   : > { %26718 = vmatpush3.bf16.msra.mxu0 %v29314_v19  ;;  %20288 = vmatmul.mubr.bf16.vlgmr.msra.gmra.mrb[92].mxu1 %v1829_v23  ;;  %v29352_v19 = vld [vmem:[%s30830_s14 + $0x1988] sm:$0xff]   ;;  %v29356_v23 = vld [vmem:[%s30830_s14 + $0x1990] sm:$0xff]  }
 0x341   : > { %26719 = vmatprep.subr.bf16.mxu0 %v29316_v24  ;;  %26740 = vmatpush3.bf16.msra.mxu1 %v29315_v22  ;;  %v29355_v22 = vld [vmem:[%s30830_s14 + $0x1910] sm:$0xff]   ;;  %v29357_v24 = vld [vmem:[%s30830_s14 + $0x1958] sm:$0xff]  }
 0x342   : > { %26741 = vmatprep.subr.bf16.mxu1 %v29317_v26  ;;  %20327 = vmatprep.mubr.bf16.mxu0 %v1832_v11  ;;  %v29359_v26 = vld [vmem:[%s30830_s14 + $0x1918] sm:$0xff]   ;;  %v29386_v11 = vld [vmem:[%s30830_s14 + $0x1a50] sm:$0xff]  }
 0x343   : > { %20367 = vmatprep.mubr.bf16.mxu1 %v1834_v16  ;;  %v29391_v16 = vld [vmem:[%s30830_s14 + $0x1ad8] sm:$0xff]  }
 0x344   : > { %26720 = vmatpush3.bf16.msra.mxu0 %v29318_v27  ;;  %v29360_v27 = vld [vmem:[%s30830_s14 + $0x1998] sm:$0xff]  }
 0x345   : > { %26721 = vmatprep.subr.bf16.mxu0 %v29320_v29  ;;  %26742 = vmatpush3.bf16.msra.mxu1 %v29319_v28  ;;  %v29361_v28 = vld [vmem:[%s30830_s14 + $0x1960] sm:$0xff]  }
 0x346   : > { %26743 = vmatprep.subr.bf16.mxu1 %v29321_v30  ;;  %v29362_v29 = vld [vmem:[%s30830_s14 + $0x19e0] sm:$0xff]  }
 0x347   : > { %v29363_v30 = vld [vmem:[%s30830_s14 + $0x1920] sm:$0xff]  }
 0x348   : > { %26722 = vmatpush3.bf16.msra.mxu0 %v29322_v31  ;;  %v29364_v31 = vld [vmem:[%s30830_s14 + $0x19a0] sm:$0xff]  }
 0x349   : > { %26723 = vmatprep.subr.bf16.mxu0 %v29324_v33  ;;  %26744 = vmatpush3.bf16.msra.mxu1 %v29323_v32  ;;  %v29365_v32 = vld [vmem:[%s30830_s14 + $0x1968] sm:$0xff]  }
 0x34a   : > { %26745 = vmatprep.subr.bf16.mxu1 %v29325_v34  ;;  %v29366_v34 = vld [vmem:[%s30830_s14 + $0x19e8] sm:$0xff]  }
 0x34c   : > { %26724 = vmatpush3.bf16.msra.mxu0 %v29326_v35 }
 0x34d   : > { %26725 = vmatprep.subr.bf16.mxu0 %v29328_v37  ;;  %26746 = vmatpush3.bf16.msra.mxu1 %v29327_v36  ;;  %v29367_v36 = vld [vmem:[%s30830_s14 + $0x1928] sm:$0xff]  }
 0x34e   : > { %26747 = vmatprep.subr.bf16.mxu1 %v29329_v38 }
 0x350   : > { %26726 = vmatpush3.bf16.msra.mxu0 %v29330_v39 }
 0x351   : > { %26727 = vmatprep.subr.bf16.mxu0 %v29332_v41  ;;  %26748 = vmatpush3.bf16.msra.mxu1 %v29331_v40  ;;  %v29368_v40 = vld [vmem:[%s30830_s14 + $0x19a8] sm:$0xff]   ;;  %v29369_v41 = vld [vmem:[%s30830_s14 + $0x1970] sm:$0xff]  }
 0x352   : > { %v26425_v42 = vpop.f32.mrb[68].mxu0  ;;  %26749 = vmatprep.subr.bf16.mxu1 %v29333_v44 }
 0x353   : > { %v26426_v45 = vpop.f32.mrb[69].mxu0  ;;  %v26447_v47 = vpop.f32.mrb[68].mxu1 }
 0x354   : > { %v26427_v48 = vadd.f32 %v26426_v45, %v26425_v42  ;;  %v26428_v49 = vpop.f32.mrb[70].mxu0  ;;  %v26448_v52 = vpop.f32.mrb[69].mxu1  ;;  %26728 = vmatpush3.bf16.msra.mxu0 %v29334_v46 }
 0x355   : > { %v26429_v53 = vpop.f32.mrb[71].mxu0  ;;  %v26449_v55 = vadd.f32 %v26448_v52, %v26447_v47  ;;  %v26450_v56 = vpop.f32.mrb[70].mxu1  ;;  %26729 = vmatprep.subr.bf16.mxu0 %v29336_v51  ;;  %26750 = vmatpush3.bf16.msra.mxu1 %v29335_v50  ;;  %v29371_v50 = vld [vmem:[%s30830_s14 + $0x1930] sm:$0xff]  }
 0x356   : > { %v19770_v54 = vadd.f32 %v26427_v48, %v31725_v5  ;;  %v26451_v58 = vpop.f32.mrb[71].mxu1  ;;  %26751 = vmatprep.subr.bf16.mxu1 %v29337_v57  ;;  %v29343_v5 = vld [vmem:[%s30830_s14 + $0x18b8] sm:$0xff]   ;;  %v29370_v48 = vld [vmem:[%s30830_s14 + $0x19f0] sm:$0xff]   ;;  %v288_v56 = vld [vmem:[%s30840_s12 + $0xc8] sm:$0xff] }
 0x357   : > { %v29372_v52 = vld [vmem:[%s30830_s14 + $0x19b0] sm:$0xff]   ;;  %v29373_v53 = vld [vmem:[%s30830_s14 + $0x1978] sm:$0xff]   ;;  %v823_v58 = vrot.slane %v288_v56, %v30878_v43 }
 0x358   : > { %v31763_v60 = vadd.f32 %v26449_v55, %v19770_v54  ;;  %26730 = vmatpush3.bf16.msra.mxu0 %v29338_v59  ;;  %v29374_v54 = vld [vmem:[%s30830_s14 + $0x19f8] sm:$0xff]   ;;  %v816_v59 = vcombine.high %v288_v56, %v288_v56  ;;  %v29413_v56 = vld [vmem:[%s30830_s14 + $0x1b00] sm:$0xff]  }
 0x359   : > { %26731 = vmatprep.subr.bf16.mxu0 %v29340_v62  ;;  %26752 = vmatpush3.bf16.msra.mxu1 %v29339_v61  ;;  %v29375_v55 = vld [vmem:[%s30830_s14 + $0x1938] sm:$0xff]   ;;  %v831_v61 = vcombine.high %v823_v58, %v823_v58 }
 0x35a   : > { %26753 = vmatprep.subr.bf16.mxu1 %v29341_v63  ;;  %v29376_v57 = vld [vmem:[%s30830_s14 + $0x19b8] sm:$0xff]   ;;  %v830_v62 = vrot.slane %v816_v59, %v30878_v43  ;;  %v29379_v63 = vld [vmem:[%s30830_s14 + $0x1ac0] sm:$0xff]  }
 0x35b   : > { %v1836_v2 = vpack.c.bf16 %v831_v61, %v831_v61  ;;  %v29414_v59 = vld [vmem:[%s30830_s14 + $0x1b80] sm:$0xff]   ;;  %v29415_v61 = vld [vmem:[%s30830_s14 + $0x1b48] sm:$0xff]  }
 0x35c   : > { %26732 = vmatpush3.bf16.msra.mxu0 %v29342_v0  ;;  %v1835_v0 = vpack.c.bf16 %v823_v58, %v823_v58  ;;  %v832_v3 = vcombine.high %v830_v62, %v830_v62 }
 0x35d   : > { %26761 = vmatprep.subr.bf16.mxu0 %v29345_v4  ;;  %26754 = vmatpush3.bf16.msra.mxu1 %v29343_v5  ;;  %v29381_v4 = vld [vmem:[%s30830_s14 + $0x1a80] sm:$0xff]   ;;  %v1837_v5 = vpack.c.bf16 %v830_v62, %v830_v62 }
 0x35e   : > { %26783 = vmatprep.subr.bf16.mxu1 %v29346_v8  ;;  %v1838_v7 = vpack.c.bf16 %v832_v3, %v832_v3  ;;  %v29383_v8 = vld [vmem:[%s30830_s14 + $0x1ac8] sm:$0xff]   ;;  %v29420_v3 = vld [vmem:[%s30830_s14 + $0x1bd0] sm:$0xff]  }
 0x35f   : > { %20328 = vmatmul.mubr.bf16.vlgmr.msra.gmra.mrb[96].mxu0 %v1831_v9  ;;  %v29384_v9 = vld [vmem:[%s30830_s14 + $0x1a08] sm:$0xff]  }
 0x360   : > { %26762 = vmatpush3.bf16.msra.mxu0 %v29347_v10  ;;  %20368 = vmatmul.mubr.bf16.vlgmr.msra.gmra.mrb[96].mxu1 %v1833_v14  ;;  %v29385_v10 = vld [vmem:[%s30830_s14 + $0x1a88] sm:$0xff]   ;;  %v29389_v14 = vld [vmem:[%s30830_s14 + $0x1a90] sm:$0xff]  }
 0x361   : > { %26763 = vmatprep.subr.bf16.mxu0 %v29349_v15  ;;  %26784 = vmatpush3.bf16.msra.mxu1 %v29348_v13  ;;  %v29388_v13 = vld [vmem:[%s30830_s14 + $0x1a10] sm:$0xff]   ;;  %v29390_v15 = vld [vmem:[%s30830_s14 + $0x1a58] sm:$0xff]  }
 0x362   : > { %26785 = vmatprep.subr.bf16.mxu1 %v29350_v17  ;;  %20407 = vmatprep.mubr.bf16.mxu0 %v1836_v2  ;;  %v29392_v17 = vld [vmem:[%s30830_s14 + $0x1a18] sm:$0xff]   ;;  %v29419_v2 = vld [vmem:[%s30830_s14 + $0x1b50] sm:$0xff]  }
 0x363   : > { %20447 = vmatprep.mubr.bf16.mxu1 %v1838_v7  ;;  %v29424_v7 = vld [vmem:[%s30830_s14 + $0x1bd8] sm:$0xff]  }
 0x364   : > { %26764 = vmatpush3.bf16.msra.mxu0 %v29351_v18  ;;  %v29393_v18 = vld [vmem:[%s30830_s14 + $0x1a98] sm:$0xff]  }
 0x365   : > { %26765 = vmatprep.subr.bf16.mxu0 %v29353_v20  ;;  %26786 = vmatpush3.bf16.msra.mxu1 %v29352_v19  ;;  %v29394_v19 = vld [vmem:[%s30830_s14 + $0x1a60] sm:$0xff]  }
 0x366   : > { %26787 = vmatprep.subr.bf16.mxu1 %v29354_v21  ;;  %v29395_v20 = vld [vmem:[%s30830_s14 + $0x1ae0] sm:$0xff]  }
 0x367   : > { %v29396_v21 = vld [vmem:[%s30830_s14 + $0x1a20] sm:$0xff]  }
 0x368   : > { %26766 = vmatpush3.bf16.msra.mxu0 %v29355_v22  ;;  %v29397_v22 = vld [vmem:[%s30830_s14 + $0x1aa0] sm:$0xff]  }
 0x369   : > { %26767 = vmatprep.subr.bf16.mxu0 %v29357_v24  ;;  %26788 = vmatpush3.bf16.msra.mxu1 %v29356_v23  ;;  %v29398_v23 = vld [vmem:[%s30830_s14 + $0x1a68] sm:$0xff]  }
 0x36a   : > { %26789 = vmatprep.subr.bf16.mxu1 %v29358_v25  ;;  %v29399_v25 = vld [vmem:[%s30830_s14 + $0x1ae8] sm:$0xff]  }
 0x36c   : > { %26768 = vmatpush3.bf16.msra.mxu0 %v29359_v26 }
 0x36d   : > { %26769 = vmatprep.subr.bf16.mxu0 %v29361_v28  ;;  %26790 = vmatpush3.bf16.msra.mxu1 %v29360_v27  ;;  %v29400_v27 = vld [vmem:[%s30830_s14 + $0x1a28] sm:$0xff]  }
 0x36e   : > { %26791 = vmatprep.subr.bf16.mxu1 %v29362_v29 }
 0x370   : > { %26770 = vmatpush3.bf16.msra.mxu0 %v29363_v30 }
 0x371   : > { %26771 = vmatprep.subr.bf16.mxu0 %v29365_v32  ;;  %26792 = vmatpush3.bf16.msra.mxu1 %v29364_v31  ;;  %v29401_v32 = vld [vmem:[%s30830_s14 + $0x1aa8] sm:$0xff]  }
 0x372   : > { %v26469_v33 = vpop.f32.mrb[72].mxu0  ;;  %26793 = vmatprep.subr.bf16.mxu1 %v29366_v34  ;;  %v29402_v34 = vld [vmem:[%s30830_s14 + $0x1a70] sm:$0xff]  }
 0x373   : > { %v26470_v35 = vpop.f32.mrb[73].mxu0  ;;  %v26491_v37 = vpop.f32.mrb[72].mxu1 }
 0x374   : > { %v26471_v38 = vadd.f32 %v26470_v35, %v26469_v33  ;;  %v26472_v39 = vpop.f32.mrb[74].mxu0  ;;  %v26492_v42 = vpop.f32.mrb[73].mxu1  ;;  %26772 = vmatpush3.bf16.msra.mxu0 %v29367_v36 }
 0x375   : > { %v26473_v44 = vpop.f32.mrb[75].mxu0  ;;  %v26493_v46 = vadd.f32 %v26492_v42, %v26491_v37  ;;  %v26494_v47 = vpop.f32.mrb[74].mxu1  ;;  %26773 = vmatprep.subr.bf16.mxu0 %v29369_v41  ;;  %26794 = vmatpush3.bf16.msra.mxu1 %v29368_v40  ;;  %v29404_v40 = vld [vmem:[%s30830_s14 + $0x1a30] sm:$0xff]   ;;  %v29406_v42 = vld [vmem:[%s30830_s14 + $0x1a78] sm:$0xff]  }
 0x376   : > { %v19850_v45 = vadd.f32 %v26471_v38, %v31763_v60  ;;  %v26495_v49 = vpop.f32.mrb[75].mxu1  ;;  %26795 = vmatprep.subr.bf16.mxu1 %v29370_v48  ;;  %v29378_v60 = vld [vmem:[%s30830_s14 + $0x1a40] sm:$0xff]   ;;  %v29403_v38 = vld [vmem:[%s30830_s14 + $0x1af0] sm:$0xff]  }
 0x377   : > { %v29405_v44 = vld [vmem:[%s30830_s14 + $0x1ab0] sm:$0xff]  }
 0x378   : > { %v31801_v51 = vadd.f32 %v26493_v46, %v19850_v45  ;;  %26774 = vmatpush3.bf16.msra.mxu0 %v29371_v50  ;;  %v29407_v45 = vld [vmem:[%s30830_s14 + $0x1af8] sm:$0xff]   ;;  %v289_v47 = vld [vmem:[%s30840_s12 + $0xd0] sm:$0xff]  ;;  %v29411_v50 = vld [vmem:[%s30830_s14 + $0x1b40] sm:$0xff]  }
 0x379   : > { %26775 = vmatprep.subr.bf16.mxu0 %v29373_v53  ;;  %26796 = vmatpush3.bf16.msra.mxu1 %v29372_v52  ;;  %v29408_v46 = vld [vmem:[%s30830_s14 + $0x1a38] sm:$0xff]   ;;  %v840_v48 = vrot.slane %v289_v47, %v30878_v43  ;;  %v833_v49 = vcombine.high %v289_v47, %v289_v47  ;;  %v29446_v47 = vld [vmem:[%s30830_s14 + $0x1c00] sm:$0xff]  }
 0x37a   : > { %26797 = vmatprep.subr.bf16.mxu1 %v29374_v54  ;;  %v29412_v54 = vld [vmem:[%s30830_s14 + $0x1bc0] sm:$0xff]  }
 0x37b   : > { %v848_v52 = vcombine.high %v840_v48, %v840_v48  ;;  %v847_v53 = vrot.slane %v833_v49, %v30878_v43 }
 0x37c   : > { %26776 = vmatpush3.bf16.msra.mxu0 %v29375_v55  ;;  %v1839_v55 = vpack.c.bf16 %v840_v48, %v840_v48 }
 0x37d   : > { %26805 = vmatprep.subr.bf16.mxu0 %v29378_v60  ;;  %26798 = vmatpush3.bf16.msra.mxu1 %v29376_v57  ;;  %v1840_v57 = vpack.c.bf16 %v848_v52, %v848_v52  ;;  %v849_v58 = vcombine.high %v847_v53, %v847_v53  ;;  %v1841_v60 = vpack.c.bf16 %v847_v53, %v847_v53  ;;  %v29448_v52 = vld [vmem:[%s30830_s14 + $0x1c48] sm:$0xff]  }
 0x37e   : > { %26827 = vmatprep.subr.bf16.mxu1 %v29379_v63  ;;  %v29416_v63 = vld [vmem:[%s30830_s14 + $0x1bc8] sm:$0xff]  }
 0x37f   : > { %20408 = vmatmul.mubr.bf16.vlgmr.msra.gmra.mrb[100].mxu0 %v1835_v0  ;;  %v1842_v62 = vpack.c.bf16 %v849_v58, %v849_v58  ;;  %v29417_v0 = vld [vmem:[%s30830_s14 + $0x1b08] sm:$0xff]   ;;  %v29453_v58 = vld [vmem:[%s30830_s14 + $0x1cd0] sm:$0xff]  }
 0x380   : > { %26806 = vmatpush3.bf16.msra.mxu0 %v29380_v1  ;;  %20448 = vmatmul.mubr.bf16.vlgmr.msra.gmra.mrb[100].mxu1 %v1837_v5  ;;  %v29418_v1 = vld [vmem:[%s30830_s14 + $0x1b88] sm:$0xff]   ;;  %v29422_v5 = vld [vmem:[%s30830_s14 + $0x1b90] sm:$0xff]  }
 0x381   : > { %26807 = vmatprep.subr.bf16.mxu0 %v29382_v6  ;;  %26828 = vmatpush3.bf16.msra.mxu1 %v29381_v4  ;;  %v29421_v4 = vld [vmem:[%s30830_s14 + $0x1b10] sm:$0xff]   ;;  %v29423_v6 = vld [vmem:[%s30830_s14 + $0x1b58] sm:$0xff]  }
 0x382   : > { %26829 = vmatprep.subr.bf16.mxu1 %v29383_v8  ;;  %20487 = vmatprep.mubr.bf16.mxu0 %v1840_v57  ;;  %v29425_v8 = vld [vmem:[%s30830_s14 + $0x1b18] sm:$0xff]   ;;  %v29452_v57 = vld [vmem:[%s30830_s14 + $0x1c50] sm:$0xff]  }
 0x383   : > { %20527 = vmatprep.mubr.bf16.mxu1 %v1842_v62  ;;  %v29457_v62 = vld [vmem:[%s30830_s14 + $0x1cd8] sm:$0xff]  }
 0x384   : > { %26808 = vmatpush3.bf16.msra.mxu0 %v29384_v9  ;;  %v29426_v9 = vld [vmem:[%s30830_s14 + $0x1b98] sm:$0xff]  }
 0x385   : > { %26809 = vmatprep.subr.bf16.mxu0 %v29386_v11  ;;  %26830 = vmatpush3.bf16.msra.mxu1 %v29385_v10  ;;  %v29427_v10 = vld [vmem:[%s30830_s14 + $0x1b60] sm:$0xff]  }
 0x386   : > { %26831 = vmatprep.subr.bf16.mxu1 %v29387_v12  ;;  %v29428_v11 = vld [vmem:[%s30830_s14 + $0x1be0] sm:$0xff]  }
 0x387   : > { %v29429_v12 = vld [vmem:[%s30830_s14 + $0x1b20] sm:$0xff]  }
 0x388   : > { %26810 = vmatpush3.bf16.msra.mxu0 %v29388_v13  ;;  %v29430_v13 = vld [vmem:[%s30830_s14 + $0x1ba0] sm:$0xff]  }
 0x389   : > { %26811 = vmatprep.subr.bf16.mxu0 %v29390_v15  ;;  %26832 = vmatpush3.bf16.msra.mxu1 %v29389_v14  ;;  %v29431_v14 = vld [vmem:[%s30830_s14 + $0x1b68] sm:$0xff]  }
 0x38a   : > { %26833 = vmatprep.subr.bf16.mxu1 %v29391_v16  ;;  %v29432_v16 = vld [vmem:[%s30830_s14 + $0x1be8] sm:$0xff]  }
 0x38c   : > { %26812 = vmatpush3.bf16.msra.mxu0 %v29392_v17 }
 0x38d   : > { %26813 = vmatprep.subr.bf16.mxu0 %v29394_v19  ;;  %26834 = vmatpush3.bf16.msra.mxu1 %v29393_v18  ;;  %v29433_v18 = vld [vmem:[%s30830_s14 + $0x1b28] sm:$0xff]  }
 0x38e   : > { %26835 = vmatprep.subr.bf16.mxu1 %v29395_v20 }
 0x390   : > { %26814 = vmatpush3.bf16.msra.mxu0 %v29396_v21 }
 0x391   : > { %26815 = vmatprep.subr.bf16.mxu0 %v29398_v23  ;;  %26836 = vmatpush3.bf16.msra.mxu1 %v29397_v22  ;;  %v29434_v22 = vld [vmem:[%s30830_s14 + $0x1ba8] sm:$0xff]   ;;  %v29435_v23 = vld [vmem:[%s30830_s14 + $0x1b70] sm:$0xff]  }
 0x392   : > { %v26513_v24 = vpop.f32.mrb[76].mxu0  ;;  %26837 = vmatprep.subr.bf16.mxu1 %v29399_v25 }
 0x393   : > { %v26514_v26 = vpop.f32.mrb[77].mxu0  ;;  %v26535_v28 = vpop.f32.mrb[76].mxu1 }
 0x394   : > { %v26515_v29 = vadd.f32 %v26514_v26, %v26513_v24  ;;  %v26516_v30 = vpop.f32.mrb[78].mxu0  ;;  %v26536_v31 = vpop.f32.mrb[77].mxu1  ;;  %26816 = vmatpush3.bf16.msra.mxu0 %v29400_v27 }
 0x395   : > { %v26517_v33 = vpop.f32.mrb[79].mxu0  ;;  %v26537_v36 = vadd.f32 %v26536_v31, %v26535_v28  ;;  %v26538_v37 = vpop.f32.mrb[78].mxu1  ;;  %26817 = vmatprep.subr.bf16.mxu0 %v29402_v34  ;;  %26838 = vmatpush3.bf16.msra.mxu1 %v29401_v32  ;;  %v29437_v31 = vld [vmem:[%s30830_s14 + $0x1b30] sm:$0xff]   ;;  %v29439_v34 = vld [vmem:[%s30830_s14 + $0x1b78] sm:$0xff]  }
 0x396   : > { %v19930_v35 = vadd.f32 %v26515_v29, %v31801_v51  ;;  %v26539_v39 = vpop.f32.mrb[79].mxu1  ;;  %26839 = vmatprep.subr.bf16.mxu1 %v29403_v38  ;;  %v29409_v51 = vld [vmem:[%s30830_s14 + $0x1ab8] sm:$0xff]   ;;  %v29436_v29 = vld [vmem:[%s30830_s14 + $0x1bf0] sm:$0xff]  }
 0x397   : > { %v29438_v33 = vld [vmem:[%s30830_s14 + $0x1bb0] sm:$0xff]  }
 0x398   : > { %v31839_v41 = vadd.f32 %v26537_v36, %v19930_v35  ;;  %26818 = vmatpush3.bf16.msra.mxu0 %v29404_v40  ;;  %v29440_v35 = vld [vmem:[%s30830_s14 + $0x1bf8] sm:$0xff]   ;;  %v29444_v40 = vld [vmem:[%s30830_s14 + $0x1c40] sm:$0xff]  }
 0x399   : > { %26819 = vmatprep.subr.bf16.mxu0 %v29406_v42  ;;  %26840 = vmatpush3.bf16.msra.mxu1 %v29405_v44  ;;  %v29441_v36 = vld [vmem:[%s30830_s14 + $0x1b38] sm:$0xff]  }
 0x39a   : > { %26841 = vmatprep.subr.bf16.mxu1 %v29407_v45  ;;  %v290_v37 = vld [vmem:[%s30840_s12 + $0xd8] sm:$0xff]  ;;  %v29445_v45 = vld [vmem:[%s30830_s14 + $0x1cc0] sm:$0xff]  }
 0x39b   : > { %v857_v38 = vrot.slane %v290_v37, %v30878_v43  ;;  %v850_v39 = vcombine.high %v290_v37, %v290_v37  ;;  %v29479_v37 = vld [vmem:[%s30830_s14 + $0x1d00] sm:$0xff]  }
 0x39c   : > { %26820 = vmatpush3.bf16.msra.mxu0 %v29408_v46 }
 0x39d   : > { %26849 = vmatprep.subr.bf16.mxu0 %v29411_v50  ;;  %26842 = vmatpush3.bf16.msra.mxu1 %v29409_v51  ;;  %v865_v42 = vcombine.high %v857_v38, %v857_v38  ;;  %v864_v44 = vrot.slane %v850_v39, %v30878_v43  ;;  %v1843_v46 = vpack.c.bf16 %v857_v38, %v857_v38  ;;  %v29447_v50 = vld [vmem:[%s30830_s14 + $0x1c80] sm:$0xff]  }
 0x39e   : > { %26871 = vmatprep.subr.bf16.mxu1 %v29412_v54  ;;  %v29449_v54 = vld [vmem:[%s30830_s14 + $0x1cc8] sm:$0xff]  }
 0x39f   : > { %20488 = vmatmul.mubr.bf16.vlgmr.msra.gmra.mrb[104].mxu0 %v1839_v55  ;;  %v1844_v48 = vpack.c.bf16 %v865_v42, %v865_v42  ;;  %v866_v49 = vcombine.high %v864_v44, %v864_v44  ;;  %v1845_v51 = vpack.c.bf16 %v864_v44, %v864_v44  ;;  %v29450_v55 = vld [vmem:[%s30830_s14 + $0x1c08] sm:$0xff]  }
 0x3a0   : > { %26850 = vmatpush3.bf16.msra.mxu0 %v29413_v56  ;;  %20528 = vmatmul.mubr.bf16.vlgmr.msra.gmra.mrb[104].mxu1 %v1841_v60  ;;  %v29451_v56 = vld [vmem:[%s30830_s14 + $0x1c88] sm:$0xff]   ;;  %v29455_v60 = vld [vmem:[%s30830_s14 + $0x1c90] sm:$0xff]  }
 0x3a1   : > { %26851 = vmatprep.subr.bf16.mxu0 %v29415_v61  ;;  %26872 = vmatpush3.bf16.msra.mxu1 %v29414_v59  ;;  %v1846_v53 = vpack.c.bf16 %v866_v49, %v866_v49  ;;  %v29454_v59 = vld [vmem:[%s30830_s14 + $0x1c10] sm:$0xff]   ;;  %v29456_v61 = vld [vmem:[%s30830_s14 + $0x1c58] sm:$0xff]   ;;  %v29481_v42 = vld [vmem:[%s30830_s14 + $0x1d48] sm:$0xff]  }
 0x3a2   : > { %26873 = vmatprep.subr.bf16.mxu1 %v29416_v63  ;;  %20567 = vmatprep.mubr.bf16.mxu0 %v1844_v48  ;;  %v29458_v63 = vld [vmem:[%s30830_s14 + $0x1c18] sm:$0xff]   ;;  %v29485_v48 = vld [vmem:[%s30830_s14 + $0x1d50] sm:$0xff]  }
 0x3a3   : > { %20607 = vmatprep.mubr.bf16.mxu1 %v1846_v53  ;;  %v29486_v49 = vld [vmem:[%s30830_s14 + $0x1dd0] sm:$0xff]   ;;  %v29490_v53 = vld [vmem:[%s30830_s14 + $0x1dd8] sm:$0xff]  }
 0x3a4   : > { %26852 = vmatpush3.bf16.msra.mxu0 %v29417_v0  ;;  %v29459_v0 = vld [vmem:[%s30830_s14 + $0x1c98] sm:$0xff]  }
 0x3a5   : > { %26853 = vmatprep.subr.bf16.mxu0 %v29419_v2  ;;  %26874 = vmatpush3.bf16.msra.mxu1 %v29418_v1  ;;  %v29460_v1 = vld [vmem:[%s30830_s14 + $0x1c60] sm:$0xff]  }
 0x3a6   : > { %26875 = vmatprep.subr.bf16.mxu1 %v29420_v3  ;;  %v29461_v2 = vld [vmem:[%s30830_s14 + $0x1ce0] sm:$0xff]  }
 0x3a7   : > { %v29462_v3 = vld [vmem:[%s30830_s14 + $0x1c20] sm:$0xff]  }
 0x3a8   : > { %26854 = vmatpush3.bf16.msra.mxu0 %v29421_v4  ;;  %v29463_v4 = vld [vmem:[%s30830_s14 + $0x1ca0] sm:$0xff]  }
 0x3a9   : > { %26855 = vmatprep.subr.bf16.mxu0 %v29423_v6  ;;  %26876 = vmatpush3.bf16.msra.mxu1 %v29422_v5  ;;  %v29464_v5 = vld [vmem:[%s30830_s14 + $0x1c68] sm:$0xff]  }
 0x3aa   : > { %26877 = vmatprep.subr.bf16.mxu1 %v29424_v7  ;;  %v29465_v7 = vld [vmem:[%s30830_s14 + $0x1ce8] sm:$0xff]  }
 0x3ac   : > { %26856 = vmatpush3.bf16.msra.mxu0 %v29425_v8 }
 0x3ad   : > { %26857 = vmatprep.subr.bf16.mxu0 %v29427_v10  ;;  %26878 = vmatpush3.bf16.msra.mxu1 %v29426_v9  ;;  %v29466_v9 = vld [vmem:[%s30830_s14 + $0x1c28] sm:$0xff]  }
 0x3ae   : > { %26879 = vmatprep.subr.bf16.mxu1 %v29428_v11 }
 0x3b0   : > { %26858 = vmatpush3.bf16.msra.mxu0 %v29429_v12 }
 0x3b1   : > { %26859 = vmatprep.subr.bf16.mxu0 %v29431_v14  ;;  %26880 = vmatpush3.bf16.msra.mxu1 %v29430_v13  ;;  %v29467_v13 = vld [vmem:[%s30830_s14 + $0x1ca8] sm:$0xff]   ;;  %v29468_v14 = vld [vmem:[%s30830_s14 + $0x1c70] sm:$0xff]  }
 0x3b2   : > { %v26557_v15 = vpop.f32.mrb[80].mxu0  ;;  %26881 = vmatprep.subr.bf16.mxu1 %v29432_v16 }
 0x3b3   : > { %v26558_v17 = vpop.f32.mrb[81].mxu0  ;;  %v26579_v19 = vpop.f32.mrb[80].mxu1 }
 0x3b4   : > { %v26559_v20 = vadd.f32 %v26558_v17, %v26557_v15  ;;  %v26560_v21 = vpop.f32.mrb[82].mxu0  ;;  %v26580_v24 = vpop.f32.mrb[81].mxu1  ;;  %26860 = vmatpush3.bf16.msra.mxu0 %v29433_v18 }
 0x3b5   : > { %v26561_v25 = vpop.f32.mrb[83].mxu0  ;;  %v26581_v27 = vadd.f32 %v26580_v24, %v26579_v19  ;;  %v26582_v28 = vpop.f32.mrb[82].mxu1  ;;  %26861 = vmatprep.subr.bf16.mxu0 %v29435_v23  ;;  %26882 = vmatpush3.bf16.msra.mxu1 %v29434_v22  ;;  %v29470_v22 = vld [vmem:[%s30830_s14 + $0x1c30] sm:$0xff]  }
 0x3b6   : > { %v20010_v26 = vadd.f32 %v26559_v20, %v31839_v41  ;;  %v26583_v30 = vpop.f32.mrb[83].mxu1  ;;  %26883 = vmatprep.subr.bf16.mxu1 %v29436_v29  ;;  %v29442_v41 = vld [vmem:[%s30830_s14 + $0x1bb8] sm:$0xff]   ;;  %v29469_v20 = vld [vmem:[%s30830_s14 + $0x1cf0] sm:$0xff]  }
 0x3b7   : > { %v29471_v24 = vld [vmem:[%s30830_s14 + $0x1cb0] sm:$0xff]   ;;  %v29472_v25 = vld [vmem:[%s30830_s14 + $0x1c78] sm:$0xff]  }
 0x3b8   : > { %v31877_v32 = vadd.f32 %v26581_v27, %v20010_v26  ;;  %26862 = vmatpush3.bf16.msra.mxu0 %v29437_v31  ;;  %v29473_v26 = vld [vmem:[%s30830_s14 + $0x1cf8] sm:$0xff]  }
 0x3b9   : > { %26863 = vmatprep.subr.bf16.mxu0 %v29439_v34  ;;  %26884 = vmatpush3.bf16.msra.mxu1 %v29438_v33  ;;  %v29474_v27 = vld [vmem:[%s30830_s14 + $0x1c38] sm:$0xff]  }
 0x3ba   : > { %26885 = vmatprep.subr.bf16.mxu1 %v29440_v35  ;;  %v291_v28 = vld [vmem:[%s30840_s12 + $0xe0] sm:$0xff] }
 0x3bb   : > { %v29475_v29 = vld [vmem:[%s30830_s14 + $0x1cb8] sm:$0xff]   ;;  %v874_v30 = vrot.slane %v291_v28, %v30878_v43  ;;  %v867_v31 = vcombine.high %v291_v28, %v291_v28  ;;  %v29478_v35 = vld [vmem:[%s30830_s14 + $0x1dc0] sm:$0xff]  }
 0x3bc   : > { %26864 = vmatpush3.bf16.msra.mxu0 %v29441_v36  ;;  %v29512_v28 = vld [vmem:[%s30830_s14 + $0x1e00] sm:$0xff]  }
 0x3bd   : > { %26893 = vmatprep.subr.bf16.mxu0 %v29444_v40  ;;  %26886 = vmatpush3.bf16.msra.mxu1 %v29442_v41  ;;  %v882_v33 = vcombine.high %v874_v30, %v874_v30  ;;  %v881_v34 = vrot.slane %v867_v31, %v30878_v43  ;;  %v1847_v36 = vpack.c.bf16 %v874_v30, %v874_v30  ;;  %v29480_v40 = vld [vmem:[%s30830_s14 + $0x1d80] sm:$0xff]  }
 0x3be   : > { %26915 = vmatprep.subr.bf16.mxu1 %v29445_v45  ;;  %v29482_v45 = vld [vmem:[%s30830_s14 + $0x1dc8] sm:$0xff]   ;;  %v29513_v31 = vld [vmem:[%s30830_s14 + $0x1e80] sm:$0xff]  }
 0x3bf   : > { %20568 = vmatmul.mubr.bf16.vlgmr.msra.gmra.mrb[108].mxu0 %v1843_v46  ;;  %v1848_v38 = vpack.c.bf16 %v882_v33, %v882_v33  ;;  %v883_v39 = vcombine.high %v881_v34, %v881_v34  ;;  %v1849_v41 = vpack.c.bf16 %v881_v34, %v881_v34  ;;  %v29483_v46 = vld [vmem:[%s30830_s14 + $0x1d08] sm:$0xff]  }
 0x3c0   : > { %26894 = vmatpush3.bf16.msra.mxu0 %v29446_v47  ;;  %20608 = vmatmul.mubr.bf16.vlgmr.msra.gmra.mrb[108].mxu1 %v1845_v51  ;;  %v29484_v47 = vld [vmem:[%s30830_s14 + $0x1d88] sm:$0xff]   ;;  %v29488_v51 = vld [vmem:[%s30830_s14 + $0x1d90] sm:$0xff]  }
 0x3c1   : > { %26895 = vmatprep.subr.bf16.mxu0 %v29448_v52  ;;  %26916 = vmatpush3.bf16.msra.mxu1 %v29447_v50  ;;  %v1850_v44 = vpack.c.bf16 %v883_v39, %v883_v39  ;;  %v29487_v50 = vld [vmem:[%s30830_s14 + $0x1d10] sm:$0xff]   ;;  %v29489_v52 = vld [vmem:[%s30830_s14 + $0x1d58] sm:$0xff]   ;;  %v29514_v33 = vld [vmem:[%s30830_s14 + $0x1e48] sm:$0xff]  }
 0x3c2   : > { %26917 = vmatprep.subr.bf16.mxu1 %v29449_v54  ;;  %20647 = vmatprep.mubr.bf16.mxu0 %v1848_v38  ;;  %v29491_v54 = vld [vmem:[%s30830_s14 + $0x1d18] sm:$0xff]   ;;  %v29518_v38 = vld [vmem:[%s30830_s14 + $0x1e50] sm:$0xff]  }
 0x3c3   : > { %20687 = vmatprep.mubr.bf16.mxu1 %v1850_v44  ;;  %v29519_v39 = vld [vmem:[%s30830_s14 + $0x1ed0] sm:$0xff]   ;;  %v29523_v44 = vld [vmem:[%s30830_s14 + $0x1ed8] sm:$0xff]  }
 0x3c4   : > { %26896 = vmatpush3.bf16.msra.mxu0 %v29450_v55  ;;  %v29492_v55 = vld [vmem:[%s30830_s14 + $0x1d98] sm:$0xff]  }
 0x3c5   : > { %26897 = vmatprep.subr.bf16.mxu0 %v29452_v57  ;;  %26918 = vmatpush3.bf16.msra.mxu1 %v29451_v56  ;;  %v29493_v56 = vld [vmem:[%s30830_s14 + $0x1d60] sm:$0xff]  }
 0x3c6   : > { %26919 = vmatprep.subr.bf16.mxu1 %v29453_v58  ;;  %v29494_v57 = vld [vmem:[%s30830_s14 + $0x1de0] sm:$0xff]  }
 0x3c7   : > { %v29495_v58 = vld [vmem:[%s30830_s14 + $0x1d20] sm:$0xff]  }
 0x3c8   : > { %26898 = vmatpush3.bf16.msra.mxu0 %v29454_v59  ;;  %v29496_v59 = vld [vmem:[%s30830_s14 + $0x1da0] sm:$0xff]  }
 0x3c9   : > { %26899 = vmatprep.subr.bf16.mxu0 %v29456_v61  ;;  %26920 = vmatpush3.bf16.msra.mxu1 %v29455_v60  ;;  %v29497_v60 = vld [vmem:[%s30830_s14 + $0x1d68] sm:$0xff]  }
 0x3ca   : > { %26921 = vmatprep.subr.bf16.mxu1 %v29457_v62  ;;  %v29498_v62 = vld [vmem:[%s30830_s14 + $0x1de8] sm:$0xff]  }
 0x3cc   : > { %26900 = vmatpush3.bf16.msra.mxu0 %v29458_v63 }
 0x3cd   : > { %26901 = vmatprep.subr.bf16.mxu0 %v29460_v1  ;;  %26922 = vmatpush3.bf16.msra.mxu1 %v29459_v0  ;;  %v29499_v0 = vld [vmem:[%s30830_s14 + $0x1d28] sm:$0xff]  }
 0x3ce   : > { %26923 = vmatprep.subr.bf16.mxu1 %v29461_v2 }
 0x3d0   : > { %26902 = vmatpush3.bf16.msra.mxu0 %v29462_v3 }
 0x3d1   : > { %26903 = vmatprep.subr.bf16.mxu0 %v29464_v5  ;;  %26924 = vmatpush3.bf16.msra.mxu1 %v29463_v4  ;;  %v29500_v5 = vld [vmem:[%s30830_s14 + $0x1da8] sm:$0xff]  }
 0x3d2   : > { %v26601_v6 = vpop.f32.mrb[84].mxu0  ;;  %26925 = vmatprep.subr.bf16.mxu1 %v29465_v7  ;;  %v29501_v7 = vld [vmem:[%s30830_s14 + $0x1d70] sm:$0xff]  }
 0x3d3   : > { %v26602_v8 = vpop.f32.mrb[85].mxu0  ;;  %v26623_v10 = vpop.f32.mrb[84].mxu1 }
 0x3d4   : > { %v26603_v11 = vadd.f32 %v26602_v8, %v26601_v6  ;;  %v26604_v12 = vpop.f32.mrb[86].mxu0  ;;  %v26624_v15 = vpop.f32.mrb[85].mxu1  ;;  %26904 = vmatpush3.bf16.msra.mxu0 %v29466_v9 }
 0x3d5   : > { %v26605_v16 = vpop.f32.mrb[87].mxu0  ;;  %v26625_v18 = vadd.f32 %v26624_v15, %v26623_v10  ;;  %v26626_v19 = vpop.f32.mrb[86].mxu1  ;;  %26905 = vmatprep.subr.bf16.mxu0 %v29468_v14  ;;  %26926 = vmatpush3.bf16.msra.mxu1 %v29467_v13  ;;  %v29503_v13 = vld [vmem:[%s30830_s14 + $0x1d30] sm:$0xff]   ;;  %v29505_v15 = vld [vmem:[%s30830_s14 + $0x1d78] sm:$0xff]  }
 0x3d6   : > { %v20090_v17 = vadd.f32 %v26603_v11, %v31877_v32  ;;  %v26627_v21 = vpop.f32.mrb[87].mxu1  ;;  %26927 = vmatprep.subr.bf16.mxu1 %v29469_v20  ;;  %v29477_v32 = vld [vmem:[%s30830_s14 + $0x1d40] sm:$0xff]   ;;  %v29502_v11 = vld [vmem:[%s30830_s14 + $0x1df0] sm:$0xff]  }
 0x3d7   : > { %v29504_v16 = vld [vmem:[%s30830_s14 + $0x1db0] sm:$0xff]   ;;  %v292_v19 = vld [vmem:[%s30840_s12 + $0xe8] sm:$0xff] }
 0x3d8   : > { %v31915_v23 = vadd.f32 %v26625_v18, %v20090_v17  ;;  %26906 = vmatpush3.bf16.msra.mxu0 %v29470_v22  ;;  %v29506_v17 = vld [vmem:[%s30830_s14 + $0x1df8] sm:$0xff]   ;;  %v891_v20 = vrot.slane %v292_v19, %v30878_v43  ;;  %v884_v21 = vcombine.high %v292_v19, %v292_v19  ;;  %v29510_v22 = vld [vmem:[%s30830_s14 + $0x1e40] sm:$0xff]  }
 0x3d9   : > { %26907 = vmatprep.subr.bf16.mxu0 %v29472_v25  ;;  %26928 = vmatpush3.bf16.msra.mxu1 %v29471_v24  ;;  %v29507_v18 = vld [vmem:[%s30830_s14 + $0x1d38] sm:$0xff]   ;;  %v29545_v19 = vld [vmem:[%s30830_s14 + $0x1f00] sm:$0xff]  }
 0x3da   : > { %26929 = vmatprep.subr.bf16.mxu1 %v29473_v26  ;;  %v899_v24 = vcombine.high %v891_v20, %v891_v20  ;;  %v898_v25 = vrot.slane %v884_v21, %v30878_v43  ;;  %v29511_v26 = vld [vmem:[%s30830_s14 + $0x1ec0] sm:$0xff]  }
 0x3dc   : > { %26908 = vmatpush3.bf16.msra.mxu0 %v29474_v27  ;;  %v1851_v27 = vpack.c.bf16 %v891_v20, %v891_v20  ;;  %v900_v30 = vcombine.high %v898_v25, %v898_v25 }
 0x3dd   : > { %26937 = vmatprep.subr.bf16.mxu0 %v29477_v32  ;;  %26930 = vmatpush3.bf16.msra.mxu1 %v29475_v29  ;;  %v1852_v29 = vpack.c.bf16 %v899_v24, %v899_v24  ;;  %v1853_v32 = vpack.c.bf16 %v898_v25, %v898_v25  ;;  %v29547_v24 = vld [vmem:[%s30830_s14 + $0x1f48] sm:$0xff]  }
 0x3de   : > { %26959 = vmatprep.subr.bf16.mxu1 %v29478_v35  ;;  %v1854_v34 = vpack.c.bf16 %v900_v30, %v900_v30  ;;  %v29515_v35 = vld [vmem:[%s30830_s14 + $0x1ec8] sm:$0xff]   ;;  %v29552_v30 = vld [vmem:[%s30830_s14 + $0x1fd0] sm:$0xff]  }
 0x3df   : > { %20648 = vmatmul.mubr.bf16.vlgmr.msra.gmra.mrb[112].mxu0 %v1847_v36  ;;  %v29516_v36 = vld [vmem:[%s30830_s14 + $0x1e08] sm:$0xff]  }
 0x3e0   : > { %26938 = vmatpush3.bf16.msra.mxu0 %v29479_v37  ;;  %20688 = vmatmul.mubr.bf16.vlgmr.msra.gmra.mrb[112].mxu1 %v1849_v41  ;;  %v29517_v37 = vld [vmem:[%s30830_s14 + $0x1e88] sm:$0xff]   ;;  %v29521_v41 = vld [vmem:[%s30830_s14 + $0x1e90] sm:$0xff]  }
 0x3e1   : > { %26939 = vmatprep.subr.bf16.mxu0 %v29481_v42  ;;  %26960 = vmatpush3.bf16.msra.mxu1 %v29480_v40  ;;  %v29520_v40 = vld [vmem:[%s30830_s14 + $0x1e10] sm:$0xff]   ;;  %v29522_v42 = vld [vmem:[%s30830_s14 + $0x1e58] sm:$0xff]  }
 0x3e2   : > { %26961 = vmatprep.subr.bf16.mxu1 %v29482_v45  ;;  %20727 = vmatprep.mubr.bf16.mxu0 %v1852_v29  ;;  %v29524_v45 = vld [vmem:[%s30830_s14 + $0x1e18] sm:$0xff]   ;;  %v29551_v29 = vld [vmem:[%s30830_s14 + $0x1f50] sm:$0xff]  }
 0x3e3   : > { %20767 = vmatprep.mubr.bf16.mxu1 %v1854_v34  ;;  %v29556_v34 = vld [vmem:[%s30830_s14 + $0x1fd8] sm:$0xff]  }
 0x3e4   : > { %26940 = vmatpush3.bf16.msra.mxu0 %v29483_v46  ;;  %v29525_v46 = vld [vmem:[%s30830_s14 + $0x1e98] sm:$0xff]  }
 0x3e5   : > { %26941 = vmatprep.subr.bf16.mxu0 %v29485_v48  ;;  %26962 = vmatpush3.bf16.msra.mxu1 %v29484_v47  ;;  %v29526_v47 = vld [vmem:[%s30830_s14 + $0x1e60] sm:$0xff]  }
 0x3e6   : > { %26963 = vmatprep.subr.bf16.mxu1 %v29486_v49  ;;  %v29527_v48 = vld [vmem:[%s30830_s14 + $0x1ee0] sm:$0xff]  }
 0x3e7   : > { %v29528_v49 = vld [vmem:[%s30830_s14 + $0x1e20] sm:$0xff]  }
 0x3e8   : > { %26942 = vmatpush3.bf16.msra.mxu0 %v29487_v50  ;;  %v29529_v50 = vld [vmem:[%s30830_s14 + $0x1ea0] sm:$0xff]  }
 0x3e9   : > { %26943 = vmatprep.subr.bf16.mxu0 %v29489_v52  ;;  %26964 = vmatpush3.bf16.msra.mxu1 %v29488_v51  ;;  %v29530_v51 = vld [vmem:[%s30830_s14 + $0x1e68] sm:$0xff]  }
 0x3ea   : > { %26965 = vmatprep.subr.bf16.mxu1 %v29490_v53  ;;  %v29531_v53 = vld [vmem:[%s30830_s14 + $0x1ee8] sm:$0xff]  }
 0x3ec   : > { %26944 = vmatpush3.bf16.msra.mxu0 %v29491_v54 }
 0x3ed   : > { %26945 = vmatprep.subr.bf16.mxu0 %v29493_v56  ;;  %26966 = vmatpush3.bf16.msra.mxu1 %v29492_v55  ;;  %v29532_v55 = vld [vmem:[%s30830_s14 + $0x1e28] sm:$0xff]  }
 0x3ee   : > { %26967 = vmatprep.subr.bf16.mxu1 %v29494_v57 }
 0x3f0   : > { %26946 = vmatpush3.bf16.msra.mxu0 %v29495_v58 }
 0x3f1   : > { %26947 = vmatprep.subr.bf16.mxu0 %v29497_v60  ;;  %26968 = vmatpush3.bf16.msra.mxu1 %v29496_v59  ;;  %v29533_v59 = vld [vmem:[%s30830_s14 + $0x1ea8] sm:$0xff]   ;;  %v29534_v60 = vld [vmem:[%s30830_s14 + $0x1e70] sm:$0xff]  }
 0x3f2   : > { %v26645_v61 = vpop.f32.mrb[88].mxu0  ;;  %26969 = vmatprep.subr.bf16.mxu1 %v29498_v62 }
 0x3f3   : > { %v26646_v63 = vpop.f32.mrb[89].mxu0  ;;  %v26667_v1 = vpop.f32.mrb[88].mxu1 }
 0x3f4   : > { %v26647_v2 = vadd.f32 %v26646_v63, %v26645_v61  ;;  %v26648_v3 = vpop.f32.mrb[90].mxu0  ;;  %v26668_v4 = vpop.f32.mrb[89].mxu1  ;;  %26948 = vmatpush3.bf16.msra.mxu0 %v29499_v0 }
 0x3f5   : > { %v26649_v6 = vpop.f32.mrb[91].mxu0  ;;  %v26669_v9 = vadd.f32 %v26668_v4, %v26667_v1  ;;  %v26670_v10 = vpop.f32.mrb[90].mxu1  ;;  %26949 = vmatprep.subr.bf16.mxu0 %v29501_v7  ;;  %26970 = vmatpush3.bf16.msra.mxu1 %v29500_v5  ;;  %v29536_v4 = vld [vmem:[%s30830_s14 + $0x1e30] sm:$0xff]   ;;  %v29538_v7 = vld [vmem:[%s30830_s14 + $0x1e78] sm:$0xff]  }
 0x3f6   : > { %v20170_v8 = vadd.f32 %v26647_v2, %v31915_v23  ;;  %v26671_v12 = vpop.f32.mrb[91].mxu1  ;;  %26971 = vmatprep.subr.bf16.mxu1 %v29502_v11  ;;  %v29508_v23 = vld [vmem:[%s30830_s14 + $0x1db8] sm:$0xff]   ;;  %v29535_v2 = vld [vmem:[%s30830_s14 + $0x1ef0] sm:$0xff]  }
 0x3f7   : > { %v29537_v6 = vld [vmem:[%s30830_s14 + $0x1eb0] sm:$0xff]  }
 0x3f8   : > { %v31953_v14 = vadd.f32 %v26669_v9, %v20170_v8  ;;  %26950 = vmatpush3.bf16.msra.mxu0 %v29503_v13  ;;  %v29539_v8 = vld [vmem:[%s30830_s14 + $0x1ef8] sm:$0xff]   ;;  %v293_v10 = vld [vmem:[%s30840_s12 + $0xf0] sm:$0xff]  ;;  %v29543_v13 = vld [vmem:[%s30830_s14 + $0x1f40] sm:$0xff]  }
 0x3f9   : > { %26951 = vmatprep.subr.bf16.mxu0 %v29505_v15  ;;  %26972 = vmatpush3.bf16.msra.mxu1 %v29504_v16  ;;  %v29540_v9 = vld [vmem:[%s30830_s14 + $0x1e38] sm:$0xff]   ;;  %v908_v11 = vrot.slane %v293_v10, %v30878_v43  ;;  %v901_v12 = vcombine.high %v293_v10, %v293_v10  ;;  %v29578_v10 = vld [vmem:[%s30830_s14 + $0x2000] sm:$0xff]  }
 0x3fa   : > { %26973 = vmatprep.subr.bf16.mxu1 %v29506_v17  ;;  %v29544_v17 = vld [vmem:[%s30830_s14 + $0x1fc0] sm:$0xff]  }
 0x3fb   : > { %v916_v15 = vcombine.high %v908_v11, %v908_v11  ;;  %v915_v16 = vrot.slane %v901_v12, %v30878_v43 }
 0x3fc   : > { %26952 = vmatpush3.bf16.msra.mxu0 %v29507_v18  ;;  %v1855_v18 = vpack.c.bf16 %v908_v11, %v908_v11 }
 0x3fd   : > { %26981 = vmatprep.subr.bf16.mxu0 %v29510_v22  ;;  %26974 = vmatpush3.bf16.msra.mxu1 %v29508_v23  ;;  %v1856_v20 = vpack.c.bf16 %v916_v15, %v916_v15  ;;  %v917_v21 = vcombine.high %v915_v16, %v915_v16  ;;  %v29546_v22 = vld [vmem:[%s30830_s14 + $0x1f80] sm:$0xff]   ;;  %v1857_v23 = vpack.c.bf16 %v915_v16, %v915_v16  ;;  %v29580_v15 = vld [vmem:[%s30830_s14 + $0x2048] sm:$0xff]  }
 0x3fe   : > { %27003 = vmatprep.subr.bf16.mxu1 %v29511_v26  ;;  %v29548_v26 = vld [vmem:[%s30830_s14 + $0x1fc8] sm:$0xff]  }
 0x3ff   : > { %20728 = vmatmul.mubr.bf16.vlgmr.msra.gmra.mrb[116].mxu0 %v1851_v27  ;;  %v1858_v25 = vpack.c.bf16 %v917_v21, %v917_v21  ;;  %v29549_v27 = vld [vmem:[%s30830_s14 + $0x1f08] sm:$0xff]   ;;  %v29585_v21 = vld [vmem:[%s30830_s14 + $0x20d0] sm:$0xff]  }
 0x400   : > { %26982 = vmatpush3.bf16.msra.mxu0 %v29512_v28  ;;  %20768 = vmatmul.mubr.bf16.vlgmr.msra.gmra.mrb[116].mxu1 %v1853_v32  ;;  %v29550_v28 = vld [vmem:[%s30830_s14 + $0x1f88] sm:$0xff]   ;;  %v29554_v32 = vld [vmem:[%s30830_s14 + $0x1f90] sm:$0xff]  }
 0x401   : > { %26983 = vmatprep.subr.bf16.mxu0 %v29514_v33  ;;  %27004 = vmatpush3.bf16.msra.mxu1 %v29513_v31  ;;  %v29553_v31 = vld [vmem:[%s30830_s14 + $0x1f10] sm:$0xff]   ;;  %v29555_v33 = vld [vmem:[%s30830_s14 + $0x1f58] sm:$0xff]  }
 0x402   : > { %27005 = vmatprep.subr.bf16.mxu1 %v29515_v35  ;;  %20807 = vmatprep.mubr.bf16.mxu0 %v1856_v20  ;;  %v29557_v35 = vld [vmem:[%s30830_s14 + $0x1f18] sm:$0xff]   ;;  %v29584_v20 = vld [vmem:[%s30830_s14 + $0x2050] sm:$0xff]  }
 0x403   : > { %20847 = vmatprep.mubr.bf16.mxu1 %v1858_v25  ;;  %v29589_v25 = vld [vmem:[%s30830_s14 + $0x20d8] sm:$0xff]  }
 0x404   : > { %26984 = vmatpush3.bf16.msra.mxu0 %v29516_v36  ;;  %v29558_v36 = vld [vmem:[%s30830_s14 + $0x1f98] sm:$0xff]  }
 0x405   : > { %26985 = vmatprep.subr.bf16.mxu0 %v29518_v38  ;;  %27006 = vmatpush3.bf16.msra.mxu1 %v29517_v37  ;;  %v29559_v37 = vld [vmem:[%s30830_s14 + $0x1f60] sm:$0xff]  }
 0x406   : > { %27007 = vmatprep.subr.bf16.mxu1 %v29519_v39  ;;  %v29560_v38 = vld [vmem:[%s30830_s14 + $0x1fe0] sm:$0xff]  }
 0x407   : > { %v29561_v39 = vld [vmem:[%s30830_s14 + $0x1f20] sm:$0xff]  }
 0x408   : > { %26986 = vmatpush3.bf16.msra.mxu0 %v29520_v40  ;;  %v29562_v40 = vld [vmem:[%s30830_s14 + $0x1fa0] sm:$0xff]  }
 0x409   : > { %26987 = vmatprep.subr.bf16.mxu0 %v29522_v42  ;;  %27008 = vmatpush3.bf16.msra.mxu1 %v29521_v41  ;;  %v29563_v41 = vld [vmem:[%s30830_s14 + $0x1f68] sm:$0xff]  }
 0x40a   : > { %27009 = vmatprep.subr.bf16.mxu1 %v29523_v44  ;;  %v29564_v44 = vld [vmem:[%s30830_s14 + $0x1fe8] sm:$0xff]  }
 0x40c   : > { %26988 = vmatpush3.bf16.msra.mxu0 %v29524_v45 }
 0x40d   : > { %26989 = vmatprep.subr.bf16.mxu0 %v29526_v47  ;;  %27010 = vmatpush3.bf16.msra.mxu1 %v29525_v46  ;;  %v29565_v46 = vld [vmem:[%s30830_s14 + $0x1f28] sm:$0xff]  }
 0x40e   : > { %27011 = vmatprep.subr.bf16.mxu1 %v29527_v48 }
 0x410   : > { %26990 = vmatpush3.bf16.msra.mxu0 %v29528_v49 }
 0x411   : > { %26991 = vmatprep.subr.bf16.mxu0 %v29530_v51  ;;  %27012 = vmatpush3.bf16.msra.mxu1 %v29529_v50  ;;  %v29566_v50 = vld [vmem:[%s30830_s14 + $0x1fa8] sm:$0xff]   ;;  %v29567_v51 = vld [vmem:[%s30830_s14 + $0x1f70] sm:$0xff]  }
 0x412   : > { %v26689_v52 = vpop.f32.mrb[92].mxu0  ;;  %27013 = vmatprep.subr.bf16.mxu1 %v29531_v53 }
 0x413   : > { %v26690_v54 = vpop.f32.mrb[93].mxu0  ;;  %v26711_v56 = vpop.f32.mrb[92].mxu1 }
 0x414   : > { %v26691_v57 = vadd.f32 %v26690_v54, %v26689_v52  ;;  %v26692_v58 = vpop.f32.mrb[94].mxu0  ;;  %v26712_v61 = vpop.f32.mrb[93].mxu1  ;;  %26992 = vmatpush3.bf16.msra.mxu0 %v29532_v55 }
 0x415   : > { %v26693_v62 = vpop.f32.mrb[95].mxu0  ;;  %v26713_v0 = vadd.f32 %v26712_v61, %v26711_v56  ;;  %v26714_v1 = vpop.f32.mrb[94].mxu1  ;;  %26993 = vmatprep.subr.bf16.mxu0 %v29534_v60  ;;  %27014 = vmatpush3.bf16.msra.mxu1 %v29533_v59  ;;  %v29569_v59 = vld [vmem:[%s30830_s14 + $0x1f30] sm:$0xff]  }
 0x416   : > { %v20250_v63 = vadd.f32 %v26691_v57, %v31953_v14  ;;  %v26715_v3 = vpop.f32.mrb[95].mxu1  ;;  %27015 = vmatprep.subr.bf16.mxu1 %v29535_v2  ;;  %v29541_v14 = vld [vmem:[%s30830_s14 + $0x1eb8] sm:$0xff]   ;;  %v29568_v57 = vld [vmem:[%s30830_s14 + $0x1ff0] sm:$0xff]  }
 0x417   : > { %v29570_v61 = vld [vmem:[%s30830_s14 + $0x1fb0] sm:$0xff]   ;;  %v29571_v62 = vld [vmem:[%s30830_s14 + $0x1f78] sm:$0xff]  }
 0x418   : > { %v31991_v5 = vadd.f32 %v26713_v0, %v20250_v63  ;;  %26994 = vmatpush3.bf16.msra.mxu0 %v29536_v4  ;;  %v29572_v63 = vld [vmem:[%s30830_s14 + $0x1ff8] sm:$0xff]  }
 0x419   : > { %26995 = vmatprep.subr.bf16.mxu0 %v29538_v7  ;;  %27016 = vmatpush3.bf16.msra.mxu1 %v29537_v6  ;;  %v29573_v0 = vld [vmem:[%s30830_s14 + $0x1f38] sm:$0xff]  }
 0x41a   : > { %27017 = vmatprep.subr.bf16.mxu1 %v29539_v8  ;;  %v294_v1 = vld [vmem:[%s30840_s12 + $0xf8] sm:$0xff]  ;;  %v29577_v8 = vld [vmem:[%s30830_s14 + $0x20c0] sm:$0xff]  }
 0x41b   : > { %v29574_v2 = vld [vmem:[%s30830_s14 + $0x1fb8] sm:$0xff]   ;;  %v925_v3 = vrot.slane %v294_v1, %v30878_v43  ;;  %v918_v4 = vcombine.high %v294_v1, %v294_v1  ;;  %v29611_v1 = vld [vmem:[%s30830_s14 + $0x2100] sm:$0xff]  }
 0x41c   : > { %26996 = vmatpush3.bf16.msra.mxu0 %v29540_v9 }
 0x41d   : > { %27025 = vmatprep.subr.bf16.mxu0 %v29543_v13  ;;  %27018 = vmatpush3.bf16.msra.mxu1 %v29541_v14  ;;  %v933_v6 = vcombine.high %v925_v3, %v925_v3  ;;  %v932_v7 = vrot.slane %v918_v4, %v30878_v43  ;;  %v1859_v9 = vpack.c.bf16 %v925_v3, %v925_v3  ;;  %v29579_v13 = vld [vmem:[%s30830_s14 + $0x2080] sm:$0xff]  }
 0x41e   : > { %27047 = vmatprep.subr.bf16.mxu1 %v29544_v17  ;;  %v29581_v17 = vld [vmem:[%s30830_s14 + $0x20c8] sm:$0xff]   ;;  %v29612_v4 = vld [vmem:[%s30830_s14 + $0x2180] sm:$0xff]  }
 0x41f   : > { %20808 = vmatmul.mubr.bf16.vlgmr.msra.gmra.mrb[120].mxu0 %v1855_v18  ;;  %v1860_v11 = vpack.c.bf16 %v933_v6, %v933_v6  ;;  %v934_v12 = vcombine.high %v932_v7, %v932_v7  ;;  %v1861_v14 = vpack.c.bf16 %v932_v7, %v932_v7  ;;  %v29582_v18 = vld [vmem:[%s30830_s14 + $0x2008] sm:$0xff]  }
 0x420   : > { %27026 = vmatpush3.bf16.msra.mxu0 %v29545_v19  ;;  %20848 = vmatmul.mubr.bf16.vlgmr.msra.gmra.mrb[120].mxu1 %v1857_v23  ;;  %v29583_v19 = vld [vmem:[%s30830_s14 + $0x2088] sm:$0xff]   ;;  %v29587_v23 = vld [vmem:[%s30830_s14 + $0x2090] sm:$0xff]  }
 0x421   : > { %27027 = vmatprep.subr.bf16.mxu0 %v29547_v24  ;;  %27048 = vmatpush3.bf16.msra.mxu1 %v29546_v22  ;;  %v1862_v16 = vpack.c.bf16 %v934_v12, %v934_v12  ;;  %v29586_v22 = vld [vmem:[%s30830_s14 + $0x2010] sm:$0xff]   ;;  %v29588_v24 = vld [vmem:[%s30830_s14 + $0x2058] sm:$0xff]   ;;  %v29613_v6 = vld [vmem:[%s30830_s14 + $0x2148] sm:$0xff]  }
 0x422   : > { %27049 = vmatprep.subr.bf16.mxu1 %v29548_v26  ;;  %20887 = vmatprep.mubr.bf16.mxu0 %v1860_v11  ;;  %v29590_v26 = vld [vmem:[%s30830_s14 + $0x2018] sm:$0xff]   ;;  %v29617_v11 = vld [vmem:[%s30830_s14 + $0x2150] sm:$0xff]  }
 0x423   : > { %20927 = vmatprep.mubr.bf16.mxu1 %v1862_v16  ;;  %v29618_v12 = vld [vmem:[%s30830_s14 + $0x21d0] sm:$0xff]   ;;  %v29622_v16 = vld [vmem:[%s30830_s14 + $0x21d8] sm:$0xff]  }
 0x424   : > { %27028 = vmatpush3.bf16.msra.mxu0 %v29549_v27  ;;  %v29591_v27 = vld [vmem:[%s30830_s14 + $0x2098] sm:$0xff]  }
 0x425   : > { %27029 = vmatprep.subr.bf16.mxu0 %v29551_v29  ;;  %27050 = vmatpush3.bf16.msra.mxu1 %v29550_v28  ;;  %v29592_v28 = vld [vmem:[%s30830_s14 + $0x2060] sm:$0xff]  }
 0x426   : > { %27051 = vmatprep.subr.bf16.mxu1 %v29552_v30  ;;  %v29593_v29 = vld [vmem:[%s30830_s14 + $0x20e0] sm:$0xff]  }
 0x427   : > { %v29594_v30 = vld [vmem:[%s30830_s14 + $0x2020] sm:$0xff]  }
 0x428   : > { %27030 = vmatpush3.bf16.msra.mxu0 %v29553_v31  ;;  %v29595_v31 = vld [vmem:[%s30830_s14 + $0x20a0] sm:$0xff]  }
 0x429   : > { %27031 = vmatprep.subr.bf16.mxu0 %v29555_v33  ;;  %27052 = vmatpush3.bf16.msra.mxu1 %v29554_v32  ;;  %v29596_v32 = vld [vmem:[%s30830_s14 + $0x2068] sm:$0xff]  }
 0x42a   : > { %27053 = vmatprep.subr.bf16.mxu1 %v29556_v34  ;;  %v29597_v34 = vld [vmem:[%s30830_s14 + $0x20e8] sm:$0xff]  }
 0x42c   : > { %27032 = vmatpush3.bf16.msra.mxu0 %v29557_v35 }
 0x42d   : > { %27033 = vmatprep.subr.bf16.mxu0 %v29559_v37  ;;  %27054 = vmatpush3.bf16.msra.mxu1 %v29558_v36  ;;  %v29598_v36 = vld [vmem:[%s30830_s14 + $0x2028] sm:$0xff]  }
 0x42e   : > { %27055 = vmatprep.subr.bf16.mxu1 %v29560_v38 }
 0x430   : > { %27034 = vmatpush3.bf16.msra.mxu0 %v29561_v39 }
 0x431   : > { %27035 = vmatprep.subr.bf16.mxu0 %v29563_v41  ;;  %27056 = vmatpush3.bf16.msra.mxu1 %v29562_v40  ;;  %v29599_v41 = vld [vmem:[%s30830_s14 + $0x20a8] sm:$0xff]  }
 0x432   : > { %v26733_v42 = vpop.f32.mrb[96].mxu0  ;;  %27057 = vmatprep.subr.bf16.mxu1 %v29564_v44  ;;  %v29600_v44 = vld [vmem:[%s30830_s14 + $0x2070] sm:$0xff]  }
 0x433   : > { %v26734_v45 = vpop.f32.mrb[97].mxu0  ;;  %v26755_v47 = vpop.f32.mrb[96].mxu1 }
 0x434   : > { %v26735_v48 = vadd.f32 %v26734_v45, %v26733_v42  ;;  %v26736_v49 = vpop.f32.mrb[98].mxu0  ;;  %v26756_v52 = vpop.f32.mrb[97].mxu1  ;;  %27036 = vmatpush3.bf16.msra.mxu0 %v29565_v46 }
 0x435   : > { %v26737_v53 = vpop.f32.mrb[99].mxu0  ;;  %v26757_v55 = vadd.f32 %v26756_v52, %v26755_v47  ;;  %v26758_v56 = vpop.f32.mrb[98].mxu1  ;;  %27037 = vmatprep.subr.bf16.mxu0 %v29567_v51  ;;  %27058 = vmatpush3.bf16.msra.mxu1 %v29566_v50  ;;  %v29602_v50 = vld [vmem:[%s30830_s14 + $0x2030] sm:$0xff]   ;;  %v29604_v52 = vld [vmem:[%s30830_s14 + $0x2078] sm:$0xff]  }
 0x436   : > { %v20330_v54 = vadd.f32 %v26735_v48, %v31991_v5  ;;  %v26759_v58 = vpop.f32.mrb[99].mxu1  ;;  %27059 = vmatprep.subr.bf16.mxu1 %v29568_v57  ;;  %v29576_v5 = vld [vmem:[%s30830_s14 + $0x2040] sm:$0xff]   ;;  %v29601_v48 = vld [vmem:[%s30830_s14 + $0x20f0] sm:$0xff]  }
 0x437   : > { %v29603_v53 = vld [vmem:[%s30830_s14 + $0x20b0] sm:$0xff]   ;;  %v295_v56 = vld [vmem:[%s30840_s12 + $0x100] sm:$0xff] }
 0x438   : > { %v32029_v60 = vadd.f32 %v26757_v55, %v20330_v54  ;;  %27038 = vmatpush3.bf16.msra.mxu0 %v29569_v59  ;;  %v29605_v54 = vld [vmem:[%s30830_s14 + $0x20f8] sm:$0xff]   ;;  %v942_v57 = vrot.slane %v295_v56, %v30878_v43  ;;  %v935_v58 = vcombine.high %v295_v56, %v295_v56  ;;  %v29609_v59 = vld [vmem:[%s30830_s14 + $0x2140] sm:$0xff]  }
 0x439   : > { %27039 = vmatprep.subr.bf16.mxu0 %v29571_v62  ;;  %27060 = vmatpush3.bf16.msra.mxu1 %v29570_v61  ;;  %v29606_v55 = vld [vmem:[%s30830_s14 + $0x2038] sm:$0xff]   ;;  %v29644_v56 = vld [vmem:[%s30830_s14 + $0x2200] sm:$0xff]  }
 0x43a   : > { %27061 = vmatprep.subr.bf16.mxu1 %v29572_v63  ;;  %v950_v61 = vcombine.high %v942_v57, %v942_v57  ;;  %v949_v62 = vrot.slane %v935_v58, %v30878_v43  ;;  %v29610_v63 = vld [vmem:[%s30830_s14 + $0x21c0] sm:$0xff]  }
 0x43c   : > { %27040 = vmatpush3.bf16.msra.mxu0 %v29573_v0  ;;  %v1863_v0 = vpack.c.bf16 %v942_v57, %v942_v57  ;;  %v951_v3 = vcombine.high %v949_v62, %v949_v62 }
 0x43d   : > { %27069 = vmatprep.subr.bf16.mxu0 %v29576_v5  ;;  %27062 = vmatpush3.bf16.msra.mxu1 %v29574_v2  ;;  %v1864_v2 = vpack.c.bf16 %v950_v61, %v950_v61  ;;  %v1865_v5 = vpack.c.bf16 %v949_v62, %v949_v62  ;;  %v29646_v61 = vld [vmem:[%s30830_s14 + $0x2248] sm:$0xff]  }
 0x43e   : > { %27091 = vmatprep.subr.bf16.mxu1 %v29577_v8  ;;  %v1866_v7 = vpack.c.bf16 %v951_v3, %v951_v3  ;;  %v29614_v8 = vld [vmem:[%s30830_s14 + $0x21c8] sm:$0xff]   ;;  %v29651_v3 = vld [vmem:[%s30830_s14 + $0x22d0] sm:$0xff]  }
 0x43f   : > { %20888 = vmatmul.mubr.bf16.vlgmr.msra.gmra.mrb[124].mxu0 %v1859_v9  ;;  %v29615_v9 = vld [vmem:[%s30830_s14 + $0x2108] sm:$0xff]  }
 0x440   : > { %27070 = vmatpush3.bf16.msra.mxu0 %v29578_v10  ;;  %20928 = vmatmul.mubr.bf16.vlgmr.msra.gmra.mrb[124].mxu1 %v1861_v14  ;;  %v29616_v10 = vld [vmem:[%s30830_s14 + $0x2188] sm:$0xff]   ;;  %v29620_v14 = vld [vmem:[%s30830_s14 + $0x2190] sm:$0xff]  }
 0x441   : > { %27071 = vmatprep.subr.bf16.mxu0 %v29580_v15  ;;  %27092 = vmatpush3.bf16.msra.mxu1 %v29579_v13  ;;  %v29619_v13 = vld [vmem:[%s30830_s14 + $0x2110] sm:$0xff]   ;;  %v29621_v15 = vld [vmem:[%s30830_s14 + $0x2158] sm:$0xff]  }
 0x442   : > { %27093 = vmatprep.subr.bf16.mxu1 %v29581_v17  ;;  %20967 = vmatprep.mubr.bf16.mxu0 %v1864_v2  ;;  %v29623_v17 = vld [vmem:[%s30830_s14 + $0x2118] sm:$0xff]   ;;  %v29650_v2 = vld [vmem:[%s30830_s14 + $0x2250] sm:$0xff]  }
 0x443   : > { %21007 = vmatprep.mubr.bf16.mxu1 %v1866_v7  ;;  %v29655_v7 = vld [vmem:[%s30830_s14 + $0x22d8] sm:$0xff]  }
 0x444   : > { %27072 = vmatpush3.bf16.msra.mxu0 %v29582_v18  ;;  %v29624_v18 = vld [vmem:[%s30830_s14 + $0x2198] sm:$0xff]  }
 0x445   : > { %27073 = vmatprep.subr.bf16.mxu0 %v29584_v20  ;;  %27094 = vmatpush3.bf16.msra.mxu1 %v29583_v19  ;;  %v29625_v19 = vld [vmem:[%s30830_s14 + $0x2160] sm:$0xff]  }
 0x446   : > { %27095 = vmatprep.subr.bf16.mxu1 %v29585_v21  ;;  %v29626_v20 = vld [vmem:[%s30830_s14 + $0x21e0] sm:$0xff]  }
 0x447   : > { %v29627_v21 = vld [vmem:[%s30830_s14 + $0x2120] sm:$0xff]  }
 0x448   : > { %27074 = vmatpush3.bf16.msra.mxu0 %v29586_v22  ;;  %v29628_v22 = vld [vmem:[%s30830_s14 + $0x21a0] sm:$0xff]  }
 0x449   : > { %27075 = vmatprep.subr.bf16.mxu0 %v29588_v24  ;;  %27096 = vmatpush3.bf16.msra.mxu1 %v29587_v23  ;;  %v29629_v23 = vld [vmem:[%s30830_s14 + $0x2168] sm:$0xff]  }
 0x44a   : > { %27097 = vmatprep.subr.bf16.mxu1 %v29589_v25  ;;  %v29630_v25 = vld [vmem:[%s30830_s14 + $0x21e8] sm:$0xff]  }
 0x44c   : > { %27076 = vmatpush3.bf16.msra.mxu0 %v29590_v26 }
 0x44d   : > { %27077 = vmatprep.subr.bf16.mxu0 %v29592_v28  ;;  %27098 = vmatpush3.bf16.msra.mxu1 %v29591_v27  ;;  %v29631_v27 = vld [vmem:[%s30830_s14 + $0x2128] sm:$0xff]  }
 0x44e   : > { %27099 = vmatprep.subr.bf16.mxu1 %v29593_v29 }
 0x450   : > { %27078 = vmatpush3.bf16.msra.mxu0 %v29594_v30 }
 0x451   : > { %27079 = vmatprep.subr.bf16.mxu0 %v29596_v32  ;;  %27100 = vmatpush3.bf16.msra.mxu1 %v29595_v31  ;;  %v29632_v31 = vld [vmem:[%s30830_s14 + $0x21a8] sm:$0xff]   ;;  %v29633_v32 = vld [vmem:[%s30830_s14 + $0x2170] sm:$0xff]  }
 0x452   : > { %v26777_v33 = vpop.f32.mrb[100].mxu0  ;;  %27101 = vmatprep.subr.bf16.mxu1 %v29597_v34 }
 0x453   : > { %v26778_v35 = vpop.f32.mrb[101].mxu0  ;;  %v26799_v37 = vpop.f32.mrb[100].mxu1 }
 0x454   : > { %v26779_v38 = vadd.f32 %v26778_v35, %v26777_v33  ;;  %v26780_v39 = vpop.f32.mrb[102].mxu0  ;;  %v26800_v40 = vpop.f32.mrb[101].mxu1  ;;  %27080 = vmatpush3.bf16.msra.mxu0 %v29598_v36 }
 0x455   : > { %v26781_v42 = vpop.f32.mrb[103].mxu0  ;;  %v26801_v46 = vadd.f32 %v26800_v40, %v26799_v37  ;;  %v26802_v47 = vpop.f32.mrb[102].mxu1  ;;  %27081 = vmatprep.subr.bf16.mxu0 %v29600_v44  ;;  %27102 = vmatpush3.bf16.msra.mxu1 %v29599_v41  ;;  %v29635_v40 = vld [vmem:[%s30830_s14 + $0x2130] sm:$0xff]   ;;  %v29637_v44 = vld [vmem:[%s30830_s14 + $0x2178] sm:$0xff]  }
 0x456   : > { %v20410_v45 = vadd.f32 %v26779_v38, %v32029_v60  ;;  %v26803_v49 = vpop.f32.mrb[103].mxu1  ;;  %27103 = vmatprep.subr.bf16.mxu1 %v29601_v48  ;;  %v29607_v60 = vld [vmem:[%s30830_s14 + $0x20b8] sm:$0xff]   ;;  %v29634_v38 = vld [vmem:[%s30830_s14 + $0x21f0] sm:$0xff]   ;;  %v296_v47 = vld [vmem:[%s30840_s12 + $0x108] sm:$0xff] }
 0x457   : > { %v29636_v42 = vld [vmem:[%s30830_s14 + $0x21b0] sm:$0xff]   ;;  %v959_v48 = vrot.slane %v296_v47, %v30878_v43  ;;  %v952_v49 = vcombine.high %v296_v47, %v296_v47  ;;  %v29677_v47 = vld [vmem:[%s30830_s14 + $0x2300] sm:$0xff]  }
 0x458   : > { %v32067_v51 = vadd.f32 %v26801_v46, %v20410_v45  ;;  %27082 = vmatpush3.bf16.msra.mxu0 %v29602_v50  ;;  %v29638_v45 = vld [vmem:[%s30830_s14 + $0x21f8] sm:$0xff]   ;;  %v29642_v50 = vld [vmem:[%s30830_s14 + $0x2240] sm:$0xff]  }
 0x459   : > { %27083 = vmatprep.subr.bf16.mxu0 %v29604_v52  ;;  %27104 = vmatpush3.bf16.msra.mxu1 %v29603_v53  ;;  %v29639_v46 = vld [vmem:[%s30830_s14 + $0x2138] sm:$0xff]   ;;  %v967_v52 = vcombine.high %v959_v48, %v959_v48  ;;  %v966_v53 = vrot.slane %v952_v49, %v30878_v43 }
 0x45a   : > { %27105 = vmatprep.subr.bf16.mxu1 %v29605_v54  ;;  %v29643_v54 = vld [vmem:[%s30830_s14 + $0x22c0] sm:$0xff]  }
 0x45b   : > { %v1868_v57 = vpack.c.bf16 %v967_v52, %v967_v52  ;;  %v968_v58 = vcombine.high %v966_v53, %v966_v53  ;;  %v29679_v52 = vld [vmem:[%s30830_s14 + $0x2348] sm:$0xff]  }
 0x45c   : > { %27084 = vmatpush3.bf16.msra.mxu0 %v29606_v55  ;;  %v1867_v55 = vpack.c.bf16 %v959_v48, %v959_v48 }
 0x45d   : > { %27113 = vmatprep.subr.bf16.mxu0 %v29609_v59  ;;  %27106 = vmatpush3.bf16.msra.mxu1 %v29607_v60  ;;  %v29645_v59 = vld [vmem:[%s30830_s14 + $0x2280] sm:$0xff]   ;;  %v1869_v60 = vpack.c.bf16 %v966_v53, %v966_v53  ;;  %v1870_v62 = vpack.c.bf16 %v968_v58, %v968_v58  ;;  %v29684_v58 = vld [vmem:[%s30830_s14 + $0x23d0] sm:$0xff]  }
 0x45e   : > { %27135 = vmatprep.subr.bf16.mxu1 %v29610_v63  ;;  %v29647_v63 = vld [vmem:[%s30830_s14 + $0x22c8] sm:$0xff]  }
 0x45f   : > { %20968 = vmatmul.mubr.bf16.vlgmr.msra.gmra.mrb[128].mxu0 %v1863_v0  ;;  %v29648_v0 = vld [vmem:[%s30830_s14 + $0x2208] sm:$0xff]  }
 0x460   : > { %27114 = vmatpush3.bf16.msra.mxu0 %v29611_v1  ;;  %21008 = vmatmul.mubr.bf16.vlgmr.msra.gmra.mrb[128].mxu1 %v1865_v5  ;;  %v29649_v1 = vld [vmem:[%s30830_s14 + $0x2288] sm:$0xff]   ;;  %v29653_v5 = vld [vmem:[%s30830_s14 + $0x2290] sm:$0xff]  }
 0x461   : > { %27115 = vmatprep.subr.bf16.mxu0 %v29613_v6  ;;  %27136 = vmatpush3.bf16.msra.mxu1 %v29612_v4  ;;  %v29652_v4 = vld [vmem:[%s30830_s14 + $0x2210] sm:$0xff]   ;;  %v29654_v6 = vld [vmem:[%s30830_s14 + $0x2258] sm:$0xff]  }
 0x462   : > { %27137 = vmatprep.subr.bf16.mxu1 %v29614_v8  ;;  %21047 = vmatprep.mubr.bf16.mxu0 %v1868_v57  ;;  %v29656_v8 = vld [vmem:[%s30830_s14 + $0x2218] sm:$0xff]   ;;  %v29683_v57 = vld [vmem:[%s30830_s14 + $0x2350] sm:$0xff]  }
 0x463   : > { %21087 = vmatprep.mubr.bf16.mxu1 %v1870_v62  ;;  %v29688_v62 = vld [vmem:[%s30830_s14 + $0x23d8] sm:$0xff]  }
 0x464   : > { %27116 = vmatpush3.bf16.msra.mxu0 %v29615_v9  ;;  %v29657_v9 = vld [vmem:[%s30830_s14 + $0x2298] sm:$0xff]  }
 0x465   : > { %27117 = vmatprep.subr.bf16.mxu0 %v29617_v11  ;;  %27138 = vmatpush3.bf16.msra.mxu1 %v29616_v10  ;;  %v29658_v10 = vld [vmem:[%s30830_s14 + $0x2260] sm:$0xff]  }
 0x466   : > { %27139 = vmatprep.subr.bf16.mxu1 %v29618_v12  ;;  %v29659_v11 = vld [vmem:[%s30830_s14 + $0x22e0] sm:$0xff]  }
 0x467   : > { %v29660_v12 = vld [vmem:[%s30830_s14 + $0x2220] sm:$0xff]  }
 0x468   : > { %27118 = vmatpush3.bf16.msra.mxu0 %v29619_v13  ;;  %v29661_v13 = vld [vmem:[%s30830_s14 + $0x22a0] sm:$0xff]  }
 0x469   : > { %27119 = vmatprep.subr.bf16.mxu0 %v29621_v15  ;;  %27140 = vmatpush3.bf16.msra.mxu1 %v29620_v14  ;;  %v29662_v14 = vld [vmem:[%s30830_s14 + $0x2268] sm:$0xff]  }
 0x46a   : > { %27141 = vmatprep.subr.bf16.mxu1 %v29622_v16  ;;  %v29663_v16 = vld [vmem:[%s30830_s14 + $0x22e8] sm:$0xff]  }
 0x46c   : > { %27120 = vmatpush3.bf16.msra.mxu0 %v29623_v17 }
 0x46d   : > { %27121 = vmatprep.subr.bf16.mxu0 %v29625_v19  ;;  %27142 = vmatpush3.bf16.msra.mxu1 %v29624_v18  ;;  %v29664_v18 = vld [vmem:[%s30830_s14 + $0x2228] sm:$0xff]  }
 0x46e   : > { %27143 = vmatprep.subr.bf16.mxu1 %v29626_v20 }
 0x470   : > { %27122 = vmatpush3.bf16.msra.mxu0 %v29627_v21 }
 0x471   : > { %27123 = vmatprep.subr.bf16.mxu0 %v29629_v23  ;;  %27144 = vmatpush3.bf16.msra.mxu1 %v29628_v22  ;;  %v29665_v22 = vld [vmem:[%s30830_s14 + $0x22a8] sm:$0xff]   ;;  %v29666_v23 = vld [vmem:[%s30830_s14 + $0x2270] sm:$0xff]  }
 0x472   : > { %v26821_v24 = vpop.f32.mrb[104].mxu0  ;;  %27145 = vmatprep.subr.bf16.mxu1 %v29630_v25 }
 0x473   : > { %v26822_v26 = vpop.f32.mrb[105].mxu0  ;;  %v26843_v28 = vpop.f32.mrb[104].mxu1 }
 0x474   : > { %v26823_v29 = vadd.f32 %v26822_v26, %v26821_v24  ;;  %v26824_v30 = vpop.f32.mrb[106].mxu0  ;;  %v26844_v33 = vpop.f32.mrb[105].mxu1  ;;  %27124 = vmatpush3.bf16.msra.mxu0 %v29631_v27 }
 0x475   : > { %v26825_v34 = vpop.f32.mrb[107].mxu0  ;;  %v26845_v36 = vadd.f32 %v26844_v33, %v26843_v28  ;;  %v26846_v37 = vpop.f32.mrb[106].mxu1  ;;  %27125 = vmatprep.subr.bf16.mxu0 %v29633_v32  ;;  %27146 = vmatpush3.bf16.msra.mxu1 %v29632_v31  ;;  %v29668_v31 = vld [vmem:[%s30830_s14 + $0x2230] sm:$0xff]  }
 0x476   : > { %v20490_v35 = vadd.f32 %v26823_v29, %v32067_v51  ;;  %v26847_v39 = vpop.f32.mrb[107].mxu1  ;;  %27147 = vmatprep.subr.bf16.mxu1 %v29634_v38  ;;  %v29640_v51 = vld [vmem:[%s30830_s14 + $0x21b8] sm:$0xff]   ;;  %v29667_v29 = vld [vmem:[%s30830_s14 + $0x22f0] sm:$0xff]  }
 0x477   : > { %v29669_v33 = vld [vmem:[%s30830_s14 + $0x22b0] sm:$0xff]   ;;  %v29670_v34 = vld [vmem:[%s30830_s14 + $0x2278] sm:$0xff]  }
 0x478   : > { %v32105_v41 = vadd.f32 %v26845_v36, %v20490_v35  ;;  %27126 = vmatpush3.bf16.msra.mxu0 %v29635_v40  ;;  %v29671_v35 = vld [vmem:[%s30830_s14 + $0x22f8] sm:$0xff]   ;;  %v297_v37 = vld [vmem:[%s30840_s12 + $0x110] sm:$0xff] }
 0x479   : > { %27127 = vmatprep.subr.bf16.mxu0 %v29637_v44  ;;  %27148 = vmatpush3.bf16.msra.mxu1 %v29636_v42  ;;  %v29672_v36 = vld [vmem:[%s30830_s14 + $0x2238] sm:$0xff]   ;;  %v976_v39 = vrot.slane %v297_v37, %v30878_v43  ;;  %v969_v40 = vcombine.high %v297_v37, %v297_v37  ;;  %v29710_v37 = vld [vmem:[%s30830_s14 + $0x2400] sm:$0xff]  }
 0x47a   : > { %27149 = vmatprep.subr.bf16.mxu1 %v29638_v45  ;;  %v29673_v38 = vld [vmem:[%s30830_s14 + $0x22b8] sm:$0xff]   ;;  %v29676_v45 = vld [vmem:[%s30830_s14 + $0x23c0] sm:$0xff]  }
 0x47b   : > { %v984_v42 = vcombine.high %v976_v39, %v976_v39  ;;  %v983_v44 = vrot.slane %v969_v40, %v30878_v43  ;;  %v29711_v40 = vld [vmem:[%s30830_s14 + $0x2480] sm:$0xff]  }
 0x47c   : > { %27128 = vmatpush3.bf16.msra.mxu0 %v29639_v46  ;;  %v1871_v46 = vpack.c.bf16 %v976_v39, %v976_v39 }
 0x47d   : > { %27157 = vmatprep.subr.bf16.mxu0 %v29642_v50  ;;  %27150 = vmatpush3.bf16.msra.mxu1 %v29640_v51  ;;  %v1872_v48 = vpack.c.bf16 %v984_v42, %v984_v42  ;;  %v985_v49 = vcombine.high %v983_v44, %v983_v44  ;;  %v29678_v50 = vld [vmem:[%s30830_s14 + $0x2380] sm:$0xff]   ;;  %v1873_v51 = vpack.c.bf16 %v983_v44, %v983_v44  ;;  %v29712_v42 = vld [vmem:[%s30830_s14 + $0x2448] sm:$0xff]  }
 0x47e   : > { %27179 = vmatprep.subr.bf16.mxu1 %v29643_v54  ;;  %v29680_v54 = vld [vmem:[%s30830_s14 + $0x23c8] sm:$0xff]  }
 0x47f   : > { %21048 = vmatmul.mubr.bf16.vlgmr.msra.gmra.mrb[132].mxu0 %v1867_v55  ;;  %v1874_v53 = vpack.c.bf16 %v985_v49, %v985_v49  ;;  %v29681_v55 = vld [vmem:[%s30830_s14 + $0x2308] sm:$0xff]   ;;  %v29717_v49 = vld [vmem:[%s30830_s14 + $0x24d0] sm:$0xff]  }
 0x480   : > { %27158 = vmatpush3.bf16.msra.mxu0 %v29644_v56  ;;  %21088 = vmatmul.mubr.bf16.vlgmr.msra.gmra.mrb[132].mxu1 %v1869_v60  ;;  %v29682_v56 = vld [vmem:[%s30830_s14 + $0x2388] sm:$0xff]   ;;  %v29686_v60 = vld [vmem:[%s30830_s14 + $0x2390] sm:$0xff]  }
 0x481   : > { %27159 = vmatprep.subr.bf16.mxu0 %v29646_v61  ;;  %27180 = vmatpush3.bf16.msra.mxu1 %v29645_v59  ;;  %v29685_v59 = vld [vmem:[%s30830_s14 + $0x2310] sm:$0xff]   ;;  %v29687_v61 = vld [vmem:[%s30830_s14 + $0x2358] sm:$0xff]  }
 0x482   : > { %27181 = vmatprep.subr.bf16.mxu1 %v29647_v63  ;;  %21127 = vmatprep.mubr.bf16.mxu0 %v1872_v48  ;;  %v29689_v63 = vld [vmem:[%s30830_s14 + $0x2318] sm:$0xff]   ;;  %v29716_v48 = vld [vmem:[%s30830_s14 + $0x2450] sm:$0xff]  }
 0x483   : > { %21167 = vmatprep.mubr.bf16.mxu1 %v1874_v53  ;;  %v29721_v53 = vld [vmem:[%s30830_s14 + $0x24d8] sm:$0xff]  }
 0x484   : > { %27160 = vmatpush3.bf16.msra.mxu0 %v29648_v0  ;;  %v29690_v0 = vld [vmem:[%s30830_s14 + $0x2398] sm:$0xff]  }
 0x485   : > { %27161 = vmatprep.subr.bf16.mxu0 %v29650_v2  ;;  %27182 = vmatpush3.bf16.msra.mxu1 %v29649_v1  ;;  %v29691_v1 = vld [vmem:[%s30830_s14 + $0x2360] sm:$0xff]  }
 0x486   : > { %27183 = vmatprep.subr.bf16.mxu1 %v29651_v3  ;;  %v29692_v2 = vld [vmem:[%s30830_s14 + $0x23e0] sm:$0xff]  }
 0x487   : > { %v29693_v3 = vld [vmem:[%s30830_s14 + $0x2320] sm:$0xff]  }
 0x488   : > { %27162 = vmatpush3.bf16.msra.mxu0 %v29652_v4  ;;  %v29694_v4 = vld [vmem:[%s30830_s14 + $0x23a0] sm:$0xff]  }
 0x489   : > { %27163 = vmatprep.subr.bf16.mxu0 %v29654_v6  ;;  %27184 = vmatpush3.bf16.msra.mxu1 %v29653_v5  ;;  %v29695_v5 = vld [vmem:[%s30830_s14 + $0x2368] sm:$0xff]  }
 0x48a   : > { %27185 = vmatprep.subr.bf16.mxu1 %v29655_v7  ;;  %v29696_v7 = vld [vmem:[%s30830_s14 + $0x23e8] sm:$0xff]  }
 0x48c   : > { %27164 = vmatpush3.bf16.msra.mxu0 %v29656_v8 }
 0x48d   : > { %27165 = vmatprep.subr.bf16.mxu0 %v29658_v10  ;;  %27186 = vmatpush3.bf16.msra.mxu1 %v29657_v9  ;;  %v29697_v9 = vld [vmem:[%s30830_s14 + $0x2328] sm:$0xff]  }
 0x48e   : > { %27187 = vmatprep.subr.bf16.mxu1 %v29659_v11 }
 0x490   : > { %27166 = vmatpush3.bf16.msra.mxu0 %v29660_v12 }
 0x491   : > { %27167 = vmatprep.subr.bf16.mxu0 %v29662_v14  ;;  %27188 = vmatpush3.bf16.msra.mxu1 %v29661_v13  ;;  %v29698_v14 = vld [vmem:[%s30830_s14 + $0x23a8] sm:$0xff]  }
 0x492   : > { %v26865_v15 = vpop.f32.mrb[108].mxu0  ;;  %27189 = vmatprep.subr.bf16.mxu1 %v29663_v16  ;;  %v29699_v16 = vld [vmem:[%s30830_s14 + $0x2370] sm:$0xff]  }
 0x493   : > { %v26866_v17 = vpop.f32.mrb[109].mxu0  ;;  %v26887_v19 = vpop.f32.mrb[108].mxu1 }
 0x494   : > { %v26867_v20 = vadd.f32 %v26866_v17, %v26865_v15  ;;  %v26868_v21 = vpop.f32.mrb[110].mxu0  ;;  %v26888_v24 = vpop.f32.mrb[109].mxu1  ;;  %27168 = vmatpush3.bf16.msra.mxu0 %v29664_v18 }
 0x495   : > { %v26869_v25 = vpop.f32.mrb[111].mxu0  ;;  %v26889_v27 = vadd.f32 %v26888_v24, %v26887_v19  ;;  %v26890_v28 = vpop.f32.mrb[110].mxu1  ;;  %27169 = vmatprep.subr.bf16.mxu0 %v29666_v23  ;;  %27190 = vmatpush3.bf16.msra.mxu1 %v29665_v22  ;;  %v29701_v22 = vld [vmem:[%s30830_s14 + $0x2330] sm:$0xff]   ;;  %v29703_v24 = vld [vmem:[%s30830_s14 + $0x2378] sm:$0xff]  }
 0x496   : > { %v20570_v26 = vadd.f32 %v26867_v20, %v32105_v41  ;;  %v26891_v30 = vpop.f32.mrb[111].mxu1  ;;  %27191 = vmatprep.subr.bf16.mxu1 %v29667_v29  ;;  %v29675_v41 = vld [vmem:[%s30830_s14 + $0x2340] sm:$0xff]   ;;  %v29700_v20 = vld [vmem:[%s30830_s14 + $0x23f0] sm:$0xff]  }
 0x497   : > { %v29702_v25 = vld [vmem:[%s30830_s14 + $0x23b0] sm:$0xff]  }
 0x498   : > { %v32143_v32 = vadd.f32 %v26889_v27, %v20570_v26  ;;  %27170 = vmatpush3.bf16.msra.mxu0 %v29668_v31  ;;  %v29704_v26 = vld [vmem:[%s30830_s14 + $0x23f8] sm:$0xff]   ;;  %v29708_v31 = vld [vmem:[%s30830_s14 + $0x2440] sm:$0xff]  }
 0x499   : > { %27171 = vmatprep.subr.bf16.mxu0 %v29670_v34  ;;  %27192 = vmatpush3.bf16.msra.mxu1 %v29669_v33  ;;  %v29705_v27 = vld [vmem:[%s30830_s14 + $0x2338] sm:$0xff]  }
 0x49a   : > { %27193 = vmatprep.subr.bf16.mxu1 %v29671_v35  ;;  %v298_v28 = vld [vmem:[%s30840_s12 + $0x118] sm:$0xff]  ;;  %v29709_v35 = vld [vmem:[%s30830_s14 + $0x24c0] sm:$0xff]  }
 0x49b   : > { %v993_v29 = vrot.slane %v298_v28, %v30878_v43  ;;  %v986_v30 = vcombine.high %v298_v28, %v298_v28  ;;  %v29743_v28 = vld [vmem:[%s30830_s14 + $0x2500] sm:$0xff]  }
 0x49c   : > { %27172 = vmatpush3.bf16.msra.mxu0 %v29672_v36 }
 0x49d   : > { %27201 = vmatprep.subr.bf16.mxu0 %v29675_v41  ;;  %27194 = vmatpush3.bf16.msra.mxu1 %v29673_v38  ;;  %v1001_v33 = vcombine.high %v993_v29, %v993_v29  ;;  %v1000_v34 = vrot.slane %v986_v30, %v30878_v43  ;;  %v1875_v36 = vpack.c.bf16 %v993_v29, %v993_v29 }
 0x49e   : > { %27223 = vmatprep.subr.bf16.mxu1 %v29676_v45  ;;  %v29713_v45 = vld [vmem:[%s30830_s14 + $0x24c8] sm:$0xff]  }
 0x49f   : > { %21128 = vmatmul.mubr.bf16.vlgmr.msra.gmra.mrb[136].mxu0 %v1871_v46  ;;  %v1876_v38 = vpack.c.bf16 %v1001_v33, %v1001_v33  ;;  %v1002_v39 = vcombine.high %v1000_v34, %v1000_v34  ;;  %v1877_v41 = vpack.c.bf16 %v1000_v34, %v1000_v34  ;;  %v29714_v46 = vld [vmem:[%s30830_s14 + $0x2408] sm:$0xff]  }
 0x4a0   : > { %27202 = vmatpush3.bf16.msra.mxu0 %v29677_v47  ;;  %21168 = vmatmul.mubr.bf16.vlgmr.msra.gmra.mrb[136].mxu1 %v1873_v51  ;;  %v29715_v47 = vld [vmem:[%s30830_s14 + $0x2488] sm:$0xff]   ;;  %v29719_v51 = vld [vmem:[%s30830_s14 + $0x2490] sm:$0xff]  }
 0x4a1   : > { %27203 = vmatprep.subr.bf16.mxu0 %v29679_v52  ;;  %27224 = vmatpush3.bf16.msra.mxu1 %v29678_v50  ;;  %v1878_v44 = vpack.c.bf16 %v1002_v39, %v1002_v39  ;;  %v29718_v50 = vld [vmem:[%s30830_s14 + $0x2410] sm:$0xff]   ;;  %v29720_v52 = vld [vmem:[%s30830_s14 + $0x2458] sm:$0xff]   ;;  %v29745_v33 = vld [vmem:[%s30830_s14 + $0x2548] sm:$0xff]  }
 0x4a2   : > { %27225 = vmatprep.subr.bf16.mxu1 %v29680_v54  ;;  %21207 = vmatprep.mubr.bf16.mxu0 %v1876_v38  ;;  %v29722_v54 = vld [vmem:[%s30830_s14 + $0x2418] sm:$0xff]   ;;  %v29749_v38 = vld [vmem:[%s30830_s14 + $0x2550] sm:$0xff]  }
 0x4a3   : > { %21247 = vmatprep.mubr.bf16.mxu1 %v1878_v44  ;;  %v29750_v39 = vld [vmem:[%s30830_s14 + $0x25d0] sm:$0xff]   ;;  %v29754_v44 = vld [vmem:[%s30830_s14 + $0x25d8] sm:$0xff]  }
 0x4a4   : > { %27204 = vmatpush3.bf16.msra.mxu0 %v29681_v55  ;;  %v29723_v55 = vld [vmem:[%s30830_s14 + $0x2498] sm:$0xff]  }
 0x4a5   : > { %27205 = vmatprep.subr.bf16.mxu0 %v29683_v57  ;;  %27226 = vmatpush3.bf16.msra.mxu1 %v29682_v56  ;;  %v29724_v56 = vld [vmem:[%s30830_s14 + $0x2460] sm:$0xff]  }
 0x4a6   : > { %27227 = vmatprep.subr.bf16.mxu1 %v29684_v58  ;;  %v29725_v57 = vld [vmem:[%s30830_s14 + $0x24e0] sm:$0xff]  }
 0x4a7   : > { %v29726_v58 = vld [vmem:[%s30830_s14 + $0x2420] sm:$0xff]  }
 0x4a8   : > { %27206 = vmatpush3.bf16.msra.mxu0 %v29685_v59  ;;  %v29727_v59 = vld [vmem:[%s30830_s14 + $0x24a0] sm:$0xff]  }
 0x4a9   : > { %27207 = vmatprep.subr.bf16.mxu0 %v29687_v61  ;;  %27228 = vmatpush3.bf16.msra.mxu1 %v29686_v60  ;;  %v29728_v60 = vld [vmem:[%s30830_s14 + $0x2468] sm:$0xff]  }
 0x4aa   : > { %27229 = vmatprep.subr.bf16.mxu1 %v29688_v62  ;;  %v29729_v62 = vld [vmem:[%s30830_s14 + $0x24e8] sm:$0xff]  }
 0x4ac   : > { %27208 = vmatpush3.bf16.msra.mxu0 %v29689_v63 }
 0x4ad   : > { %27209 = vmatprep.subr.bf16.mxu0 %v29691_v1  ;;  %27230 = vmatpush3.bf16.msra.mxu1 %v29690_v0  ;;  %v29730_v0 = vld [vmem:[%s30830_s14 + $0x2428] sm:$0xff]  }
 0x4ae   : > { %27231 = vmatprep.subr.bf16.mxu1 %v29692_v2 }
 0x4b0   : > { %27210 = vmatpush3.bf16.msra.mxu0 %v29693_v3 }
 0x4b1   : > { %27211 = vmatprep.subr.bf16.mxu0 %v29695_v5  ;;  %27232 = vmatpush3.bf16.msra.mxu1 %v29694_v4  ;;  %v29731_v4 = vld [vmem:[%s30830_s14 + $0x24a8] sm:$0xff]   ;;  %v29732_v5 = vld [vmem:[%s30830_s14 + $0x2470] sm:$0xff]  }
 0x4b2   : > { %v26909_v6 = vpop.f32.mrb[112].mxu0  ;;  %27233 = vmatprep.subr.bf16.mxu1 %v29696_v7 }
 0x4b3   : > { %v26910_v8 = vpop.f32.mrb[113].mxu0  ;;  %v26931_v10 = vpop.f32.mrb[112].mxu1 }
 0x4b4   : > { %v26911_v11 = vadd.f32 %v26910_v8, %v26909_v6  ;;  %v26912_v12 = vpop.f32.mrb[114].mxu0  ;;  %v26932_v13 = vpop.f32.mrb[113].mxu1  ;;  %27212 = vmatpush3.bf16.msra.mxu0 %v29697_v9 }
 0x4b5   : > { %v26913_v15 = vpop.f32.mrb[115].mxu0  ;;  %v26933_v18 = vadd.f32 %v26932_v13, %v26931_v10  ;;  %v26934_v19 = vpop.f32.mrb[114].mxu1  ;;  %27213 = vmatprep.subr.bf16.mxu0 %v29699_v16  ;;  %27234 = vmatpush3.bf16.msra.mxu1 %v29698_v14  ;;  %v29734_v13 = vld [vmem:[%s30830_s14 + $0x2430] sm:$0xff]   ;;  %v29736_v16 = vld [vmem:[%s30830_s14 + $0x2478] sm:$0xff]  }
 0x4b6   : > { %v20650_v17 = vadd.f32 %v26911_v11, %v32143_v32  ;;  %v26935_v21 = vpop.f32.mrb[115].mxu1  ;;  %27235 = vmatprep.subr.bf16.mxu1 %v29700_v20  ;;  %v29706_v32 = vld [vmem:[%s30830_s14 + $0x23b8] sm:$0xff]   ;;  %v29733_v11 = vld [vmem:[%s30830_s14 + $0x24f0] sm:$0xff]  }
 0x4b7   : > { %v29735_v15 = vld [vmem:[%s30830_s14 + $0x24b0] sm:$0xff]   ;;  %v299_v19 = vld [vmem:[%s30840_s12 + $0x120] sm:$0xff] }
 0x4b8   : > { %v32181_v23 = vadd.f32 %v26933_v18, %v20650_v17  ;;  %27214 = vmatpush3.bf16.msra.mxu0 %v29701_v22  ;;  %v29737_v17 = vld [vmem:[%s30830_s14 + $0x24f8] sm:$0xff]   ;;  %v1010_v20 = vrot.slane %v299_v19, %v30878_v43  ;;  %v1003_v21 = vcombine.high %v299_v19, %v299_v19  ;;  %v29741_v22 = vld [vmem:[%s30830_s14 + $0x2540] sm:$0xff]  }
 0x4b9   : > { %27215 = vmatprep.subr.bf16.mxu0 %v29703_v24  ;;  %27236 = vmatpush3.bf16.msra.mxu1 %v29702_v25  ;;  %v29738_v18 = vld [vmem:[%s30830_s14 + $0x2438] sm:$0xff]   ;;  %v29776_v19 = vld [vmem:[%s30830_s14 + $0x2600] sm:$0xff]  }
 0x4ba   : > { %27237 = vmatprep.subr.bf16.mxu1 %v29704_v26  ;;  %v1018_v24 = vcombine.high %v1010_v20, %v1010_v20  ;;  %v1017_v25 = vrot.slane %v1003_v21, %v30878_v43  ;;  %v29742_v26 = vld [vmem:[%s30830_s14 + $0x25c0] sm:$0xff]  }
 0x4bc   : > { %27216 = vmatpush3.bf16.msra.mxu0 %v29705_v27  ;;  %v1879_v27 = vpack.c.bf16 %v1010_v20, %v1010_v20  ;;  %v1880_v29 = vpack.c.bf16 %v1018_v24, %v1018_v24  ;;  %v1019_v30 = vcombine.high %v1017_v25, %v1017_v25  ;;  %v29778_v24 = vld [vmem:[%s30830_s14 + $0x2648] sm:$0xff]  }
 0x4bd   : > { %27245 = vmatprep.subr.bf16.mxu0 %v29708_v31  ;;  %27238 = vmatpush3.bf16.msra.mxu1 %v29706_v32  ;;  %v29744_v31 = vld [vmem:[%s30830_s14 + $0x2580] sm:$0xff]   ;;  %v1881_v32 = vpack.c.bf16 %v1017_v25, %v1017_v25 }
 0x4be   : > { %27267 = vmatprep.subr.bf16.mxu1 %v29709_v35  ;;  %v1882_v34 = vpack.c.bf16 %v1019_v30, %v1019_v30  ;;  %v29746_v35 = vld [vmem:[%s30830_s14 + $0x25c8] sm:$0xff]   ;;  %v29783_v30 = vld [vmem:[%s30830_s14 + $0x26d0] sm:$0xff]  }
 0x4bf   : > { %21208 = vmatmul.mubr.bf16.vlgmr.msra.gmra.mrb[140].mxu0 %v1875_v36  ;;  %v29747_v36 = vld [vmem:[%s30830_s14 + $0x2508] sm:$0xff]  }
 0x4c0   : > { %27246 = vmatpush3.bf16.msra.mxu0 %v29710_v37  ;;  %21248 = vmatmul.mubr.bf16.vlgmr.msra.gmra.mrb[140].mxu1 %v1877_v41  ;;  %v29748_v37 = vld [vmem:[%s30830_s14 + $0x2588] sm:$0xff]   ;;  %v29752_v41 = vld [vmem:[%s30830_s14 + $0x2590] sm:$0xff]  }
 0x4c1   : > { %27247 = vmatprep.subr.bf16.mxu0 %v29712_v42  ;;  %27268 = vmatpush3.bf16.msra.mxu1 %v29711_v40  ;;  %v29751_v40 = vld [vmem:[%s30830_s14 + $0x2510] sm:$0xff]   ;;  %v29753_v42 = vld [vmem:[%s30830_s14 + $0x2558] sm:$0xff]  }
 0x4c2   : > { %27269 = vmatprep.subr.bf16.mxu1 %v29713_v45  ;;  %21287 = vmatprep.mubr.bf16.mxu0 %v1880_v29  ;;  %v29755_v45 = vld [vmem:[%s30830_s14 + $0x2518] sm:$0xff]   ;;  %v29782_v29 = vld [vmem:[%s30830_s14 + $0x2650] sm:$0xff]  }
 0x4c3   : > { %21327 = vmatprep.mubr.bf16.mxu1 %v1882_v34  ;;  %v29787_v34 = vld [vmem:[%s30830_s14 + $0x26d8] sm:$0xff]  }
 0x4c4   : > { %27248 = vmatpush3.bf16.msra.mxu0 %v29714_v46  ;;  %v29756_v46 = vld [vmem:[%s30830_s14 + $0x2598] sm:$0xff]  }
 0x4c5   : > { %27249 = vmatprep.subr.bf16.mxu0 %v29716_v48  ;;  %27270 = vmatpush3.bf16.msra.mxu1 %v29715_v47  ;;  %v29757_v47 = vld [vmem:[%s30830_s14 + $0x2560] sm:$0xff]  }
 0x4c6   : > { %27271 = vmatprep.subr.bf16.mxu1 %v29717_v49  ;;  %v29758_v48 = vld [vmem:[%s30830_s14 + $0x25e0] sm:$0xff]  }
 0x4c7   : > { %v29759_v49 = vld [vmem:[%s30830_s14 + $0x2520] sm:$0xff]  }
 0x4c8   : > { %27250 = vmatpush3.bf16.msra.mxu0 %v29718_v50  ;;  %v29760_v50 = vld [vmem:[%s30830_s14 + $0x25a0] sm:$0xff]  }
 0x4c9   : > { %27251 = vmatprep.subr.bf16.mxu0 %v29720_v52  ;;  %27272 = vmatpush3.bf16.msra.mxu1 %v29719_v51  ;;  %v29761_v51 = vld [vmem:[%s30830_s14 + $0x2568] sm:$0xff]  }
 0x4ca   : > { %27273 = vmatprep.subr.bf16.mxu1 %v29721_v53  ;;  %v29762_v53 = vld [vmem:[%s30830_s14 + $0x25e8] sm:$0xff]  }
 0x4cc   : > { %27252 = vmatpush3.bf16.msra.mxu0 %v29722_v54 }
 0x4cd   : > { %27253 = vmatprep.subr.bf16.mxu0 %v29724_v56  ;;  %27274 = vmatpush3.bf16.msra.mxu1 %v29723_v55  ;;  %v29763_v55 = vld [vmem:[%s30830_s14 + $0x2528] sm:$0xff]  }
 0x4ce   : > { %27275 = vmatprep.subr.bf16.mxu1 %v29725_v57 }
 0x4d0   : > { %27254 = vmatpush3.bf16.msra.mxu0 %v29726_v58 }
 0x4d1   : > { %27255 = vmatprep.subr.bf16.mxu0 %v29728_v60  ;;  %27276 = vmatpush3.bf16.msra.mxu1 %v29727_v59  ;;  %v29764_v59 = vld [vmem:[%s30830_s14 + $0x25a8] sm:$0xff]   ;;  %v29765_v60 = vld [vmem:[%s30830_s14 + $0x2570] sm:$0xff]  }
 0x4d2   : > { %v26953_v61 = vpop.f32.mrb[116].mxu0  ;;  %27277 = vmatprep.subr.bf16.mxu1 %v29729_v62 }
 0x4d3   : > { %v26954_v63 = vpop.f32.mrb[117].mxu0  ;;  %v26975_v1 = vpop.f32.mrb[116].mxu1 }
 0x4d4   : > { %v26955_v2 = vadd.f32 %v26954_v63, %v26953_v61  ;;  %v26956_v3 = vpop.f32.mrb[118].mxu0  ;;  %v26976_v6 = vpop.f32.mrb[117].mxu1  ;;  %27256 = vmatpush3.bf16.msra.mxu0 %v29730_v0 }
 0x4d5   : > { %v26957_v7 = vpop.f32.mrb[119].mxu0  ;;  %v26977_v9 = vadd.f32 %v26976_v6, %v26975_v1  ;;  %v26978_v10 = vpop.f32.mrb[118].mxu1  ;;  %27257 = vmatprep.subr.bf16.mxu0 %v29732_v5  ;;  %27278 = vmatpush3.bf16.msra.mxu1 %v29731_v4  ;;  %v29767_v4 = vld [vmem:[%s30830_s14 + $0x2530] sm:$0xff]  }
 0x4d6   : > { %v20730_v8 = vadd.f32 %v26955_v2, %v32181_v23  ;;  %v26979_v12 = vpop.f32.mrb[119].mxu1  ;;  %27279 = vmatprep.subr.bf16.mxu1 %v29733_v11  ;;  %v29739_v23 = vld [vmem:[%s30830_s14 + $0x24b8] sm:$0xff]   ;;  %v29766_v2 = vld [vmem:[%s30830_s14 + $0x25f0] sm:$0xff]   ;;  %v300_v10 = vld [vmem:[%s30840_s12 + $0x128] sm:$0xff] }
 0x4d7   : > { %v29768_v6 = vld [vmem:[%s30830_s14 + $0x25b0] sm:$0xff]   ;;  %v29769_v7 = vld [vmem:[%s30830_s14 + $0x2578] sm:$0xff]   ;;  %v1027_v12 = vrot.slane %v300_v10, %v30878_v43 }
 0x4d8   : > { %v32219_v14 = vadd.f32 %v26977_v9, %v20730_v8  ;;  %27258 = vmatpush3.bf16.msra.mxu0 %v29734_v13  ;;  %v29770_v8 = vld [vmem:[%s30830_s14 + $0x25f8] sm:$0xff]   ;;  %v1020_v13 = vcombine.high %v300_v10, %v300_v10  ;;  %v29809_v10 = vld [vmem:[%s30830_s14 + $0x2700] sm:$0xff]  }
 0x4d9   : > { %27259 = vmatprep.subr.bf16.mxu0 %v29736_v16  ;;  %27280 = vmatpush3.bf16.msra.mxu1 %v29735_v15  ;;  %v29771_v9 = vld [vmem:[%s30830_s14 + $0x2538] sm:$0xff]   ;;  %v1035_v15 = vcombine.high %v1027_v12, %v1027_v12 }
 0x4da   : > { %27281 = vmatprep.subr.bf16.mxu1 %v29737_v17  ;;  %v29772_v11 = vld [vmem:[%s30830_s14 + $0x25b8] sm:$0xff]   ;;  %v1034_v16 = vrot.slane %v1020_v13, %v30878_v43  ;;  %v29775_v17 = vld [vmem:[%s30830_s14 + $0x26c0] sm:$0xff]  }
 0x4db   : > { %v1884_v20 = vpack.c.bf16 %v1035_v15, %v1035_v15  ;;  %v29810_v13 = vld [vmem:[%s30830_s14 + $0x2780] sm:$0xff]   ;;  %v29811_v15 = vld [vmem:[%s30830_s14 + $0x2748] sm:$0xff]  }
 0x4dc   : > { %27260 = vmatpush3.bf16.msra.mxu0 %v29738_v18  ;;  %v1883_v18 = vpack.c.bf16 %v1027_v12, %v1027_v12  ;;  %v1036_v21 = vcombine.high %v1034_v16, %v1034_v16 }
 0x4dd   : > { %27289 = vmatprep.subr.bf16.mxu0 %v29741_v22  ;;  %27282 = vmatpush3.bf16.msra.mxu1 %v29739_v23  ;;  %v29777_v22 = vld [vmem:[%s30830_s14 + $0x2680] sm:$0xff]   ;;  %v1885_v23 = vpack.c.bf16 %v1034_v16, %v1034_v16 }
 0x4de   : > { %27311 = vmatprep.subr.bf16.mxu1 %v29742_v26  ;;  %v1886_v25 = vpack.c.bf16 %v1036_v21, %v1036_v21  ;;  %v29779_v26 = vld [vmem:[%s30830_s14 + $0x26c8] sm:$0xff]   ;;  %v29816_v21 = vld [vmem:[%s30830_s14 + $0x27d0] sm:$0xff]  }
 0x4df   : > { %21288 = vmatmul.mubr.bf16.vlgmr.msra.gmra.mrb[144].mxu0 %v1879_v27  ;;  %v29780_v27 = vld [vmem:[%s30830_s14 + $0x2608] sm:$0xff]  }
 0x4e0   : > { %27290 = vmatpush3.bf16.msra.mxu0 %v29743_v28  ;;  %21328 = vmatmul.mubr.bf16.vlgmr.msra.gmra.mrb[144].mxu1 %v1881_v32  ;;  %v29781_v28 = vld [vmem:[%s30830_s14 + $0x2688] sm:$0xff]   ;;  %v29785_v32 = vld [vmem:[%s30830_s14 + $0x2690] sm:$0xff]  }
 0x4e1   : > { %27291 = vmatprep.subr.bf16.mxu0 %v29745_v33  ;;  %27312 = vmatpush3.bf16.msra.mxu1 %v29744_v31  ;;  %v29784_v31 = vld [vmem:[%s30830_s14 + $0x2610] sm:$0xff]   ;;  %v29786_v33 = vld [vmem:[%s30830_s14 + $0x2658] sm:$0xff]  }
 0x4e2   : > { %27313 = vmatprep.subr.bf16.mxu1 %v29746_v35  ;;  %21367 = vmatprep.mubr.bf16.mxu0 %v1884_v20  ;;  %v29788_v35 = vld [vmem:[%s30830_s14 + $0x2618] sm:$0xff]   ;;  %v29815_v20 = vld [vmem:[%s30830_s14 + $0x2750] sm:$0xff]  }
 0x4e3   : > { %21407 = vmatprep.mubr.bf16.mxu1 %v1886_v25  ;;  %v29820_v25 = vld [vmem:[%s30830_s14 + $0x27d8] sm:$0xff]  }
 0x4e4   : > { %27292 = vmatpush3.bf16.msra.mxu0 %v29747_v36  ;;  %v29789_v36 = vld [vmem:[%s30830_s14 + $0x2698] sm:$0xff]  }
 0x4e5   : > { %27293 = vmatprep.subr.bf16.mxu0 %v29749_v38  ;;  %27314 = vmatpush3.bf16.msra.mxu1 %v29748_v37  ;;  %v29790_v37 = vld [vmem:[%s30830_s14 + $0x2660] sm:$0xff]  }
 0x4e6   : > { %27315 = vmatprep.subr.bf16.mxu1 %v29750_v39  ;;  %v29791_v38 = vld [vmem:[%s30830_s14 + $0x26e0] sm:$0xff]  }
 0x4e7   : > { %v29792_v39 = vld [vmem:[%s30830_s14 + $0x2620] sm:$0xff]  }
 0x4e8   : > { %27294 = vmatpush3.bf16.msra.mxu0 %v29751_v40  ;;  %v29793_v40 = vld [vmem:[%s30830_s14 + $0x26a0] sm:$0xff]  }
 0x4e9   : > { %27295 = vmatprep.subr.bf16.mxu0 %v29753_v42  ;;  %27316 = vmatpush3.bf16.msra.mxu1 %v29752_v41  ;;  %v29794_v41 = vld [vmem:[%s30830_s14 + $0x2668] sm:$0xff]  }
 0x4ea   : > { %27317 = vmatprep.subr.bf16.mxu1 %v29754_v44  ;;  %v29795_v44 = vld [vmem:[%s30830_s14 + $0x26e8] sm:$0xff]  }
 0x4ec   : > { %27296 = vmatpush3.bf16.msra.mxu0 %v29755_v45 }
 0x4ed   : > { %27297 = vmatprep.subr.bf16.mxu0 %v29757_v47  ;;  %27318 = vmatpush3.bf16.msra.mxu1 %v29756_v46  ;;  %v29796_v46 = vld [vmem:[%s30830_s14 + $0x2628] sm:$0xff]  }
 0x4ee   : > { %27319 = vmatprep.subr.bf16.mxu1 %v29758_v48 }
 0x4f0   : > { %27298 = vmatpush3.bf16.msra.mxu0 %v29759_v49 }
 0x4f1   : > { %27299 = vmatprep.subr.bf16.mxu0 %v29761_v51  ;;  %27320 = vmatpush3.bf16.msra.mxu1 %v29760_v50  ;;  %v29797_v51 = vld [vmem:[%s30830_s14 + $0x26a8] sm:$0xff]  }
 0x4f2   : > { %v26997_v52 = vpop.f32.mrb[120].mxu0  ;;  %27321 = vmatprep.subr.bf16.mxu1 %v29762_v53  ;;  %v29798_v53 = vld [vmem:[%s30830_s14 + $0x2670] sm:$0xff]  }
 0x4f3   : > { %v26998_v54 = vpop.f32.mrb[121].mxu0  ;;  %v27019_v56 = vpop.f32.mrb[120].mxu1 }
 0x4f4   : > { %v26999_v57 = vadd.f32 %v26998_v54, %v26997_v52  ;;  %v27000_v58 = vpop.f32.mrb[122].mxu0  ;;  %v27020_v61 = vpop.f32.mrb[121].mxu1  ;;  %27300 = vmatpush3.bf16.msra.mxu0 %v29763_v55 }
 0x4f5   : > { %v27001_v62 = vpop.f32.mrb[123].mxu0  ;;  %v27021_v0 = vadd.f32 %v27020_v61, %v27019_v56  ;;  %v27022_v1 = vpop.f32.mrb[122].mxu1  ;;  %27301 = vmatprep.subr.bf16.mxu0 %v29765_v60  ;;  %27322 = vmatpush3.bf16.msra.mxu1 %v29764_v59  ;;  %v29800_v59 = vld [vmem:[%s30830_s14 + $0x2630] sm:$0xff]   ;;  %v29802_v61 = vld [vmem:[%s30830_s14 + $0x2678] sm:$0xff]  }
 0x4f6   : > { %v20810_v63 = vadd.f32 %v26999_v57, %v32219_v14  ;;  %v27023_v3 = vpop.f32.mrb[123].mxu1  ;;  %27323 = vmatprep.subr.bf16.mxu1 %v29766_v2  ;;  %v29774_v14 = vld [vmem:[%s30830_s14 + $0x2640] sm:$0xff]   ;;  %v29799_v57 = vld [vmem:[%s30830_s14 + $0x26f0] sm:$0xff]  }
 0x4f7   : > { %v29801_v62 = vld [vmem:[%s30830_s14 + $0x26b0] sm:$0xff]  }
 0x4f8   : > { %v32257_v5 = vadd.f32 %v27021_v0, %v20810_v63  ;;  %27302 = vmatpush3.bf16.msra.mxu0 %v29767_v4  ;;  %v29803_v63 = vld [vmem:[%s30830_s14 + $0x26f8] sm:$0xff]   ;;  %v301_v1 = vld [vmem:[%s30840_s12 + $0x130] sm:$0xff]  ;;  %v29807_v4 = vld [vmem:[%s30830_s14 + $0x2740] sm:$0xff]  }
 0x4f9   : > { %27303 = vmatprep.subr.bf16.mxu0 %v29769_v7  ;;  %27324 = vmatpush3.bf16.msra.mxu1 %v29768_v6  ;;  %v29804_v0 = vld [vmem:[%s30830_s14 + $0x2638] sm:$0xff]   ;;  %v1044_v2 = vrot.slane %v301_v1, %v30878_v43  ;;  %v1037_v3 = vcombine.high %v301_v1, %v301_v1  ;;  %v29842_v1 = vld [vmem:[%s30830_s14 + $0x2800] sm:$0xff]  }
 0x4fa   : > { %27325 = vmatprep.subr.bf16.mxu1 %v29770_v8  ;;  %v29808_v8 = vld [vmem:[%s30830_s14 + $0x27c0] sm:$0xff]  }
 0x4fb   : > { %v1052_v6 = vcombine.high %v1044_v2, %v1044_v2  ;;  %v1051_v7 = vrot.slane %v1037_v3, %v30878_v43 }
 0x4fc   : > { %27304 = vmatpush3.bf16.msra.mxu0 %v29771_v9  ;;  %v1887_v9 = vpack.c.bf16 %v1044_v2, %v1044_v2 }
 0x4fd   : > { %27333 = vmatprep.subr.bf16.mxu0 %v29774_v14  ;;  %27326 = vmatpush3.bf16.msra.mxu1 %v29772_v11  ;;  %v1888_v11 = vpack.c.bf16 %v1052_v6, %v1052_v6  ;;  %v1053_v12 = vcombine.high %v1051_v7, %v1051_v7  ;;  %v1889_v14 = vpack.c.bf16 %v1051_v7, %v1051_v7  ;;  %v29844_v6 = vld [vmem:[%s30830_s14 + $0x2848] sm:$0xff]  }
 0x4fe   : > { %27355 = vmatprep.subr.bf16.mxu1 %v29775_v17  ;;  %v29812_v17 = vld [vmem:[%s30830_s14 + $0x27c8] sm:$0xff]  }
 0x4ff   : > { %21368 = vmatmul.mubr.bf16.vlgmr.msra.gmra.mrb[148].mxu0 %v1883_v18  ;;  %v1890_v16 = vpack.c.bf16 %v1053_v12, %v1053_v12  ;;  %v29813_v18 = vld [vmem:[%s30830_s14 + $0x2708] sm:$0xff]   ;;  %v29849_v12 = vld [vmem:[%s30830_s14 + $0x28d0] sm:$0xff]  }
 0x500   : > { %27334 = vmatpush3.bf16.msra.mxu0 %v29776_v19  ;;  %21408 = vmatmul.mubr.bf16.vlgmr.msra.gmra.mrb[148].mxu1 %v1885_v23  ;;  %v29814_v19 = vld [vmem:[%s30830_s14 + $0x2788] sm:$0xff]   ;;  %v29818_v23 = vld [vmem:[%s30830_s14 + $0x2790] sm:$0xff]  }
 0x501   : > { %27335 = vmatprep.subr.bf16.mxu0 %v29778_v24  ;;  %27356 = vmatpush3.bf16.msra.mxu1 %v29777_v22  ;;  %v29817_v22 = vld [vmem:[%s30830_s14 + $0x2710] sm:$0xff]   ;;  %v29819_v24 = vld [vmem:[%s30830_s14 + $0x2758] sm:$0xff]  }
 0x502   : > { %27357 = vmatprep.subr.bf16.mxu1 %v29779_v26  ;;  %21447 = vmatprep.mubr.bf16.mxu0 %v1888_v11  ;;  %v29821_v26 = vld [vmem:[%s30830_s14 + $0x2718] sm:$0xff]   ;;  %v29848_v11 = vld [vmem:[%s30830_s14 + $0x2850] sm:$0xff]  }
 0x503   : > { %21487 = vmatprep.mubr.bf16.mxu1 %v1890_v16  ;;  %v29853_v16 = vld [vmem:[%s30830_s14 + $0x28d8] sm:$0xff]  }
 0x504   : > { %27336 = vmatpush3.bf16.msra.mxu0 %v29780_v27  ;;  %v29822_v27 = vld [vmem:[%s30830_s14 + $0x2798] sm:$0xff]  }
 0x505   : > { %27337 = vmatprep.subr.bf16.mxu0 %v29782_v29  ;;  %27358 = vmatpush3.bf16.msra.mxu1 %v29781_v28  ;;  %v29823_v28 = vld [vmem:[%s30830_s14 + $0x2760] sm:$0xff]  }
 0x506   : > { %27359 = vmatprep.subr.bf16.mxu1 %v29783_v30  ;;  %v29824_v29 = vld [vmem:[%s30830_s14 + $0x27e0] sm:$0xff]  }
 0x507   : > { %v29825_v30 = vld [vmem:[%s30830_s14 + $0x2720] sm:$0xff]  }
 0x508   : > { %27338 = vmatpush3.bf16.msra.mxu0 %v29784_v31  ;;  %v29826_v31 = vld [vmem:[%s30830_s14 + $0x27a0] sm:$0xff]  }
 0x509   : > { %27339 = vmatprep.subr.bf16.mxu0 %v29786_v33  ;;  %27360 = vmatpush3.bf16.msra.mxu1 %v29785_v32  ;;  %v29827_v32 = vld [vmem:[%s30830_s14 + $0x2768] sm:$0xff]  }
 0x50a   : > { %27361 = vmatprep.subr.bf16.mxu1 %v29787_v34  ;;  %v29828_v34 = vld [vmem:[%s30830_s14 + $0x27e8] sm:$0xff]  }
 0x50c   : > { %27340 = vmatpush3.bf16.msra.mxu0 %v29788_v35 }
 0x50d   : > { %27341 = vmatprep.subr.bf16.mxu0 %v29790_v37  ;;  %27362 = vmatpush3.bf16.msra.mxu1 %v29789_v36  ;;  %v29829_v36 = vld [vmem:[%s30830_s14 + $0x2728] sm:$0xff]  }
 0x50e   : > { %27363 = vmatprep.subr.bf16.mxu1 %v29791_v38 }
 0x510   : > { %27342 = vmatpush3.bf16.msra.mxu0 %v29792_v39 }
 0x511   : > { %27343 = vmatprep.subr.bf16.mxu0 %v29794_v41  ;;  %27364 = vmatpush3.bf16.msra.mxu1 %v29793_v40  ;;  %v29830_v40 = vld [vmem:[%s30830_s14 + $0x27a8] sm:$0xff]   ;;  %v29831_v41 = vld [vmem:[%s30830_s14 + $0x2770] sm:$0xff]  }
 0x512   : > { %v27041_v42 = vpop.f32.mrb[124].mxu0  ;;  %27365 = vmatprep.subr.bf16.mxu1 %v29795_v44 }
 0x513   : > { %v27042_v45 = vpop.f32.mrb[125].mxu0  ;;  %v27063_v47 = vpop.f32.mrb[124].mxu1 }
 0x514   : > { %v27043_v48 = vadd.f32 %v27042_v45, %v27041_v42  ;;  %v27044_v49 = vpop.f32.mrb[126].mxu0  ;;  %v27064_v50 = vpop.f32.mrb[125].mxu1  ;;  %27344 = vmatpush3.bf16.msra.mxu0 %v29796_v46 }
 0x515   : > { %v27045_v52 = vpop.f32.mrb[127].mxu0  ;;  %v27065_v55 = vadd.f32 %v27064_v50, %v27063_v47  ;;  %v27066_v56 = vpop.f32.mrb[126].mxu1  ;;  %27345 = vmatprep.subr.bf16.mxu0 %v29798_v53  ;;  %27366 = vmatpush3.bf16.msra.mxu1 %v29797_v51  ;;  %v29833_v50 = vld [vmem:[%s30830_s14 + $0x2730] sm:$0xff]   ;;  %v29835_v53 = vld [vmem:[%s30830_s14 + $0x2778] sm:$0xff]  }
 0x516   : > { %v20890_v54 = vadd.f32 %v27043_v48, %v32257_v5  ;;  %v27067_v58 = vpop.f32.mrb[127].mxu1  ;;  %27367 = vmatprep.subr.bf16.mxu1 %v29799_v57  ;;  %v29805_v5 = vld [vmem:[%s30830_s14 + $0x26b8] sm:$0xff]   ;;  %v29832_v48 = vld [vmem:[%s30830_s14 + $0x27f0] sm:$0xff]  }
 0x517   : > { %v29834_v52 = vld [vmem:[%s30830_s14 + $0x27b0] sm:$0xff]  }
 0x518   : > { %v32295_v60 = vadd.f32 %v27065_v55, %v20890_v54  ;;  %27346 = vmatpush3.bf16.msra.mxu0 %v29800_v59  ;;  %v29836_v54 = vld [vmem:[%s30830_s14 + $0x27f8] sm:$0xff]   ;;  %v29840_v59 = vld [vmem:[%s30830_s14 + $0x2840] sm:$0xff]  }
 0x519   : > { %27347 = vmatprep.subr.bf16.mxu0 %v29802_v61  ;;  %27368 = vmatpush3.bf16.msra.mxu1 %v29801_v62  ;;  %v29837_v55 = vld [vmem:[%s30830_s14 + $0x2738] sm:$0xff]  }
 0x51a   : > { %27369 = vmatprep.subr.bf16.mxu1 %v29803_v63  ;;  %v302_v56 = vld [vmem:[%s30840_s12 + $0x138] sm:$0xff]  ;;  %v29841_v63 = vld [vmem:[%s30830_s14 + $0x28c0] sm:$0xff]  }
 0x51b   : > { %v1061_v57 = vrot.slane %v302_v56, %v30878_v43  ;;  %v1054_v58 = vcombine.high %v302_v56, %v302_v56  ;;  %v29875_v56 = vld [vmem:[%s30830_s14 + $0x2900] sm:$0xff]  }
 0x51c   : > { %27348 = vmatpush3.bf16.msra.mxu0 %v29804_v0 }
 0x51d   : > { %27377 = vmatprep.subr.bf16.mxu0 %v29807_v4  ;;  %27370 = vmatpush3.bf16.msra.mxu1 %v29805_v5  ;;  %v1069_v61 = vcombine.high %v1061_v57, %v1061_v57  ;;  %v1068_v62 = vrot.slane %v1054_v58, %v30878_v43  ;;  %v1891_v0 = vpack.c.bf16 %v1061_v57, %v1061_v57  ;;  %v29843_v4 = vld [vmem:[%s30830_s14 + $0x2880] sm:$0xff]  }
 0x51e   : > { %27399 = vmatprep.subr.bf16.mxu1 %v29808_v8  ;;  %v29845_v8 = vld [vmem:[%s30830_s14 + $0x28c8] sm:$0xff]  }
 0x51f   : > { %21448 = vmatmul.mubr.bf16.vlgmr.msra.gmra.mrb[152].mxu0 %v1887_v9  ;;  %v1892_v2 = vpack.c.bf16 %v1069_v61, %v1069_v61  ;;  %v1070_v3 = vcombine.high %v1068_v62, %v1068_v62  ;;  %v1893_v5 = vpack.c.bf16 %v1068_v62, %v1068_v62  ;;  %v29846_v9 = vld [vmem:[%s30830_s14 + $0x2808] sm:$0xff]  }
 0x520   : > { %27378 = vmatpush3.bf16.msra.mxu0 %v29809_v10  ;;  %21488 = vmatmul.mubr.bf16.vlgmr.msra.gmra.mrb[152].mxu1 %v1889_v14  ;;  %v29847_v10 = vld [vmem:[%s30830_s14 + $0x2888] sm:$0xff]   ;;  %v29851_v14 = vld [vmem:[%s30830_s14 + $0x2890] sm:$0xff]  }
 0x521   : > { %27379 = vmatprep.subr.bf16.mxu0 %v29811_v15  ;;  %27400 = vmatpush3.bf16.msra.mxu1 %v29810_v13  ;;  %v1894_v7 = vpack.c.bf16 %v1070_v3, %v1070_v3  ;;  %v29850_v13 = vld [vmem:[%s30830_s14 + $0x2810] sm:$0xff]   ;;  %v29852_v15 = vld [vmem:[%s30830_s14 + $0x2858] sm:$0xff]   ;;  %v29877_v61 = vld [vmem:[%s30830_s14 + $0x2948] sm:$0xff]  }
 0x522   : > { %27401 = vmatprep.subr.bf16.mxu1 %v29812_v17  ;;  %21527 = vmatprep.mubr.bf16.mxu0 %v1892_v2  ;;  %v29854_v17 = vld [vmem:[%s30830_s14 + $0x2818] sm:$0xff]   ;;  %v29881_v2 = vld [vmem:[%s30830_s14 + $0x2950] sm:$0xff]  }
 0x523   : > { %21567 = vmatprep.mubr.bf16.mxu1 %v1894_v7  ;;  %v29882_v3 = vld [vmem:[%s30830_s14 + $0x29d0] sm:$0xff]   ;;  %v29886_v7 = vld [vmem:[%s30830_s14 + $0x29d8] sm:$0xff]  }
 0x524   : > { %27380 = vmatpush3.bf16.msra.mxu0 %v29813_v18  ;;  %v29855_v18 = vld [vmem:[%s30830_s14 + $0x2898] sm:$0xff]  }
 0x525   : > { %27381 = vmatprep.subr.bf16.mxu0 %v29815_v20  ;;  %27402 = vmatpush3.bf16.msra.mxu1 %v29814_v19  ;;  %v29856_v19 = vld [vmem:[%s30830_s14 + $0x2860] sm:$0xff]  }
 0x526   : > { %27403 = vmatprep.subr.bf16.mxu1 %v29816_v21  ;;  %v29857_v20 = vld [vmem:[%s30830_s14 + $0x28e0] sm:$0xff]  }
 0x527   : > { %v29858_v21 = vld [vmem:[%s30830_s14 + $0x2820] sm:$0xff]  }
 0x528   : > { %27382 = vmatpush3.bf16.msra.mxu0 %v29817_v22  ;;  %v29859_v22 = vld [vmem:[%s30830_s14 + $0x28a0] sm:$0xff]  }
 0x529   : > { %27383 = vmatprep.subr.bf16.mxu0 %v29819_v24  ;;  %27404 = vmatpush3.bf16.msra.mxu1 %v29818_v23  ;;  %v29860_v23 = vld [vmem:[%s30830_s14 + $0x2868] sm:$0xff]  }
 0x52a   : > { %27405 = vmatprep.subr.bf16.mxu1 %v29820_v25  ;;  %v29861_v25 = vld [vmem:[%s30830_s14 + $0x28e8] sm:$0xff]  }
 0x52c   : > { %27384 = vmatpush3.bf16.msra.mxu0 %v29821_v26 }
 0x52d   : > { %27385 = vmatprep.subr.bf16.mxu0 %v29823_v28  ;;  %27406 = vmatpush3.bf16.msra.mxu1 %v29822_v27  ;;  %v29862_v27 = vld [vmem:[%s30830_s14 + $0x2828] sm:$0xff]  }
 0x52e   : > { %27407 = vmatprep.subr.bf16.mxu1 %v29824_v29 }
 0x530   : > { %27386 = vmatpush3.bf16.msra.mxu0 %v29825_v30 }
 0x531   : > { %27387 = vmatprep.subr.bf16.mxu0 %v29827_v32  ;;  %27408 = vmatpush3.bf16.msra.mxu1 %v29826_v31  ;;  %v29863_v31 = vld [vmem:[%s30830_s14 + $0x28a8] sm:$0xff]   ;;  %v29864_v32 = vld [vmem:[%s30830_s14 + $0x2870] sm:$0xff]  }
 0x532   : > { %v27085_v33 = vpop.f32.mrb[128].mxu0  ;;  %27409 = vmatprep.subr.bf16.mxu1 %v29828_v34 }
 0x533   : > { %v27086_v35 = vpop.f32.mrb[129].mxu0  ;;  %v27107_v37 = vpop.f32.mrb[128].mxu1 }
 0x534   : > { %v27087_v38 = vadd.f32 %v27086_v35, %v27085_v33  ;;  %v27088_v39 = vpop.f32.mrb[130].mxu0  ;;  %v27108_v42 = vpop.f32.mrb[129].mxu1  ;;  %27388 = vmatpush3.bf16.msra.mxu0 %v29829_v36 }
 0x535   : > { %v27089_v44 = vpop.f32.mrb[131].mxu0  ;;  %v27109_v46 = vadd.f32 %v27108_v42, %v27107_v37  ;;  %v27110_v47 = vpop.f32.mrb[130].mxu1  ;;  %27389 = vmatprep.subr.bf16.mxu0 %v29831_v41  ;;  %27410 = vmatpush3.bf16.msra.mxu1 %v29830_v40  ;;  %v29866_v40 = vld [vmem:[%s30830_s14 + $0x2830] sm:$0xff]  }
 0x536   : > { %v20970_v45 = vadd.f32 %v27087_v38, %v32295_v60  ;;  %v27111_v49 = vpop.f32.mrb[131].mxu1  ;;  %27411 = vmatprep.subr.bf16.mxu1 %v29832_v48  ;;  %v29838_v60 = vld [vmem:[%s30830_s14 + $0x27b8] sm:$0xff]   ;;  %v29865_v38 = vld [vmem:[%s30830_s14 + $0x28f0] sm:$0xff]  }
 0x537   : > { %v29867_v42 = vld [vmem:[%s30830_s14 + $0x28b0] sm:$0xff]   ;;  %v29868_v44 = vld [vmem:[%s30830_s14 + $0x2878] sm:$0xff]  }
 0x538   : > { %v32333_v51 = vadd.f32 %v27109_v46, %v20970_v45  ;;  %27390 = vmatpush3.bf16.msra.mxu0 %v29833_v50  ;;  %v29869_v45 = vld [vmem:[%s30830_s14 + $0x28f8] sm:$0xff]  }
 0x539   : > { %27391 = vmatprep.subr.bf16.mxu0 %v29835_v53  ;;  %27412 = vmatpush3.bf16.msra.mxu1 %v29834_v52  ;;  %v29870_v46 = vld [vmem:[%s30830_s14 + $0x2838] sm:$0xff]  }
 0x53a   : > { %27413 = vmatprep.subr.bf16.mxu1 %v29836_v54  ;;  %v303_v47 = vld [vmem:[%s30840_s12 + $0x140] sm:$0xff] }
 0x53b   : > { %v29871_v48 = vld [vmem:[%s30830_s14 + $0x28b8] sm:$0xff]   ;;  %v1078_v49 = vrot.slane %v303_v47, %v30878_v43  ;;  %v1071_v50 = vcombine.high %v303_v47, %v303_v47  ;;  %v29874_v54 = vld [vmem:[%s30830_s14 + $0x29c0] sm:$0xff]  }
 0x53c   : > { %27392 = vmatpush3.bf16.msra.mxu0 %v29837_v55  ;;  %v29908_v47 = vld [vmem:[%s30830_s14 + $0x2a00] sm:$0xff]  }
 0x53d   : > { %27421 = vmatprep.subr.bf16.mxu0 %v29840_v59  ;;  %27414 = vmatpush3.bf16.msra.mxu1 %v29838_v60  ;;  %v1086_v52 = vcombine.high %v1078_v49, %v1078_v49  ;;  %v1085_v53 = vrot.slane %v1071_v50, %v30878_v43  ;;  %v1895_v55 = vpack.c.bf16 %v1078_v49, %v1078_v49  ;;  %v29876_v59 = vld [vmem:[%s30830_s14 + $0x2980] sm:$0xff]  }
 0x53e   : > { %27443 = vmatprep.subr.bf16.mxu1 %v29841_v63  ;;  %v29878_v63 = vld [vmem:[%s30830_s14 + $0x29c8] sm:$0xff]   ;;  %v29909_v50 = vld [vmem:[%s30830_s14 + $0x2a80] sm:$0xff]  }
 0x53f   : > { %21528 = vmatmul.mubr.bf16.vlgmr.msra.gmra.mrb[156].mxu0 %v1891_v0  ;;  %v1896_v57 = vpack.c.bf16 %v1086_v52, %v1086_v52  ;;  %v1087_v58 = vcombine.high %v1085_v53, %v1085_v53  ;;  %v1897_v60 = vpack.c.bf16 %v1085_v53, %v1085_v53  ;;  %v29879_v0 = vld [vmem:[%s30830_s14 + $0x2908] sm:$0xff]  }
 0x540   : > { %27422 = vmatpush3.bf16.msra.mxu0 %v29842_v1  ;;  %21568 = vmatmul.mubr.bf16.vlgmr.msra.gmra.mrb[156].mxu1 %v1893_v5  ;;  %v29880_v1 = vld [vmem:[%s30830_s14 + $0x2988] sm:$0xff]   ;;  %v29884_v5 = vld [vmem:[%s30830_s14 + $0x2990] sm:$0xff]  }
 0x541   : > { %27423 = vmatprep.subr.bf16.mxu0 %v29844_v6  ;;  %27444 = vmatpush3.bf16.msra.mxu1 %v29843_v4  ;;  %v1898_v62 = vpack.c.bf16 %v1087_v58, %v1087_v58  ;;  %v29883_v4 = vld [vmem:[%s30830_s14 + $0x2910] sm:$0xff]   ;;  %v29885_v6 = vld [vmem:[%s30830_s14 + $0x2958] sm:$0xff]   ;;  %v29910_v52 = vld [vmem:[%s30830_s14 + $0x2a48] sm:$0xff]  }
 0x542   : > { %27445 = vmatprep.subr.bf16.mxu1 %v29845_v8  ;;  %21607 = vmatprep.mubr.bf16.mxu0 %v1896_v57  ;;  %v29887_v8 = vld [vmem:[%s30830_s14 + $0x2918] sm:$0xff]   ;;  %v29914_v57 = vld [vmem:[%s30830_s14 + $0x2a50] sm:$0xff]  }
 0x543   : > { %21647 = vmatprep.mubr.bf16.mxu1 %v1898_v62  ;;  %v29915_v58 = vld [vmem:[%s30830_s14 + $0x2ad0] sm:$0xff]   ;;  %v29919_v62 = vld [vmem:[%s30830_s14 + $0x2ad8] sm:$0xff]  }
 0x544   : > { %27424 = vmatpush3.bf16.msra.mxu0 %v29846_v9  ;;  %v29888_v9 = vld [vmem:[%s30830_s14 + $0x2998] sm:$0xff]  }
 0x545   : > { %27425 = vmatprep.subr.bf16.mxu0 %v29848_v11  ;;  %27446 = vmatpush3.bf16.msra.mxu1 %v29847_v10  ;;  %v29889_v10 = vld [vmem:[%s30830_s14 + $0x2960] sm:$0xff]  }
 0x546   : > { %27447 = vmatprep.subr.bf16.mxu1 %v29849_v12  ;;  %v29890_v11 = vld [vmem:[%s30830_s14 + $0x29e0] sm:$0xff]  }
 0x547   : > { %v29891_v12 = vld [vmem:[%s30830_s14 + $0x2920] sm:$0xff]  }
 0x548   : > { %27426 = vmatpush3.bf16.msra.mxu0 %v29850_v13  ;;  %v29892_v13 = vld [vmem:[%s30830_s14 + $0x29a0] sm:$0xff]  }
 0x549   : > { %27427 = vmatprep.subr.bf16.mxu0 %v29852_v15  ;;  %27448 = vmatpush3.bf16.msra.mxu1 %v29851_v14  ;;  %v29893_v14 = vld [vmem:[%s30830_s14 + $0x2968] sm:$0xff]  }
 0x54a   : > { %27449 = vmatprep.subr.bf16.mxu1 %v29853_v16  ;;  %v29894_v16 = vld [vmem:[%s30830_s14 + $0x29e8] sm:$0xff]  }
 0x54c   : > { %27428 = vmatpush3.bf16.msra.mxu0 %v29854_v17 }
 0x54d   : > { %27429 = vmatprep.subr.bf16.mxu0 %v29856_v19  ;;  %27450 = vmatpush3.bf16.msra.mxu1 %v29855_v18  ;;  %v29895_v18 = vld [vmem:[%s30830_s14 + $0x2928] sm:$0xff]  }
 0x54e   : > { %27451 = vmatprep.subr.bf16.mxu1 %v29857_v20 }
 0x550   : > { %27430 = vmatpush3.bf16.msra.mxu0 %v29858_v21 }
 0x551   : > { %27431 = vmatprep.subr.bf16.mxu0 %v29860_v23  ;;  %27452 = vmatpush3.bf16.msra.mxu1 %v29859_v22  ;;  %v29896_v23 = vld [vmem:[%s30830_s14 + $0x29a8] sm:$0xff]  }
 0x552   : > { %v27129_v24 = vpop.f32.mrb[132].mxu0  ;;  %27453 = vmatprep.subr.bf16.mxu1 %v29861_v25  ;;  %v29897_v25 = vld [vmem:[%s30830_s14 + $0x2970] sm:$0xff]  }
 0x553   : > { %v27130_v26 = vpop.f32.mrb[133].mxu0  ;;  %v27151_v28 = vpop.f32.mrb[132].mxu1 }
 0x554   : > { %v27131_v29 = vadd.f32 %v27130_v26, %v27129_v24  ;;  %v27132_v30 = vpop.f32.mrb[134].mxu0  ;;  %v27152_v33 = vpop.f32.mrb[133].mxu1  ;;  %27432 = vmatpush3.bf16.msra.mxu0 %v29862_v27 }
 0x555   : > { %v27133_v34 = vpop.f32.mrb[135].mxu0  ;;  %v27153_v36 = vadd.f32 %v27152_v33, %v27151_v28  ;;  %v27154_v37 = vpop.f32.mrb[134].mxu1  ;;  %27433 = vmatprep.subr.bf16.mxu0 %v29864_v32  ;;  %27454 = vmatpush3.bf16.msra.mxu1 %v29863_v31  ;;  %v29899_v31 = vld [vmem:[%s30830_s14 + $0x2930] sm:$0xff]   ;;  %v29901_v33 = vld [vmem:[%s30830_s14 + $0x2978] sm:$0xff]  }
 0x556   : > { %v21050_v35 = vadd.f32 %v27131_v29, %v32333_v51  ;;  %v27155_v39 = vpop.f32.mrb[135].mxu1  ;;  %27455 = vmatprep.subr.bf16.mxu1 %v29865_v38  ;;  %v29873_v51 = vld [vmem:[%s30830_s14 + $0x2940] sm:$0xff]   ;;  %v29898_v29 = vld [vmem:[%s30830_s14 + $0x29f0] sm:$0xff]  }
 0x557   : > { %v29900_v34 = vld [vmem:[%s30830_s14 + $0x29b0] sm:$0xff]   ;;  %v304_v37 = vld [vmem:[%s30840_s12 + $0x148] sm:$0xff] }
 0x558   : > { %v32371_v41 = vadd.f32 %v27153_v36, %v21050_v35  ;;  %27434 = vmatpush3.bf16.msra.mxu0 %v29866_v40  ;;  %v29902_v35 = vld [vmem:[%s30830_s14 + $0x29f8] sm:$0xff]   ;;  %v1095_v38 = vrot.slane %v304_v37, %v30878_v43  ;;  %v1088_v39 = vcombine.high %v304_v37, %v304_v37  ;;  %v29906_v40 = vld [vmem:[%s30830_s14 + $0x2a40] sm:$0xff]  }
 0x559   : > { %27435 = vmatprep.subr.bf16.mxu0 %v29868_v44  ;;  %27456 = vmatpush3.bf16.msra.mxu1 %v29867_v42  ;;  %v29903_v36 = vld [vmem:[%s30830_s14 + $0x2938] sm:$0xff]   ;;  %v29941_v37 = vld [vmem:[%s30830_s14 + $0x2b00] sm:$0xff]  }
 0x55a   : > { %27457 = vmatprep.subr.bf16.mxu1 %v29869_v45  ;;  %v1103_v42 = vcombine.high %v1095_v38, %v1095_v38  ;;  %v1102_v44 = vrot.slane %v1088_v39, %v30878_v43  ;;  %v29907_v45 = vld [vmem:[%s30830_s14 + $0x2ac0] sm:$0xff]  }
 0x55c   : > { %27436 = vmatpush3.bf16.msra.mxu0 %v29870_v46  ;;  %v1899_v46 = vpack.c.bf16 %v1095_v38, %v1095_v38  ;;  %v1104_v49 = vcombine.high %v1102_v44, %v1102_v44 }
 0x55d   : > { %27465 = vmatprep.subr.bf16.mxu0 %v29873_v51  ;;  %27458 = vmatpush3.bf16.msra.mxu1 %v29871_v48  ;;  %v1900_v48 = vpack.c.bf16 %v1103_v42, %v1103_v42  ;;  %v1901_v51 = vpack.c.bf16 %v1102_v44, %v1102_v44  ;;  %v29943_v42 = vld [vmem:[%s30830_s14 + $0x2b48] sm:$0xff]  }
 0x55e   : > { %27487 = vmatprep.subr.bf16.mxu1 %v29874_v54  ;;  %v1902_v53 = vpack.c.bf16 %v1104_v49, %v1104_v49  ;;  %v29911_v54 = vld [vmem:[%s30830_s14 + $0x2ac8] sm:$0xff]   ;;  %v29948_v49 = vld [vmem:[%s30830_s14 + $0x2bd0] sm:$0xff]  }
 0x55f   : > { %21608 = vmatmul.mubr.bf16.vlgmr.msra.gmra.mrb[160].mxu0 %v1895_v55  ;;  %v29912_v55 = vld [vmem:[%s30830_s14 + $0x2a08] sm:$0xff]  }
 0x560   : > { %27466 = vmatpush3.bf16.msra.mxu0 %v29875_v56  ;;  %21648 = vmatmul.mubr.bf16.vlgmr.msra.gmra.mrb[160].mxu1 %v1897_v60  ;;  %v29913_v56 = vld [vmem:[%s30830_s14 + $0x2a88] sm:$0xff]   ;;  %v29917_v60 = vld [vmem:[%s30830_s14 + $0x2a90] sm:$0xff]  }
 0x561   : > { %27467 = vmatprep.subr.bf16.mxu0 %v29877_v61  ;;  %27488 = vmatpush3.bf16.msra.mxu1 %v29876_v59  ;;  %v29916_v59 = vld [vmem:[%s30830_s14 + $0x2a10] sm:$0xff]   ;;  %v29918_v61 = vld [vmem:[%s30830_s14 + $0x2a58] sm:$0xff]  }
 0x562   : > { %27489 = vmatprep.subr.bf16.mxu1 %v29878_v63  ;;  %21687 = vmatprep.mubr.bf16.mxu0 %v1900_v48  ;;  %v29920_v63 = vld [vmem:[%s30830_s14 + $0x2a18] sm:$0xff]   ;;  %v29947_v48 = vld [vmem:[%s30830_s14 + $0x2b50] sm:$0xff]  }
 0x563   : > { %21727 = vmatprep.mubr.bf16.mxu1 %v1902_v53  ;;  %v29952_v53 = vld [vmem:[%s30830_s14 + $0x2bd8] sm:$0xff]  }
 0x564   : > { %27468 = vmatpush3.bf16.msra.mxu0 %v29879_v0  ;;  %v29921_v0 = vld [vmem:[%s30830_s14 + $0x2a98] sm:$0xff]  }
 0x565   : > { %27469 = vmatprep.subr.bf16.mxu0 %v29881_v2  ;;  %27490 = vmatpush3.bf16.msra.mxu1 %v29880_v1  ;;  %v29922_v1 = vld [vmem:[%s30830_s14 + $0x2a60] sm:$0xff]  }
 0x566   : > { %27491 = vmatprep.subr.bf16.mxu1 %v29882_v3  ;;  %v29923_v2 = vld [vmem:[%s30830_s14 + $0x2ae0] sm:$0xff]  }
 0x567   : > { %v29924_v3 = vld [vmem:[%s30830_s14 + $0x2a20] sm:$0xff]  }
 0x568   : > { %27470 = vmatpush3.bf16.msra.mxu0 %v29883_v4  ;;  %v29925_v4 = vld [vmem:[%s30830_s14 + $0x2aa0] sm:$0xff]  }
 0x569   : > { %27471 = vmatprep.subr.bf16.mxu0 %v29885_v6  ;;  %27492 = vmatpush3.bf16.msra.mxu1 %v29884_v5  ;;  %v29926_v5 = vld [vmem:[%s30830_s14 + $0x2a68] sm:$0xff]  }
 0x56a   : > { %27493 = vmatprep.subr.bf16.mxu1 %v29886_v7  ;;  %v29927_v7 = vld [vmem:[%s30830_s14 + $0x2ae8] sm:$0xff]  }
 0x56c   : > { %27472 = vmatpush3.bf16.msra.mxu0 %v29887_v8 }
 0x56d   : > { %27473 = vmatprep.subr.bf16.mxu0 %v29889_v10  ;;  %27494 = vmatpush3.bf16.msra.mxu1 %v29888_v9  ;;  %v29928_v9 = vld [vmem:[%s30830_s14 + $0x2a28] sm:$0xff]  }
 0x56e   : > { %27495 = vmatprep.subr.bf16.mxu1 %v29890_v11 }
 0x570   : > { %27474 = vmatpush3.bf16.msra.mxu0 %v29891_v12 }
 0x571   : > { %27475 = vmatprep.subr.bf16.mxu0 %v29893_v14  ;;  %27496 = vmatpush3.bf16.msra.mxu1 %v29892_v13  ;;  %v29929_v13 = vld [vmem:[%s30830_s14 + $0x2aa8] sm:$0xff]   ;;  %v29930_v14 = vld [vmem:[%s30830_s14 + $0x2a70] sm:$0xff]  }
 0x572   : > { %v27173_v15 = vpop.f32.mrb[136].mxu0  ;;  %27497 = vmatprep.subr.bf16.mxu1 %v29894_v16 }
 0x573   : > { %v27174_v17 = vpop.f32.mrb[137].mxu0  ;;  %v27195_v19 = vpop.f32.mrb[136].mxu1 }
 0x574   : > { %v27175_v20 = vadd.f32 %v27174_v17, %v27173_v15  ;;  %v27176_v21 = vpop.f32.mrb[138].mxu0  ;;  %v27196_v22 = vpop.f32.mrb[137].mxu1  ;;  %27476 = vmatpush3.bf16.msra.mxu0 %v29895_v18 }
 0x575   : > { %v27177_v24 = vpop.f32.mrb[139].mxu0  ;;  %v27197_v27 = vadd.f32 %v27196_v22, %v27195_v19  ;;  %v27198_v28 = vpop.f32.mrb[138].mxu1  ;;  %27477 = vmatprep.subr.bf16.mxu0 %v29897_v25  ;;  %27498 = vmatpush3.bf16.msra.mxu1 %v29896_v23  ;;  %v29932_v22 = vld [vmem:[%s30830_s14 + $0x2a30] sm:$0xff]   ;;  %v29934_v25 = vld [vmem:[%s30830_s14 + $0x2a78] sm:$0xff]  }
 0x576   : > { %v21130_v26 = vadd.f32 %v27175_v20, %v32371_v41  ;;  %v27199_v30 = vpop.f32.mrb[139].mxu1  ;;  %27499 = vmatprep.subr.bf16.mxu1 %v29898_v29  ;;  %v29904_v41 = vld [vmem:[%s30830_s14 + $0x29b8] sm:$0xff]   ;;  %v29931_v20 = vld [vmem:[%s30830_s14 + $0x2af0] sm:$0xff]  }
 0x577   : > { %v29933_v24 = vld [vmem:[%s30830_s14 + $0x2ab0] sm:$0xff]  }
 0x578   : > { %v32409_v32 = vadd.f32 %v27197_v27, %v21130_v26  ;;  %27478 = vmatpush3.bf16.msra.mxu0 %v29899_v31  ;;  %v29935_v26 = vld [vmem:[%s30830_s14 + $0x2af8] sm:$0xff]   ;;  %v305_v28 = vld [vmem:[%s30840_s12 + $0x150] sm:$0xff]  ;;  %v29939_v31 = vld [vmem:[%s30830_s14 + $0x2b40] sm:$0xff]  }
 0x579   : > { %27479 = vmatprep.subr.bf16.mxu0 %v29901_v33  ;;  %27500 = vmatpush3.bf16.msra.mxu1 %v29900_v34  ;;  %v29936_v27 = vld [vmem:[%s30830_s14 + $0x2a38] sm:$0xff]   ;;  %v1112_v29 = vrot.slane %v305_v28, %v30878_v43  ;;  %v1105_v30 = vcombine.high %v305_v28, %v305_v28  ;;  %v29974_v28 = vld [vmem:[%s30830_s14 + $0x2c00] sm:$0xff]  }
 0x57a   : > { %27501 = vmatprep.subr.bf16.mxu1 %v29902_v35  ;;  %v29940_v35 = vld [vmem:[%s30830_s14 + $0x2bc0] sm:$0xff]  }
 0x57b   : > { %v1120_v33 = vcombine.high %v1112_v29, %v1112_v29  ;;  %v1119_v34 = vrot.slane %v1105_v30, %v30878_v43 }
 0x57c   : > { %27480 = vmatpush3.bf16.msra.mxu0 %v29903_v36  ;;  %v1903_v36 = vpack.c.bf16 %v1112_v29, %v1112_v29 }
 0x57d   : > { %27509 = vmatprep.subr.bf16.mxu0 %v29906_v40  ;;  %27502 = vmatpush3.bf16.msra.mxu1 %v29904_v41  ;;  %v1904_v38 = vpack.c.bf16 %v1120_v33, %v1120_v33  ;;  %v1121_v39 = vcombine.high %v1119_v34, %v1119_v34  ;;  %v29942_v40 = vld [vmem:[%s30830_s14 + $0x2b80] sm:$0xff]   ;;  %v1905_v41 = vpack.c.bf16 %v1119_v34, %v1119_v34  ;;  %v29976_v33 = vld [vmem:[%s30830_s14 + $0x2c48] sm:$0xff]  }
 0x57e   : > { %27531 = vmatprep.subr.bf16.mxu1 %v29907_v45  ;;  %v29944_v45 = vld [vmem:[%s30830_s14 + $0x2bc8] sm:$0xff]  }
 0x57f   : > { %21688 = vmatmul.mubr.bf16.vlgmr.msra.gmra.mrb[164].mxu0 %v1899_v46  ;;  %v1906_v44 = vpack.c.bf16 %v1121_v39, %v1121_v39  ;;  %v29945_v46 = vld [vmem:[%s30830_s14 + $0x2b08] sm:$0xff]   ;;  %v29981_v39 = vld [vmem:[%s30830_s14 + $0x2cd0] sm:$0xff]  }
 0x580   : > { %27510 = vmatpush3.bf16.msra.mxu0 %v29908_v47  ;;  %21728 = vmatmul.mubr.bf16.vlgmr.msra.gmra.mrb[164].mxu1 %v1901_v51  ;;  %v29946_v47 = vld [vmem:[%s30830_s14 + $0x2b88] sm:$0xff]   ;;  %v29950_v51 = vld [vmem:[%s30830_s14 + $0x2b90] sm:$0xff]  }
 0x581   : > { %27511 = vmatprep.subr.bf16.mxu0 %v29910_v52  ;;  %27532 = vmatpush3.bf16.msra.mxu1 %v29909_v50  ;;  %v29949_v50 = vld [vmem:[%s30830_s14 + $0x2b10] sm:$0xff]   ;;  %v29951_v52 = vld [vmem:[%s30830_s14 + $0x2b58] sm:$0xff]  }
 0x582   : > { %27533 = vmatprep.subr.bf16.mxu1 %v29911_v54  ;;  %21767 = vmatprep.mubr.bf16.mxu0 %v1904_v38  ;;  %v29953_v54 = vld [vmem:[%s30830_s14 + $0x2b18] sm:$0xff]   ;;  %v29980_v38 = vld [vmem:[%s30830_s14 + $0x2c50] sm:$0xff]  }
 0x583   : > { %21807 = vmatprep.mubr.bf16.mxu1 %v1906_v44  ;;  %v29985_v44 = vld [vmem:[%s30830_s14 + $0x2cd8] sm:$0xff]  }
 0x584   : > { %27512 = vmatpush3.bf16.msra.mxu0 %v29912_v55  ;;  %v29954_v55 = vld [vmem:[%s30830_s14 + $0x2b98] sm:$0xff]  }
 0x585   : > { %27513 = vmatprep.subr.bf16.mxu0 %v29914_v57  ;;  %27534 = vmatpush3.bf16.msra.mxu1 %v29913_v56  ;;  %v29955_v56 = vld [vmem:[%s30830_s14 + $0x2b60] sm:$0xff]  }
 0x586   : > { %27535 = vmatprep.subr.bf16.mxu1 %v29915_v58  ;;  %v29956_v57 = vld [vmem:[%s30830_s14 + $0x2be0] sm:$0xff]  }
 0x587   : > { %v29957_v58 = vld [vmem:[%s30830_s14 + $0x2b20] sm:$0xff]  }
 0x588   : > { %27514 = vmatpush3.bf16.msra.mxu0 %v29916_v59  ;;  %v29958_v59 = vld [vmem:[%s30830_s14 + $0x2ba0] sm:$0xff]  }
 0x589   : > { %27515 = vmatprep.subr.bf16.mxu0 %v29918_v61  ;;  %27536 = vmatpush3.bf16.msra.mxu1 %v29917_v60  ;;  %v29959_v60 = vld [vmem:[%s30830_s14 + $0x2b68] sm:$0xff]  }
 0x58a   : > { %27537 = vmatprep.subr.bf16.mxu1 %v29919_v62  ;;  %v29960_v62 = vld [vmem:[%s30830_s14 + $0x2be8] sm:$0xff]  }
 0x58c   : > { %27516 = vmatpush3.bf16.msra.mxu0 %v29920_v63 }
 0x58d   : > { %27517 = vmatprep.subr.bf16.mxu0 %v29922_v1  ;;  %27538 = vmatpush3.bf16.msra.mxu1 %v29921_v0  ;;  %v29961_v0 = vld [vmem:[%s30830_s14 + $0x2b28] sm:$0xff]  }
 0x58e   : > { %27539 = vmatprep.subr.bf16.mxu1 %v29923_v2 }
 0x590   : > { %27518 = vmatpush3.bf16.msra.mxu0 %v29924_v3 }
 0x591   : > { %27519 = vmatprep.subr.bf16.mxu0 %v29926_v5  ;;  %27540 = vmatpush3.bf16.msra.mxu1 %v29925_v4  ;;  %v29962_v4 = vld [vmem:[%s30830_s14 + $0x2ba8] sm:$0xff]   ;;  %v29963_v5 = vld [vmem:[%s30830_s14 + $0x2b70] sm:$0xff]  }
 0x592   : > { %v27217_v6 = vpop.f32.mrb[140].mxu0  ;;  %27541 = vmatprep.subr.bf16.mxu1 %v29927_v7 }
 0x593   : > { %v27218_v8 = vpop.f32.mrb[141].mxu0  ;;  %v27239_v10 = vpop.f32.mrb[140].mxu1 }
 0x594   : > { %v27219_v11 = vadd.f32 %v27218_v8, %v27217_v6  ;;  %v27220_v12 = vpop.f32.mrb[142].mxu0  ;;  %v27240_v15 = vpop.f32.mrb[141].mxu1  ;;  %27520 = vmatpush3.bf16.msra.mxu0 %v29928_v9 }
 0x595   : > { %v27221_v16 = vpop.f32.mrb[143].mxu0  ;;  %v27241_v18 = vadd.f32 %v27240_v15, %v27239_v10  ;;  %v27242_v19 = vpop.f32.mrb[142].mxu1  ;;  %27521 = vmatprep.subr.bf16.mxu0 %v29930_v14  ;;  %27542 = vmatpush3.bf16.msra.mxu1 %v29929_v13  ;;  %v29965_v13 = vld [vmem:[%s30830_s14 + $0x2b30] sm:$0xff]  }
 0x596   : > { %v21210_v17 = vadd.f32 %v27219_v11, %v32409_v32  ;;  %v27243_v21 = vpop.f32.mrb[143].mxu1  ;;  %27543 = vmatprep.subr.bf16.mxu1 %v29931_v20  ;;  %v29937_v32 = vld [vmem:[%s30830_s14 + $0x2ab8] sm:$0xff]   ;;  %v29964_v11 = vld [vmem:[%s30830_s14 + $0x2bf0] sm:$0xff]  }
 0x597   : > { %v29966_v15 = vld [vmem:[%s30830_s14 + $0x2bb0] sm:$0xff]   ;;  %v29967_v16 = vld [vmem:[%s30830_s14 + $0x2b78] sm:$0xff]  }
 0x598   : > { %v32447_v23 = vadd.f32 %v27241_v18, %v21210_v17  ;;  %27522 = vmatpush3.bf16.msra.mxu0 %v29932_v22  ;;  %v29968_v17 = vld [vmem:[%s30830_s14 + $0x2bf8] sm:$0xff]  }
 0x599   : > { %27523 = vmatprep.subr.bf16.mxu0 %v29934_v25  ;;  %27544 = vmatpush3.bf16.msra.mxu1 %v29933_v24  ;;  %v29969_v18 = vld [vmem:[%s30830_s14 + $0x2b38] sm:$0xff]  }
 0x59a   : > { %27545 = vmatprep.subr.bf16.mxu1 %v29935_v26  ;;  %v306_v19 = vld [vmem:[%s30840_s12 + $0x158] sm:$0xff]  ;;  %v29973_v26 = vld [vmem:[%s30830_s14 + $0x2cc0] sm:$0xff]  }
 0x59b   : > { %v29970_v20 = vld [vmem:[%s30830_s14 + $0x2bb8] sm:$0xff]   ;;  %v1129_v21 = vrot.slane %v306_v19, %v30878_v43  ;;  %v1122_v22 = vcombine.high %v306_v19, %v306_v19  ;;  %v30007_v19 = vld [vmem:[%s30830_s14 + $0x2d00] sm:$0xff]  }
 0x59c   : > { %27524 = vmatpush3.bf16.msra.mxu0 %v29936_v27 }
 0x59d   : > { %27553 = vmatprep.subr.bf16.mxu0 %v29939_v31  ;;  %27546 = vmatpush3.bf16.msra.mxu1 %v29937_v32  ;;  %v1137_v24 = vcombine.high %v1129_v21, %v1129_v21  ;;  %v1136_v25 = vrot.slane %v1122_v22, %v30878_v43  ;;  %v1907_v27 = vpack.c.bf16 %v1129_v21, %v1129_v21  ;;  %v29975_v31 = vld [vmem:[%s30830_s14 + $0x2c80] sm:$0xff]  }
 0x59e   : > { %27575 = vmatprep.subr.bf16.mxu1 %v29940_v35  ;;  %v29977_v35 = vld [vmem:[%s30830_s14 + $0x2cc8] sm:$0xff]   ;;  %v30008_v22 = vld [vmem:[%s30830_s14 + $0x2d80] sm:$0xff]  }
 0x59f   : > { %21768 = vmatmul.mubr.bf16.vlgmr.msra.gmra.mrb[168].mxu0 %v1903_v36  ;;  %v1908_v29 = vpack.c.bf16 %v1137_v24, %v1137_v24  ;;  %v1138_v30 = vcombine.high %v1136_v25, %v1136_v25  ;;  %v1909_v32 = vpack.c.bf16 %v1136_v25, %v1136_v25  ;;  %v29978_v36 = vld [vmem:[%s30830_s14 + $0x2c08] sm:$0xff]  }
 0x5a0   : > { %27554 = vmatpush3.bf16.msra.mxu0 %v29941_v37  ;;  %21808 = vmatmul.mubr.bf16.vlgmr.msra.gmra.mrb[168].mxu1 %v1905_v41  ;;  %v29979_v37 = vld [vmem:[%s30830_s14 + $0x2c88] sm:$0xff]   ;;  %v29983_v41 = vld [vmem:[%s30830_s14 + $0x2c90] sm:$0xff]  }
 0x5a1   : > { %27555 = vmatprep.subr.bf16.mxu0 %v29943_v42  ;;  %27576 = vmatpush3.bf16.msra.mxu1 %v29942_v40  ;;  %v1910_v34 = vpack.c.bf16 %v1138_v30, %v1138_v30  ;;  %v29982_v40 = vld [vmem:[%s30830_s14 + $0x2c10] sm:$0xff]   ;;  %v29984_v42 = vld [vmem:[%s30830_s14 + $0x2c58] sm:$0xff]   ;;  %v30009_v24 = vld [vmem:[%s30830_s14 + $0x2d48] sm:$0xff]  }
 0x5a2   : > { %27577 = vmatprep.subr.bf16.mxu1 %v29944_v45  ;;  %21847 = vmatprep.mubr.bf16.mxu0 %v1908_v29  ;;  %v29986_v45 = vld [vmem:[%s30830_s14 + $0x2c18] sm:$0xff]   ;;  %v30013_v29 = vld [vmem:[%s30830_s14 + $0x2d50] sm:$0xff]  }
 0x5a3   : > { %21887 = vmatprep.mubr.bf16.mxu1 %v1910_v34  ;;  %v30014_v30 = vld [vmem:[%s30830_s14 + $0x2dd0] sm:$0xff]   ;;  %v30018_v34 = vld [vmem:[%s30830_s14 + $0x2dd8] sm:$0xff]  }
 0x5a4   : > { %27556 = vmatpush3.bf16.msra.mxu0 %v29945_v46  ;;  %v29987_v46 = vld [vmem:[%s30830_s14 + $0x2c98] sm:$0xff]  }
 0x5a5   : > { %27557 = vmatprep.subr.bf16.mxu0 %v29947_v48  ;;  %27578 = vmatpush3.bf16.msra.mxu1 %v29946_v47  ;;  %v29988_v47 = vld [vmem:[%s30830_s14 + $0x2c60] sm:$0xff]  }
 0x5a6   : > { %27579 = vmatprep.subr.bf16.mxu1 %v29948_v49  ;;  %v29989_v48 = vld [vmem:[%s30830_s14 + $0x2ce0] sm:$0xff]  }
 0x5a7   : > { %v29990_v49 = vld [vmem:[%s30830_s14 + $0x2c20] sm:$0xff]  }
 0x5a8   : > { %27558 = vmatpush3.bf16.msra.mxu0 %v29949_v50  ;;  %v29991_v50 = vld [vmem:[%s30830_s14 + $0x2ca0] sm:$0xff]  }
 0x5a9   : > { %27559 = vmatprep.subr.bf16.mxu0 %v29951_v52  ;;  %27580 = vmatpush3.bf16.msra.mxu1 %v29950_v51  ;;  %v29992_v51 = vld [vmem:[%s30830_s14 + $0x2c68] sm:$0xff]  }
 0x5aa   : > { %27581 = vmatprep.subr.bf16.mxu1 %v29952_v53  ;;  %v29993_v53 = vld [vmem:[%s30830_s14 + $0x2ce8] sm:$0xff]  }
 0x5ac   : > { %27560 = vmatpush3.bf16.msra.mxu0 %v29953_v54 }
 0x5ad   : > { %27561 = vmatprep.subr.bf16.mxu0 %v29955_v56  ;;  %27582 = vmatpush3.bf16.msra.mxu1 %v29954_v55  ;;  %v29994_v55 = vld [vmem:[%s30830_s14 + $0x2c28] sm:$0xff]  }
 0x5ae   : > { %27583 = vmatprep.subr.bf16.mxu1 %v29956_v57 }
 0x5b0   : > { %27562 = vmatpush3.bf16.msra.mxu0 %v29957_v58 }
 0x5b1   : > { %27563 = vmatprep.subr.bf16.mxu0 %v29959_v60  ;;  %27584 = vmatpush3.bf16.msra.mxu1 %v29958_v59  ;;  %v29995_v60 = vld [vmem:[%s30830_s14 + $0x2ca8] sm:$0xff]  }
 0x5b2   : > { %v27261_v61 = vpop.f32.mrb[144].mxu0  ;;  %27585 = vmatprep.subr.bf16.mxu1 %v29960_v62  ;;  %v29996_v62 = vld [vmem:[%s30830_s14 + $0x2c70] sm:$0xff]  }
 0x5b3   : > { %v27262_v63 = vpop.f32.mrb[145].mxu0  ;;  %v27283_v1 = vpop.f32.mrb[144].mxu1 }
 0x5b4   : > { %v27263_v2 = vadd.f32 %v27262_v63, %v27261_v61  ;;  %v27264_v3 = vpop.f32.mrb[146].mxu0  ;;  %v27284_v6 = vpop.f32.mrb[145].mxu1  ;;  %27564 = vmatpush3.bf16.msra.mxu0 %v29961_v0 }
 0x5b5   : > { %v27265_v7 = vpop.f32.mrb[147].mxu0  ;;  %v27285_v9 = vadd.f32 %v27284_v6, %v27283_v1  ;;  %v27286_v10 = vpop.f32.mrb[146].mxu1  ;;  %27565 = vmatprep.subr.bf16.mxu0 %v29963_v5  ;;  %27586 = vmatpush3.bf16.msra.mxu1 %v29962_v4  ;;  %v29998_v4 = vld [vmem:[%s30830_s14 + $0x2c30] sm:$0xff]   ;;  %v30000_v6 = vld [vmem:[%s30830_s14 + $0x2c78] sm:$0xff]  }
 0x5b6   : > { %v21290_v8 = vadd.f32 %v27263_v2, %v32447_v23  ;;  %v27287_v12 = vpop.f32.mrb[147].mxu1  ;;  %27587 = vmatprep.subr.bf16.mxu1 %v29964_v11  ;;  %v29972_v23 = vld [vmem:[%s30830_s14 + $0x2c40] sm:$0xff]   ;;  %v29997_v2 = vld [vmem:[%s30830_s14 + $0x2cf0] sm:$0xff]  }
 0x5b7   : > { %v29999_v7 = vld [vmem:[%s30830_s14 + $0x2cb0] sm:$0xff]   ;;  %v307_v10 = vld [vmem:[%s30840_s12 + $0x160] sm:$0xff] }
 0x5b8   : > { %v32485_v14 = vadd.f32 %v27285_v9, %v21290_v8  ;;  %27566 = vmatpush3.bf16.msra.mxu0 %v29965_v13  ;;  %v30001_v8 = vld [vmem:[%s30830_s14 + $0x2cf8] sm:$0xff]   ;;  %v1146_v11 = vrot.slane %v307_v10, %v30878_v43  ;;  %v1139_v12 = vcombine.high %v307_v10, %v307_v10  ;;  %v30005_v13 = vld [vmem:[%s30830_s14 + $0x2d40] sm:$0xff]  }
 0x5b9   : > { %27567 = vmatprep.subr.bf16.mxu0 %v29967_v16  ;;  %27588 = vmatpush3.bf16.msra.mxu1 %v29966_v15  ;;  %v30002_v9 = vld [vmem:[%s30830_s14 + $0x2c38] sm:$0xff]   ;;  %v30040_v10 = vld [vmem:[%s30830_s14 + $0x2e00] sm:$0xff]  }
 0x5ba   : > { %27589 = vmatprep.subr.bf16.mxu1 %v29968_v17  ;;  %v1154_v15 = vcombine.high %v1146_v11, %v1146_v11  ;;  %v1153_v16 = vrot.slane %v1139_v12, %v30878_v43  ;;  %v30006_v17 = vld [vmem:[%s30830_s14 + $0x2dc0] sm:$0xff]  }
 0x5bc   : > { %27568 = vmatpush3.bf16.msra.mxu0 %v29969_v18  ;;  %v1911_v18 = vpack.c.bf16 %v1146_v11, %v1146_v11  ;;  %v1155_v21 = vcombine.high %v1153_v16, %v1153_v16 }
 0x5bd   : > { %27597 = vmatprep.subr.bf16.mxu0 %v29972_v23  ;;  %27590 = vmatpush3.bf16.msra.mxu1 %v29970_v20  ;;  %v1912_v20 = vpack.c.bf16 %v1154_v15, %v1154_v15  ;;  %v1913_v23 = vpack.c.bf16 %v1153_v16, %v1153_v16  ;;  %v30042_v15 = vld [vmem:[%s30830_s14 + $0x2e48] sm:$0xff]  }
 0x5be   : > { %27619 = vmatprep.subr.bf16.mxu1 %v29973_v26  ;;  %v1914_v25 = vpack.c.bf16 %v1155_v21, %v1155_v21  ;;  %v30010_v26 = vld [vmem:[%s30830_s14 + $0x2dc8] sm:$0xff]   ;;  %v30047_v21 = vld [vmem:[%s30830_s14 + $0x2ed0] sm:$0xff]  }
 0x5bf   : > { %21848 = vmatmul.mubr.bf16.vlgmr.msra.gmra.mrb[172].mxu0 %v1907_v27  ;;  %v30011_v27 = vld [vmem:[%s30830_s14 + $0x2d08] sm:$0xff]  }
 0x5c0   : > { %27598 = vmatpush3.bf16.msra.mxu0 %v29974_v28  ;;  %21888 = vmatmul.mubr.bf16.vlgmr.msra.gmra.mrb[172].mxu1 %v1909_v32  ;;  %v30012_v28 = vld [vmem:[%s30830_s14 + $0x2d88] sm:$0xff]   ;;  %v30016_v32 = vld [vmem:[%s30830_s14 + $0x2d90] sm:$0xff]  }
 0x5c1   : > { %27599 = vmatprep.subr.bf16.mxu0 %v29976_v33  ;;  %27620 = vmatpush3.bf16.msra.mxu1 %v29975_v31  ;;  %v30015_v31 = vld [vmem:[%s30830_s14 + $0x2d10] sm:$0xff]   ;;  %v30017_v33 = vld [vmem:[%s30830_s14 + $0x2d58] sm:$0xff]  }
 0x5c2   : > { %27621 = vmatprep.subr.bf16.mxu1 %v29977_v35  ;;  %21927 = vmatprep.mubr.bf16.mxu0 %v1912_v20  ;;  %v30019_v35 = vld [vmem:[%s30830_s14 + $0x2d18] sm:$0xff]   ;;  %v30046_v20 = vld [vmem:[%s30830_s14 + $0x2e50] sm:$0xff]  }
 0x5c3   : > { %21967 = vmatprep.mubr.bf16.mxu1 %v1914_v25  ;;  %v30051_v25 = vld [vmem:[%s30830_s14 + $0x2ed8] sm:$0xff]  }
 0x5c4   : > { %27600 = vmatpush3.bf16.msra.mxu0 %v29978_v36  ;;  %v30020_v36 = vld [vmem:[%s30830_s14 + $0x2d98] sm:$0xff]  }
 0x5c5   : > { %27601 = vmatprep.subr.bf16.mxu0 %v29980_v38  ;;  %27622 = vmatpush3.bf16.msra.mxu1 %v29979_v37  ;;  %v30021_v37 = vld [vmem:[%s30830_s14 + $0x2d60] sm:$0xff]  }
 0x5c6   : > { %27623 = vmatprep.subr.bf16.mxu1 %v29981_v39  ;;  %v30022_v38 = vld [vmem:[%s30830_s14 + $0x2de0] sm:$0xff]  }
 0x5c7   : > { %v30023_v39 = vld [vmem:[%s30830_s14 + $0x2d20] sm:$0xff]  }
 0x5c8   : > { %27602 = vmatpush3.bf16.msra.mxu0 %v29982_v40  ;;  %v30024_v40 = vld [vmem:[%s30830_s14 + $0x2da0] sm:$0xff]  }
 0x5c9   : > { %27603 = vmatprep.subr.bf16.mxu0 %v29984_v42  ;;  %27624 = vmatpush3.bf16.msra.mxu1 %v29983_v41  ;;  %v30025_v41 = vld [vmem:[%s30830_s14 + $0x2d68] sm:$0xff]  }
 0x5ca   : > { %27625 = vmatprep.subr.bf16.mxu1 %v29985_v44  ;;  %v30026_v44 = vld [vmem:[%s30830_s14 + $0x2de8] sm:$0xff]  }
 0x5cc   : > { %27604 = vmatpush3.bf16.msra.mxu0 %v29986_v45 }
 0x5cd   : > { %27605 = vmatprep.subr.bf16.mxu0 %v29988_v47  ;;  %27626 = vmatpush3.bf16.msra.mxu1 %v29987_v46  ;;  %v30027_v46 = vld [vmem:[%s30830_s14 + $0x2d28] sm:$0xff]  }
 0x5ce   : > { %27627 = vmatprep.subr.bf16.mxu1 %v29989_v48 }
 0x5d0   : > { %27606 = vmatpush3.bf16.msra.mxu0 %v29990_v49 }
 0x5d1   : > { %27607 = vmatprep.subr.bf16.mxu0 %v29992_v51  ;;  %27628 = vmatpush3.bf16.msra.mxu1 %v29991_v50  ;;  %v30028_v50 = vld [vmem:[%s30830_s14 + $0x2da8] sm:$0xff]   ;;  %v30029_v51 = vld [vmem:[%s30830_s14 + $0x2d70] sm:$0xff]  }
 0x5d2   : > { %v27305_v52 = vpop.f32.mrb[148].mxu0  ;;  %27629 = vmatprep.subr.bf16.mxu1 %v29993_v53 }
 0x5d3   : > { %v27306_v54 = vpop.f32.mrb[149].mxu0  ;;  %v27327_v56 = vpop.f32.mrb[148].mxu1 }
 0x5d4   : > { %v27307_v57 = vadd.f32 %v27306_v54, %v27305_v52  ;;  %v27308_v58 = vpop.f32.mrb[150].mxu0  ;;  %v27328_v59 = vpop.f32.mrb[149].mxu1  ;;  %27608 = vmatpush3.bf16.msra.mxu0 %v29994_v55 }
 0x5d5   : > { %v27309_v61 = vpop.f32.mrb[151].mxu0  ;;  %v27329_v0 = vadd.f32 %v27328_v59, %v27327_v56  ;;  %v27330_v1 = vpop.f32.mrb[150].mxu1  ;;  %27609 = vmatprep.subr.bf16.mxu0 %v29996_v62  ;;  %27630 = vmatpush3.bf16.msra.mxu1 %v29995_v60  ;;  %v30031_v59 = vld [vmem:[%s30830_s14 + $0x2d30] sm:$0xff]   ;;  %v30033_v62 = vld [vmem:[%s30830_s14 + $0x2d78] sm:$0xff]  }
 0x5d6   : > { %v21370_v63 = vadd.f32 %v27307_v57, %v32485_v14  ;;  %v27331_v3 = vpop.f32.mrb[151].mxu1  ;;  %27631 = vmatprep.subr.bf16.mxu1 %v29997_v2  ;;  %v30003_v14 = vld [vmem:[%s30830_s14 + $0x2cb8] sm:$0xff]   ;;  %v30030_v57 = vld [vmem:[%s30830_s14 + $0x2df0] sm:$0xff]   ;;  %v308_v1 = vld [vmem:[%s30840_s12 + $0x168] sm:$0xff] }
 0x5d7   : > { %v30032_v61 = vld [vmem:[%s30830_s14 + $0x2db0] sm:$0xff]   ;;  %v1163_v2 = vrot.slane %v308_v1, %v30878_v43  ;;  %v1156_v3 = vcombine.high %v308_v1, %v308_v1  ;;  %v30073_v1 = vld [vmem:[%s30830_s14 + $0x2f00] sm:$0xff]  }
 0x5d8   : > { %v32523_v5 = vadd.f32 %v27329_v0, %v21370_v63  ;;  %27610 = vmatpush3.bf16.msra.mxu0 %v29998_v4  ;;  %v30034_v63 = vld [vmem:[%s30830_s14 + $0x2df8] sm:$0xff]   ;;  %v30038_v4 = vld [vmem:[%s30830_s14 + $0x2e40] sm:$0xff]  }
 0x5d9   : > { %27611 = vmatprep.subr.bf16.mxu0 %v30000_v6  ;;  %27632 = vmatpush3.bf16.msra.mxu1 %v29999_v7  ;;  %v30035_v0 = vld [vmem:[%s30830_s14 + $0x2d38] sm:$0xff]   ;;  %v1171_v6 = vcombine.high %v1163_v2, %v1163_v2  ;;  %v1170_v7 = vrot.slane %v1156_v3, %v30878_v43 }
 0x5da   : > { %27633 = vmatprep.subr.bf16.mxu1 %v30001_v8  ;;  %v30039_v8 = vld [vmem:[%s30830_s14 + $0x2ec0] sm:$0xff]  }
 0x5db   : > { %v1916_v11 = vpack.c.bf16 %v1171_v6, %v1171_v6  ;;  %v1172_v12 = vcombine.high %v1170_v7, %v1170_v7  ;;  %v30075_v6 = vld [vmem:[%s30830_s14 + $0x2f48] sm:$0xff]  }
 0x5dc   : > { %27612 = vmatpush3.bf16.msra.mxu0 %v30002_v9  ;;  %v1915_v9 = vpack.c.bf16 %v1163_v2, %v1163_v2 }
 0x5dd   : > { %27641 = vmatprep.subr.bf16.mxu0 %v30005_v13  ;;  %27634 = vmatpush3.bf16.msra.mxu1 %v30003_v14  ;;  %v30041_v13 = vld [vmem:[%s30830_s14 + $0x2e80] sm:$0xff]   ;;  %v1917_v14 = vpack.c.bf16 %v1170_v7, %v1170_v7  ;;  %v1918_v16 = vpack.c.bf16 %v1172_v12, %v1172_v12  ;;  %v30080_v12 = vld [vmem:[%s30830_s14 + $0x2fd0] sm:$0xff]  }
 0x5de   : > { %27663 = vmatprep.subr.bf16.mxu1 %v30006_v17  ;;  %v30043_v17 = vld [vmem:[%s30830_s14 + $0x2ec8] sm:$0xff]  }
 0x5df   : > { %21928 = vmatmul.mubr.bf16.vlgmr.msra.gmra.mrb[176].mxu0 %v1911_v18  ;;  %v30044_v18 = vld [vmem:[%s30830_s14 + $0x2e08] sm:$0xff]  }
 0x5e0   : > { %27642 = vmatpush3.bf16.msra.mxu0 %v30007_v19  ;;  %21968 = vmatmul.mubr.bf16.vlgmr.msra.gmra.mrb[176].mxu1 %v1913_v23  ;;  %v30045_v19 = vld [vmem:[%s30830_s14 + $0x2e88] sm:$0xff]   ;;  %v30049_v23 = vld [vmem:[%s30830_s14 + $0x2e90] sm:$0xff]  }
 0x5e1   : > { %27643 = vmatprep.subr.bf16.mxu0 %v30009_v24  ;;  %27664 = vmatpush3.bf16.msra.mxu1 %v30008_v22  ;;  %v30048_v22 = vld [vmem:[%s30830_s14 + $0x2e10] sm:$0xff]   ;;  %v30050_v24 = vld [vmem:[%s30830_s14 + $0x2e58] sm:$0xff]  }
 0x5e2   : > { %27665 = vmatprep.subr.bf16.mxu1 %v30010_v26  ;;  %22007 = vmatprep.mubr.bf16.mxu0 %v1916_v11  ;;  %v30052_v26 = vld [vmem:[%s30830_s14 + $0x2e18] sm:$0xff]   ;;  %v30079_v11 = vld [vmem:[%s30830_s14 + $0x2f50] sm:$0xff]  }
 0x5e3   : > { %22047 = vmatprep.mubr.bf16.mxu1 %v1918_v16  ;;  %v30084_v16 = vld [vmem:[%s30830_s14 + $0x2fd8] sm:$0xff]  }
 0x5e4   : > { %27644 = vmatpush3.bf16.msra.mxu0 %v30011_v27  ;;  %v30053_v27 = vld [vmem:[%s30830_s14 + $0x2e98] sm:$0xff]  }
 0x5e5   : > { %27645 = vmatprep.subr.bf16.mxu0 %v30013_v29  ;;  %27666 = vmatpush3.bf16.msra.mxu1 %v30012_v28  ;;  %v30054_v28 = vld [vmem:[%s30830_s14 + $0x2e60] sm:$0xff]  }
 0x5e6   : > { %27667 = vmatprep.subr.bf16.mxu1 %v30014_v30  ;;  %v30055_v29 = vld [vmem:[%s30830_s14 + $0x2ee0] sm:$0xff]  }
 0x5e7   : > { %v30056_v30 = vld [vmem:[%s30830_s14 + $0x2e20] sm:$0xff]  }
 0x5e8   : > { %27646 = vmatpush3.bf16.msra.mxu0 %v30015_v31  ;;  %v30057_v31 = vld [vmem:[%s30830_s14 + $0x2ea0] sm:$0xff]  }
 0x5e9   : > { %27647 = vmatprep.subr.bf16.mxu0 %v30017_v33  ;;  %27668 = vmatpush3.bf16.msra.mxu1 %v30016_v32  ;;  %v30058_v32 = vld [vmem:[%s30830_s14 + $0x2e68] sm:$0xff]  }
 0x5ea   : > { %27669 = vmatprep.subr.bf16.mxu1 %v30018_v34  ;;  %v30059_v34 = vld [vmem:[%s30830_s14 + $0x2ee8] sm:$0xff]  }
 0x5ec   : > { %27648 = vmatpush3.bf16.msra.mxu0 %v30019_v35 }
 0x5ed   : > { %27649 = vmatprep.subr.bf16.mxu0 %v30021_v37  ;;  %27670 = vmatpush3.bf16.msra.mxu1 %v30020_v36  ;;  %v30060_v36 = vld [vmem:[%s30830_s14 + $0x2e28] sm:$0xff]  }
 0x5ee   : > { %27671 = vmatprep.subr.bf16.mxu1 %v30022_v38 }
 0x5f0   : > { %27650 = vmatpush3.bf16.msra.mxu0 %v30023_v39 }
 0x5f1   : > { %27651 = vmatprep.subr.bf16.mxu0 %v30025_v41  ;;  %27672 = vmatpush3.bf16.msra.mxu1 %v30024_v40  ;;  %v30061_v40 = vld [vmem:[%s30830_s14 + $0x2ea8] sm:$0xff]   ;;  %v30062_v41 = vld [vmem:[%s30830_s14 + $0x2e70] sm:$0xff]  }
 0x5f2   : > { %v27349_v42 = vpop.f32.mrb[152].mxu0  ;;  %27673 = vmatprep.subr.bf16.mxu1 %v30026_v44 }
 0x5f3   : > { %v27350_v45 = vpop.f32.mrb[153].mxu0  ;;  %v27371_v47 = vpop.f32.mrb[152].mxu1 }
 0x5f4   : > { %v27351_v48 = vadd.f32 %v27350_v45, %v27349_v42  ;;  %v27352_v49 = vpop.f32.mrb[154].mxu0  ;;  %v27372_v52 = vpop.f32.mrb[153].mxu1  ;;  %27652 = vmatpush3.bf16.msra.mxu0 %v30027_v46 }
 0x5f5   : > { %v27353_v53 = vpop.f32.mrb[155].mxu0  ;;  %v27373_v55 = vadd.f32 %v27372_v52, %v27371_v47  ;;  %v27374_v56 = vpop.f32.mrb[154].mxu1  ;;  %27653 = vmatprep.subr.bf16.mxu0 %v30029_v51  ;;  %27674 = vmatpush3.bf16.msra.mxu1 %v30028_v50  ;;  %v30064_v50 = vld [vmem:[%s30830_s14 + $0x2e30] sm:$0xff]  }
 0x5f6   : > { %v21450_v54 = vadd.f32 %v27351_v48, %v32523_v5  ;;  %v27375_v58 = vpop.f32.mrb[155].mxu1  ;;  %27675 = vmatprep.subr.bf16.mxu1 %v30030_v57  ;;  %v30036_v5 = vld [vmem:[%s30830_s14 + $0x2db8] sm:$0xff]   ;;  %v30063_v48 = vld [vmem:[%s30830_s14 + $0x2ef0] sm:$0xff]  }
 0x5f7   : > { %v30065_v52 = vld [vmem:[%s30830_s14 + $0x2eb0] sm:$0xff]   ;;  %v30066_v53 = vld [vmem:[%s30830_s14 + $0x2e78] sm:$0xff]  }
 0x5f8   : > { %v32561_v60 = vadd.f32 %v27373_v55, %v21450_v54  ;;  %27654 = vmatpush3.bf16.msra.mxu0 %v30031_v59  ;;  %v30067_v54 = vld [vmem:[%s30830_s14 + $0x2ef8] sm:$0xff]   ;;  %v309_v56 = vld [vmem:[%s30840_s12 + $0x170] sm:$0xff] }
 0x5f9   : > { %27655 = vmatprep.subr.bf16.mxu0 %v30033_v62  ;;  %27676 = vmatpush3.bf16.msra.mxu1 %v30032_v61  ;;  %v30068_v55 = vld [vmem:[%s30830_s14 + $0x2e38] sm:$0xff]   ;;  %v1180_v58 = vrot.slane %v309_v56, %v30878_v43  ;;  %v1173_v59 = vcombine.high %v309_v56, %v309_v56  ;;  %v30106_v56 = vld [vmem:[%s30830_s14 + $0x3000] sm:$0xff]  }
 0x5fa   : > { %27677 = vmatprep.subr.bf16.mxu1 %v30034_v63  ;;  %v30069_v57 = vld [vmem:[%s30830_s14 + $0x2eb8] sm:$0xff]   ;;  %v30072_v63 = vld [vmem:[%s30830_s14 + $0x2fc0] sm:$0xff]  }
 0x5fb   : > { %v1188_v61 = vcombine.high %v1180_v58, %v1180_v58  ;;  %v1187_v62 = vrot.slane %v1173_v59, %v30878_v43  ;;  %v30107_v59 = vld [vmem:[%s30830_s14 + $0x3080] sm:$0xff]  }
 0x5fc   : > { %27656 = vmatpush3.bf16.msra.mxu0 %v30035_v0  ;;  %v1919_v0 = vpack.c.bf16 %v1180_v58, %v1180_v58 }
 0x5fd   : > { %27685 = vmatprep.subr.bf16.mxu0 %v30038_v4  ;;  %27678 = vmatpush3.bf16.msra.mxu1 %v30036_v5  ;;  %v1920_v2 = vpack.c.bf16 %v1188_v61, %v1188_v61  ;;  %v1189_v3 = vcombine.high %v1187_v62, %v1187_v62  ;;  %v30074_v4 = vld [vmem:[%s30830_s14 + $0x2f80] sm:$0xff]   ;;  %v1921_v5 = vpack.c.bf16 %v1187_v62, %v1187_v62  ;;  %v30108_v61 = vld [vmem:[%s30830_s14 + $0x3048] sm:$0xff]  }
 0x5fe   : > { %27707 = vmatprep.subr.bf16.mxu1 %v30039_v8  ;;  %v30076_v8 = vld [vmem:[%s30830_s14 + $0x2fc8] sm:$0xff]  }
 0x5ff   : > { %22008 = vmatmul.mubr.bf16.vlgmr.msra.gmra.mrb[180].mxu0 %v1915_v9  ;;  %v1922_v7 = vpack.c.bf16 %v1189_v3, %v1189_v3  ;;  %v30077_v9 = vld [vmem:[%s30830_s14 + $0x2f08] sm:$0xff]   ;;  %v30113_v3 = vld [vmem:[%s30830_s14 + $0x30d0] sm:$0xff]  }
 0x600   : > { %27686 = vmatpush3.bf16.msra.mxu0 %v30040_v10  ;;  %22048 = vmatmul.mubr.bf16.vlgmr.msra.gmra.mrb[180].mxu1 %v1917_v14  ;;  %v30078_v10 = vld [vmem:[%s30830_s14 + $0x2f88] sm:$0xff]   ;;  %v30082_v14 = vld [vmem:[%s30830_s14 + $0x2f90] sm:$0xff]  }
 0x601   : > { %27687 = vmatprep.subr.bf16.mxu0 %v30042_v15  ;;  %27708 = vmatpush3.bf16.msra.mxu1 %v30041_v13  ;;  %v30081_v13 = vld [vmem:[%s30830_s14 + $0x2f10] sm:$0xff]   ;;  %v30083_v15 = vld [vmem:[%s30830_s14 + $0x2f58] sm:$0xff]  }
 0x602   : > { %27709 = vmatprep.subr.bf16.mxu1 %v30043_v17  ;;  %22087 = vmatprep.mubr.bf16.mxu0 %v1920_v2  ;;  %v30085_v17 = vld [vmem:[%s30830_s14 + $0x2f18] sm:$0xff]   ;;  %v30112_v2 = vld [vmem:[%s30830_s14 + $0x3050] sm:$0xff]  }
 0x603   : > { %22127 = vmatprep.mubr.bf16.mxu1 %v1922_v7  ;;  %v30117_v7 = vld [vmem:[%s30830_s14 + $0x30d8] sm:$0xff]  }
 0x604   : > { %27688 = vmatpush3.bf16.msra.mxu0 %v30044_v18  ;;  %v30086_v18 = vld [vmem:[%s30830_s14 + $0x2f98] sm:$0xff]  }
 0x605   : > { %27689 = vmatprep.subr.bf16.mxu0 %v30046_v20  ;;  %27710 = vmatpush3.bf16.msra.mxu1 %v30045_v19  ;;  %v30087_v19 = vld [vmem:[%s30830_s14 + $0x2f60] sm:$0xff]  }
 0x606   : > { %27711 = vmatprep.subr.bf16.mxu1 %v30047_v21  ;;  %v30088_v20 = vld [vmem:[%s30830_s14 + $0x2fe0] sm:$0xff]  }
 0x607   : > { %v30089_v21 = vld [vmem:[%s30830_s14 + $0x2f20] sm:$0xff]  }
 0x608   : > { %27690 = vmatpush3.bf16.msra.mxu0 %v30048_v22  ;;  %v30090_v22 = vld [vmem:[%s30830_s14 + $0x2fa0] sm:$0xff]  }
 0x609   : > { %27691 = vmatprep.subr.bf16.mxu0 %v30050_v24  ;;  %27712 = vmatpush3.bf16.msra.mxu1 %v30049_v23  ;;  %v30091_v23 = vld [vmem:[%s30830_s14 + $0x2f68] sm:$0xff]  }
 0x60a   : > { %27713 = vmatprep.subr.bf16.mxu1 %v30051_v25  ;;  %v30092_v25 = vld [vmem:[%s30830_s14 + $0x2fe8] sm:$0xff]  }
 0x60c   : > { %27692 = vmatpush3.bf16.msra.mxu0 %v30052_v26 }
 0x60d   : > { %27693 = vmatprep.subr.bf16.mxu0 %v30054_v28  ;;  %27714 = vmatpush3.bf16.msra.mxu1 %v30053_v27  ;;  %v30093_v27 = vld [vmem:[%s30830_s14 + $0x2f28] sm:$0xff]  }
 0x60e   : > { %27715 = vmatprep.subr.bf16.mxu1 %v30055_v29 }
 0x610   : > { %27694 = vmatpush3.bf16.msra.mxu0 %v30056_v30 }
 0x611   : > { %27695 = vmatprep.subr.bf16.mxu0 %v30058_v32  ;;  %27716 = vmatpush3.bf16.msra.mxu1 %v30057_v31  ;;  %v30094_v32 = vld [vmem:[%s30830_s14 + $0x2fa8] sm:$0xff]  }
 0x612   : > { %v27393_v33 = vpop.f32.mrb[156].mxu0  ;;  %27717 = vmatprep.subr.bf16.mxu1 %v30059_v34  ;;  %v30095_v34 = vld [vmem:[%s30830_s14 + $0x2f70] sm:$0xff]  }
 0x613   : > { %v27394_v35 = vpop.f32.mrb[157].mxu0  ;;  %v27415_v37 = vpop.f32.mrb[156].mxu1 }
 0x614   : > { %v27395_v38 = vadd.f32 %v27394_v35, %v27393_v33  ;;  %v27396_v39 = vpop.f32.mrb[158].mxu0  ;;  %v27416_v42 = vpop.f32.mrb[157].mxu1  ;;  %27696 = vmatpush3.bf16.msra.mxu0 %v30060_v36 }
 0x615   : > { %v27397_v44 = vpop.f32.mrb[159].mxu0  ;;  %v27417_v46 = vadd.f32 %v27416_v42, %v27415_v37  ;;  %v27418_v47 = vpop.f32.mrb[158].mxu1  ;;  %27697 = vmatprep.subr.bf16.mxu0 %v30062_v41  ;;  %27718 = vmatpush3.bf16.msra.mxu1 %v30061_v40  ;;  %v30097_v40 = vld [vmem:[%s30830_s14 + $0x2f30] sm:$0xff]   ;;  %v30099_v42 = vld [vmem:[%s30830_s14 + $0x2f78] sm:$0xff]  }
 0x616   : > { %v21530_v45 = vadd.f32 %v27395_v38, %v32561_v60  ;;  %v27419_v49 = vpop.f32.mrb[159].mxu1  ;;  %27719 = vmatprep.subr.bf16.mxu1 %v30063_v48  ;;  %v30071_v60 = vld [vmem:[%s30830_s14 + $0x2f40] sm:$0xff]   ;;  %v30096_v38 = vld [vmem:[%s30830_s14 + $0x2ff0] sm:$0xff]  }
 0x617   : > { %v30098_v44 = vld [vmem:[%s30830_s14 + $0x2fb0] sm:$0xff]  }
 0x618   : > { %v32599_v51 = vadd.f32 %v27417_v46, %v21530_v45  ;;  %27698 = vmatpush3.bf16.msra.mxu0 %v30064_v50  ;;  %v30100_v45 = vld [vmem:[%s30830_s14 + $0x2ff8] sm:$0xff]   ;;  %v30104_v50 = vld [vmem:[%s30830_s14 + $0x3040] sm:$0xff]  }
 0x619   : > { %27699 = vmatprep.subr.bf16.mxu0 %v30066_v53  ;;  %27720 = vmatpush3.bf16.msra.mxu1 %v30065_v52  ;;  %v30101_v46 = vld [vmem:[%s30830_s14 + $0x2f38] sm:$0xff]  }
 0x61a   : > { %27721 = vmatprep.subr.bf16.mxu1 %v30067_v54  ;;  %v310_v47 = vld [vmem:[%s30840_s12 + $0x178] sm:$0xff]  ;;  %v30105_v54 = vld [vmem:[%s30830_s14 + $0x30c0] sm:$0xff]  }
 0x61b   : > { %v1197_v48 = vrot.slane %v310_v47, %v30878_v43  ;;  %v1190_v49 = vcombine.high %v310_v47, %v310_v47  ;;  %v30139_v47 = vld [vmem:[%s30830_s14 + $0x3100] sm:$0xff]  }
 0x61c   : > { %27700 = vmatpush3.bf16.msra.mxu0 %v30068_v55 }
 0x61d   : > { %27729 = vmatprep.subr.bf16.mxu0 %v30071_v60  ;;  %27722 = vmatpush3.bf16.msra.mxu1 %v30069_v57  ;;  %v1205_v52 = vcombine.high %v1197_v48, %v1197_v48  ;;  %v1204_v53 = vrot.slane %v1190_v49, %v30878_v43  ;;  %v1923_v55 = vpack.c.bf16 %v1197_v48, %v1197_v48 }
 0x61e   : > { %27751 = vmatprep.subr.bf16.mxu1 %v30072_v63  ;;  %v30109_v63 = vld [vmem:[%s30830_s14 + $0x30c8] sm:$0xff]  }
 0x61f   : > { %22088 = vmatmul.mubr.bf16.vlgmr.msra.gmra.mrb[184].mxu0 %v1919_v0  ;;  %v1924_v57 = vpack.c.bf16 %v1205_v52, %v1205_v52  ;;  %v1206_v58 = vcombine.high %v1204_v53, %v1204_v53  ;;  %v1925_v60 = vpack.c.bf16 %v1204_v53, %v1204_v53  ;;  %v30110_v0 = vld [vmem:[%s30830_s14 + $0x3008] sm:$0xff]  }
 0x620   : > { %27730 = vmatpush3.bf16.msra.mxu0 %v30073_v1  ;;  %22128 = vmatmul.mubr.bf16.vlgmr.msra.gmra.mrb[184].mxu1 %v1921_v5  ;;  %v30111_v1 = vld [vmem:[%s30830_s14 + $0x3088] sm:$0xff]   ;;  %v30115_v5 = vld [vmem:[%s30830_s14 + $0x3090] sm:$0xff]  }
 0x621   : > { %27731 = vmatprep.subr.bf16.mxu0 %v30075_v6  ;;  %27752 = vmatpush3.bf16.msra.mxu1 %v30074_v4  ;;  %v1926_v62 = vpack.c.bf16 %v1206_v58, %v1206_v58  ;;  %v30114_v4 = vld [vmem:[%s30830_s14 + $0x3010] sm:$0xff]   ;;  %v30116_v6 = vld [vmem:[%s30830_s14 + $0x3058] sm:$0xff]   ;;  %v30141_v52 = vld [vmem:[%s30830_s14 + $0x3148] sm:$0xff]  }
 0x622   : > { %27753 = vmatprep.subr.bf16.mxu1 %v30076_v8  ;;  %22167 = vmatprep.mubr.bf16.mxu0 %v1924_v57  ;;  %v30118_v8 = vld [vmem:[%s30830_s14 + $0x3018] sm:$0xff]   ;;  %v30145_v57 = vld [vmem:[%s30830_s14 + $0x3150] sm:$0xff]  }
 0x623   : > { %22207 = vmatprep.mubr.bf16.mxu1 %v1926_v62  ;;  %v30146_v58 = vld [vmem:[%s30830_s14 + $0x31d0] sm:$0xff]   ;;  %v30150_v62 = vld [vmem:[%s30830_s14 + $0x31d8] sm:$0xff]  }
 0x624   : > { %27732 = vmatpush3.bf16.msra.mxu0 %v30077_v9  ;;  %v30119_v9 = vld [vmem:[%s30830_s14 + $0x3098] sm:$0xff]  }
 0x625   : > { %27733 = vmatprep.subr.bf16.mxu0 %v30079_v11  ;;  %27754 = vmatpush3.bf16.msra.mxu1 %v30078_v10  ;;  %v30120_v10 = vld [vmem:[%s30830_s14 + $0x3060] sm:$0xff]  }
 0x626   : > { %27755 = vmatprep.subr.bf16.mxu1 %v30080_v12  ;;  %v30121_v11 = vld [vmem:[%s30830_s14 + $0x30e0] sm:$0xff]  }
 0x627   : > { %v30122_v12 = vld [vmem:[%s30830_s14 + $0x3020] sm:$0xff]  }
 0x628   : > { %27734 = vmatpush3.bf16.msra.mxu0 %v30081_v13  ;;  %v30123_v13 = vld [vmem:[%s30830_s14 + $0x30a0] sm:$0xff]  }
 0x629   : > { %27735 = vmatprep.subr.bf16.mxu0 %v30083_v15  ;;  %27756 = vmatpush3.bf16.msra.mxu1 %v30082_v14  ;;  %v30124_v14 = vld [vmem:[%s30830_s14 + $0x3068] sm:$0xff]  }
 0x62a   : > { %27757 = vmatprep.subr.bf16.mxu1 %v30084_v16  ;;  %v30125_v16 = vld [vmem:[%s30830_s14 + $0x30e8] sm:$0xff]  }
 0x62c   : > { %27736 = vmatpush3.bf16.msra.mxu0 %v30085_v17 }
 0x62d   : > { %27737 = vmatprep.subr.bf16.mxu0 %v30087_v19  ;;  %27758 = vmatpush3.bf16.msra.mxu1 %v30086_v18  ;;  %v30126_v18 = vld [vmem:[%s30830_s14 + $0x3028] sm:$0xff]  }
 0x62e   : > { %27759 = vmatprep.subr.bf16.mxu1 %v30088_v20 }
 0x630   : > { %27738 = vmatpush3.bf16.msra.mxu0 %v30089_v21 }
 0x631   : > { %27739 = vmatprep.subr.bf16.mxu0 %v30091_v23  ;;  %27760 = vmatpush3.bf16.msra.mxu1 %v30090_v22  ;;  %v30127_v22 = vld [vmem:[%s30830_s14 + $0x30a8] sm:$0xff]   ;;  %v30128_v23 = vld [vmem:[%s30830_s14 + $0x3070] sm:$0xff]  }
 0x632   : > { %v27437_v24 = vpop.f32.mrb[160].mxu0  ;;  %27761 = vmatprep.subr.bf16.mxu1 %v30092_v25 }
 0x633   : > { %v27438_v26 = vpop.f32.mrb[161].mxu0  ;;  %v27459_v28 = vpop.f32.mrb[160].mxu1 }
 0x634   : > { %v27439_v29 = vadd.f32 %v27438_v26, %v27437_v24  ;;  %v27440_v30 = vpop.f32.mrb[162].mxu0  ;;  %v27460_v31 = vpop.f32.mrb[161].mxu1  ;;  %27740 = vmatpush3.bf16.msra.mxu0 %v30093_v27 }
 0x635   : > { %v27441_v33 = vpop.f32.mrb[163].mxu0  ;;  %v27461_v36 = vadd.f32 %v27460_v31, %v27459_v28  ;;  %v27462_v37 = vpop.f32.mrb[162].mxu1  ;;  %27741 = vmatprep.subr.bf16.mxu0 %v30095_v34  ;;  %27762 = vmatpush3.bf16.msra.mxu1 %v30094_v32  ;;  %v30130_v31 = vld [vmem:[%s30830_s14 + $0x3030] sm:$0xff]   ;;  %v30132_v34 = vld [vmem:[%s30830_s14 + $0x3078] sm:$0xff]  }
 0x636   : > { %v21610_v35 = vadd.f32 %v27439_v29, %v32599_v51  ;;  %v27463_v39 = vpop.f32.mrb[163].mxu1  ;;  %27763 = vmatprep.subr.bf16.mxu1 %v30096_v38  ;;  %v30102_v51 = vld [vmem:[%s30830_s14 + $0x2fb8] sm:$0xff]   ;;  %v30129_v29 = vld [vmem:[%s30830_s14 + $0x30f0] sm:$0xff]  }
 0x637   : > { %v30131_v33 = vld [vmem:[%s30830_s14 + $0x30b0] sm:$0xff]   ;;  %v311_v37 = vld [vmem:[%s30840_s12 + $0x180] sm:$0xff] }
 0x638   : > { %v32637_v41 = vadd.f32 %v27461_v36, %v21610_v35  ;;  %27742 = vmatpush3.bf16.msra.mxu0 %v30097_v40  ;;  %v30133_v35 = vld [vmem:[%s30830_s14 + $0x30f8] sm:$0xff]   ;;  %v1214_v38 = vrot.slane %v311_v37, %v30878_v43  ;;  %v1207_v39 = vcombine.high %v311_v37, %v311_v37  ;;  %v30137_v40 = vld [vmem:[%s30830_s14 + $0x3140] sm:$0xff]  }
 0x639   : > { %27743 = vmatprep.subr.bf16.mxu0 %v30099_v42  ;;  %27764 = vmatpush3.bf16.msra.mxu1 %v30098_v44  ;;  %v30134_v36 = vld [vmem:[%s30830_s14 + $0x3038] sm:$0xff]   ;;  %v30172_v37 = vld [vmem:[%s30830_s14 + $0x3200] sm:$0xff]  }
 0x63a   : > { %27765 = vmatprep.subr.bf16.mxu1 %v30100_v45  ;;  %v1222_v42 = vcombine.high %v1214_v38, %v1214_v38  ;;  %v1221_v44 = vrot.slane %v1207_v39, %v30878_v43  ;;  %v30138_v45 = vld [vmem:[%s30830_s14 + $0x31c0] sm:$0xff]  }
 0x63c   : > { %27744 = vmatpush3.bf16.msra.mxu0 %v30101_v46  ;;  %v1927_v46 = vpack.c.bf16 %v1214_v38, %v1214_v38  ;;  %v1928_v48 = vpack.c.bf16 %v1222_v42, %v1222_v42  ;;  %v1223_v49 = vcombine.high %v1221_v44, %v1221_v44  ;;  %v30174_v42 = vld [vmem:[%s30830_s14 + $0x3248] sm:$0xff]  }
 0x63d   : > { %27773 = vmatprep.subr.bf16.mxu0 %v30104_v50  ;;  %27766 = vmatpush3.bf16.msra.mxu1 %v30102_v51  ;;  %v30140_v50 = vld [vmem:[%s30830_s14 + $0x3180] sm:$0xff]   ;;  %v1929_v51 = vpack.c.bf16 %v1221_v44, %v1221_v44 }
 0x63e   : > { %27795 = vmatprep.subr.bf16.mxu1 %v30105_v54  ;;  %v1930_v53 = vpack.c.bf16 %v1223_v49, %v1223_v49  ;;  %v30142_v54 = vld [vmem:[%s30830_s14 + $0x31c8] sm:$0xff]   ;;  %v30179_v49 = vld [vmem:[%s30830_s14 + $0x32d0] sm:$0xff]  }
 0x63f   : > { %22168 = vmatmul.mubr.bf16.vlgmr.msra.gmra.mrb[188].mxu0 %v1923_v55  ;;  %v30143_v55 = vld [vmem:[%s30830_s14 + $0x3108] sm:$0xff]  }
 0x640   : > { %27774 = vmatpush3.bf16.msra.mxu0 %v30106_v56  ;;  %22208 = vmatmul.mubr.bf16.vlgmr.msra.gmra.mrb[188].mxu1 %v1925_v60  ;;  %v30144_v56 = vld [vmem:[%s30830_s14 + $0x3188] sm:$0xff]   ;;  %v30148_v60 = vld [vmem:[%s30830_s14 + $0x3190] sm:$0xff]  }
 0x641   : > { %27775 = vmatprep.subr.bf16.mxu0 %v30108_v61  ;;  %27796 = vmatpush3.bf16.msra.mxu1 %v30107_v59  ;;  %v30147_v59 = vld [vmem:[%s30830_s14 + $0x3110] sm:$0xff]   ;;  %v30149_v61 = vld [vmem:[%s30830_s14 + $0x3158] sm:$0xff]  }
 0x642   : > { %27797 = vmatprep.subr.bf16.mxu1 %v30109_v63  ;;  %22247 = vmatprep.mubr.bf16.mxu0 %v1928_v48  ;;  %v30151_v63 = vld [vmem:[%s30830_s14 + $0x3118] sm:$0xff]   ;;  %v30178_v48 = vld [vmem:[%s30830_s14 + $0x3250] sm:$0xff]  }
 0x643   : > { %22287 = vmatprep.mubr.bf16.mxu1 %v1930_v53  ;;  %v30183_v53 = vld [vmem:[%s30830_s14 + $0x32d8] sm:$0xff]  }
 0x644   : > { %27776 = vmatpush3.bf16.msra.mxu0 %v30110_v0  ;;  %v30152_v0 = vld [vmem:[%s30830_s14 + $0x3198] sm:$0xff]  }
 0x645   : > { %27777 = vmatprep.subr.bf16.mxu0 %v30112_v2  ;;  %27798 = vmatpush3.bf16.msra.mxu1 %v30111_v1  ;;  %v30153_v1 = vld [vmem:[%s30830_s14 + $0x3160] sm:$0xff]  }
 0x646   : > { %27799 = vmatprep.subr.bf16.mxu1 %v30113_v3  ;;  %v30154_v2 = vld [vmem:[%s30830_s14 + $0x31e0] sm:$0xff]  }
 0x647   : > { %v30155_v3 = vld [vmem:[%s30830_s14 + $0x3120] sm:$0xff]  }
 0x648   : > { %27778 = vmatpush3.bf16.msra.mxu0 %v30114_v4  ;;  %v30156_v4 = vld [vmem:[%s30830_s14 + $0x31a0] sm:$0xff]  }
 0x649   : > { %27779 = vmatprep.subr.bf16.mxu0 %v30116_v6  ;;  %27800 = vmatpush3.bf16.msra.mxu1 %v30115_v5  ;;  %v30157_v5 = vld [vmem:[%s30830_s14 + $0x3168] sm:$0xff]  }
 0x64a   : > { %27801 = vmatprep.subr.bf16.mxu1 %v30117_v7  ;;  %v30158_v7 = vld [vmem:[%s30830_s14 + $0x31e8] sm:$0xff]  }
 0x64c   : > { %27780 = vmatpush3.bf16.msra.mxu0 %v30118_v8 }
 0x64d   : > { %27781 = vmatprep.subr.bf16.mxu0 %v30120_v10  ;;  %27802 = vmatpush3.bf16.msra.mxu1 %v30119_v9  ;;  %v30159_v9 = vld [vmem:[%s30830_s14 + $0x3128] sm:$0xff]  }
 0x64e   : > { %27803 = vmatprep.subr.bf16.mxu1 %v30121_v11 }
 0x650   : > { %27782 = vmatpush3.bf16.msra.mxu0 %v30122_v12 }
 0x651   : > { %27783 = vmatprep.subr.bf16.mxu0 %v30124_v14  ;;  %27804 = vmatpush3.bf16.msra.mxu1 %v30123_v13  ;;  %v30160_v13 = vld [vmem:[%s30830_s14 + $0x31a8] sm:$0xff]   ;;  %v30161_v14 = vld [vmem:[%s30830_s14 + $0x3170] sm:$0xff]  }
 0x652   : > { %v27481_v15 = vpop.f32.mrb[164].mxu0  ;;  %27805 = vmatprep.subr.bf16.mxu1 %v30125_v16 }
 0x653   : > { %v27482_v17 = vpop.f32.mrb[165].mxu0  ;;  %v27503_v19 = vpop.f32.mrb[164].mxu1 }
 0x654   : > { %v27483_v20 = vadd.f32 %v27482_v17, %v27481_v15  ;;  %v27484_v21 = vpop.f32.mrb[166].mxu0  ;;  %v27504_v24 = vpop.f32.mrb[165].mxu1  ;;  %27784 = vmatpush3.bf16.msra.mxu0 %v30126_v18 }
 0x655   : > { %v27485_v25 = vpop.f32.mrb[167].mxu0  ;;  %v27505_v27 = vadd.f32 %v27504_v24, %v27503_v19  ;;  %v27506_v28 = vpop.f32.mrb[166].mxu1  ;;  %27785 = vmatprep.subr.bf16.mxu0 %v30128_v23  ;;  %27806 = vmatpush3.bf16.msra.mxu1 %v30127_v22  ;;  %v30163_v22 = vld [vmem:[%s30830_s14 + $0x3130] sm:$0xff]  }
 0x656   : > { %v21690_v26 = vadd.f32 %v27483_v20, %v32637_v41  ;;  %v27507_v30 = vpop.f32.mrb[167].mxu1  ;;  %27807 = vmatprep.subr.bf16.mxu1 %v30129_v29  ;;  %v30135_v41 = vld [vmem:[%s30830_s14 + $0x30b8] sm:$0xff]   ;;  %v30162_v20 = vld [vmem:[%s30830_s14 + $0x31f0] sm:$0xff]   ;;  %v312_v28 = vld [vmem:[%s30840_s12 + $0x188] sm:$0xff] }
 0x657   : > { %v30164_v24 = vld [vmem:[%s30830_s14 + $0x31b0] sm:$0xff]   ;;  %v30165_v25 = vld [vmem:[%s30830_s14 + $0x3178] sm:$0xff]   ;;  %v1231_v30 = vrot.slane %v312_v28, %v30878_v43 }
 0x658   : > { %v32675_v32 = vadd.f32 %v27505_v27, %v21690_v26  ;;  %27786 = vmatpush3.bf16.msra.mxu0 %v30130_v31  ;;  %v30166_v26 = vld [vmem:[%s30830_s14 + $0x31f8] sm:$0xff]   ;;  %v1224_v31 = vcombine.high %v312_v28, %v312_v28  ;;  %v30205_v28 = vld [vmem:[%s30830_s14 + $0x3300] sm:$0xff]  }
 0x659   : > { %27787 = vmatprep.subr.bf16.mxu0 %v30132_v34  ;;  %27808 = vmatpush3.bf16.msra.mxu1 %v30131_v33  ;;  %v30167_v27 = vld [vmem:[%s30830_s14 + $0x3138] sm:$0xff]   ;;  %v1239_v33 = vcombine.high %v1231_v30, %v1231_v30 }
 0x65a   : > { %27809 = vmatprep.subr.bf16.mxu1 %v30133_v35  ;;  %v30168_v29 = vld [vmem:[%s30830_s14 + $0x31b8] sm:$0xff]   ;;  %v1238_v34 = vrot.slane %v1224_v31, %v30878_v43  ;;  %v30171_v35 = vld [vmem:[%s30830_s14 + $0x32c0] sm:$0xff]  }
 0x65b   : > { %v1932_v38 = vpack.c.bf16 %v1239_v33, %v1239_v33  ;;  %v30206_v31 = vld [vmem:[%s30830_s14 + $0x3380] sm:$0xff]   ;;  %v30207_v33 = vld [vmem:[%s30830_s14 + $0x3348] sm:$0xff]  }
 0x65c   : > { %27788 = vmatpush3.bf16.msra.mxu0 %v30134_v36  ;;  %v1931_v36 = vpack.c.bf16 %v1231_v30, %v1231_v30  ;;  %v1240_v39 = vcombine.high %v1238_v34, %v1238_v34 }
 0x65d   : > { %27817 = vmatprep.subr.bf16.mxu0 %v30137_v40  ;;  %27810 = vmatpush3.bf16.msra.mxu1 %v30135_v41  ;;  %v30173_v40 = vld [vmem:[%s30830_s14 + $0x3280] sm:$0xff]   ;;  %v1933_v41 = vpack.c.bf16 %v1238_v34, %v1238_v34 }
 0x65e   : > { %27839 = vmatprep.subr.bf16.mxu1 %v30138_v45  ;;  %v1934_v44 = vpack.c.bf16 %v1240_v39, %v1240_v39  ;;  %v30175_v45 = vld [vmem:[%s30830_s14 + $0x32c8] sm:$0xff]   ;;  %v30212_v39 = vld [vmem:[%s30830_s14 + $0x33d0] sm:$0xff]  }
 0x65f   : > { %22248 = vmatmul.mubr.bf16.vlgmr.msra.gmra.mrb[192].mxu0 %v1927_v46  ;;  %v30176_v46 = vld [vmem:[%s30830_s14 + $0x3208] sm:$0xff]  }
 0x660   : > { %27818 = vmatpush3.bf16.msra.mxu0 %v30139_v47  ;;  %22288 = vmatmul.mubr.bf16.vlgmr.msra.gmra.mrb[192].mxu1 %v1929_v51  ;;  %v30177_v47 = vld [vmem:[%s30830_s14 + $0x3288] sm:$0xff]   ;;  %v30181_v51 = vld [vmem:[%s30830_s14 + $0x3290] sm:$0xff]  }
 0x661   : > { %27819 = vmatprep.subr.bf16.mxu0 %v30141_v52  ;;  %27840 = vmatpush3.bf16.msra.mxu1 %v30140_v50  ;;  %v30180_v50 = vld [vmem:[%s30830_s14 + $0x3210] sm:$0xff]   ;;  %v30182_v52 = vld [vmem:[%s30830_s14 + $0x3258] sm:$0xff]  }
 0x662   : > { %27841 = vmatprep.subr.bf16.mxu1 %v30142_v54  ;;  %22327 = vmatprep.mubr.bf16.mxu0 %v1932_v38  ;;  %v30184_v54 = vld [vmem:[%s30830_s14 + $0x3218] sm:$0xff]   ;;  %v30211_v38 = vld [vmem:[%s30830_s14 + $0x3350] sm:$0xff]  }
 0x663   : > { %22367 = vmatprep.mubr.bf16.mxu1 %v1934_v44  ;;  %v30216_v44 = vld [vmem:[%s30830_s14 + $0x33d8] sm:$0xff]  }
 0x664   : > { %27820 = vmatpush3.bf16.msra.mxu0 %v30143_v55  ;;  %v30185_v55 = vld [vmem:[%s30830_s14 + $0x3298] sm:$0xff]  }
 0x665   : > { %27821 = vmatprep.subr.bf16.mxu0 %v30145_v57  ;;  %27842 = vmatpush3.bf16.msra.mxu1 %v30144_v56  ;;  %v30186_v56 = vld [vmem:[%s30830_s14 + $0x3260] sm:$0xff]  }
 0x666   : > { %27843 = vmatprep.subr.bf16.mxu1 %v30146_v58  ;;  %v30187_v57 = vld [vmem:[%s30830_s14 + $0x32e0] sm:$0xff]  }
 0x667   : > { %v30188_v58 = vld [vmem:[%s30830_s14 + $0x3220] sm:$0xff]  }
 0x668   : > { %27822 = vmatpush3.bf16.msra.mxu0 %v30147_v59  ;;  %v30189_v59 = vld [vmem:[%s30830_s14 + $0x32a0] sm:$0xff]  }
 0x669   : > { %27823 = vmatprep.subr.bf16.mxu0 %v30149_v61  ;;  %27844 = vmatpush3.bf16.msra.mxu1 %v30148_v60  ;;  %v30190_v60 = vld [vmem:[%s30830_s14 + $0x3268] sm:$0xff]  }
 0x66a   : > { %27845 = vmatprep.subr.bf16.mxu1 %v30150_v62  ;;  %v30191_v62 = vld [vmem:[%s30830_s14 + $0x32e8] sm:$0xff]  }
 0x66c   : > { %27824 = vmatpush3.bf16.msra.mxu0 %v30151_v63 }
 0x66d   : > { %27825 = vmatprep.subr.bf16.mxu0 %v30153_v1  ;;  %27846 = vmatpush3.bf16.msra.mxu1 %v30152_v0  ;;  %v30192_v0 = vld [vmem:[%s30830_s14 + $0x3228] sm:$0xff]  }
 0x66e   : > { %27847 = vmatprep.subr.bf16.mxu1 %v30154_v2 }
 0x670   : > { %27826 = vmatpush3.bf16.msra.mxu0 %v30155_v3 }
 0x671   : > { %27827 = vmatprep.subr.bf16.mxu0 %v30157_v5  ;;  %27848 = vmatpush3.bf16.msra.mxu1 %v30156_v4  ;;  %v30193_v5 = vld [vmem:[%s30830_s14 + $0x32a8] sm:$0xff]  }
 0x672   : > { %v27525_v6 = vpop.f32.mrb[168].mxu0  ;;  %27849 = vmatprep.subr.bf16.mxu1 %v30158_v7  ;;  %v30194_v7 = vld [vmem:[%s30830_s14 + $0x3270] sm:$0xff]  }
 0x673   : > { %v27526_v8 = vpop.f32.mrb[169].mxu0  ;;  %v27547_v10 = vpop.f32.mrb[168].mxu1 }
 0x674   : > { %v27527_v11 = vadd.f32 %v27526_v8, %v27525_v6  ;;  %v27528_v12 = vpop.f32.mrb[170].mxu0  ;;  %v27548_v15 = vpop.f32.mrb[169].mxu1  ;;  %27828 = vmatpush3.bf16.msra.mxu0 %v30159_v9 }
 0x675   : > { %v27529_v16 = vpop.f32.mrb[171].mxu0  ;;  %v27549_v18 = vadd.f32 %v27548_v15, %v27547_v10  ;;  %v27550_v19 = vpop.f32.mrb[170].mxu1  ;;  %27829 = vmatprep.subr.bf16.mxu0 %v30161_v14  ;;  %27850 = vmatpush3.bf16.msra.mxu1 %v30160_v13  ;;  %v30196_v13 = vld [vmem:[%s30830_s14 + $0x3230] sm:$0xff]   ;;  %v30198_v15 = vld [vmem:[%s30830_s14 + $0x3278] sm:$0xff]  }
 0x676   : > { %v21770_v17 = vadd.f32 %v27527_v11, %v32675_v32  ;;  %v27551_v21 = vpop.f32.mrb[171].mxu1  ;;  %27851 = vmatprep.subr.bf16.mxu1 %v30162_v20  ;;  %v30170_v32 = vld [vmem:[%s30830_s14 + $0x3240] sm:$0xff]   ;;  %v30195_v11 = vld [vmem:[%s30830_s14 + $0x32f0] sm:$0xff]  }
 0x677   : > { %v30197_v16 = vld [vmem:[%s30830_s14 + $0x32b0] sm:$0xff]  }
 0x678   : > { %v32713_v23 = vadd.f32 %v27549_v18, %v21770_v17  ;;  %27830 = vmatpush3.bf16.msra.mxu0 %v30163_v22  ;;  %v30199_v17 = vld [vmem:[%s30830_s14 + $0x32f8] sm:$0xff]   ;;  %v313_v19 = vld [vmem:[%s30840_s12 + $0x190] sm:$0xff]  ;;  %v30203_v22 = vld [vmem:[%s30830_s14 + $0x3340] sm:$0xff]  }
 0x679   : > { %27831 = vmatprep.subr.bf16.mxu0 %v30165_v25  ;;  %27852 = vmatpush3.bf16.msra.mxu1 %v30164_v24  ;;  %v30200_v18 = vld [vmem:[%s30830_s14 + $0x3238] sm:$0xff]   ;;  %v1248_v20 = vrot.slane %v313_v19, %v30878_v43  ;;  %v1241_v21 = vcombine.high %v313_v19, %v313_v19  ;;  %v30238_v19 = vld [vmem:[%s30830_s14 + $0x3400] sm:$0xff]  }
 0x67a   : > { %27853 = vmatprep.subr.bf16.mxu1 %v30166_v26  ;;  %v30204_v26 = vld [vmem:[%s30830_s14 + $0x33c0] sm:$0xff]  }
 0x67b   : > { %v1256_v24 = vcombine.high %v1248_v20, %v1248_v20  ;;  %v1255_v25 = vrot.slane %v1241_v21, %v30878_v43 }
 0x67c   : > { %27832 = vmatpush3.bf16.msra.mxu0 %v30167_v27  ;;  %v1935_v27 = vpack.c.bf16 %v1248_v20, %v1248_v20 }
 0x67d   : > { %27861 = vmatprep.subr.bf16.mxu0 %v30170_v32  ;;  %27854 = vmatpush3.bf16.msra.mxu1 %v30168_v29  ;;  %v1936_v29 = vpack.c.bf16 %v1256_v24, %v1256_v24  ;;  %v1257_v30 = vcombine.high %v1255_v25, %v1255_v25  ;;  %v1937_v32 = vpack.c.bf16 %v1255_v25, %v1255_v25  ;;  %v30240_v24 = vld [vmem:[%s30830_s14 + $0x3448] sm:$0xff]  }
 0x67e   : > { %27883 = vmatprep.subr.bf16.mxu1 %v30171_v35  ;;  %v30208_v35 = vld [vmem:[%s30830_s14 + $0x33c8] sm:$0xff]  }
 0x67f   : > { %22328 = vmatmul.mubr.bf16.vlgmr.msra.gmra.mrb[196].mxu0 %v1931_v36  ;;  %v1938_v34 = vpack.c.bf16 %v1257_v30, %v1257_v30  ;;  %v30209_v36 = vld [vmem:[%s30830_s14 + $0x3308] sm:$0xff]   ;;  %v30245_v30 = vld [vmem:[%s30830_s14 + $0x34d0] sm:$0xff]  }
 0x680   : > { %27862 = vmatpush3.bf16.msra.mxu0 %v30172_v37  ;;  %22368 = vmatmul.mubr.bf16.vlgmr.msra.gmra.mrb[196].mxu1 %v1933_v41  ;;  %v30210_v37 = vld [vmem:[%s30830_s14 + $0x3388] sm:$0xff]   ;;  %v30214_v41 = vld [vmem:[%s30830_s14 + $0x3390] sm:$0xff]  }
 0x681   : > { %27863 = vmatprep.subr.bf16.mxu0 %v30174_v42  ;;  %27884 = vmatpush3.bf16.msra.mxu1 %v30173_v40  ;;  %v30213_v40 = vld [vmem:[%s30830_s14 + $0x3310] sm:$0xff]   ;;  %v30215_v42 = vld [vmem:[%s30830_s14 + $0x3358] sm:$0xff]  }
 0x682   : > { %27885 = vmatprep.subr.bf16.mxu1 %v30175_v45  ;;  %22407 = vmatprep.mubr.bf16.mxu0 %v1936_v29  ;;  %v30217_v45 = vld [vmem:[%s30830_s14 + $0x3318] sm:$0xff]   ;;  %v30244_v29 = vld [vmem:[%s30830_s14 + $0x3450] sm:$0xff]  }
 0x683   : > { %22447 = vmatprep.mubr.bf16.mxu1 %v1938_v34  ;;  %v30249_v34 = vld [vmem:[%s30830_s14 + $0x34d8] sm:$0xff]  }
 0x684   : > { %27864 = vmatpush3.bf16.msra.mxu0 %v30176_v46  ;;  %v30218_v46 = vld [vmem:[%s30830_s14 + $0x3398] sm:$0xff]  }
 0x685   : > { %27865 = vmatprep.subr.bf16.mxu0 %v30178_v48  ;;  %27886 = vmatpush3.bf16.msra.mxu1 %v30177_v47  ;;  %v30219_v47 = vld [vmem:[%s30830_s14 + $0x3360] sm:$0xff]  }
 0x686   : > { %27887 = vmatprep.subr.bf16.mxu1 %v30179_v49  ;;  %v30220_v48 = vld [vmem:[%s30830_s14 + $0x33e0] sm:$0xff]  }
 0x687   : > { %v30221_v49 = vld [vmem:[%s30830_s14 + $0x3320] sm:$0xff]  }
 0x688   : > { %27866 = vmatpush3.bf16.msra.mxu0 %v30180_v50  ;;  %v30222_v50 = vld [vmem:[%s30830_s14 + $0x33a0] sm:$0xff]  }
 0x689   : > { %27867 = vmatprep.subr.bf16.mxu0 %v30182_v52  ;;  %27888 = vmatpush3.bf16.msra.mxu1 %v30181_v51  ;;  %v30223_v51 = vld [vmem:[%s30830_s14 + $0x3368] sm:$0xff]  }
 0x68a   : > { %27889 = vmatprep.subr.bf16.mxu1 %v30183_v53  ;;  %v30224_v53 = vld [vmem:[%s30830_s14 + $0x33e8] sm:$0xff]  }
 0x68c   : > { %27868 = vmatpush3.bf16.msra.mxu0 %v30184_v54 }
 0x68d   : > { %27869 = vmatprep.subr.bf16.mxu0 %v30186_v56  ;;  %27890 = vmatpush3.bf16.msra.mxu1 %v30185_v55  ;;  %v30225_v55 = vld [vmem:[%s30830_s14 + $0x3328] sm:$0xff]  }
 0x68e   : > { %27891 = vmatprep.subr.bf16.mxu1 %v30187_v57 }
 0x690   : > { %27870 = vmatpush3.bf16.msra.mxu0 %v30188_v58 }
 0x691   : > { %27871 = vmatprep.subr.bf16.mxu0 %v30190_v60  ;;  %27892 = vmatpush3.bf16.msra.mxu1 %v30189_v59  ;;  %v30226_v59 = vld [vmem:[%s30830_s14 + $0x33a8] sm:$0xff]   ;;  %v30227_v60 = vld [vmem:[%s30830_s14 + $0x3370] sm:$0xff]  }
 0x692   : > { %v27569_v61 = vpop.f32.mrb[172].mxu0  ;;  %27893 = vmatprep.subr.bf16.mxu1 %v30191_v62 }
 0x693   : > { %v27570_v63 = vpop.f32.mrb[173].mxu0  ;;  %v27591_v1 = vpop.f32.mrb[172].mxu1 }
 0x694   : > { %v27571_v2 = vadd.f32 %v27570_v63, %v27569_v61  ;;  %v27572_v3 = vpop.f32.mrb[174].mxu0  ;;  %v27592_v4 = vpop.f32.mrb[173].mxu1  ;;  %27872 = vmatpush3.bf16.msra.mxu0 %v30192_v0 }
 0x695   : > { %v27573_v6 = vpop.f32.mrb[175].mxu0  ;;  %v27593_v9 = vadd.f32 %v27592_v4, %v27591_v1  ;;  %v27594_v10 = vpop.f32.mrb[174].mxu1  ;;  %27873 = vmatprep.subr.bf16.mxu0 %v30194_v7  ;;  %27894 = vmatpush3.bf16.msra.mxu1 %v30193_v5  ;;  %v30229_v4 = vld [vmem:[%s30830_s14 + $0x3330] sm:$0xff]   ;;  %v30231_v7 = vld [vmem:[%s30830_s14 + $0x3378] sm:$0xff]  }
 0x696   : > { %v21850_v8 = vadd.f32 %v27571_v2, %v32713_v23  ;;  %v27595_v12 = vpop.f32.mrb[175].mxu1  ;;  %27895 = vmatprep.subr.bf16.mxu1 %v30195_v11  ;;  %v30201_v23 = vld [vmem:[%s30830_s14 + $0x32b8] sm:$0xff]   ;;  %v30228_v2 = vld [vmem:[%s30830_s14 + $0x33f0] sm:$0xff]  }
 0x697   : > { %v30230_v6 = vld [vmem:[%s30830_s14 + $0x33b0] sm:$0xff]  }
 0x698   : > { %v32751_v14 = vadd.f32 %v27593_v9, %v21850_v8  ;;  %27874 = vmatpush3.bf16.msra.mxu0 %v30196_v13  ;;  %v30232_v8 = vld [vmem:[%s30830_s14 + $0x33f8] sm:$0xff]   ;;  %v30236_v13 = vld [vmem:[%s30830_s14 + $0x3440] sm:$0xff]  }
 0x699   : > { %27875 = vmatprep.subr.bf16.mxu0 %v30198_v15  ;;  %27896 = vmatpush3.bf16.msra.mxu1 %v30197_v16  ;;  %v30233_v9 = vld [vmem:[%s30830_s14 + $0x3338] sm:$0xff]  }
 0x69a   : > { %27897 = vmatprep.subr.bf16.mxu1 %v30199_v17  ;;  %v314_v10 = vld [vmem:[%s30840_s12 + $0x198] sm:$0xff]  ;;  %v30237_v17 = vld [vmem:[%s30830_s14 + $0x34c0] sm:$0xff]  }
 0x69b   : > { %v1265_v11 = vrot.slane %v314_v10, %v30878_v43  ;;  %v1258_v12 = vcombine.high %v314_v10, %v314_v10  ;;  %v30271_v10 = vld [vmem:[%s30830_s14 + $0x3500] sm:$0xff]  }
 0x69c   : > { %27876 = vmatpush3.bf16.msra.mxu0 %v30200_v18 }
 0x69d   : > { %27905 = vmatprep.subr.bf16.mxu0 %v30203_v22  ;;  %27898 = vmatpush3.bf16.msra.mxu1 %v30201_v23  ;;  %v1273_v15 = vcombine.high %v1265_v11, %v1265_v11  ;;  %v1272_v16 = vrot.slane %v1258_v12, %v30878_v43  ;;  %v1939_v18 = vpack.c.bf16 %v1265_v11, %v1265_v11  ;;  %v30239_v22 = vld [vmem:[%s30830_s14 + $0x3480] sm:$0xff]  }
 0x69e   : > { %27927 = vmatprep.subr.bf16.mxu1 %v30204_v26  ;;  %v30241_v26 = vld [vmem:[%s30830_s14 + $0x34c8] sm:$0xff]  }
 0x69f   : > { %22408 = vmatmul.mubr.bf16.vlgmr.msra.gmra.mrb[200].mxu0 %v1935_v27  ;;  %v1940_v20 = vpack.c.bf16 %v1273_v15, %v1273_v15  ;;  %v1274_v21 = vcombine.high %v1272_v16, %v1272_v16  ;;  %v1941_v23 = vpack.c.bf16 %v1272_v16, %v1272_v16  ;;  %v30242_v27 = vld [vmem:[%s30830_s14 + $0x3408] sm:$0xff]  }
 0x6a0   : > { %27906 = vmatpush3.bf16.msra.mxu0 %v30205_v28  ;;  %22448 = vmatmul.mubr.bf16.vlgmr.msra.gmra.mrb[200].mxu1 %v1937_v32  ;;  %v30243_v28 = vld [vmem:[%s30830_s14 + $0x3488] sm:$0xff]   ;;  %v30247_v32 = vld [vmem:[%s30830_s14 + $0x3490] sm:$0xff]  }
 0x6a1   : > { %27907 = vmatprep.subr.bf16.mxu0 %v30207_v33  ;;  %27928 = vmatpush3.bf16.msra.mxu1 %v30206_v31  ;;  %v1942_v25 = vpack.c.bf16 %v1274_v21, %v1274_v21  ;;  %v30246_v31 = vld [vmem:[%s30830_s14 + $0x3410] sm:$0xff]   ;;  %v30248_v33 = vld [vmem:[%s30830_s14 + $0x3458] sm:$0xff]   ;;  %v30273_v15 = vld [vmem:[%s30830_s14 + $0x3548] sm:$0xff]  }
 0x6a2   : > { %27929 = vmatprep.subr.bf16.mxu1 %v30208_v35  ;;  %22487 = vmatprep.mubr.bf16.mxu0 %v1940_v20  ;;  %v30250_v35 = vld [vmem:[%s30830_s14 + $0x3418] sm:$0xff]   ;;  %v30277_v20 = vld [vmem:[%s30830_s14 + $0x3550] sm:$0xff]  }
 0x6a3   : > { %22527 = vmatprep.mubr.bf16.mxu1 %v1942_v25  ;;  %v30278_v21 = vld [vmem:[%s30830_s14 + $0x35d0] sm:$0xff]   ;;  %v30282_v25 = vld [vmem:[%s30830_s14 + $0x35d8] sm:$0xff]  }
 0x6a4   : > { %27908 = vmatpush3.bf16.msra.mxu0 %v30209_v36  ;;  %v30251_v36 = vld [vmem:[%s30830_s14 + $0x3498] sm:$0xff]  }
 0x6a5   : > { %27909 = vmatprep.subr.bf16.mxu0 %v30211_v38  ;;  %27930 = vmatpush3.bf16.msra.mxu1 %v30210_v37  ;;  %v30252_v37 = vld [vmem:[%s30830_s14 + $0x3460] sm:$0xff]  }
 0x6a6   : > { %27931 = vmatprep.subr.bf16.mxu1 %v30212_v39  ;;  %v30253_v38 = vld [vmem:[%s30830_s14 + $0x34e0] sm:$0xff]  }
 0x6a7   : > { %v30254_v39 = vld [vmem:[%s30830_s14 + $0x3420] sm:$0xff]  }
 0x6a8   : > { %27910 = vmatpush3.bf16.msra.mxu0 %v30213_v40  ;;  %v30255_v40 = vld [vmem:[%s30830_s14 + $0x34a0] sm:$0xff]  }
 0x6a9   : > { %27911 = vmatprep.subr.bf16.mxu0 %v30215_v42  ;;  %27932 = vmatpush3.bf16.msra.mxu1 %v30214_v41  ;;  %v30256_v41 = vld [vmem:[%s30830_s14 + $0x3468] sm:$0xff]  }
 0x6aa   : > { %27933 = vmatprep.subr.bf16.mxu1 %v30216_v44  ;;  %v30257_v44 = vld [vmem:[%s30830_s14 + $0x34e8] sm:$0xff]  }
 0x6ac   : > { %27912 = vmatpush3.bf16.msra.mxu0 %v30217_v45 }
 0x6ad   : > { %27913 = vmatprep.subr.bf16.mxu0 %v30219_v47  ;;  %27934 = vmatpush3.bf16.msra.mxu1 %v30218_v46  ;;  %v30258_v46 = vld [vmem:[%s30830_s14 + $0x3428] sm:$0xff]  }
 0x6ae   : > { %27935 = vmatprep.subr.bf16.mxu1 %v30220_v48 }
 0x6b0   : > { %27914 = vmatpush3.bf16.msra.mxu0 %v30221_v49 }
 0x6b1   : > { %27915 = vmatprep.subr.bf16.mxu0 %v30223_v51  ;;  %27936 = vmatpush3.bf16.msra.mxu1 %v30222_v50  ;;  %v30259_v50 = vld [vmem:[%s30830_s14 + $0x34a8] sm:$0xff]   ;;  %v30260_v51 = vld [vmem:[%s30830_s14 + $0x3470] sm:$0xff]  }
 0x6b2   : > { %v27613_v52 = vpop.f32.mrb[176].mxu0  ;;  %27937 = vmatprep.subr.bf16.mxu1 %v30224_v53 }
 0x6b3   : > { %v27614_v54 = vpop.f32.mrb[177].mxu0  ;;  %v27635_v56 = vpop.f32.mrb[176].mxu1 }
 0x6b4   : > { %v27615_v57 = vadd.f32 %v27614_v54, %v27613_v52  ;;  %v27616_v58 = vpop.f32.mrb[178].mxu0  ;;  %v27636_v61 = vpop.f32.mrb[177].mxu1  ;;  %27916 = vmatpush3.bf16.msra.mxu0 %v30225_v55 }
 0x6b5   : > { %v27617_v62 = vpop.f32.mrb[179].mxu0  ;;  %v27637_v0 = vadd.f32 %v27636_v61, %v27635_v56  ;;  %v27638_v1 = vpop.f32.mrb[178].mxu1  ;;  %27917 = vmatprep.subr.bf16.mxu0 %v30227_v60  ;;  %27938 = vmatpush3.bf16.msra.mxu1 %v30226_v59  ;;  %v30262_v59 = vld [vmem:[%s30830_s14 + $0x3430] sm:$0xff]  }
 0x6b6   : > { %v21930_v63 = vadd.f32 %v27615_v57, %v32751_v14  ;;  %v27639_v3 = vpop.f32.mrb[179].mxu1  ;;  %27939 = vmatprep.subr.bf16.mxu1 %v30228_v2  ;;  %v30234_v14 = vld [vmem:[%s30830_s14 + $0x33b8] sm:$0xff]   ;;  %v30261_v57 = vld [vmem:[%s30830_s14 + $0x34f0] sm:$0xff]  }
 0x6b7   : > { %v30263_v61 = vld [vmem:[%s30830_s14 + $0x34b0] sm:$0xff]   ;;  %v30264_v62 = vld [vmem:[%s30830_s14 + $0x3478] sm:$0xff]  }
 0x6b8   : > { %v32789_v5 = vadd.f32 %v27637_v0, %v21930_v63  ;;  %27918 = vmatpush3.bf16.msra.mxu0 %v30229_v4  ;;  %v30265_v63 = vld [vmem:[%s30830_s14 + $0x34f8] sm:$0xff]  }
 0x6b9   : > { %27919 = vmatprep.subr.bf16.mxu0 %v30231_v7  ;;  %27940 = vmatpush3.bf16.msra.mxu1 %v30230_v6  ;;  %v30266_v0 = vld [vmem:[%s30830_s14 + $0x3438] sm:$0xff]  }
 0x6ba   : > { %27941 = vmatprep.subr.bf16.mxu1 %v30232_v8  ;;  %v315_v1 = vld [vmem:[%s30840_s12 + $0x1a0] sm:$0xff] }
 0x6bb   : > { %v30267_v2 = vld [vmem:[%s30830_s14 + $0x34b8] sm:$0xff]   ;;  %v1282_v3 = vrot.slane %v315_v1, %v30878_v43  ;;  %v1275_v4 = vcombine.high %v315_v1, %v315_v1  ;;  %v30270_v8 = vld [vmem:[%s30830_s14 + $0x35c0] sm:$0xff]  }
 0x6bc   : > { %27920 = vmatpush3.bf16.msra.mxu0 %v30233_v9  ;;  %v30304_v1 = vld [vmem:[%s30830_s14 + $0x3600] sm:$0xff]  }
 0x6bd   : > { %27949 = vmatprep.subr.bf16.mxu0 %v30236_v13  ;;  %27942 = vmatpush3.bf16.msra.mxu1 %v30234_v14  ;;  %v1290_v6 = vcombine.high %v1282_v3, %v1282_v3  ;;  %v1289_v7 = vrot.slane %v1275_v4, %v30878_v43  ;;  %v1943_v9 = vpack.c.bf16 %v1282_v3, %v1282_v3  ;;  %v30272_v13 = vld [vmem:[%s30830_s14 + $0x3580] sm:$0xff]  }
 0x6be   : > { %27971 = vmatprep.subr.bf16.mxu1 %v30237_v17  ;;  %v30274_v17 = vld [vmem:[%s30830_s14 + $0x35c8] sm:$0xff]   ;;  %v30305_v4 = vld [vmem:[%s30830_s14 + $0x3680] sm:$0xff]  }
 0x6bf   : > { %22488 = vmatmul.mubr.bf16.vlgmr.msra.gmra.mrb[204].mxu0 %v1939_v18  ;;  %v1944_v11 = vpack.c.bf16 %v1290_v6, %v1290_v6  ;;  %v1291_v12 = vcombine.high %v1289_v7, %v1289_v7  ;;  %v1945_v14 = vpack.c.bf16 %v1289_v7, %v1289_v7  ;;  %v30275_v18 = vld [vmem:[%s30830_s14 + $0x3508] sm:$0xff]  }
 0x6c0   : > { %27950 = vmatpush3.bf16.msra.mxu0 %v30238_v19  ;;  %22528 = vmatmul.mubr.bf16.vlgmr.msra.gmra.mrb[204].mxu1 %v1941_v23  ;;  %v30276_v19 = vld [vmem:[%s30830_s14 + $0x3588] sm:$0xff]   ;;  %v30280_v23 = vld [vmem:[%s30830_s14 + $0x3590] sm:$0xff]  }
 0x6c1   : > { %27951 = vmatprep.subr.bf16.mxu0 %v30240_v24  ;;  %27972 = vmatpush3.bf16.msra.mxu1 %v30239_v22  ;;  %v1946_v16 = vpack.c.bf16 %v1291_v12, %v1291_v12  ;;  %v30279_v22 = vld [vmem:[%s30830_s14 + $0x3510] sm:$0xff]   ;;  %v30281_v24 = vld [vmem:[%s30830_s14 + $0x3558] sm:$0xff]   ;;  %v30306_v6 = vld [vmem:[%s30830_s14 + $0x3648] sm:$0xff]  }
 0x6c2   : > { %27973 = vmatprep.subr.bf16.mxu1 %v30241_v26  ;;  %22567 = vmatprep.mubr.bf16.mxu0 %v1944_v11  ;;  %v30283_v26 = vld [vmem:[%s30830_s14 + $0x3518] sm:$0xff]   ;;  %v30310_v11 = vld [vmem:[%s30830_s14 + $0x3650] sm:$0xff]  }
 0x6c3   : > { %22607 = vmatprep.mubr.bf16.mxu1 %v1946_v16  ;;  %v30311_v12 = vld [vmem:[%s30830_s14 + $0x36d0] sm:$0xff]   ;;  %v30315_v16 = vld [vmem:[%s30830_s14 + $0x36d8] sm:$0xff]  }
 0x6c4   : > { %27952 = vmatpush3.bf16.msra.mxu0 %v30242_v27  ;;  %v30284_v27 = vld [vmem:[%s30830_s14 + $0x3598] sm:$0xff]  }
 0x6c5   : > { %27953 = vmatprep.subr.bf16.mxu0 %v30244_v29  ;;  %27974 = vmatpush3.bf16.msra.mxu1 %v30243_v28  ;;  %v30285_v28 = vld [vmem:[%s30830_s14 + $0x3560] sm:$0xff]  }
 0x6c6   : > { %27975 = vmatprep.subr.bf16.mxu1 %v30245_v30  ;;  %v30286_v29 = vld [vmem:[%s30830_s14 + $0x35e0] sm:$0xff]  }
 0x6c7   : > { %v30287_v30 = vld [vmem:[%s30830_s14 + $0x3520] sm:$0xff]  }
 0x6c8   : > { %27954 = vmatpush3.bf16.msra.mxu0 %v30246_v31  ;;  %v30288_v31 = vld [vmem:[%s30830_s14 + $0x35a0] sm:$0xff]  }
 0x6c9   : > { %27955 = vmatprep.subr.bf16.mxu0 %v30248_v33  ;;  %27976 = vmatpush3.bf16.msra.mxu1 %v30247_v32  ;;  %v30289_v32 = vld [vmem:[%s30830_s14 + $0x3568] sm:$0xff]  }
 0x6ca   : > { %27977 = vmatprep.subr.bf16.mxu1 %v30249_v34  ;;  %v30290_v34 = vld [vmem:[%s30830_s14 + $0x35e8] sm:$0xff]  }
 0x6cc   : > { %27956 = vmatpush3.bf16.msra.mxu0 %v30250_v35 }
 0x6cd   : > { %27957 = vmatprep.subr.bf16.mxu0 %v30252_v37  ;;  %27978 = vmatpush3.bf16.msra.mxu1 %v30251_v36  ;;  %v30291_v36 = vld [vmem:[%s30830_s14 + $0x3528] sm:$0xff]  }
 0x6ce   : > { %27979 = vmatprep.subr.bf16.mxu1 %v30253_v38 }
 0x6d0   : > { %27958 = vmatpush3.bf16.msra.mxu0 %v30254_v39 }
 0x6d1   : > { %27959 = vmatprep.subr.bf16.mxu0 %v30256_v41  ;;  %27980 = vmatpush3.bf16.msra.mxu1 %v30255_v40  ;;  %v30292_v41 = vld [vmem:[%s30830_s14 + $0x35a8] sm:$0xff]  }
 0x6d2   : > { %v27657_v42 = vpop.f32.mrb[180].mxu0  ;;  %27981 = vmatprep.subr.bf16.mxu1 %v30257_v44  ;;  %v30293_v44 = vld [vmem:[%s30830_s14 + $0x3570] sm:$0xff]  }
 0x6d3   : > { %v27658_v45 = vpop.f32.mrb[181].mxu0  ;;  %v27679_v47 = vpop.f32.mrb[180].mxu1 }
 0x6d4   : > { %v27659_v48 = vadd.f32 %v27658_v45, %v27657_v42  ;;  %v27660_v49 = vpop.f32.mrb[182].mxu0  ;;  %v27680_v52 = vpop.f32.mrb[181].mxu1  ;;  %27960 = vmatpush3.bf16.msra.mxu0 %v30258_v46 }
 0x6d5   : > { %v27661_v53 = vpop.f32.mrb[183].mxu0  ;;  %v27681_v55 = vadd.f32 %v27680_v52, %v27679_v47  ;;  %v27682_v56 = vpop.f32.mrb[182].mxu1  ;;  %27961 = vmatprep.subr.bf16.mxu0 %v30260_v51  ;;  %27982 = vmatpush3.bf16.msra.mxu1 %v30259_v50  ;;  %v30295_v50 = vld [vmem:[%s30830_s14 + $0x3530] sm:$0xff]   ;;  %v30297_v52 = vld [vmem:[%s30830_s14 + $0x3578] sm:$0xff]  }
 0x6d6   : > { %v22010_v54 = vadd.f32 %v27659_v48, %v32789_v5  ;;  %v27683_v58 = vpop.f32.mrb[183].mxu1  ;;  %27983 = vmatprep.subr.bf16.mxu1 %v30261_v57  ;;  %v30269_v5 = vld [vmem:[%s30830_s14 + $0x3540] sm:$0xff]   ;;  %v30294_v48 = vld [vmem:[%s30830_s14 + $0x35f0] sm:$0xff]  }
 0x6d7   : > { %v30296_v53 = vld [vmem:[%s30830_s14 + $0x35b0] sm:$0xff]   ;;  %v316_v56 = vld [vmem:[%s30840_s12 + $0x1a8] sm:$0xff] }
 0x6d8   : > { %v32827_v60 = vadd.f32 %v27681_v55, %v22010_v54  ;;  %27962 = vmatpush3.bf16.msra.mxu0 %v30262_v59  ;;  %v30298_v54 = vld [vmem:[%s30830_s14 + $0x35f8] sm:$0xff]   ;;  %v1299_v57 = vrot.slane %v316_v56, %v30878_v43  ;;  %v1292_v58 = vcombine.high %v316_v56, %v316_v56  ;;  %v30302_v59 = vld [vmem:[%s30830_s14 + $0x3640] sm:$0xff]  }
 0x6d9   : > { %27963 = vmatprep.subr.bf16.mxu0 %v30264_v62  ;;  %27984 = vmatpush3.bf16.msra.mxu1 %v30263_v61  ;;  %v30299_v55 = vld [vmem:[%s30830_s14 + $0x3538] sm:$0xff]   ;;  %v30337_v56 = vld [vmem:[%s30830_s14 + $0x3700] sm:$0xff]  }
 0x6da   : > { %27985 = vmatprep.subr.bf16.mxu1 %v30265_v63  ;;  %v1307_v61 = vcombine.high %v1299_v57, %v1299_v57  ;;  %v1306_v62 = vrot.slane %v1292_v58, %v30878_v43  ;;  %v30303_v63 = vld [vmem:[%s30830_s14 + $0x36c0] sm:$0xff]  }
 0x6dc   : > { %27964 = vmatpush3.bf16.msra.mxu0 %v30266_v0  ;;  %v1947_v0 = vpack.c.bf16 %v1299_v57, %v1299_v57  ;;  %v1308_v3 = vcombine.high %v1306_v62, %v1306_v62 }
 0x6dd   : > { %27993 = vmatprep.subr.bf16.mxu0 %v30269_v5  ;;  %27986 = vmatpush3.bf16.msra.mxu1 %v30267_v2  ;;  %v1948_v2 = vpack.c.bf16 %v1307_v61, %v1307_v61  ;;  %v1949_v5 = vpack.c.bf16 %v1306_v62, %v1306_v62  ;;  %v30339_v61 = vld [vmem:[%s30830_s14 + $0x3748] sm:$0xff]  }
 0x6de   : > { %28015 = vmatprep.subr.bf16.mxu1 %v30270_v8  ;;  %v1950_v7 = vpack.c.bf16 %v1308_v3, %v1308_v3  ;;  %v30307_v8 = vld [vmem:[%s30830_s14 + $0x36c8] sm:$0xff]   ;;  %v30344_v3 = vld [vmem:[%s30830_s14 + $0x37d0] sm:$0xff]  }
 0x6df   : > { %22568 = vmatmul.mubr.bf16.vlgmr.msra.gmra.mrb[208].mxu0 %v1943_v9  ;;  %v30308_v9 = vld [vmem:[%s30830_s14 + $0x3608] sm:$0xff]  }
 0x6e0   : > { %27994 = vmatpush3.bf16.msra.mxu0 %v30271_v10  ;;  %22608 = vmatmul.mubr.bf16.vlgmr.msra.gmra.mrb[208].mxu1 %v1945_v14  ;;  %v30309_v10 = vld [vmem:[%s30830_s14 + $0x3688] sm:$0xff]   ;;  %v30313_v14 = vld [vmem:[%s30830_s14 + $0x3690] sm:$0xff]  }
 0x6e1   : > { %27995 = vmatprep.subr.bf16.mxu0 %v30273_v15  ;;  %28016 = vmatpush3.bf16.msra.mxu1 %v30272_v13  ;;  %v30312_v13 = vld [vmem:[%s30830_s14 + $0x3610] sm:$0xff]   ;;  %v30314_v15 = vld [vmem:[%s30830_s14 + $0x3658] sm:$0xff]  }
 0x6e2   : > { %28017 = vmatprep.subr.bf16.mxu1 %v30274_v17  ;;  %22647 = vmatprep.mubr.bf16.mxu0 %v1948_v2  ;;  %v30316_v17 = vld [vmem:[%s30830_s14 + $0x3618] sm:$0xff]   ;;  %v30343_v2 = vld [vmem:[%s30830_s14 + $0x3750] sm:$0xff]  }
 0x6e3   : > { %22687 = vmatprep.mubr.bf16.mxu1 %v1950_v7  ;;  %v30348_v7 = vld [vmem:[%s30830_s14 + $0x37d8] sm:$0xff]  }
 0x6e4   : > { %27996 = vmatpush3.bf16.msra.mxu0 %v30275_v18  ;;  %v30317_v18 = vld [vmem:[%s30830_s14 + $0x3698] sm:$0xff]  }
 0x6e5   : > { %27997 = vmatprep.subr.bf16.mxu0 %v30277_v20  ;;  %28018 = vmatpush3.bf16.msra.mxu1 %v30276_v19  ;;  %v30318_v19 = vld [vmem:[%s30830_s14 + $0x3660] sm:$0xff]  }
 0x6e6   : > { %28019 = vmatprep.subr.bf16.mxu1 %v30278_v21  ;;  %v30319_v20 = vld [vmem:[%s30830_s14 + $0x36e0] sm:$0xff]  }
 0x6e7   : > { %v30320_v21 = vld [vmem:[%s30830_s14 + $0x3620] sm:$0xff]  }
 0x6e8   : > { %27998 = vmatpush3.bf16.msra.mxu0 %v30279_v22  ;;  %v30321_v22 = vld [vmem:[%s30830_s14 + $0x36a0] sm:$0xff]  }
 0x6e9   : > { %27999 = vmatprep.subr.bf16.mxu0 %v30281_v24  ;;  %28020 = vmatpush3.bf16.msra.mxu1 %v30280_v23  ;;  %v30322_v23 = vld [vmem:[%s30830_s14 + $0x3668] sm:$0xff]  }
 0x6ea   : > { %28021 = vmatprep.subr.bf16.mxu1 %v30282_v25  ;;  %v30323_v25 = vld [vmem:[%s30830_s14 + $0x36e8] sm:$0xff]  }
 0x6ec   : > { %28000 = vmatpush3.bf16.msra.mxu0 %v30283_v26 }
 0x6ed   : > { %28001 = vmatprep.subr.bf16.mxu0 %v30285_v28  ;;  %28022 = vmatpush3.bf16.msra.mxu1 %v30284_v27  ;;  %v30324_v27 = vld [vmem:[%s30830_s14 + $0x3628] sm:$0xff]  }
 0x6ee   : > { %28023 = vmatprep.subr.bf16.mxu1 %v30286_v29 }
 0x6f0   : > { %28002 = vmatpush3.bf16.msra.mxu0 %v30287_v30 }
 0x6f1   : > { %28003 = vmatprep.subr.bf16.mxu0 %v30289_v32  ;;  %28024 = vmatpush3.bf16.msra.mxu1 %v30288_v31  ;;  %v30325_v31 = vld [vmem:[%s30830_s14 + $0x36a8] sm:$0xff]   ;;  %v30326_v32 = vld [vmem:[%s30830_s14 + $0x3670] sm:$0xff]  }
 0x6f2   : > { %v27701_v33 = vpop.f32.mrb[184].mxu0  ;;  %28025 = vmatprep.subr.bf16.mxu1 %v30290_v34 }
 0x6f3   : > { %v27702_v35 = vpop.f32.mrb[185].mxu0  ;;  %v27723_v37 = vpop.f32.mrb[184].mxu1 }
 0x6f4   : > { %v27703_v38 = vadd.f32 %v27702_v35, %v27701_v33  ;;  %v27704_v39 = vpop.f32.mrb[186].mxu0  ;;  %v27724_v40 = vpop.f32.mrb[185].mxu1  ;;  %28004 = vmatpush3.bf16.msra.mxu0 %v30291_v36 }
 0x6f5   : > { %v27705_v42 = vpop.f32.mrb[187].mxu0  ;;  %v27725_v46 = vadd.f32 %v27724_v40, %v27723_v37  ;;  %v27726_v47 = vpop.f32.mrb[186].mxu1  ;;  %28005 = vmatprep.subr.bf16.mxu0 %v30293_v44  ;;  %28026 = vmatpush3.bf16.msra.mxu1 %v30292_v41  ;;  %v30328_v40 = vld [vmem:[%s30830_s14 + $0x3630] sm:$0xff]   ;;  %v30330_v44 = vld [vmem:[%s30830_s14 + $0x3678] sm:$0xff]  }
 0x6f6   : > { %v22090_v45 = vadd.f32 %v27703_v38, %v32827_v60  ;;  %v27727_v49 = vpop.f32.mrb[187].mxu1  ;;  %28027 = vmatprep.subr.bf16.mxu1 %v30294_v48  ;;  %v30300_v60 = vld [vmem:[%s30830_s14 + $0x35b8] sm:$0xff]   ;;  %v30327_v38 = vld [vmem:[%s30830_s14 + $0x36f0] sm:$0xff]  }
 0x6f7   : > { %v30329_v42 = vld [vmem:[%s30830_s14 + $0x36b0] sm:$0xff]  }
 0x6f8   : > { %v32865_v51 = vadd.f32 %v27725_v46, %v22090_v45  ;;  %28006 = vmatpush3.bf16.msra.mxu0 %v30295_v50  ;;  %v30331_v45 = vld [vmem:[%s30830_s14 + $0x36f8] sm:$0xff]   ;;  %v317_v47 = vld [vmem:[%s30840_s12 + $0x1b0] sm:$0xff]  ;;  %v30335_v50 = vld [vmem:[%s30830_s14 + $0x3740] sm:$0xff]  }
 0x6f9   : > { %28007 = vmatprep.subr.bf16.mxu0 %v30297_v52  ;;  %28028 = vmatpush3.bf16.msra.mxu1 %v30296_v53  ;;  %v30332_v46 = vld [vmem:[%s30830_s14 + $0x3638] sm:$0xff]   ;;  %v1316_v48 = vrot.slane %v317_v47, %v30878_v43  ;;  %v1309_v49 = vcombine.high %v317_v47, %v317_v47  ;;  %v30370_v47 = vld [vmem:[%s30830_s14 + $0x3800] sm:$0xff]  }
 0x6fa   : > { %28029 = vmatprep.subr.bf16.mxu1 %v30298_v54  ;;  %v30336_v54 = vld [vmem:[%s30830_s14 + $0x37c0] sm:$0xff]  }
 0x6fb   : > { %v1324_v52 = vcombine.high %v1316_v48, %v1316_v48  ;;  %v1323_v53 = vrot.slane %v1309_v49, %v30878_v43 }
 0x6fc   : > { %28008 = vmatpush3.bf16.msra.mxu0 %v30299_v55  ;;  %v1951_v55 = vpack.c.bf16 %v1316_v48, %v1316_v48 }
 0x6fd   : > { %28037 = vmatprep.subr.bf16.mxu0 %v30302_v59  ;;  %28030 = vmatpush3.bf16.msra.mxu1 %v30300_v60  ;;  %v1952_v57 = vpack.c.bf16 %v1324_v52, %v1324_v52  ;;  %v1325_v58 = vcombine.high %v1323_v53, %v1323_v53  ;;  %v30338_v59 = vld [vmem:[%s30830_s14 + $0x3780] sm:$0xff]   ;;  %v1953_v60 = vpack.c.bf16 %v1323_v53, %v1323_v53  ;;  %v30372_v52 = vld [vmem:[%s30830_s14 + $0x3848] sm:$0xff]  }
 0x6fe   : > { %28059 = vmatprep.subr.bf16.mxu1 %v30303_v63  ;;  %v30340_v63 = vld [vmem:[%s30830_s14 + $0x37c8] sm:$0xff]  }
 0x6ff   : > { %22648 = vmatmul.mubr.bf16.vlgmr.msra.gmra.mrb[212].mxu0 %v1947_v0  ;;  %v1954_v62 = vpack.c.bf16 %v1325_v58, %v1325_v58  ;;  %v30341_v0 = vld [vmem:[%s30830_s14 + $0x3708] sm:$0xff]   ;;  %v30377_v58 = vld [vmem:[%s30830_s14 + $0x38d0] sm:$0xff]  }
 0x700   : > { %28038 = vmatpush3.bf16.msra.mxu0 %v30304_v1  ;;  %22688 = vmatmul.mubr.bf16.vlgmr.msra.gmra.mrb[212].mxu1 %v1949_v5  ;;  %v30342_v1 = vld [vmem:[%s30830_s14 + $0x3788] sm:$0xff]   ;;  %v30346_v5 = vld [vmem:[%s30830_s14 + $0x3790] sm:$0xff]  }
 0x701   : > { %28039 = vmatprep.subr.bf16.mxu0 %v30306_v6  ;;  %28060 = vmatpush3.bf16.msra.mxu1 %v30305_v4  ;;  %v30345_v4 = vld [vmem:[%s30830_s14 + $0x3710] sm:$0xff]   ;;  %v30347_v6 = vld [vmem:[%s30830_s14 + $0x3758] sm:$0xff]  }
 0x702   : > { %28061 = vmatprep.subr.bf16.mxu1 %v30307_v8  ;;  %22727 = vmatprep.mubr.bf16.mxu0 %v1952_v57  ;;  %v30349_v8 = vld [vmem:[%s30830_s14 + $0x3718] sm:$0xff]   ;;  %v30376_v57 = vld [vmem:[%s30830_s14 + $0x3850] sm:$0xff]  }
 0x703   : > { %22767 = vmatprep.mubr.bf16.mxu1 %v1954_v62  ;;  %v30381_v62 = vld [vmem:[%s30830_s14 + $0x38d8] sm:$0xff]  }
 0x704   : > { %28040 = vmatpush3.bf16.msra.mxu0 %v30308_v9  ;;  %v30350_v9 = vld [vmem:[%s30830_s14 + $0x3798] sm:$0xff]  }
 0x705   : > { %28041 = vmatprep.subr.bf16.mxu0 %v30310_v11  ;;  %28062 = vmatpush3.bf16.msra.mxu1 %v30309_v10  ;;  %v30351_v10 = vld [vmem:[%s30830_s14 + $0x3760] sm:$0xff]  }
 0x706   : > { %28063 = vmatprep.subr.bf16.mxu1 %v30311_v12  ;;  %v30352_v11 = vld [vmem:[%s30830_s14 + $0x37e0] sm:$0xff]  }
 0x707   : > { %v30353_v12 = vld [vmem:[%s30830_s14 + $0x3720] sm:$0xff]  }
 0x708   : > { %28042 = vmatpush3.bf16.msra.mxu0 %v30312_v13  ;;  %v30354_v13 = vld [vmem:[%s30830_s14 + $0x37a0] sm:$0xff]  }
 0x709   : > { %28043 = vmatprep.subr.bf16.mxu0 %v30314_v15  ;;  %28064 = vmatpush3.bf16.msra.mxu1 %v30313_v14  ;;  %v30355_v14 = vld [vmem:[%s30830_s14 + $0x3768] sm:$0xff]  }
 0x70a   : > { %28065 = vmatprep.subr.bf16.mxu1 %v30315_v16  ;;  %v30356_v16 = vld [vmem:[%s30830_s14 + $0x37e8] sm:$0xff]  }
 0x70c   : > { %28044 = vmatpush3.bf16.msra.mxu0 %v30316_v17 }
 0x70d   : > { %28045 = vmatprep.subr.bf16.mxu0 %v30318_v19  ;;  %28066 = vmatpush3.bf16.msra.mxu1 %v30317_v18  ;;  %v30357_v18 = vld [vmem:[%s30830_s14 + $0x3728] sm:$0xff]  }
 0x70e   : > { %28067 = vmatprep.subr.bf16.mxu1 %v30319_v20 }
 0x710   : > { %28046 = vmatpush3.bf16.msra.mxu0 %v30320_v21 }
 0x711   : > { %28047 = vmatprep.subr.bf16.mxu0 %v30322_v23  ;;  %28068 = vmatpush3.bf16.msra.mxu1 %v30321_v22  ;;  %v30358_v22 = vld [vmem:[%s30830_s14 + $0x37a8] sm:$0xff]   ;;  %v30359_v23 = vld [vmem:[%s30830_s14 + $0x3770] sm:$0xff]  }
 0x712   : > { %v27745_v24 = vpop.f32.mrb[188].mxu0  ;;  %28069 = vmatprep.subr.bf16.mxu1 %v30323_v25 }
 0x713   : > { %v27746_v26 = vpop.f32.mrb[189].mxu0  ;;  %v27767_v28 = vpop.f32.mrb[188].mxu1 }
 0x714   : > { %v27747_v29 = vadd.f32 %v27746_v26, %v27745_v24  ;;  %v27748_v30 = vpop.f32.mrb[190].mxu0  ;;  %v27768_v33 = vpop.f32.mrb[189].mxu1  ;;  %28048 = vmatpush3.bf16.msra.mxu0 %v30324_v27 }
 0x715   : > { %v27749_v34 = vpop.f32.mrb[191].mxu0  ;;  %v27769_v36 = vadd.f32 %v27768_v33, %v27767_v28  ;;  %v27770_v37 = vpop.f32.mrb[190].mxu1  ;;  %28049 = vmatprep.subr.bf16.mxu0 %v30326_v32  ;;  %28070 = vmatpush3.bf16.msra.mxu1 %v30325_v31  ;;  %v30361_v31 = vld [vmem:[%s30830_s14 + $0x3730] sm:$0xff]  }
 0x716   : > { %v22170_v35 = vadd.f32 %v27747_v29, %v32865_v51  ;;  %v27771_v39 = vpop.f32.mrb[191].mxu1  ;;  %28071 = vmatprep.subr.bf16.mxu1 %v30327_v38  ;;  %v30333_v51 = vld [vmem:[%s30830_s14 + $0x36b8] sm:$0xff]   ;;  %v30360_v29 = vld [vmem:[%s30830_s14 + $0x37f0] sm:$0xff]  }
 0x717   : > { %v30362_v33 = vld [vmem:[%s30830_s14 + $0x37b0] sm:$0xff]   ;;  %v30363_v34 = vld [vmem:[%s30830_s14 + $0x3778] sm:$0xff]  }
 0x718   : > { %v32903_v41 = vadd.f32 %v27769_v36, %v22170_v35  ;;  %28050 = vmatpush3.bf16.msra.mxu0 %v30328_v40  ;;  %v30364_v35 = vld [vmem:[%s30830_s14 + $0x37f8] sm:$0xff]  }
 0x719   : > { %28051 = vmatprep.subr.bf16.mxu0 %v30330_v44  ;;  %28072 = vmatpush3.bf16.msra.mxu1 %v30329_v42  ;;  %v30365_v36 = vld [vmem:[%s30830_s14 + $0x3738] sm:$0xff]  }
 0x71a   : > { %28073 = vmatprep.subr.bf16.mxu1 %v30331_v45  ;;  %v318_v37 = vld [vmem:[%s30840_s12 + $0x1b8] sm:$0xff]  ;;  %v30369_v45 = vld [vmem:[%s30830_s14 + $0x38c0] sm:$0xff]  }
 0x71b   : > { %v30366_v38 = vld [vmem:[%s30830_s14 + $0x37b8] sm:$0xff]   ;;  %v1333_v39 = vrot.slane %v318_v37, %v30878_v43  ;;  %v1326_v40 = vcombine.high %v318_v37, %v318_v37  ;;  %v30403_v37 = vld [vmem:[%s30830_s14 + $0x3900] sm:$0xff]  }
 0x71c   : > { %28052 = vmatpush3.bf16.msra.mxu0 %v30332_v46 }
 0x71d   : > { %28081 = vmatprep.subr.bf16.mxu0 %v30335_v50  ;;  %28074 = vmatpush3.bf16.msra.mxu1 %v30333_v51  ;;  %v1341_v42 = vcombine.high %v1333_v39, %v1333_v39  ;;  %v1340_v44 = vrot.slane %v1326_v40, %v30878_v43  ;;  %v1955_v46 = vpack.c.bf16 %v1333_v39, %v1333_v39  ;;  %v30371_v50 = vld [vmem:[%s30830_s14 + $0x3880] sm:$0xff]  }
 0x71e   : > { %28103 = vmatprep.subr.bf16.mxu1 %v30336_v54  ;;  %v30373_v54 = vld [vmem:[%s30830_s14 + $0x38c8] sm:$0xff]   ;;  %v30404_v40 = vld [vmem:[%s30830_s14 + $0x3980] sm:$0xff]  }
 0x71f   : > { %22728 = vmatmul.mubr.bf16.vlgmr.msra.gmra.mrb[216].mxu0 %v1951_v55  ;;  %v1956_v48 = vpack.c.bf16 %v1341_v42, %v1341_v42  ;;  %v1342_v49 = vcombine.high %v1340_v44, %v1340_v44  ;;  %v1957_v51 = vpack.c.bf16 %v1340_v44, %v1340_v44  ;;  %v30374_v55 = vld [vmem:[%s30830_s14 + $0x3808] sm:$0xff]  }
 0x720   : > { %28082 = vmatpush3.bf16.msra.mxu0 %v30337_v56  ;;  %22768 = vmatmul.mubr.bf16.vlgmr.msra.gmra.mrb[216].mxu1 %v1953_v60  ;;  %v30375_v56 = vld [vmem:[%s30830_s14 + $0x3888] sm:$0xff]   ;;  %v30379_v60 = vld [vmem:[%s30830_s14 + $0x3890] sm:$0xff]  }
 0x721   : > { %28083 = vmatprep.subr.bf16.mxu0 %v30339_v61  ;;  %28104 = vmatpush3.bf16.msra.mxu1 %v30338_v59  ;;  %v1958_v53 = vpack.c.bf16 %v1342_v49, %v1342_v49  ;;  %v30378_v59 = vld [vmem:[%s30830_s14 + $0x3810] sm:$0xff]   ;;  %v30380_v61 = vld [vmem:[%s30830_s14 + $0x3858] sm:$0xff]   ;;  %v30405_v42 = vld [vmem:[%s30830_s14 + $0x3948] sm:$0xff]  }
 0x722   : > { %28105 = vmatprep.subr.bf16.mxu1 %v30340_v63  ;;  %22807 = vmatprep.mubr.bf16.mxu0 %v1956_v48  ;;  %v30382_v63 = vld [vmem:[%s30830_s14 + $0x3818] sm:$0xff]   ;;  %v30409_v48 = vld [vmem:[%s30830_s14 + $0x3950] sm:$0xff]  }
 0x723   : > { %22847 = vmatprep.mubr.bf16.mxu1 %v1958_v53  ;;  %v30410_v49 = vld [vmem:[%s30830_s14 + $0x39d0] sm:$0xff]   ;;  %v30414_v53 = vld [vmem:[%s30830_s14 + $0x39d8] sm:$0xff]  }
 0x724   : > { %28084 = vmatpush3.bf16.msra.mxu0 %v30341_v0  ;;  %v30383_v0 = vld [vmem:[%s30830_s14 + $0x3898] sm:$0xff]  }
 0x725   : > { %28085 = vmatprep.subr.bf16.mxu0 %v30343_v2  ;;  %28106 = vmatpush3.bf16.msra.mxu1 %v30342_v1  ;;  %v30384_v1 = vld [vmem:[%s30830_s14 + $0x3860] sm:$0xff]  }
 0x726   : > { %28107 = vmatprep.subr.bf16.mxu1 %v30344_v3  ;;  %v30385_v2 = vld [vmem:[%s30830_s14 + $0x38e0] sm:$0xff]  }
 0x727   : > { %v30386_v3 = vld [vmem:[%s30830_s14 + $0x3820] sm:$0xff]  }
 0x728   : > { %28086 = vmatpush3.bf16.msra.mxu0 %v30345_v4  ;;  %v30387_v4 = vld [vmem:[%s30830_s14 + $0x38a0] sm:$0xff]  }
 0x729   : > { %28087 = vmatprep.subr.bf16.mxu0 %v30347_v6  ;;  %28108 = vmatpush3.bf16.msra.mxu1 %v30346_v5  ;;  %v30388_v5 = vld [vmem:[%s30830_s14 + $0x3868] sm:$0xff]  }
 0x72a   : > { %28109 = vmatprep.subr.bf16.mxu1 %v30348_v7  ;;  %v30389_v7 = vld [vmem:[%s30830_s14 + $0x38e8] sm:$0xff]  }
 0x72c   : > { %28088 = vmatpush3.bf16.msra.mxu0 %v30349_v8 }
 0x72d   : > { %28089 = vmatprep.subr.bf16.mxu0 %v30351_v10  ;;  %28110 = vmatpush3.bf16.msra.mxu1 %v30350_v9  ;;  %v30390_v9 = vld [vmem:[%s30830_s14 + $0x3828] sm:$0xff]  }
 0x72e   : > { %28111 = vmatprep.subr.bf16.mxu1 %v30352_v11 }
 0x730   : > { %28090 = vmatpush3.bf16.msra.mxu0 %v30353_v12 }
 0x731   : > { %28091 = vmatprep.subr.bf16.mxu0 %v30355_v14  ;;  %28112 = vmatpush3.bf16.msra.mxu1 %v30354_v13  ;;  %v30391_v14 = vld [vmem:[%s30830_s14 + $0x38a8] sm:$0xff]  }
 0x732   : > { %v27789_v15 = vpop.f32.mrb[192].mxu0  ;;  %28113 = vmatprep.subr.bf16.mxu1 %v30356_v16  ;;  %v30392_v16 = vld [vmem:[%s30830_s14 + $0x3870] sm:$0xff]  }
 0x733   : > { %v27790_v17 = vpop.f32.mrb[193].mxu0  ;;  %v27811_v19 = vpop.f32.mrb[192].mxu1 }
 0x734   : > { %v27791_v20 = vadd.f32 %v27790_v17, %v27789_v15  ;;  %v27792_v21 = vpop.f32.mrb[194].mxu0  ;;  %v27812_v24 = vpop.f32.mrb[193].mxu1  ;;  %28092 = vmatpush3.bf16.msra.mxu0 %v30357_v18 }
 0x735   : > { %v27793_v25 = vpop.f32.mrb[195].mxu0  ;;  %v27813_v27 = vadd.f32 %v27812_v24, %v27811_v19  ;;  %v27814_v28 = vpop.f32.mrb[194].mxu1  ;;  %28093 = vmatprep.subr.bf16.mxu0 %v30359_v23  ;;  %28114 = vmatpush3.bf16.msra.mxu1 %v30358_v22  ;;  %v30394_v22 = vld [vmem:[%s30830_s14 + $0x3830] sm:$0xff]   ;;  %v30396_v24 = vld [vmem:[%s30830_s14 + $0x3878] sm:$0xff]  }
 0x736   : > { %v22250_v26 = vadd.f32 %v27791_v20, %v32903_v41  ;;  %v27815_v30 = vpop.f32.mrb[195].mxu1  ;;  %28115 = vmatprep.subr.bf16.mxu1 %v30360_v29  ;;  %v30368_v41 = vld [vmem:[%s30830_s14 + $0x3840] sm:$0xff]   ;;  %v30393_v20 = vld [vmem:[%s30830_s14 + $0x38f0] sm:$0xff]  }
 0x737   : > { %v30395_v25 = vld [vmem:[%s30830_s14 + $0x38b0] sm:$0xff]   ;;  %v319_v28 = vld [vmem:[%s30840_s12 + $0x1c0] sm:$0xff] }
 0x738   : > { %v32941_v32 = vadd.f32 %v27813_v27, %v22250_v26  ;;  %28094 = vmatpush3.bf16.msra.mxu0 %v30361_v31  ;;  %v30397_v26 = vld [vmem:[%s30830_s14 + $0x38f8] sm:$0xff]   ;;  %v1350_v29 = vrot.slane %v319_v28, %v30878_v43  ;;  %v1343_v30 = vcombine.high %v319_v28, %v319_v28  ;;  %v30401_v31 = vld [vmem:[%s30830_s14 + $0x3940] sm:$0xff]  }
 0x739   : > { %28095 = vmatprep.subr.bf16.mxu0 %v30363_v34  ;;  %28116 = vmatpush3.bf16.msra.mxu1 %v30362_v33  ;;  %v30398_v27 = vld [vmem:[%s30830_s14 + $0x3838] sm:$0xff]   ;;  %v30436_v28 = vld [vmem:[%s30830_s14 + $0x3a00] sm:$0xff]  }
 0x73a   : > { %28117 = vmatprep.subr.bf16.mxu1 %v30364_v35  ;;  %v1358_v33 = vcombine.high %v1350_v29, %v1350_v29  ;;  %v1357_v34 = vrot.slane %v1343_v30, %v30878_v43  ;;  %v30402_v35 = vld [vmem:[%s30830_s14 + $0x39c0] sm:$0xff]  }
 0x73c   : > { %28096 = vmatpush3.bf16.msra.mxu0 %v30365_v36  ;;  %v1959_v36 = vpack.c.bf16 %v1350_v29, %v1350_v29  ;;  %v1359_v39 = vcombine.high %v1357_v34, %v1357_v34 }
 0x73d   : > { %28125 = vmatprep.subr.bf16.mxu0 %v30368_v41  ;;  %28118 = vmatpush3.bf16.msra.mxu1 %v30366_v38  ;;  %v1960_v38 = vpack.c.bf16 %v1358_v33, %v1358_v33  ;;  %v1961_v41 = vpack.c.bf16 %v1357_v34, %v1357_v34  ;;  %v30438_v33 = vld [vmem:[%s30830_s14 + $0x3a48] sm:$0xff]  }
 0x73e   : > { %28147 = vmatprep.subr.bf16.mxu1 %v30369_v45  ;;  %v1962_v44 = vpack.c.bf16 %v1359_v39, %v1359_v39  ;;  %v30406_v45 = vld [vmem:[%s30830_s14 + $0x39c8] sm:$0xff]   ;;  %v30443_v39 = vld [vmem:[%s30830_s14 + $0x3ad0] sm:$0xff]  }
 0x73f   : > { %22808 = vmatmul.mubr.bf16.vlgmr.msra.gmra.mrb[220].mxu0 %v1955_v46  ;;  %v30407_v46 = vld [vmem:[%s30830_s14 + $0x3908] sm:$0xff]  }
 0x740   : > { %28126 = vmatpush3.bf16.msra.mxu0 %v30370_v47  ;;  %22848 = vmatmul.mubr.bf16.vlgmr.msra.gmra.mrb[220].mxu1 %v1957_v51  ;;  %v30408_v47 = vld [vmem:[%s30830_s14 + $0x3988] sm:$0xff]   ;;  %v30412_v51 = vld [vmem:[%s30830_s14 + $0x3990] sm:$0xff]  }
 0x741   : > { %28127 = vmatprep.subr.bf16.mxu0 %v30372_v52  ;;  %28148 = vmatpush3.bf16.msra.mxu1 %v30371_v50  ;;  %v30411_v50 = vld [vmem:[%s30830_s14 + $0x3910] sm:$0xff]   ;;  %v30413_v52 = vld [vmem:[%s30830_s14 + $0x3958] sm:$0xff]  }
 0x742   : > { %28149 = vmatprep.subr.bf16.mxu1 %v30373_v54  ;;  %22887 = vmatprep.mubr.bf16.mxu0 %v1960_v38  ;;  %v30415_v54 = vld [vmem:[%s30830_s14 + $0x3918] sm:$0xff]   ;;  %v30442_v38 = vld [vmem:[%s30830_s14 + $0x3a50] sm:$0xff]  }
 0x743   : > { %22927 = vmatprep.mubr.bf16.mxu1 %v1962_v44  ;;  %v30447_v44 = vld [vmem:[%s30830_s14 + $0x3ad8] sm:$0xff]  }
 0x744   : > { %28128 = vmatpush3.bf16.msra.mxu0 %v30374_v55  ;;  %v30416_v55 = vld [vmem:[%s30830_s14 + $0x3998] sm:$0xff]  }
 0x745   : > { %28129 = vmatprep.subr.bf16.mxu0 %v30376_v57  ;;  %28150 = vmatpush3.bf16.msra.mxu1 %v30375_v56  ;;  %v30417_v56 = vld [vmem:[%s30830_s14 + $0x3960] sm:$0xff]  }
 0x746   : > { %28151 = vmatprep.subr.bf16.mxu1 %v30377_v58  ;;  %v30418_v57 = vld [vmem:[%s30830_s14 + $0x39e0] sm:$0xff]  }
 0x747   : > { %v30419_v58 = vld [vmem:[%s30830_s14 + $0x3920] sm:$0xff]  }
 0x748   : > { %28130 = vmatpush3.bf16.msra.mxu0 %v30378_v59  ;;  %v30420_v59 = vld [vmem:[%s30830_s14 + $0x39a0] sm:$0xff]  }
 0x749   : > { %28131 = vmatprep.subr.bf16.mxu0 %v30380_v61  ;;  %28152 = vmatpush3.bf16.msra.mxu1 %v30379_v60  ;;  %v30421_v60 = vld [vmem:[%s30830_s14 + $0x3968] sm:$0xff]  }
 0x74a   : > { %28153 = vmatprep.subr.bf16.mxu1 %v30381_v62  ;;  %v30422_v62 = vld [vmem:[%s30830_s14 + $0x39e8] sm:$0xff]  }
 0x74c   : > { %28132 = vmatpush3.bf16.msra.mxu0 %v30382_v63 }
 0x74d   : > { %28133 = vmatprep.subr.bf16.mxu0 %v30384_v1  ;;  %28154 = vmatpush3.bf16.msra.mxu1 %v30383_v0  ;;  %v30423_v0 = vld [vmem:[%s30830_s14 + $0x3928] sm:$0xff]  }
 0x74e   : > { %28155 = vmatprep.subr.bf16.mxu1 %v30385_v2 }
 0x750   : > { %28134 = vmatpush3.bf16.msra.mxu0 %v30386_v3 }
 0x751   : > { %28135 = vmatprep.subr.bf16.mxu0 %v30388_v5  ;;  %28156 = vmatpush3.bf16.msra.mxu1 %v30387_v4  ;;  %v30424_v4 = vld [vmem:[%s30830_s14 + $0x39a8] sm:$0xff]   ;;  %v30425_v5 = vld [vmem:[%s30830_s14 + $0x3970] sm:$0xff]  }
 0x752   : > { %v27833_v6 = vpop.f32.mrb[196].mxu0  ;;  %28157 = vmatprep.subr.bf16.mxu1 %v30389_v7 }
 0x753   : > { %v27834_v8 = vpop.f32.mrb[197].mxu0  ;;  %v27855_v10 = vpop.f32.mrb[196].mxu1 }
 0x754   : > { %v27835_v11 = vadd.f32 %v27834_v8, %v27833_v6  ;;  %v27836_v12 = vpop.f32.mrb[198].mxu0  ;;  %v27856_v13 = vpop.f32.mrb[197].mxu1  ;;  %28136 = vmatpush3.bf16.msra.mxu0 %v30390_v9 }
 0x755   : > { %v27837_v15 = vpop.f32.mrb[199].mxu0  ;;  %v27857_v18 = vadd.f32 %v27856_v13, %v27855_v10  ;;  %v27858_v19 = vpop.f32.mrb[198].mxu1  ;;  %28137 = vmatprep.subr.bf16.mxu0 %v30392_v16  ;;  %28158 = vmatpush3.bf16.msra.mxu1 %v30391_v14  ;;  %v30427_v13 = vld [vmem:[%s30830_s14 + $0x3930] sm:$0xff]   ;;  %v30429_v16 = vld [vmem:[%s30830_s14 + $0x3978] sm:$0xff]  }
 0x756   : > { %v22330_v17 = vadd.f32 %v27835_v11, %v32941_v32  ;;  %v27859_v21 = vpop.f32.mrb[199].mxu1  ;;  %28159 = vmatprep.subr.bf16.mxu1 %v30393_v20  ;;  %v30399_v32 = vld [vmem:[%s30830_s14 + $0x38b8] sm:$0xff]   ;;  %v30426_v11 = vld [vmem:[%s30830_s14 + $0x39f0] sm:$0xff]   ;;  %v320_v19 = vld [vmem:[%s30840_s12 + $0x1c8] sm:$0xff] }
 0x757   : > { %v30428_v15 = vld [vmem:[%s30830_s14 + $0x39b0] sm:$0xff]   ;;  %v1367_v20 = vrot.slane %v320_v19, %v30878_v43  ;;  %v1360_v21 = vcombine.high %v320_v19, %v320_v19  ;;  %v30469_v19 = vld [vmem:[%s30830_s14 + $0x3b00] sm:$0xff]  }
 0x758   : > { %v32979_v23 = vadd.f32 %v27857_v18, %v22330_v17  ;;  %28138 = vmatpush3.bf16.msra.mxu0 %v30394_v22  ;;  %v30430_v17 = vld [vmem:[%s30830_s14 + $0x39f8] sm:$0xff]   ;;  %v30434_v22 = vld [vmem:[%s30830_s14 + $0x3a40] sm:$0xff]  }
 0x759   : > { %28139 = vmatprep.subr.bf16.mxu0 %v30396_v24  ;;  %28160 = vmatpush3.bf16.msra.mxu1 %v30395_v25  ;;  %v30431_v18 = vld [vmem:[%s30830_s14 + $0x3938] sm:$0xff]   ;;  %v1375_v24 = vcombine.high %v1367_v20, %v1367_v20  ;;  %v1374_v25 = vrot.slane %v1360_v21, %v30878_v43 }
 0x75a   : > { %28161 = vmatprep.subr.bf16.mxu1 %v30397_v26  ;;  %v30435_v26 = vld [vmem:[%s30830_s14 + $0x3ac0] sm:$0xff]  }
 0x75b   : > { %v1964_v29 = vpack.c.bf16 %v1375_v24, %v1375_v24  ;;  %v1376_v30 = vcombine.high %v1374_v25, %v1374_v25  ;;  %v30471_v24 = vld [vmem:[%s30830_s14 + $0x3b48] sm:$0xff]  }
 0x75c   : > { %28140 = vmatpush3.bf16.msra.mxu0 %v30398_v27  ;;  %v1963_v27 = vpack.c.bf16 %v1367_v20, %v1367_v20 }
 0x75d   : > { %28169 = vmatprep.subr.bf16.mxu0 %v30401_v31  ;;  %28162 = vmatpush3.bf16.msra.mxu1 %v30399_v32  ;;  %v30437_v31 = vld [vmem:[%s30830_s14 + $0x3a80] sm:$0xff]   ;;  %v1965_v32 = vpack.c.bf16 %v1374_v25, %v1374_v25  ;;  %v1966_v34 = vpack.c.bf16 %v1376_v30, %v1376_v30  ;;  %v30476_v30 = vld [vmem:[%s30830_s14 + $0x3bd0] sm:$0xff]  }
 0x75e   : > { %28191 = vmatprep.subr.bf16.mxu1 %v30402_v35  ;;  %v30439_v35 = vld [vmem:[%s30830_s14 + $0x3ac8] sm:$0xff]  }
 0x75f   : > { %22888 = vmatmul.mubr.bf16.vlgmr.msra.gmra.mrb[224].mxu0 %v1959_v36  ;;  %v30440_v36 = vld [vmem:[%s30830_s14 + $0x3a08] sm:$0xff]  }
 0x760   : > { %28170 = vmatpush3.bf16.msra.mxu0 %v30403_v37  ;;  %22928 = vmatmul.mubr.bf16.vlgmr.msra.gmra.mrb[224].mxu1 %v1961_v41  ;;  %v30441_v37 = vld [vmem:[%s30830_s14 + $0x3a88] sm:$0xff]   ;;  %v30445_v41 = vld [vmem:[%s30830_s14 + $0x3a90] sm:$0xff]  }
 0x761   : > { %28171 = vmatprep.subr.bf16.mxu0 %v30405_v42  ;;  %28192 = vmatpush3.bf16.msra.mxu1 %v30404_v40  ;;  %v30444_v40 = vld [vmem:[%s30830_s14 + $0x3a10] sm:$0xff]   ;;  %v30446_v42 = vld [vmem:[%s30830_s14 + $0x3a58] sm:$0xff]  }
 0x762   : > { %28193 = vmatprep.subr.bf16.mxu1 %v30406_v45  ;;  %22967 = vmatprep.mubr.bf16.mxu0 %v1964_v29  ;;  %v30448_v45 = vld [vmem:[%s30830_s14 + $0x3a18] sm:$0xff]   ;;  %v30475_v29 = vld [vmem:[%s30830_s14 + $0x3b50] sm:$0xff]  }
 0x763   : > { %23007 = vmatprep.mubr.bf16.mxu1 %v1966_v34  ;;  %v30480_v34 = vld [vmem:[%s30830_s14 + $0x3bd8] sm:$0xff]  }
 0x764   : > { %28172 = vmatpush3.bf16.msra.mxu0 %v30407_v46  ;;  %v30449_v46 = vld [vmem:[%s30830_s14 + $0x3a98] sm:$0xff]  }
 0x765   : > { %28173 = vmatprep.subr.bf16.mxu0 %v30409_v48  ;;  %28194 = vmatpush3.bf16.msra.mxu1 %v30408_v47  ;;  %v30450_v47 = vld [vmem:[%s30830_s14 + $0x3a60] sm:$0xff]  }
 0x766   : > { %28195 = vmatprep.subr.bf16.mxu1 %v30410_v49  ;;  %v30451_v48 = vld [vmem:[%s30830_s14 + $0x3ae0] sm:$0xff]  }
 0x767   : > { %v30452_v49 = vld [vmem:[%s30830_s14 + $0x3a20] sm:$0xff]  }
 0x768   : > { %28174 = vmatpush3.bf16.msra.mxu0 %v30411_v50  ;;  %v30453_v50 = vld [vmem:[%s30830_s14 + $0x3aa0] sm:$0xff]  }
 0x769   : > { %28175 = vmatprep.subr.bf16.mxu0 %v30413_v52  ;;  %28196 = vmatpush3.bf16.msra.mxu1 %v30412_v51  ;;  %v30454_v51 = vld [vmem:[%s30830_s14 + $0x3a68] sm:$0xff]  }
 0x76a   : > { %28197 = vmatprep.subr.bf16.mxu1 %v30414_v53  ;;  %v30455_v53 = vld [vmem:[%s30830_s14 + $0x3ae8] sm:$0xff]  }
 0x76c   : > { %28176 = vmatpush3.bf16.msra.mxu0 %v30415_v54 }
 0x76d   : > { %28177 = vmatprep.subr.bf16.mxu0 %v30417_v56  ;;  %28198 = vmatpush3.bf16.msra.mxu1 %v30416_v55  ;;  %v30456_v55 = vld [vmem:[%s30830_s14 + $0x3a28] sm:$0xff]  }
 0x76e   : > { %28199 = vmatprep.subr.bf16.mxu1 %v30418_v57 }
 0x770   : > { %28178 = vmatpush3.bf16.msra.mxu0 %v30419_v58 }
 0x771   : > { %28179 = vmatprep.subr.bf16.mxu0 %v30421_v60  ;;  %28200 = vmatpush3.bf16.msra.mxu1 %v30420_v59  ;;  %v30457_v59 = vld [vmem:[%s30830_s14 + $0x3aa8] sm:$0xff]   ;;  %v30458_v60 = vld [vmem:[%s30830_s14 + $0x3a70] sm:$0xff]  }
 0x772   : > { %v27877_v61 = vpop.f32.mrb[200].mxu0  ;;  %28201 = vmatprep.subr.bf16.mxu1 %v30422_v62 }
 0x773   : > { %v27878_v63 = vpop.f32.mrb[201].mxu0  ;;  %v27899_v1 = vpop.f32.mrb[200].mxu1 }
 0x774   : > { %v27879_v2 = vadd.f32 %v27878_v63, %v27877_v61  ;;  %v27880_v3 = vpop.f32.mrb[202].mxu0  ;;  %v27900_v6 = vpop.f32.mrb[201].mxu1  ;;  %28180 = vmatpush3.bf16.msra.mxu0 %v30423_v0 }
 0x775   : > { %v27881_v7 = vpop.f32.mrb[203].mxu0  ;;  %v27901_v9 = vadd.f32 %v27900_v6, %v27899_v1  ;;  %v27902_v10 = vpop.f32.mrb[202].mxu1  ;;  %28181 = vmatprep.subr.bf16.mxu0 %v30425_v5  ;;  %28202 = vmatpush3.bf16.msra.mxu1 %v30424_v4  ;;  %v30460_v4 = vld [vmem:[%s30830_s14 + $0x3a30] sm:$0xff]  }
 0x776   : > { %v22410_v8 = vadd.f32 %v27879_v2, %v32979_v23  ;;  %v27903_v12 = vpop.f32.mrb[203].mxu1  ;;  %28203 = vmatprep.subr.bf16.mxu1 %v30426_v11  ;;  %v30432_v23 = vld [vmem:[%s30830_s14 + $0x39b8] sm:$0xff]   ;;  %v30459_v2 = vld [vmem:[%s30830_s14 + $0x3af0] sm:$0xff]  }
 0x777   : > { %v30461_v6 = vld [vmem:[%s30830_s14 + $0x3ab0] sm:$0xff]   ;;  %v30462_v7 = vld [vmem:[%s30830_s14 + $0x3a78] sm:$0xff]  }
 0x778   : > { %v33017_v14 = vadd.f32 %v27901_v9, %v22410_v8  ;;  %28182 = vmatpush3.bf16.msra.mxu0 %v30427_v13  ;;  %v30463_v8 = vld [vmem:[%s30830_s14 + $0x3af8] sm:$0xff]   ;;  %v321_v10 = vld [vmem:[%s30840_s12 + $0x1d0] sm:$0xff] }
 0x779   : > { %28183 = vmatprep.subr.bf16.mxu0 %v30429_v16  ;;  %28204 = vmatpush3.bf16.msra.mxu1 %v30428_v15  ;;  %v30464_v9 = vld [vmem:[%s30830_s14 + $0x3a38] sm:$0xff]   ;;  %v1384_v12 = vrot.slane %v321_v10, %v30878_v43  ;;  %v1377_v13 = vcombine.high %v321_v10, %v321_v10  ;;  %v30502_v10 = vld [vmem:[%s30830_s14 + $0x3c00] sm:$0xff]  }
 0x77a   : > { %28205 = vmatprep.subr.bf16.mxu1 %v30430_v17  ;;  %v30465_v11 = vld [vmem:[%s30830_s14 + $0x3ab8] sm:$0xff]   ;;  %v30468_v17 = vld [vmem:[%s30830_s14 + $0x3bc0] sm:$0xff]  }
 0x77b   : > { %v1392_v15 = vcombine.high %v1384_v12, %v1384_v12  ;;  %v1391_v16 = vrot.slane %v1377_v13, %v30878_v43  ;;  %v30503_v13 = vld [vmem:[%s30830_s14 + $0x3c80] sm:$0xff]  }
 0x77c   : > { %28184 = vmatpush3.bf16.msra.mxu0 %v30431_v18  ;;  %v1967_v18 = vpack.c.bf16 %v1384_v12, %v1384_v12 }
 0x77d   : > { %28213 = vmatprep.subr.bf16.mxu0 %v30434_v22  ;;  %28206 = vmatpush3.bf16.msra.mxu1 %v30432_v23  ;;  %v1968_v20 = vpack.c.bf16 %v1392_v15, %v1392_v15  ;;  %v1393_v21 = vcombine.high %v1391_v16, %v1391_v16  ;;  %v30470_v22 = vld [vmem:[%s30830_s14 + $0x3b80] sm:$0xff]   ;;  %v1969_v23 = vpack.c.bf16 %v1391_v16, %v1391_v16  ;;  %v30504_v15 = vld [vmem:[%s30830_s14 + $0x3c48] sm:$0xff]  }
 0x77e   : > { %28235 = vmatprep.subr.bf16.mxu1 %v30435_v26  ;;  %v30472_v26 = vld [vmem:[%s30830_s14 + $0x3bc8] sm:$0xff]  }
 0x77f   : > { %22968 = vmatmul.mubr.bf16.vlgmr.msra.gmra.mrb[228].mxu0 %v1963_v27  ;;  %v1970_v25 = vpack.c.bf16 %v1393_v21, %v1393_v21  ;;  %v30473_v27 = vld [vmem:[%s30830_s14 + $0x3b08] sm:$0xff]   ;;  %v30509_v21 = vld [vmem:[%s30830_s14 + $0x3cd0] sm:$0xff]  }
 0x780   : > { %28214 = vmatpush3.bf16.msra.mxu0 %v30436_v28  ;;  %23008 = vmatmul.mubr.bf16.vlgmr.msra.gmra.mrb[228].mxu1 %v1965_v32  ;;  %v30474_v28 = vld [vmem:[%s30830_s14 + $0x3b88] sm:$0xff]   ;;  %v30478_v32 = vld [vmem:[%s30830_s14 + $0x3b90] sm:$0xff]  }
 0x781   : > { %28215 = vmatprep.subr.bf16.mxu0 %v30438_v33  ;;  %28236 = vmatpush3.bf16.msra.mxu1 %v30437_v31  ;;  %v30477_v31 = vld [vmem:[%s30830_s14 + $0x3b10] sm:$0xff]   ;;  %v30479_v33 = vld [vmem:[%s30830_s14 + $0x3b58] sm:$0xff]  }
 0x782   : > { %28237 = vmatprep.subr.bf16.mxu1 %v30439_v35  ;;  %23047 = vmatprep.mubr.bf16.mxu0 %v1968_v20  ;;  %v30481_v35 = vld [vmem:[%s30830_s14 + $0x3b18] sm:$0xff]   ;;  %v30508_v20 = vld [vmem:[%s30830_s14 + $0x3c50] sm:$0xff]  }
 0x783   : > { %23087 = vmatprep.mubr.bf16.mxu1 %v1970_v25  ;;  %v30513_v25 = vld [vmem:[%s30830_s14 + $0x3cd8] sm:$0xff]  }
 0x784   : > { %28216 = vmatpush3.bf16.msra.mxu0 %v30440_v36  ;;  %v30482_v36 = vld [vmem:[%s30830_s14 + $0x3b98] sm:$0xff]  }
 0x785   : > { %28217 = vmatprep.subr.bf16.mxu0 %v30442_v38  ;;  %28238 = vmatpush3.bf16.msra.mxu1 %v30441_v37  ;;  %v30483_v37 = vld [vmem:[%s30830_s14 + $0x3b60] sm:$0xff]  }
 0x786   : > { %28239 = vmatprep.subr.bf16.mxu1 %v30443_v39  ;;  %v30484_v38 = vld [vmem:[%s30830_s14 + $0x3be0] sm:$0xff]  }
 0x787   : > { %v30485_v39 = vld [vmem:[%s30830_s14 + $0x3b20] sm:$0xff]  }
 0x788   : > { %28218 = vmatpush3.bf16.msra.mxu0 %v30444_v40  ;;  %v30486_v40 = vld [vmem:[%s30830_s14 + $0x3ba0] sm:$0xff]  }
 0x789   : > { %28219 = vmatprep.subr.bf16.mxu0 %v30446_v42  ;;  %28240 = vmatpush3.bf16.msra.mxu1 %v30445_v41  ;;  %v30487_v41 = vld [vmem:[%s30830_s14 + $0x3b68] sm:$0xff]  }
 0x78a   : > { %28241 = vmatprep.subr.bf16.mxu1 %v30447_v44  ;;  %v30488_v44 = vld [vmem:[%s30830_s14 + $0x3be8] sm:$0xff]  }
 0x78c   : > { %28220 = vmatpush3.bf16.msra.mxu0 %v30448_v45 }
 0x78d   : > { %28221 = vmatprep.subr.bf16.mxu0 %v30450_v47  ;;  %28242 = vmatpush3.bf16.msra.mxu1 %v30449_v46  ;;  %v30489_v46 = vld [vmem:[%s30830_s14 + $0x3b28] sm:$0xff]  }
 0x78e   : > { %28243 = vmatprep.subr.bf16.mxu1 %v30451_v48 }
 0x790   : > { %28222 = vmatpush3.bf16.msra.mxu0 %v30452_v49 }
 0x791   : > { %28223 = vmatprep.subr.bf16.mxu0 %v30454_v51  ;;  %28244 = vmatpush3.bf16.msra.mxu1 %v30453_v50  ;;  %v30490_v51 = vld [vmem:[%s30830_s14 + $0x3ba8] sm:$0xff]  }
 0x792   : > { %v27921_v52 = vpop.f32.mrb[204].mxu0  ;;  %28245 = vmatprep.subr.bf16.mxu1 %v30455_v53  ;;  %v30491_v53 = vld [vmem:[%s30830_s14 + $0x3b70] sm:$0xff]  }
 0x793   : > { %v27922_v54 = vpop.f32.mrb[205].mxu0  ;;  %v27943_v56 = vpop.f32.mrb[204].mxu1 }
 0x794   : > { %v27923_v57 = vadd.f32 %v27922_v54, %v27921_v52  ;;  %v27924_v58 = vpop.f32.mrb[206].mxu0  ;;  %v27944_v61 = vpop.f32.mrb[205].mxu1  ;;  %28224 = vmatpush3.bf16.msra.mxu0 %v30456_v55 }
 0x795   : > { %v27925_v62 = vpop.f32.mrb[207].mxu0  ;;  %v27945_v0 = vadd.f32 %v27944_v61, %v27943_v56  ;;  %v27946_v1 = vpop.f32.mrb[206].mxu1  ;;  %28225 = vmatprep.subr.bf16.mxu0 %v30458_v60  ;;  %28246 = vmatpush3.bf16.msra.mxu1 %v30457_v59  ;;  %v30493_v59 = vld [vmem:[%s30830_s14 + $0x3b30] sm:$0xff]   ;;  %v30495_v61 = vld [vmem:[%s30830_s14 + $0x3b78] sm:$0xff]  }
 0x796   : > { %v22490_v63 = vadd.f32 %v27923_v57, %v33017_v14  ;;  %v27947_v3 = vpop.f32.mrb[207].mxu1  ;;  %28247 = vmatprep.subr.bf16.mxu1 %v30459_v2  ;;  %v30467_v14 = vld [vmem:[%s30830_s14 + $0x3b40] sm:$0xff]   ;;  %v30492_v57 = vld [vmem:[%s30830_s14 + $0x3bf0] sm:$0xff]  }
 0x797   : > { %v30494_v62 = vld [vmem:[%s30830_s14 + $0x3bb0] sm:$0xff]  }
 0x798   : > { %v33055_v5 = vadd.f32 %v27945_v0, %v22490_v63  ;;  %28226 = vmatpush3.bf16.msra.mxu0 %v30460_v4  ;;  %v30496_v63 = vld [vmem:[%s30830_s14 + $0x3bf8] sm:$0xff]   ;;  %v30500_v4 = vld [vmem:[%s30830_s14 + $0x3c40] sm:$0xff]  }
 0x799   : > { %28227 = vmatprep.subr.bf16.mxu0 %v30462_v7  ;;  %28248 = vmatpush3.bf16.msra.mxu1 %v30461_v6  ;;  %v30497_v0 = vld [vmem:[%s30830_s14 + $0x3b38] sm:$0xff]  }
 0x79a   : > { %28249 = vmatprep.subr.bf16.mxu1 %v30463_v8  ;;  %v322_v1 = vld [vmem:[%s30840_s12 + $0x1d8] sm:$0xff]  ;;  %v30501_v8 = vld [vmem:[%s30830_s14 + $0x3cc0] sm:$0xff]  }
 0x79b   : > { %v1401_v2 = vrot.slane %v322_v1, %v30878_v43  ;;  %v1394_v3 = vcombine.high %v322_v1, %v322_v1  ;;  %v30535_v1 = vld [vmem:[%s30830_s14 + $0x3d00] sm:$0xff]  }
 0x79c   : > { %28228 = vmatpush3.bf16.msra.mxu0 %v30464_v9 }
 0x79d   : > { %28257 = vmatprep.subr.bf16.mxu0 %v30467_v14  ;;  %28250 = vmatpush3.bf16.msra.mxu1 %v30465_v11  ;;  %v1409_v6 = vcombine.high %v1401_v2, %v1401_v2  ;;  %v1408_v7 = vrot.slane %v1394_v3, %v30878_v43  ;;  %v1971_v9 = vpack.c.bf16 %v1401_v2, %v1401_v2 }
 0x79e   : > { %28279 = vmatprep.subr.bf16.mxu1 %v30468_v17  ;;  %v30505_v17 = vld [vmem:[%s30830_s14 + $0x3cc8] sm:$0xff]  }
 0x79f   : > { %23048 = vmatmul.mubr.bf16.vlgmr.msra.gmra.mrb[232].mxu0 %v1967_v18  ;;  %v1972_v11 = vpack.c.bf16 %v1409_v6, %v1409_v6  ;;  %v1410_v12 = vcombine.high %v1408_v7, %v1408_v7  ;;  %v1973_v14 = vpack.c.bf16 %v1408_v7, %v1408_v7  ;;  %v30506_v18 = vld [vmem:[%s30830_s14 + $0x3c08] sm:$0xff]  }
 0x7a0   : > { %28258 = vmatpush3.bf16.msra.mxu0 %v30469_v19  ;;  %23088 = vmatmul.mubr.bf16.vlgmr.msra.gmra.mrb[232].mxu1 %v1969_v23  ;;  %v30507_v19 = vld [vmem:[%s30830_s14 + $0x3c88] sm:$0xff]   ;;  %v30511_v23 = vld [vmem:[%s30830_s14 + $0x3c90] sm:$0xff]  }
 0x7a1   : > { %28259 = vmatprep.subr.bf16.mxu0 %v30471_v24  ;;  %28280 = vmatpush3.bf16.msra.mxu1 %v30470_v22  ;;  %v1974_v16 = vpack.c.bf16 %v1410_v12, %v1410_v12  ;;  %v30510_v22 = vld [vmem:[%s30830_s14 + $0x3c10] sm:$0xff]   ;;  %v30512_v24 = vld [vmem:[%s30830_s14 + $0x3c58] sm:$0xff]   ;;  %v30537_v6 = vld [vmem:[%s30830_s14 + $0x3d48] sm:$0xff]  }
 0x7a2   : > { %28281 = vmatprep.subr.bf16.mxu1 %v30472_v26  ;;  %23127 = vmatprep.mubr.bf16.mxu0 %v1972_v11  ;;  %v30514_v26 = vld [vmem:[%s30830_s14 + $0x3c18] sm:$0xff]   ;;  %v30541_v11 = vld [vmem:[%s30830_s14 + $0x3d50] sm:$0xff]  }
 0x7a3   : > { %23167 = vmatprep.mubr.bf16.mxu1 %v1974_v16  ;;  %v30542_v12 = vld [vmem:[%s30830_s14 + $0x3dd0] sm:$0xff]   ;;  %v30546_v16 = vld [vmem:[%s30830_s14 + $0x3dd8] sm:$0xff]  }
 0x7a4   : > { %28260 = vmatpush3.bf16.msra.mxu0 %v30473_v27  ;;  %v30515_v27 = vld [vmem:[%s30830_s14 + $0x3c98] sm:$0xff]  }
 0x7a5   : > { %28261 = vmatprep.subr.bf16.mxu0 %v30475_v29  ;;  %28282 = vmatpush3.bf16.msra.mxu1 %v30474_v28  ;;  %v30516_v28 = vld [vmem:[%s30830_s14 + $0x3c60] sm:$0xff]  }
 0x7a6   : > { %28283 = vmatprep.subr.bf16.mxu1 %v30476_v30  ;;  %v30517_v29 = vld [vmem:[%s30830_s14 + $0x3ce0] sm:$0xff]  }
 0x7a7   : > { %v30518_v30 = vld [vmem:[%s30830_s14 + $0x3c20] sm:$0xff]  }
 0x7a8   : > { %28262 = vmatpush3.bf16.msra.mxu0 %v30477_v31  ;;  %v30519_v31 = vld [vmem:[%s30830_s14 + $0x3ca0] sm:$0xff]  }
 0x7a9   : > { %28263 = vmatprep.subr.bf16.mxu0 %v30479_v33  ;;  %28284 = vmatpush3.bf16.msra.mxu1 %v30478_v32  ;;  %v30520_v32 = vld [vmem:[%s30830_s14 + $0x3c68] sm:$0xff]  }
 0x7aa   : > { %28285 = vmatprep.subr.bf16.mxu1 %v30480_v34  ;;  %v30521_v34 = vld [vmem:[%s30830_s14 + $0x3ce8] sm:$0xff]  }
 0x7ac   : > { %28264 = vmatpush3.bf16.msra.mxu0 %v30481_v35 }
 0x7ad   : > { %28265 = vmatprep.subr.bf16.mxu0 %v30483_v37  ;;  %28286 = vmatpush3.bf16.msra.mxu1 %v30482_v36  ;;  %v30522_v36 = vld [vmem:[%s30830_s14 + $0x3c28] sm:$0xff]  }
 0x7ae   : > { %28287 = vmatprep.subr.bf16.mxu1 %v30484_v38 }
 0x7b0   : > { %28266 = vmatpush3.bf16.msra.mxu0 %v30485_v39 }
 0x7b1   : > { %28267 = vmatprep.subr.bf16.mxu0 %v30487_v41  ;;  %28288 = vmatpush3.bf16.msra.mxu1 %v30486_v40  ;;  %v30523_v40 = vld [vmem:[%s30830_s14 + $0x3ca8] sm:$0xff]   ;;  %v30524_v41 = vld [vmem:[%s30830_s14 + $0x3c70] sm:$0xff]  }
 0x7b2   : > { %v27965_v42 = vpop.f32.mrb[208].mxu0  ;;  %28289 = vmatprep.subr.bf16.mxu1 %v30488_v44 }
 0x7b3   : > { %v27966_v45 = vpop.f32.mrb[209].mxu0  ;;  %v27987_v47 = vpop.f32.mrb[208].mxu1 }
 0x7b4   : > { %v27967_v48 = vadd.f32 %v27966_v45, %v27965_v42  ;;  %v27968_v49 = vpop.f32.mrb[210].mxu0  ;;  %v27988_v50 = vpop.f32.mrb[209].mxu1  ;;  %28268 = vmatpush3.bf16.msra.mxu0 %v30489_v46 }
 0x7b5   : > { %v27969_v52 = vpop.f32.mrb[211].mxu0  ;;  %v27989_v55 = vadd.f32 %v27988_v50, %v27987_v47  ;;  %v27990_v56 = vpop.f32.mrb[210].mxu1  ;;  %28269 = vmatprep.subr.bf16.mxu0 %v30491_v53  ;;  %28290 = vmatpush3.bf16.msra.mxu1 %v30490_v51  ;;  %v30526_v50 = vld [vmem:[%s30830_s14 + $0x3c30] sm:$0xff]   ;;  %v30528_v53 = vld [vmem:[%s30830_s14 + $0x3c78] sm:$0xff]  }
 0x7b6   : > { %v22570_v54 = vadd.f32 %v27967_v48, %v33055_v5  ;;  %v27991_v58 = vpop.f32.mrb[211].mxu1  ;;  %28291 = vmatprep.subr.bf16.mxu1 %v30492_v57  ;;  %v30498_v5 = vld [vmem:[%s30830_s14 + $0x3bb8] sm:$0xff]   ;;  %v30525_v48 = vld [vmem:[%s30830_s14 + $0x3cf0] sm:$0xff]  }
 0x7b7   : > { %v30527_v52 = vld [vmem:[%s30830_s14 + $0x3cb0] sm:$0xff]   ;;  %v323_v56 = vld [vmem:[%s30840_s12 + $0x1e0] sm:$0xff] }
 0x7b8   : > { %v33093_v60 = vadd.f32 %v27989_v55, %v22570_v54  ;;  %28270 = vmatpush3.bf16.msra.mxu0 %v30493_v59  ;;  %v30529_v54 = vld [vmem:[%s30830_s14 + $0x3cf8] sm:$0xff]   ;;  %v1418_v57 = vrot.slane %v323_v56, %v30878_v43  ;;  %v1411_v58 = vcombine.high %v323_v56, %v323_v56  ;;  %v30533_v59 = vld [vmem:[%s30830_s14 + $0x3d40] sm:$0xff]  }
 0x7b9   : > { %28271 = vmatprep.subr.bf16.mxu0 %v30495_v61  ;;  %28292 = vmatpush3.bf16.msra.mxu1 %v30494_v62  ;;  %v30530_v55 = vld [vmem:[%s30830_s14 + $0x3c38] sm:$0xff]   ;;  %v30568_v56 = vld [vmem:[%s30830_s14 + $0x3e00] sm:$0xff]  }
 0x7ba   : > { %28293 = vmatprep.subr.bf16.mxu1 %v30496_v63  ;;  %v1426_v61 = vcombine.high %v1418_v57, %v1418_v57  ;;  %v1425_v62 = vrot.slane %v1411_v58, %v30878_v43  ;;  %v30534_v63 = vld [vmem:[%s30830_s14 + $0x3dc0] sm:$0xff]  }
 0x7bc   : > { %28272 = vmatpush3.bf16.msra.mxu0 %v30497_v0  ;;  %v1975_v0 = vpack.c.bf16 %v1418_v57, %v1418_v57  ;;  %v1976_v2 = vpack.c.bf16 %v1426_v61, %v1426_v61  ;;  %v1427_v3 = vcombine.high %v1425_v62, %v1425_v62  ;;  %v30570_v61 = vld [vmem:[%s30830_s14 + $0x3e48] sm:$0xff]  }
 0x7bd   : > { %28301 = vmatprep.subr.bf16.mxu0 %v30500_v4  ;;  %28294 = vmatpush3.bf16.msra.mxu1 %v30498_v5  ;;  %v30536_v4 = vld [vmem:[%s30830_s14 + $0x3d80] sm:$0xff]   ;;  %v1977_v5 = vpack.c.bf16 %v1425_v62, %v1425_v62 }
 0x7be   : > { %28323 = vmatprep.subr.bf16.mxu1 %v30501_v8  ;;  %v1978_v7 = vpack.c.bf16 %v1427_v3, %v1427_v3  ;;  %v30538_v8 = vld [vmem:[%s30830_s14 + $0x3dc8] sm:$0xff]   ;;  %v30575_v3 = vld [vmem:[%s30830_s14 + $0x3ed0] sm:$0xff]  }
 0x7bf   : > { %23128 = vmatmul.mubr.bf16.vlgmr.msra.gmra.mrb[236].mxu0 %v1971_v9  ;;  %v30539_v9 = vld [vmem:[%s30830_s14 + $0x3d08] sm:$0xff]  }
 0x7c0   : > { %28302 = vmatpush3.bf16.msra.mxu0 %v30502_v10  ;;  %23168 = vmatmul.mubr.bf16.vlgmr.msra.gmra.mrb[236].mxu1 %v1973_v14  ;;  %v30540_v10 = vld [vmem:[%s30830_s14 + $0x3d88] sm:$0xff]   ;;  %v30544_v14 = vld [vmem:[%s30830_s14 + $0x3d90] sm:$0xff]  }
 0x7c1   : > { %28303 = vmatprep.subr.bf16.mxu0 %v30504_v15  ;;  %28324 = vmatpush3.bf16.msra.mxu1 %v30503_v13  ;;  %v30543_v13 = vld [vmem:[%s30830_s14 + $0x3d10] sm:$0xff]   ;;  %v30545_v15 = vld [vmem:[%s30830_s14 + $0x3d58] sm:$0xff]  }
 0x7c2   : > { %28325 = vmatprep.subr.bf16.mxu1 %v30505_v17  ;;  %23207 = vmatprep.mubr.bf16.mxu0 %v1976_v2  ;;  %v30547_v17 = vld [vmem:[%s30830_s14 + $0x3d18] sm:$0xff]   ;;  %v30574_v2 = vld [vmem:[%s30830_s14 + $0x3e50] sm:$0xff]  }
 0x7c3   : > { %23247 = vmatprep.mubr.bf16.mxu1 %v1978_v7  ;;  %v30579_v7 = vld [vmem:[%s30830_s14 + $0x3ed8] sm:$0xff]  }
 0x7c4   : > { %28304 = vmatpush3.bf16.msra.mxu0 %v30506_v18  ;;  %v30548_v18 = vld [vmem:[%s30830_s14 + $0x3d98] sm:$0xff]  }
 0x7c5   : > { %28305 = vmatprep.subr.bf16.mxu0 %v30508_v20  ;;  %28326 = vmatpush3.bf16.msra.mxu1 %v30507_v19  ;;  %v30549_v19 = vld [vmem:[%s30830_s14 + $0x3d60] sm:$0xff]  }
 0x7c6   : > { %28327 = vmatprep.subr.bf16.mxu1 %v30509_v21  ;;  %v30550_v20 = vld [vmem:[%s30830_s14 + $0x3de0] sm:$0xff]  }
 0x7c7   : > { %v30551_v21 = vld [vmem:[%s30830_s14 + $0x3d20] sm:$0xff]  }
 0x7c8   : > { %28306 = vmatpush3.bf16.msra.mxu0 %v30510_v22  ;;  %v30552_v22 = vld [vmem:[%s30830_s14 + $0x3da0] sm:$0xff]  }
 0x7c9   : > { %28307 = vmatprep.subr.bf16.mxu0 %v30512_v24  ;;  %28328 = vmatpush3.bf16.msra.mxu1 %v30511_v23  ;;  %v30553_v23 = vld [vmem:[%s30830_s14 + $0x3d68] sm:$0xff]  }
 0x7ca   : > { %28329 = vmatprep.subr.bf16.mxu1 %v30513_v25  ;;  %v30554_v25 = vld [vmem:[%s30830_s14 + $0x3de8] sm:$0xff]  }
 0x7cc   : > { %28308 = vmatpush3.bf16.msra.mxu0 %v30514_v26 }
 0x7cd   : > { %28309 = vmatprep.subr.bf16.mxu0 %v30516_v28  ;;  %28330 = vmatpush3.bf16.msra.mxu1 %v30515_v27  ;;  %v30555_v27 = vld [vmem:[%s30830_s14 + $0x3d28] sm:$0xff]  }
 0x7ce   : > { %28331 = vmatprep.subr.bf16.mxu1 %v30517_v29 }
 0x7d0   : > { %28310 = vmatpush3.bf16.msra.mxu0 %v30518_v30 }
 0x7d1   : > { %28311 = vmatprep.subr.bf16.mxu0 %v30520_v32  ;;  %28332 = vmatpush3.bf16.msra.mxu1 %v30519_v31  ;;  %v30556_v31 = vld [vmem:[%s30830_s14 + $0x3da8] sm:$0xff]   ;;  %v30557_v32 = vld [vmem:[%s30830_s14 + $0x3d70] sm:$0xff]  }
 0x7d2   : > { %v28009_v33 = vpop.f32.mrb[212].mxu0  ;;  %28333 = vmatprep.subr.bf16.mxu1 %v30521_v34 }
 0x7d3   : > { %v28010_v35 = vpop.f32.mrb[213].mxu0  ;;  %v28031_v37 = vpop.f32.mrb[212].mxu1 }
 0x7d4   : > { %v28011_v38 = vadd.f32 %v28010_v35, %v28009_v33  ;;  %v28012_v39 = vpop.f32.mrb[214].mxu0  ;;  %v28032_v42 = vpop.f32.mrb[213].mxu1  ;;  %28312 = vmatpush3.bf16.msra.mxu0 %v30522_v36 }
 0x7d5   : > { %v28013_v44 = vpop.f32.mrb[215].mxu0  ;;  %v28033_v46 = vadd.f32 %v28032_v42, %v28031_v37  ;;  %v28034_v47 = vpop.f32.mrb[214].mxu1  ;;  %28313 = vmatprep.subr.bf16.mxu0 %v30524_v41  ;;  %28334 = vmatpush3.bf16.msra.mxu1 %v30523_v40  ;;  %v30559_v40 = vld [vmem:[%s30830_s14 + $0x3d30] sm:$0xff]  }
 0x7d6   : > { %v22650_v45 = vadd.f32 %v28011_v38, %v33093_v60  ;;  %v28035_v49 = vpop.f32.mrb[215].mxu1  ;;  %28335 = vmatprep.subr.bf16.mxu1 %v30525_v48  ;;  %v30531_v60 = vld [vmem:[%s30830_s14 + $0x3cb8] sm:$0xff]   ;;  %v30558_v38 = vld [vmem:[%s30830_s14 + $0x3df0] sm:$0xff]   ;;  %v324_v47 = vld [vmem:[%s30840_s12 + $0x1e8] sm:$0xff] }
 0x7d7   : > { %v30560_v42 = vld [vmem:[%s30830_s14 + $0x3db0] sm:$0xff]   ;;  %v30561_v44 = vld [vmem:[%s30830_s14 + $0x3d78] sm:$0xff]   ;;  %v1435_v49 = vrot.slane %v324_v47, %v30878_v43 }
 0x7d8   : > { %v33131_v51 = vadd.f32 %v28033_v46, %v22650_v45  ;;  %28314 = vmatpush3.bf16.msra.mxu0 %v30526_v50  ;;  %v30562_v45 = vld [vmem:[%s30830_s14 + $0x3df8] sm:$0xff]   ;;  %v1428_v50 = vcombine.high %v324_v47, %v324_v47 }
 0x7d9   : > { %28315 = vmatprep.subr.bf16.mxu0 %v30528_v53  ;;  %28336 = vmatpush3.bf16.msra.mxu1 %v30527_v52  ;;  %v30563_v46 = vld [vmem:[%s30830_s14 + $0x3d38] sm:$0xff]   ;;  %v1443_v52 = vcombine.high %v1435_v49, %v1435_v49 }
 0x7da   : > { %28337 = vmatprep.subr.bf16.mxu1 %v30529_v54  ;;  %v30564_v48 = vld [vmem:[%s30830_s14 + $0x3db8] sm:$0xff]   ;;  %v1442_v53 = vrot.slane %v1428_v50, %v30878_v43  ;;  %v30567_v54 = vld [vmem:[%s30830_s14 + $0x3ec0] sm:$0xff]  }
 0x7db   : > { %v1980_v57 = vpack.c.bf16 %v1443_v52, %v1443_v52 }
 0x7dc   : > { %28316 = vmatpush3.bf16.msra.mxu0 %v30530_v55  ;;  %v1979_v55 = vpack.c.bf16 %v1435_v49, %v1435_v49  ;;  %v1444_v58 = vcombine.high %v1442_v53, %v1442_v53  ;;  %v30601_v49 = vld [vmem:[%s30830_s14 + $0x3f00] sm:$0xff]  }
 0x7dd   : > { %28345 = vmatprep.subr.bf16.mxu0 %v30533_v59  ;;  %28338 = vmatpush3.bf16.msra.mxu1 %v30531_v60  ;;  %v30569_v59 = vld [vmem:[%s30830_s14 + $0x3e80] sm:$0xff]   ;;  %v1981_v60 = vpack.c.bf16 %v1442_v53, %v1442_v53 }
 0x7de   : > { %28367 = vmatprep.subr.bf16.mxu1 %v30534_v63  ;;  %v1982_v62 = vpack.c.bf16 %v1444_v58, %v1444_v58  ;;  %v30571_v63 = vld [vmem:[%s30830_s14 + $0x3ec8] sm:$0xff]   ;;  %v30602_v53 = vld [vmem:[%s30830_s14 + $0x3f80] sm:$0xff]   ;;  %v30608_v58 = vld [vmem:[%s30830_s14 + $0x3fd0] sm:$0xff]  }
 0x7df   : > { %23208 = vmatmul.mubr.bf16.vlgmr.msra.gmra.mrb[240].mxu0 %v1975_v0  ;;  %v30572_v0 = vld [vmem:[%s30830_s14 + $0x3e08] sm:$0xff]  }
 0x7e0   : > { %28346 = vmatpush3.bf16.msra.mxu0 %v30535_v1  ;;  %23248 = vmatmul.mubr.bf16.vlgmr.msra.gmra.mrb[240].mxu1 %v1977_v5  ;;  %v30573_v1 = vld [vmem:[%s30830_s14 + $0x3e88] sm:$0xff]   ;;  %v30577_v5 = vld [vmem:[%s30830_s14 + $0x3e90] sm:$0xff]  }
 0x7e1   : > { %28347 = vmatprep.subr.bf16.mxu0 %v30537_v6  ;;  %28368 = vmatpush3.bf16.msra.mxu1 %v30536_v4  ;;  %v30576_v4 = vld [vmem:[%s30830_s14 + $0x3e10] sm:$0xff]   ;;  %v30578_v6 = vld [vmem:[%s30830_s14 + $0x3e58] sm:$0xff]  }
 0x7e2   : > { %28369 = vmatprep.subr.bf16.mxu1 %v30538_v8  ;;  %23287 = vmatprep.mubr.bf16.mxu0 %v1980_v57  ;;  %v30580_v8 = vld [vmem:[%s30830_s14 + $0x3e18] sm:$0xff]   ;;  %v30606_v57 = vld [vmem:[%s30830_s14 + $0x3f88] sm:$0xff]  }
 0x7e3   : > { %23327 = vmatprep.mubr.bf16.mxu1 %v1982_v62  ;;  %v30612_v62 = vld [vmem:[%s30830_s14 + $0x3fd8] sm:$0xff]  }
 0x7e4   : > { %28348 = vmatpush3.bf16.msra.mxu0 %v30539_v9  ;;  %v30581_v9 = vld [vmem:[%s30830_s14 + $0x3e98] sm:$0xff]  }
 0x7e5   : > { %28349 = vmatprep.subr.bf16.mxu0 %v30541_v11  ;;  %28370 = vmatpush3.bf16.msra.mxu1 %v30540_v10  ;;  %v30582_v10 = vld [vmem:[%s30830_s14 + $0x3e60] sm:$0xff]  }
 0x7e6   : > { %28371 = vmatprep.subr.bf16.mxu1 %v30542_v12  ;;  %v30583_v11 = vld [vmem:[%s30830_s14 + $0x3ee0] sm:$0xff]  }
 0x7e7   : > { %v30584_v12 = vld [vmem:[%s30830_s14 + $0x3e20] sm:$0xff]  }
 0x7e8   : > { %28350 = vmatpush3.bf16.msra.mxu0 %v30543_v13  ;;  %v30585_v13 = vld [vmem:[%s30830_s14 + $0x3ea0] sm:$0xff]  }
 0x7e9   : > { %28351 = vmatprep.subr.bf16.mxu0 %v30545_v15  ;;  %28372 = vmatpush3.bf16.msra.mxu1 %v30544_v14  ;;  %v30586_v14 = vld [vmem:[%s30830_s14 + $0x3e68] sm:$0xff]  }
 0x7ea   : > { %28373 = vmatprep.subr.bf16.mxu1 %v30546_v16  ;;  %v30587_v16 = vld [vmem:[%s30830_s14 + $0x3ee8] sm:$0xff]  }
 0x7ec   : > { %28352 = vmatpush3.bf16.msra.mxu0 %v30547_v17 }
 0x7ed   : > { %28353 = vmatprep.subr.bf16.mxu0 %v30549_v19  ;;  %28374 = vmatpush3.bf16.msra.mxu1 %v30548_v18  ;;  %v30588_v18 = vld [vmem:[%s30830_s14 + $0x3e28] sm:$0xff]  }
 0x7ee   : > { %28375 = vmatprep.subr.bf16.mxu1 %v30550_v20 }
 0x7f0   : > { %28354 = vmatpush3.bf16.msra.mxu0 %v30551_v21 }
 0x7f1   : > { %28355 = vmatprep.subr.bf16.mxu0 %v30553_v23  ;;  %28376 = vmatpush3.bf16.msra.mxu1 %v30552_v22  ;;  %v30589_v23 = vld [vmem:[%s30830_s14 + $0x3ea8] sm:$0xff]  }
 0x7f2   : > { %v28053_v24 = vpop.f32.mrb[216].mxu0  ;;  %28377 = vmatprep.subr.bf16.mxu1 %v30554_v25  ;;  %v30590_v25 = vld [vmem:[%s30830_s14 + $0x3e70] sm:$0xff]  }
 0x7f3   : > { %v28054_v26 = vpop.f32.mrb[217].mxu0  ;;  %v28075_v28 = vpop.f32.mrb[216].mxu1 }
 0x7f4   : > { %v28055_v29 = vadd.f32 %v28054_v26, %v28053_v24  ;;  %v28056_v30 = vpop.f32.mrb[218].mxu0  ;;  %v28076_v33 = vpop.f32.mrb[217].mxu1  ;;  %28356 = vmatpush3.bf16.msra.mxu0 %v30555_v27 }
 0x7f5   : > { %v28057_v34 = vpop.f32.mrb[219].mxu0  ;;  %v28077_v36 = vadd.f32 %v28076_v33, %v28075_v28  ;;  %v28078_v37 = vpop.f32.mrb[218].mxu1  ;;  %28357 = vmatprep.subr.bf16.mxu0 %v30557_v32  ;;  %28378 = vmatpush3.bf16.msra.mxu1 %v30556_v31  ;;  %v30592_v31 = vld [vmem:[%s30830_s14 + $0x3e30] sm:$0xff]   ;;  %v30594_v33 = vld [vmem:[%s30830_s14 + $0x3e78] sm:$0xff]  }
 0x7f6   : > { %v22730_v35 = vadd.f32 %v28055_v29, %v33131_v51  ;;  %v28079_v39 = vpop.f32.mrb[219].mxu1  ;;  %28379 = vmatprep.subr.bf16.mxu1 %v30558_v38  ;;  %v30566_v51 = vld [vmem:[%s30830_s14 + $0x3e40] sm:$0xff]   ;;  %v30591_v29 = vld [vmem:[%s30830_s14 + $0x3ef0] sm:$0xff]  }
 0x7f7   : > { %v30593_v34 = vld [vmem:[%s30830_s14 + $0x3eb0] sm:$0xff]  }
 0x7f8   : > { %v33169_v41 = vadd.f32 %v28077_v36, %v22730_v35  ;;  %28358 = vmatpush3.bf16.msra.mxu0 %v30559_v40  ;;  %v30595_v35 = vld [vmem:[%s30830_s14 + $0x3ef8] sm:$0xff]   ;;  %v325_v37 = vld [vmem:[%s30840_s12 + $0x1f0] sm:$0xff]  ;;  %v30599_v40 = vld [vmem:[%s30830_s14 + $0x3f40] sm:$0xff]  }
 0x7f9   : > { %28359 = vmatprep.subr.bf16.mxu0 %v30561_v44  ;;  %28380 = vmatpush3.bf16.msra.mxu1 %v30560_v42  ;;  %v30596_v36 = vld [vmem:[%s30830_s14 + $0x3e38] sm:$0xff]   ;;  %v1452_v38 = vrot.slane %v325_v37, %v30878_v43  ;;  %v1445_v39 = vcombine.high %v325_v37, %v325_v37 }
 0x7fa   : > { %28381 = vmatprep.subr.bf16.mxu1 %v30562_v45  ;;  %v30600_v45 = vld [vmem:[%s30830_s14 + $0x3fc0] sm:$0xff]  }
 0x7fb   : > { %v1460_v42 = vcombine.high %v1452_v38, %v1452_v38  ;;  %v1459_v44 = vrot.slane %v1445_v39, %v30878_v43 }
 0x7fc   : > { %28360 = vmatpush3.bf16.msra.mxu0 %v30563_v46  ;;  %v1983_v46 = vpack.c.bf16 %v1452_v38, %v1452_v38 }
 0x7fd   : > { %28389 = vmatprep.subr.bf16.mxu0 %v30566_v51  ;;  %28382 = vmatpush3.bf16.msra.mxu1 %v30564_v48  ;;  %v1984_v47 = vpack.c.bf16 %v1460_v42, %v1460_v42  ;;  %v1461_v48 = vcombine.high %v1459_v44, %v1459_v44  ;;  %v1985_v50 = vpack.c.bf16 %v1459_v44, %v1459_v44  ;;  %v30603_v51 = vld [vmem:[%s30830_s14 + $0x3f48] sm:$0xff]  }
 0x7fe   : > { %28411 = vmatprep.subr.bf16.mxu1 %v30567_v54  ;;  %v30604_v54 = vld [vmem:[%s30830_s14 + $0x3fc8] sm:$0xff]  }
 0x7ff   : > { %23288 = vmatmul.mubr.bf16.vlgmr.msra.gmra.mrb[244].mxu0 %v1979_v55  ;;  %v1986_v52 = vpack.c.bf16 %v1461_v48, %v1461_v48  ;;  %v30605_v55 = vld [vmem:[%s30830_s14 + $0x3f08] sm:$0xff]  }
 0x800   : > { %28390 = vmatpush3.bf16.msra.mxu0 %v30568_v56  ;;  %23328 = vmatmul.mubr.bf16.vlgmr.msra.gmra.mrb[244].mxu1 %v1981_v60  ;;  %v30607_v56 = vld [vmem:[%s30830_s14 + $0x3f50] sm:$0xff]   ;;  %v30611_v60 = vld [vmem:[%s30830_s14 + $0x3f58] sm:$0xff]  }
 0x801   : > { %28391 = vmatprep.subr.bf16.mxu0 %v30570_v61  ;;  %28412 = vmatpush3.bf16.msra.mxu1 %v30569_v59  ;;  %v30609_v59 = vld [vmem:[%s30830_s14 + $0x3f10] sm:$0xff]  }
 0x802   : > { %28413 = vmatprep.subr.bf16.mxu1 %v30571_v63  ;;  %23367 = vmatprep.mubr.bf16.mxu0 %v1984_v47  ;;  %v30610_v61 = vld [vmem:[%s30830_s14 + $0x3f90] sm:$0xff]   ;;  %v30613_v63 = vld [vmem:[%s30830_s14 + $0x3f18] sm:$0xff]  }
 0x803   : > { %23407 = vmatprep.mubr.bf16.mxu1 %v1986_v52 }
 0x804   : > { %28392 = vmatpush3.bf16.msra.mxu0 %v30572_v0  ;;  %v30615_v0 = vld [vmem:[%s30830_s14 + $0x3f60] sm:$0xff]  }
 0x805   : > { %28393 = vmatprep.subr.bf16.mxu0 %v30574_v2  ;;  %28414 = vmatpush3.bf16.msra.mxu1 %v30573_v1  ;;  %v30614_v1 = vld [vmem:[%s30830_s14 + $0x3f98] sm:$0xff]   ;;  %v30616_v2 = vld [vmem:[%s30830_s14 + $0x3fe0] sm:$0xff]  }
 0x806   : > { %28415 = vmatprep.subr.bf16.mxu1 %v30575_v3  ;;  %v30617_v3 = vld [vmem:[%s30830_s14 + $0x3f20] sm:$0xff]  }
 0x808   : > { %28394 = vmatpush3.bf16.msra.mxu0 %v30576_v4  ;;  %v30619_v4 = vld [vmem:[%s30830_s14 + $0x3f68] sm:$0xff]  }
 0x809   : > { %28395 = vmatprep.subr.bf16.mxu0 %v30578_v6  ;;  %28416 = vmatpush3.bf16.msra.mxu1 %v30577_v5  ;;  %v30618_v5 = vld [vmem:[%s30830_s14 + $0x3fa0] sm:$0xff]  }
 0x80a   : > { %28417 = vmatprep.subr.bf16.mxu1 %v30579_v7 }
 0x80c   : > { %28396 = vmatpush3.bf16.msra.mxu0 %v30580_v8  ;;  %v30620_v8 = vld [vmem:[%s30830_s14 + $0x3fe8] sm:$0xff]  }
 0x80d   : > { %28397 = vmatprep.subr.bf16.mxu0 %v30582_v10  ;;  %28418 = vmatpush3.bf16.msra.mxu1 %v30581_v9 }
 0x80e   : > { %28419 = vmatprep.subr.bf16.mxu1 %v30583_v11 }
 0x810   : > { %28398 = vmatpush3.bf16.msra.mxu0 %v30584_v12  ;;  %v30621_v12 = vld [vmem:[%s30830_s14 + $0x3f28] sm:$0xff]  }
 0x811   : > { %28399 = vmatprep.subr.bf16.mxu0 %v30586_v14  ;;  %28420 = vmatpush3.bf16.msra.mxu1 %v30585_v13  ;;  %v30623_v13 = vld [vmem:[%s30830_s14 + $0x3f70] sm:$0xff]  }
 0x812   : > { %v28097_v15 = vpop.f32.mrb[220].mxu0  ;;  %28421 = vmatprep.subr.bf16.mxu1 %v30587_v16 }
 0x813   : > { %v28098_v17 = vpop.f32.mrb[221].mxu0  ;;  %v28119_v19 = vpop.f32.mrb[220].mxu1 }
 0x814   : > { %v28099_v20 = vadd.f32 %v28098_v17, %v28097_v15  ;;  %v28100_v21 = vpop.f32.mrb[222].mxu0  ;;  %v28120_v22 = vpop.f32.mrb[221].mxu1  ;;  %28400 = vmatpush3.bf16.msra.mxu0 %v30588_v18 }
 0x815   : > { %v28101_v24 = vpop.f32.mrb[223].mxu0  ;;  %v28121_v27 = vadd.f32 %v28120_v22, %v28119_v19  ;;  %v28122_v28 = vpop.f32.mrb[222].mxu1  ;;  %28401 = vmatprep.subr.bf16.mxu0 %v30590_v25  ;;  %28422 = vmatpush3.bf16.msra.mxu1 %v30589_v23  ;;  %v30622_v19 = vld [vmem:[%s30830_s14 + $0x3fa8] sm:$0xff]   ;;  %v30624_v21 = vld [vmem:[%s30830_s14 + $0x3ff0] sm:$0xff]  }
 0x816   : > { %v22810_v26 = vadd.f32 %v28099_v20, %v33169_v41  ;;  %v28123_v30 = vpop.f32.mrb[223].mxu1  ;;  %28423 = vmatprep.subr.bf16.mxu1 %v30591_v29  ;;  %v30597_v41 = vld [vmem:[%s30830_s14 + $0x3eb8] sm:$0xff]   ;;  %v30625_v23 = vld [vmem:[%s30830_s14 + $0x3f30] sm:$0xff]  }
 0x817   : > { %v30627_v24 = vld [vmem:[%s30830_s14 + $0x3f78] sm:$0xff]   ;;  %v30626_v25 = vld [vmem:[%s30830_s14 + $0x3fb0] sm:$0xff]  }
 0x818   : > { %v33207_v32 = vadd.f32 %v28121_v27, %v22810_v26  ;;  %28402 = vmatpush3.bf16.msra.mxu0 %v30592_v31  ;;  %v30628_v26 = vld [vmem:[%s30830_s14 + $0x3ff8] sm:$0xff]  }
 0x819   : > { %28403 = vmatprep.subr.bf16.mxu0 %v30594_v33  ;;  %28424 = vmatpush3.bf16.msra.mxu1 %v30593_v34  ;;  %v30629_v27 = vld [vmem:[%s30830_s14 + $0x3f38] sm:$0xff]  }
 0x81a   : > { %28425 = vmatprep.subr.bf16.mxu1 %v30595_v35  ;;  %v326_v28 = vld [vmem:[%s30840_s12 + $0x1f8] sm:$0xff] }
 0x81b   : > { %v1469_v29 = vrot.slane %v326_v28, %v30878_v43  ;;  %v1462_v30 = vcombine.high %v326_v28, %v326_v28  ;;  %v30630_v31 = vld [vmem:[%s30830_s14 + $0x3fb8] sm:$0xff]  }
 0x81c   : > { %28404 = vmatpush3.bf16.msra.mxu0 %v30596_v36 }
 0x81d   : > { %28433 = vmatprep.subr.bf16.mxu0 %v30599_v40  ;;  %28426 = vmatpush3.bf16.msra.mxu1 %v30597_v41  ;;  %v1476_v33 = vrot.slane %v1462_v30, %v30878_v43  ;;  %v1987_v34 = vpack.c.bf16 %v1469_v29, %v1469_v29 }
 0x81e   : > { %28455 = vmatprep.subr.bf16.mxu1 %v30600_v45 }
 0x81f   : > { %23368 = vmatmul.mubr.bf16.vlgmr.msra.gmra.mrb[248].mxu0 %v1983_v46  ;;  %v1478_v36 = vcombine.high %v1476_v33, %v1476_v33  ;;  %v1989_v37 = vpack.c.bf16 %v1476_v33, %v1476_v33 }
 0x820   : > { %28434 = vmatpush3.bf16.msra.mxu0 %v30601_v49  ;;  %23408 = vmatmul.mubr.bf16.vlgmr.msra.gmra.mrb[248].mxu1 %v1985_v50 }
 0x821   : > { %28435 = vmatprep.subr.bf16.mxu0 %v30603_v51  ;;  %28456 = vmatpush3.bf16.msra.mxu1 %v30602_v53  ;;  %v1990_v38 = vpack.c.bf16 %v1478_v36, %v1478_v36 }
 0x822   : > { %28457 = vmatprep.subr.bf16.mxu1 %v30604_v54 }
 0x823   : > { %23487 = vmatprep.mubr.bf16.mxu1 %v1990_v38 }
 0x824   : > { %28436 = vmatpush3.bf16.msra.mxu0 %v30605_v55 }
 0x825   : > { %28437 = vmatprep.subr.bf16.mxu0 %v30607_v56  ;;  %28458 = vmatpush3.bf16.msra.mxu1 %v30606_v57 }
 0x826   : > { %28459 = vmatprep.subr.bf16.mxu1 %v30608_v58 }
 0x828   : > { %28438 = vmatpush3.bf16.msra.mxu0 %v30609_v59 }
 0x829   : > { %28439 = vmatprep.subr.bf16.mxu0 %v30611_v60  ;;  %28460 = vmatpush3.bf16.msra.mxu1 %v30610_v61 }
 0x82a   : > { %28461 = vmatprep.subr.bf16.mxu1 %v30612_v62 }
 0x82c   : > { %28440 = vmatpush3.bf16.msra.mxu0 %v30613_v63 }
 0x82d   : > { %28441 = vmatprep.subr.bf16.mxu0 %v30615_v0  ;;  %28462 = vmatpush3.bf16.msra.mxu1 %v30614_v1 }
 0x82e   : > { %28463 = vmatprep.subr.bf16.mxu1 %v30616_v2 }
 0x830   : > { %28442 = vmatpush3.bf16.msra.mxu0 %v30617_v3 }
 0x831   : > { %28443 = vmatprep.subr.bf16.mxu0 %v30619_v4  ;;  %28464 = vmatpush3.bf16.msra.mxu1 %v30618_v5 }
 0x832   : > { %v28141_v6 = vpop.f32.mrb[224].mxu0  ;;  %28465 = vmatprep.subr.bf16.mxu1 %v30620_v8 }
 0x833   : > { %v28142_v7 = vpop.f32.mrb[225].mxu0  ;;  %v28163_v9 = vpop.f32.mrb[224].mxu1 }
 0x834   : > { %v28143_v10 = vadd.f32 %v28142_v7, %v28141_v6  ;;  %v28144_v11 = vpop.f32.mrb[226].mxu0  ;;  %v28164_v14 = vpop.f32.mrb[225].mxu1  ;;  %28444 = vmatpush3.bf16.msra.mxu0 %v30621_v12 }
 0x835   : > { %v28145_v15 = vpop.f32.mrb[227].mxu0  ;;  %v28165_v17 = vadd.f32 %v28164_v14, %v28163_v9  ;;  %v28166_v18 = vpop.f32.mrb[226].mxu1  ;;  %28445 = vmatprep.subr.bf16.mxu0 %v30623_v13  ;;  %28466 = vmatpush3.bf16.msra.mxu1 %v30622_v19 }
 0x836   : > { %v22890_v16 = vadd.f32 %v28143_v10, %v33207_v32  ;;  %v28167_v20 = vpop.f32.mrb[227].mxu1  ;;  %28467 = vmatprep.subr.bf16.mxu1 %v30624_v21  ;;  %v1477_v32 = vcombine.high %v1469_v29, %v1469_v29 }
 0x838   : > { %v22930_v22 = vadd.f32 %v28165_v17, %v22890_v16  ;;  %28446 = vmatpush3.bf16.msra.mxu0 %v30625_v23  ;;  %v1988_v35 = vpack.c.bf16 %v1477_v32, %v1477_v32 }
 0x839   : > { %28447 = vmatprep.subr.bf16.mxu0 %v30627_v24  ;;  %28468 = vmatpush3.bf16.msra.mxu1 %v30626_v25 }
 0x83a   : > { %28469 = vmatprep.subr.bf16.mxu1 %v30628_v26  ;;  %23447 = vmatprep.mubr.bf16.mxu0 %v1988_v35 }
 0x83c   : > { %28448 = vmatpush3.bf16.msra.mxu0 %v30629_v27 }
 0x83d   : > { %28470 = vmatpush3.bf16.msra.mxu1 %v30630_v31 }
 0x83f   : > { %23448 = vmatmul.mubr.bf16.vlgmr.msra.gmra.mrb[252].mxu0 %v1987_v34 }
 0x840   : > { %23488 = vmatmul.mubr.bf16.vlgmr.msra.gmra.mrb[252].mxu1 %v1989_v37 }
 0x852   : > { %v28185_v39 = vpop.f32.mrb[228].mxu0 }
 0x853   : > { %v28186_v40 = vpop.f32.mrb[229].mxu0  ;;  %v28207_v41 = vpop.f32.mrb[228].mxu1 }
 0x854   : > { %v28187_v42 = vadd.f32 %v28186_v40, %v28185_v39  ;;  %v28188_v44 = vpop.f32.mrb[230].mxu0  ;;  %v28208_v45 = vpop.f32.mrb[229].mxu1 }
 0x855   : > { %v28189_v46 = vpop.f32.mrb[231].mxu0  ;;  %v28209_v43 = vadd.f32 %v28208_v45, %v28207_v41  ;;  %v28210_v48 = vpop.f32.mrb[230].mxu1 }
 0x856   : > { %v22970_v47 = vadd.f32 %v28187_v42, %v22930_v22  ;;  %v28211_v49 = vpop.f32.mrb[231].mxu1 }
 0x858   : > { %v23010_v50 = vadd.f32 %v28209_v43, %v22970_v47 }
 0x872   : > { %v28229_v51 = vpop.f32.mrb[232].mxu0 }
 0x873   : > { %v28230_v52 = vpop.f32.mrb[233].mxu0  ;;  %v28251_v53 = vpop.f32.mrb[232].mxu1 }
 0x874   : > { %v28231_v54 = vadd.f32 %v28230_v52, %v28229_v51  ;;  %v28232_v55 = vpop.f32.mrb[234].mxu0  ;;  %v28252_v56 = vpop.f32.mrb[233].mxu1 }
 0x875   : > { %v28233_v57 = vpop.f32.mrb[235].mxu0  ;;  %v28253_v59 = vadd.f32 %v28252_v56, %v28251_v53  ;;  %v28254_v60 = vpop.f32.mrb[234].mxu1 }
 0x876   : > { %v23050_v58 = vadd.f32 %v28231_v54, %v23010_v50  ;;  %v28255_v61 = vpop.f32.mrb[235].mxu1  ;;  %v262_v57 = vld [vmem:[#allocation2] sm:$0x3] }
 0x878   : > { %v23090_v62 = vadd.f32 %v28253_v59, %v23050_v58 }
 0x892   : > { %v28273_v63 = vpop.f32.mrb[236].mxu0 }
 0x893   : > { %v28274_v0 = vpop.f32.mrb[237].mxu0  ;;  %v28295_v1 = vpop.f32.mrb[236].mxu1 }
 0x894   : > { %v28275_v2 = vadd.f32 %v28274_v0, %v28273_v63  ;;  %v28276_v3 = vpop.f32.mrb[238].mxu0  ;;  %v28296_v4 = vpop.f32.mrb[237].mxu1 }
 0x895   : > { %v28277_v5 = vpop.f32.mrb[239].mxu0  ;;  %v28297_v7 = vadd.f32 %v28296_v4, %v28295_v1  ;;  %v28298_v8 = vpop.f32.mrb[238].mxu1  ;;  %v25656_v4 = vld [vmem:[%s33281_s3] ss:$0 sm:$0xff] (!%p25654_p7) }
 0x896   : > { %v23130_v6 = vadd.f32 %v28275_v2, %v23090_v62  ;;  %v28299_v9 = vpop.f32.mrb[239].mxu1  ;;  %v25655_v62 = vld [vmem:[%s33280_s2] ss:$0 sm:$0xff] (!%p25654_p7)  ;;  %v25657_v8 = vld [vmem:[#allocation3] ss:$0 sm:$0xff] (!%p25654_p7) }
 0x898   : > { %v23170_v10 = vadd.f32 %v28297_v7, %v23130_v6 }
 0x8b2   : > { %v28317_v11 = vpop.f32.mrb[240].mxu0 }
 0x8b3   : > { %v28318_v12 = vpop.f32.mrb[241].mxu0  ;;  %v28339_v13 = vpop.f32.mrb[240].mxu1 }
 0x8b4   : > { %v28319_v14 = vadd.f32 %v28318_v12, %v28317_v11  ;;  %v28320_v15 = vpop.f32.mrb[242].mxu0  ;;  %v28340_v16 = vpop.f32.mrb[241].mxu1 }
 0x8b5   : > { %v28321_v17 = vpop.f32.mrb[243].mxu0  ;;  %v28341_v19 = vadd.f32 %v28340_v16, %v28339_v13  ;;  %v28342_v20 = vpop.f32.mrb[242].mxu1 }
 0x8b6   : > { %v23210_v18 = vadd.f32 %v28319_v14, %v23170_v10  ;;  %v28343_v21 = vpop.f32.mrb[243].mxu1 }
 0x8b8   : > { %v23250_v22 = vadd.f32 %v28341_v19, %v23210_v18 }
 0x8d2   : > { %v28361_v23 = vpop.f32.mrb[244].mxu0 }
 0x8d3   : > { %v28362_v24 = vpop.f32.mrb[245].mxu0  ;;  %v28383_v25 = vpop.f32.mrb[244].mxu1 }
 0x8d4   : > { %v28363_v26 = vadd.f32 %v28362_v24, %v28361_v23  ;;  %v28364_v27 = vpop.f32.mrb[246].mxu0  ;;  %v28384_v28 = vpop.f32.mrb[245].mxu1 }
 0x8d5   : > { %v28365_v29 = vpop.f32.mrb[247].mxu0  ;;  %v28385_v31 = vadd.f32 %v28384_v28, %v28383_v25  ;;  %v28386_v32 = vpop.f32.mrb[246].mxu1 }
 0x8d6   : > { %v23290_v30 = vadd.f32 %v28363_v26, %v23250_v22  ;;  %v28387_v33 = vpop.f32.mrb[247].mxu1 }
 0x8d8   : > { %v23330_v34 = vadd.f32 %v28385_v31, %v23290_v30 }
 0x8f2   : > { %v28405_v35 = vpop.f32.mrb[248].mxu0 }
 0x8f3   : > { %v28406_v36 = vpop.f32.mrb[249].mxu0  ;;  %v28427_v37 = vpop.f32.mrb[248].mxu1 }
 0x8f4   : > { %v28407_v38 = vadd.f32 %v28406_v36, %v28405_v35  ;;  %v28408_v39 = vpop.f32.mrb[250].mxu0  ;;  %v28428_v40 = vpop.f32.mrb[249].mxu1 }
 0x8f5   : > { %v28409_v41 = vpop.f32.mrb[251].mxu0  ;;  %v28429_v44 = vadd.f32 %v28428_v40, %v28427_v37  ;;  %v28430_v45 = vpop.f32.mrb[250].mxu1 }
 0x8f6   : > { %v23370_v42 = vadd.f32 %v28407_v38, %v23330_v34  ;;  %v28431_v46 = vpop.f32.mrb[251].mxu1 }
 0x8f8   : > { %v23410_v47 = vadd.f32 %v28429_v44, %v23370_v42 }
 0x912   : > { %v28449_v43 = vpop.f32.mrb[252].mxu0 }
 0x913   : > { %v28450_v48 = vpop.f32.mrb[253].mxu0  ;;  %v28471_v49 = vpop.f32.mrb[252].mxu1 }
 0x914   : > { %v28451_v50 = vadd.f32 %v28450_v48, %v28449_v43  ;;  %v28452_v51 = vpop.f32.mrb[254].mxu0  ;;  %v28472_v52 = vpop.f32.mrb[253].mxu1 }
 0x915   : > { %v28453_v53 = vpop.f32.mrb[255].mxu0  ;;  %v28473_v55 = vadd.f32 %v28472_v52, %v28471_v49  ;;  %v28474_v56 = vpop.f32.mrb[254].mxu1 }
 0x916   : > { %v23450_v54 = vadd.f32 %v28451_v50, %v23410_v47  ;;  %v28475_v58 = vpop.f32.mrb[255].mxu1  ;;  %23501 = sbr.rel (%p25654_p7) target bundleno = 2546 (0x9f2), region = 52 }
 0x918   : > { %v23490_v59 = vadd.f32 %v28473_v55, %v23450_v54 }
 0x91a   : > { %v23495_v60 = vadd.f32 %v23490_v59, %v262_v57 }
 0x91c   : > { %23497 = vst.msk [vmem:[#allocation2] sm:$0x3] %vm23496_vm1, %v23495_v60 }
 0x923   : > { %v23502_v61 = vld [vmem:[#allocation2] sm:$0x3] }
 0x924   : > { %v23510_v63 = vadd.f32 %v25655_v62, %v23502_v61 }
 0x926   : > { %v23511_v0 = vsub.f32 0.0, %v23510_v63 }
 0x928   : > { %v23512_v1 = vmul.f32 1.442695, %v23511_v0 }
 0x92a   : > { %30632 = vpow2.f32 %v23512_v1 }
 0x934   : > { %v30633_v2 = vpop.eup %30632 }
 0x935   : > { %v23514_v3 = vadd.f32 1.0, %v30633_v2 }
 0x937   : > { %30634 = vrcp.f32 %v23514_v3 }
 0x941   : > { %v30635_v5 = vpop.eup %30634 }
 0x942   : > { %v23524_v6 = vmul.f32 %v30635_v5, %v25656_v4 }
 0x944   : > { %v23525_v7 = vsel %vm23496_vm1, %v23524_v6, 0.0 }
 0x945   : > { %23526 = vadd.xlane.f32.xlu0 %v23525_v7 }
 0x9d2   : > { %v23527_v9 = vpop.xlane.xlu0 %23526 }
 0x9d3   : > { %v23535_v10 = vadd.f32 %v25657_v8, %v23527_v9 }
 0x9d5   : > { %v23536_v11 = vsub.f32 0.0, %v23535_v10 }
 0x9d7   : > { %v23537_v12 = vmul.f32 1.442695, %v23536_v11 }
 0x9d9   : > { %30636 = vpow2.f32 %v23537_v12 }
 0x9e3   : > { %v30637_v13 = vpop.eup %30636 }
 0x9e4   : > { %v23539_v14 = vadd.f32 1.0, %v30637_v13 }
 0x9e6   : > { %30638 = vrcp.f32 %v23539_v14 }
 0x9f0   : > { %v30639_v15 = vpop.eup %30638 }
 0x9f1   : > { %23543 = vst.msk [vmem:[%s33283_s5] sm:$0x3] %vm23542_vm2, %v30639_v15 }
 0x9f2 PF: > { %p17_p4 = scmp.ge.s32.totalorder %s30766_s24, 8   ;;  %s33287_s20 = smov %s30696_s21 }
 0x9f3   : > { %s33288_s21 = smov %s30700_s22  ;;  %s33289_s22 = smov %s30776_s27 }
 0x9f4   : > { %s33290_s23 = smov %s30766_s24  ;;  %19 = sbr.rel (!%p17_p4) target bundleno = 6 (0x6), region = 87 }
 0x9fb   :  { %23555 = vsyncpa [#allocation5], 1 }
 0x9fc   :  { %23557 = vsyncpa [#allocation5 + $0x1], 1 }

</bundles_post_ra>
